<compile_context>
chip_gen: v7x
topology: tpu7x:2x2x1
jax: 0.10.0
libtpu: 0.0.40
codegen_flags: <defaults>
</compile_context>

<pallas_src>
import functools

import jax
import jax.numpy as jnp
from jax.experimental import pallas as pl
from jax.experimental.pallas import tpu as pltpu

VMEM_SPEC = pl.BlockSpec(memory_space=pltpu.MemorySpace.VMEM)

# tap index (0..2) of a 3x3 / stride-2 / pad-1 conv -> (parity plane, slice start)
# in the de-interleaved layout produced by _deinterleave().
_TAP = ((1, 0), (0, 0), (1, 1))


def _silu(x):
    return x * jax.nn.sigmoid(x)


# --------------------------------------------------------------------------- #
#                               Pallas kernels                                 #
# --------------------------------------------------------------------------- #

def _stem_block1_kernel(patch_ref, stem_w_ref, stem_b_ref,
                        exp_w_ref, exp_b_ref, dw_w_ref, dw_b_ref,
                        ser_w_ref, ser_b_ref, see_w_ref, see_b_ref,
                        prj_w_ref, prj_b_ref, e2w_ref, e2b_ref,
                        out_ref, pad_ref, *, bsub, hs):
    """Fused: stem conv (im2col matmul) + MBConv block 1 + block-2 expand.

    Processes `bsub` images per grid step; all matmuls use bf16 operands with
    f32 accumulation, elementwise stays f32 (v5e-safe).
    """
    hw = hs * hs
    m = bsub * hw
    kdim = patch_ref.shape[-1]            # 27 = 3*3*3 stem patch width
    cmid = exp_w_ref.shape[1]             # 64

    # ---- stem 3x3/s2 conv: single (m,27)x(27,16) bf16 matmul (im2col done in glue)
    patches = patch_ref[...].reshape(m, kdim)
    x0 = _silu(jnp.dot(patches, stem_w_ref[...],
                       preferred_element_type=jnp.float32) + stem_b_ref[...])      # (m,16)

    # ---- block-1 expand 1x1
    e = _silu(jnp.dot(x0.astype(jnp.bfloat16), exp_w_ref[...],
                      preferred_element_type=jnp.float32) + exp_b_ref[...])        # (m,64)

    # ---- depthwise 3x3 / stride 1 / pad 1 via padded VMEM scratch.
    # Every position the tap windows read is rewritten THIS step (interior + the
    # four 1-wide border strips), so there is no cross-step / cross-core zero-init
    # invariant and no full-scratch zero-fill.
    zr = jnp.zeros((bsub, 1, hs + 2, cmid), jnp.float32)
    zc = jnp.zeros((bsub, hs, 1, cmid), jnp.float32)
    pad_ref[:, 7:8, 7:9 + hs, :] = zr                     # top border row
    pad_ref[:, 8 + hs:9 + hs, 7:9 + hs, :] = zr           # bottom border row
    pad_ref[:, 8:8 + hs, 7:8, :] = zc                     # left border col
    pad_ref[:, 8:8 + hs, 8 + hs:9 + hs, :] = zc           # right border col
    pad_ref[:, 8:8 + hs, 8:8 + hs, :] = e.reshape(bsub, hs, hs, cmid)

    dacc = jnp.zeros((bsub, hs, hs, cmid), jnp.float32)
    for kh in range(3):
        for kw in range(3):
            dacc = dacc + (pad_ref[:, 7 + kh:7 + kh + hs, 7 + kw:7 + kw + hs, :]
                           * dw_w_ref[kh * 3 + kw])
    d = _silu(dacc + dw_b_ref[...]).reshape(bsub, hw, cmid)                         # (b,hw,64)

    # ---- squeeze & excite: pool first, then two tiny bf16 matmuls
    pooled = jnp.sum(d, axis=1) * (1.0 / hw)                                        # (b,64)
    s = _silu(jnp.dot(pooled.astype(jnp.bfloat16), ser_w_ref[...],
                      preferred_element_type=jnp.float32) + ser_b_ref[...])         # (b,4)
    gate = jax.nn.sigmoid(jnp.dot(s.astype(jnp.bfloat16), see_w_ref[...],
                                  preferred_element_type=jnp.float32) + see_b_ref[...])
    dg = (d * gate[:, None, :]).reshape(m, cmid)

    # ---- project 1x1 (no act) + residual, then block-2 expand 1x1 (moved here so
    #      the kernel-1 -> kernel-2 handoff needs no padding-fixup mask)
    y1 = (jnp.dot(dg.astype(jnp.bfloat16), prj_w_ref[...],
                  preferred_element_type=jnp.float32) + prj_b_ref[...]) + x0        # (m,16)
    e2 = _silu(jnp.dot(y1.astype(jnp.bfloat16), e2w_ref[...],
                       preferred_element_type=jnp.float32) + e2b_ref[...])          # (m,64)
    out_ref[...] = e2.reshape(bsub, hw, cmid).astype(out_ref.dtype)


def _block2_head_pool_kernel(e2d_ref, dw_w_ref, dw_b_ref,
                             ser_w_ref, ser_b_ref, see_w_ref, see_b_ref,
                             prj_w_ref, prj_b_ref, head_w_ref, head_b_ref,
                             out_ref, *, bsub, hs):
    """Fused: MBConv block-2 dw 3x3/s2 + SE + project + head 1x1 + global avg pool."""
    prs = hs + 1                          # rows per de-interleaved parity plane
    hw = hs * hs
    cmid = dw_b_ref.shape[-1]             # 64

    # ---- depthwise 3x3 / stride 2: each tap is a contiguous window of one parity plane
    dacc = jnp.zeros((bsub, hs, hs, cmid), jnp.float32)
    for kh in range(3):
        ph, si = _TAP[kh]
        for kw in range(3):
            pw, sj = _TAP[kw]
            r0 = (2 * ph + pw) * prs + si
            tap = e2d_ref[:, r0:r0 + hs, sj:sj + hs, :].astype(jnp.float32)
            dacc = dacc + tap * dw_w_ref[kh * 3 + kw]
    d = _silu(dacc + dw_b_ref[...]).reshape(bsub, hw, cmid)

    # ---- squeeze & excite (pool first, tiny bf16 matmuls)
    pooled = jnp.sum(d, axis=1) * (1.0 / hw)
    s = _silu(jnp.dot(pooled.astype(jnp.bfloat16), ser_w_ref[...],
                      preferred_element_type=jnp.float32) + ser_b_ref[...])
    gate = jax.nn.sigmoid(jnp.dot(s.astype(jnp.bfloat16), see_w_ref[...],
                                  preferred_element_type=jnp.float32) + see_b_ref[...])
    dg = (d * gate[:, None, :]).reshape(bsub * hw, cmid)

    # ---- project 1x1 (no act) -> head 1x1 conv (silu) -> global average pool
    p = jnp.dot(dg.astype(jnp.bfloat16), prj_w_ref[...],
                preferred_element_type=jnp.float32) + prj_b_ref[...]                # (b*hw,24)
    hfeat = _silu(jnp.dot(p.astype(jnp.bfloat16), head_w_ref[...],
                          preferred_element_type=jnp.float32) + head_b_ref[...])    # (b*hw,64)
    out_ref[...] = jnp.sum(hfeat.reshape(bsub, hw, -1), axis=1) * (1.0 / hw)        # (b,64)


def _fc_ce_kernel(pooled_ref, fc_w_ref, fc_b_ref, onehot_ref, logits_ref, loss_ref):
    """Fused tail: final FC + mean cross-entropy (single launch, batch is tiny)."""
    # TODO(synk): for very large batches give this kernel a batch grid + loss accumulator.
    n = pooled_ref.shape[0]
    logits = jnp.dot(pooled_ref[...].astype(jnp.bfloat16), fc_w_ref[...],
                     preferred_element_type=jnp.float32) + fc_b_ref[...]            # (n,C)
    mx = jnp.max(logits, axis=-1, keepdims=True)
    lse = jnp.log(jnp.sum(jnp.exp(logits - mx), axis=-1, keepdims=True)) + mx
    nll = -jnp.sum(onehot_ref[...] * (logits - lse), axis=-1, keepdims=True)        # (n,1)
    logits_ref[...] = logits
    loss_ref[...] = jnp.sum(nll, axis=0, keepdims=True) * (1.0 / n)


# --------------------------------------------------------------------------- #
#                      JAX glue: layout prep, specs, params                    #
# --------------------------------------------------------------------------- #

def _deinterleave(x, pad_cols=None):
    """NHWC (even H, W) -> stride-2 parity planes [N, 4*(H/2+1), W/2+1(+pad), C].

    Plane (p, q) holds x[:, p::2, q::2, :] shifted by (p, q) so that every tap of a
    3x3/stride-2/pad-1 conv is a contiguous window of exactly one plane (see _TAP).
    """
    n, h, w, c = x.shape
    hh, wh = h // 2, w // 2
    planes = []
    for p in (0, 1):
        for q in (0, 1):
            sub = x[:, p::2, q::2, :]
            sub = jnp.pad(sub, ((0, 0), (p, 1 - p), (q, 1 - q), (0, 0)))
            planes.append(sub)
    d = jnp.stack(planes, axis=1)                     # [n, 4, hh+1, wh+1, c]
    cols = wh + 1
    if pad_cols is not None and pad_cols > cols:
        d = jnp.pad(d, ((0, 0), (0, 0), (0, 0), (0, pad_cols - cols), (0, 0)))
        cols = pad_cols
    return d.reshape(n, 4 * (hh + 1), cols, c)


def _stem_patches(x_nhwc):
    """Glue-side im2col for the 3x3/stride-2/pad-1 stem -> (n, (H/2)*(W/2), 27)."""
    n, h, w, c = x_nhwc.shape
    xp = jnp.pad(x_nhwc, ((0, 0), (1, 1), (1, 1), (0, 0)))
    taps = [xp[:, kh:kh + h:2, kw:kw + w:2, :] for kh in range(3) for kw in range(3)]
    patches = jnp.concatenate(taps, axis=-1)          # (n, H/2, W/2, 9*c)
    return patches.reshape(n, (h // 2) * (w // 2), 9 * c).astype(jnp.bfloat16)


def _bcast_spec(shape):
    zeros = (0,) * len(shape)
    return pl.BlockSpec(tuple(shape), lambda i: zeros)


def _batched_spec(shape, bsub):
    tail = (0,) * (len(shape) - 1)
    return pl.BlockSpec((bsub,) + tuple(shape[1:]), lambda i: (i,) + tail)


def _pick_bsub(n, target=8):
    """Images per grid step: whole batch if small, else a multiple of 8 dividing n."""
    if n <= target:
        return n
    for b in range(target, n, target):
        if n % b == 0:
            return b
    return n


_COMPILER_PARAMS = pltpu.CompilerParams(
    dimension_semantics=("parallel",),          # v7x megacore can shard batch blocks
    vmem_limit_bytes=32 * 1024 * 1024,          # explicit; v7x (64 MiB physical) safe
)


# ------------------------------- parameters -------------------------------- #

def _fold_bn(key, cout):
    k1, k2, k3, k4 = jax.random.split(key, 4)
    gamma = 1.0 + 0.01 * jax.random.normal(k1, (cout,), jnp.float32)
    beta = 0.01 * jax.random.normal(k2, (cout,), jnp.float32)
    mean = 0.01 * jax.random.normal(k3, (cout,), jnp.float32)
    var = 1.0 + 0.1 * jnp.abs(jax.random.normal(k4, (cout,), jnp.float32))
    scale = gamma / jnp.sqrt(var + 1e-3)
    bias = beta - mean * scale
    return scale, bias


def stem_params(key, cin, cout):
    kw, kb = jax.random.split(key)
    w = jax.random.normal(kw, (3, 3, cin, cout), jnp.float32) * 0.05
    scale, bias = _fold_bn(kb, cout)
    # (kh, kw, cin) flattened to 27 -> matches the glue-side im2col patch ordering
    w = (w * scale).reshape(9 * cin, cout).astype(jnp.bfloat16)
    return w, bias.reshape(1, cout)


def conv1x1_params(key, cin, cout):
    kw, kb = jax.random.split(key)
    w = jax.random.normal(kw, (cin, cout), jnp.float32) * 0.05
    scale, bias = _fold_bn(kb, cout)
    return (w * scale).astype(jnp.bfloat16), bias.reshape(1, cout)


def dw_params(key, c):
    kw, kb = jax.random.split(key)
    w = jax.random.normal(kw, (3, 3, c), jnp.float32) * 0.1
    scale, bias = _fold_bn(kb, c)
    return (w * scale).reshape(9, 1, c), bias.reshape(1, c)      # VPU path stays f32


def fc_params(key, cin, cout, dtype=jnp.float32):
    kw, kb = jax.random.split(key)
    w = jax.random.normal(kw, (cin, cout), jnp.float32) * (1.0 / float(cin) ** 0.5)
    b = 0.01 * jax.random.normal(kb, (cout,), jnp.float32)
    return w.astype(dtype), b.reshape(1, cout)


def init_params(key, num_classes):
    keys = jax.random.split(key, 13)
    return {
        "stem": stem_params(keys[0], 3, 16),
        "block1": {
            "expand": conv1x1_params(keys[1], 16, 64),
            "dw": dw_params(keys[2], 64),
            "se_reduce": fc_params(keys[3], 64, 4, jnp.bfloat16),
            "se_expand": fc_params(keys[4], 4, 64, jnp.bfloat16),
            "project": conv1x1_params(keys[5], 64, 16),
        },
        "block2": {
            "expand": conv1x1_params(keys[6], 16, 64),
            "dw": dw_params(keys[7], 64),
            "se_reduce": fc_params(keys[8], 64, 4, jnp.bfloat16),
            "se_expand": fc_params(keys[9], 4, 64, jnp.bfloat16),
            "project": conv1x1_params(keys[10], 64, 24),
        },
        "head": conv1x1_params(keys[11], 24, 64),
        "fc": fc_params(keys[12], 64, num_classes, jnp.bfloat16),  # replaces base_model._fc
    }


# ------------------------------ forward pass -------------------------------- #

def efficientnet_backbone_forward(params, image_nchw, targets):
    """Mirrors efficientnetBackBone.forward(image, targets) -> (out, loss)."""
    x = jnp.transpose(image_nchw, (0, 2, 3, 1)).astype(jnp.float32)   # NCHW -> NHWC
    n, h, w, _ = x.shape
    hs1, hs2 = h // 2, h // 4
    hw1 = hs1 * hs1
    bsub = _pick_bsub(n)
    nblk = n // bsub

    b1, b2 = params["block1"], params["block2"]

    # --- kernel 1: stem (im2col matmul) + MBConv block 1 + block-2 expand ----
    patches = _stem_patches(x)                                        # (n, 256, 27) bf16
    k1_in = (patches, *params["stem"],
             *b1["expand"], *b1["dw"], *b1["se_reduce"], *b1["se_expand"], *b1["project"],
             *b2["expand"])
    e2 = pl.pallas_call(
        functools.partial(_stem_block1_kernel, bsub=bsub, hs=hs1),
        grid=(nblk,),
        in_specs=[_batched_spec(patches.shape, bsub)]
                 + [_bcast_spec(a.shape) for a in k1_in[1:]],
        out_specs=pl.BlockSpec((bsub, hw1, 64), lambda i: (i, 0, 0)),
        out_shape=jax.ShapeDtypeStruct((n, hw1, 64), jnp.bfloat16),   # bf16 handoff
        scratch_shapes=[pltpu.VMEM((bsub, hs1 + 16, hs1 + 16, 64), jnp.float32)],
        compiler_params=_COMPILER_PARAMS,
    )(*k1_in)                                                         # [n, 256, 64]

    # --- glue: de-interleave the expanded block-2 input into stride-2 parity planes
    e2_d = _deinterleave(e2.reshape(n, hs1, hs1, 64), pad_cols=16)    # [n, 36, 16, 64]

    # --- kernel 2: block-2 dw 3x3/s2 + SE + project + head + global avg pool --
    k2_in = (e2_d, *b2["dw"], *b2["se_reduce"], *b2["se_expand"], *b2["project"],
             *params["head"])
    pooled = pl.pallas_call(
        functools.partial(_block2_head_pool_kernel, bsub=bsub, hs=hs2),
        grid=(nblk,),
        in_specs=[_batched_spec(e2_d.shape, bsub)]
                 + [_bcast_spec(a.shape) for a in k2_in[1:]],
        out_specs=pl.BlockSpec((bsub, 64), lambda i: (i, 0)),
        out_shape=jax.ShapeDtypeStruct((n, 64), jnp.float32),
        compiler_params=_COMPILER_PARAMS,
    )(*k2_in)                                                         # [n, 64]

    # --- kernel 3: FC + cross-entropy ----------------------------------------
    fc_w, fc_b = params["fc"]
    num_classes = fc_w.shape[1]
    onehot = jax.nn.one_hot(targets, num_classes, dtype=jnp.float32)
    logits, loss = pl.pallas_call(
        _fc_ce_kernel,
        out_shape=(jax.ShapeDtypeStruct((n, num_classes), jnp.float32),
                   jax.ShapeDtypeStruct((1, 1), jnp.float32)),
        in_specs=[VMEM_SPEC, VMEM_SPEC, VMEM_SPEC, VMEM_SPEC],
        out_specs=(VMEM_SPEC, VMEM_SPEC),
    )(pooled, fc_w, fc_b, onehot)
    return logits, loss[0, 0]


if __name__ == "__main__":
    num_classes = 10
    key = jax.random.PRNGKey(0)
    kp, kx, kt = jax.random.split(key, 3)

    params = init_params(kp, num_classes)
    image = jax.random.normal(kx, (2, 3, 32, 32), jnp.float32)        # NCHW like PyTorch
    targets = jax.random.randint(kt, (2,), 0, num_classes)

    fwd = jax.jit(efficientnet_backbone_forward)
    out, loss = fwd(params, image, targets)
    jax.block_until_ready((out, loss))

    assert out.shape == (2, num_classes)
    assert out.dtype == jnp.float32
    assert loss.shape == ()
    assert bool(jnp.isfinite(loss))
    print("KERNEL_OK")
</pallas_src>

<mosaic_0001>
module attributes {stable_mosaic.version = 11 : i64} {
  func.func @_stem_block1_kernel(%arg0: i32, %arg1: memref<2x256x27xbf16, #tpu.memory_space<vmem>>, %arg2: memref<27x16xbf16, #tpu.memory_space<vmem>>, %arg3: memref<1x16xf32, #tpu.memory_space<vmem>>, %arg4: memref<16x64xbf16, #tpu.memory_space<vmem>>, %arg5: memref<1x64xf32, #tpu.memory_space<vmem>>, %arg6: memref<9x1x64xf32, #tpu.memory_space<vmem>>, %arg7: memref<1x64xf32, #tpu.memory_space<vmem>>, %arg8: memref<64x4xbf16, #tpu.memory_space<vmem>>, %arg9: memref<1x4xf32, #tpu.memory_space<vmem>>, %arg10: memref<4x64xbf16, #tpu.memory_space<vmem>>, %arg11: memref<1x64xf32, #tpu.memory_space<vmem>>, %arg12: memref<64x16xbf16, #tpu.memory_space<vmem>>, %arg13: memref<1x16xf32, #tpu.memory_space<vmem>>, %arg14: memref<16x64xbf16, #tpu.memory_space<vmem>>, %arg15: memref<1x64xf32, #tpu.memory_space<vmem>>, %arg16: memref<2x256x64xbf16, #tpu.memory_space<vmem>>, %arg17: memref<2x32x32x64xf32, #tpu.memory_space<vmem>>) attributes {dimension_semantics = [#tpu.dimension_semantics<parallel>], iteration_bounds = array<i64: 1>, scalar_prefetch = 0 : i64, scratch_operands = 1 : i64, tpu.core_type = #tpu.core_type<tc>, window_params = [{transform_indices = @transform_0, window_bounds = array<i64: 2, 256, 27>}, {pipeline_mode = #tpu.pipeline_mode<synchronous>, transform_indices = @transform_1, window_bounds = array<i64: 27, 16>}, {pipeline_mode = #tpu.pipeline_mode<synchronous>, transform_indices = @transform_2, window_bounds = array<i64: 1, 16>}, {pipeline_mode = #tpu.pipeline_mode<synchronous>, transform_indices = @transform_3, window_bounds = array<i64: 16, 64>}, {pipeline_mode = #tpu.pipeline_mode<synchronous>, transform_indices = @transform_4, window_bounds = array<i64: 1, 64>}, {pipeline_mode = #tpu.pipeline_mode<synchronous>, transform_indices = @transform_5, window_bounds = array<i64: 9, 1, 64>}, {pipeline_mode = #tpu.pipeline_mode<synchronous>, transform_indices = @transform_6, window_bounds = array<i64: 1, 64>}, {pipeline_mode = #tpu.pipeline_mode<synchronous>, transform_indices = @transform_7, window_bounds = array<i64: 64, 4>}, {pipeline_mode = #tpu.pipeline_mode<synchronous>, transform_indices = @transform_8, window_bounds = array<i64: 1, 4>}, {pipeline_mode = #tpu.pipeline_mode<synchronous>, transform_indices = @transform_9, window_bounds = array<i64: 4, 64>}, {pipeline_mode = #tpu.pipeline_mode<synchronous>, transform_indices = @transform_10, window_bounds = array<i64: 1, 64>}, {pipeline_mode = #tpu.pipeline_mode<synchronous>, transform_indices = @transform_11, window_bounds = array<i64: 64, 16>}, {pipeline_mode = #tpu.pipeline_mode<synchronous>, transform_indices = @transform_12, window_bounds = array<i64: 1, 16>}, {pipeline_mode = #tpu.pipeline_mode<synchronous>, transform_indices = @transform_13, window_bounds = array<i64: 16, 64>}, {pipeline_mode = #tpu.pipeline_mode<synchronous>, transform_indices = @transform_14, window_bounds = array<i64: 1, 64>}, {transform_indices = @transform_15, window_bounds = array<i64: 2, 256, 64>}]} {
    %c0 = arith.constant 0 : index
    %c0_0 = arith.constant 0 : index
    %c0_1 = arith.constant 0 : index
    %0 = vector.load %arg1[%c0, %c0_0, %c0_1] : memref<2x256x27xbf16, #tpu.memory_space<vmem>>, vector<2x256x27xbf16>
    %1 = vector.shape_cast %0 : vector<2x256x27xbf16> to vector<512x27xbf16>
    %c0_2 = arith.constant 0 : index
    %c0_3 = arith.constant 0 : index
    %2 = vector.load %arg2[%c0_2, %c0_3] : memref<27x16xbf16, #tpu.memory_space<vmem>>, vector<27x16xbf16>
    %cst = arith.constant dense<0.000000e+00> : vector<512x16xf32>
    %3 = tpu.matmul %1, %2, %cst {dimension_numbers = #tpu.dot_dimension_numbers<[1], [0], [0], [1], [0, 0, 1, 1], [], []>} : vector<512x27xbf16>, vector<27x16xbf16>, vector<512x16xf32> -> vector<512x16xf32>
    %c0_4 = arith.constant 0 : index
    %c0_5 = arith.constant 0 : index
    %4 = vector.load %arg3[%c0_4, %c0_5] : memref<1x16xf32, #tpu.memory_space<vmem>>, vector<1x16xf32>
    %5 = vector.broadcast %4 : vector<1x16xf32> to vector<512x16xf32>
    %6 = arith.addf %3, %5 : vector<512x16xf32>
    %7 = arith.negf %6 : vector<512x16xf32>
    %8 = math.exp %7 : vector<512x16xf32>
    %cst_6 = arith.constant 1.000000e+00 : f32
    %9 = vector.broadcast %cst_6 : f32 to vector<512x16xf32>
    %10 = arith.addf %9, %8 : vector<512x16xf32>
    %11 = arith.divf %9, %10 : vector<512x16xf32>
    %12 = arith.mulf %6, %11 : vector<512x16xf32>
    %13 = arith.truncf %12 : vector<512x16xf32> to vector<512x16xbf16>
    %c0_7 = arith.constant 0 : index
    %c0_8 = arith.constant 0 : index
    %14 = vector.load %arg4[%c0_7, %c0_8] : memref<16x64xbf16, #tpu.memory_space<vmem>>, vector<16x64xbf16>
    %cst_9 = arith.constant dense<0.000000e+00> : vector<512x64xf32>
    %15 = tpu.matmul %13, %14, %cst_9 {dimension_numbers = #tpu.dot_dimension_numbers<[1], [0], [0], [1], [0, 0, 1, 1], [], []>} : vector<512x16xbf16>, vector<16x64xbf16>, vector<512x64xf32> -> vector<512x64xf32>
    %c0_10 = arith.constant 0 : index
    %c0_11 = arith.constant 0 : index
    %16 = vector.load %arg5[%c0_10, %c0_11] : memref<1x64xf32, #tpu.memory_space<vmem>>, vector<1x64xf32>
    %17 = vector.broadcast %16 : vector<1x64xf32> to vector<512x64xf32>
    %18 = arith.addf %15, %17 : vector<512x64xf32>
    %19 = arith.negf %18 : vector<512x64xf32>
    %20 = math.exp %19 : vector<512x64xf32>
    %cst_12 = arith.constant 1.000000e+00 : f32
    %21 = vector.broadcast %cst_12 : f32 to vector<512x64xf32>
    %22 = arith.addf %21, %20 : vector<512x64xf32>
    %23 = arith.divf %21, %22 : vector<512x64xf32>
    %24 = arith.mulf %18, %23 : vector<512x64xf32>
    %cst_13 = arith.constant 0.000000e+00 : f32
    %25 = vector.broadcast %cst_13 : f32 to vector<2x1x18x64xf32>
    %cst_14 = arith.constant 0.000000e+00 : f32
    %26 = vector.broadcast %cst_14 : f32 to vector<2x16x1x64xf32>
    %c0_15 = arith.constant 0 : index
    %c7 = arith.constant 7 : index
    %c7_16 = arith.constant 7 : index
    %c0_17 = arith.constant 0 : index
    %27 = vector.load %arg17[%c0_15, %c7, %c7_16, %c0_17] : memref<2x32x32x64xf32, #tpu.memory_space<vmem>>, vector<2x1x18x64xf32>
    tpu.vector_store %arg17[%c0_15, %c7, %c7_16, %c0_17], %25 {strides = array<i32>} : memref<2x32x32x64xf32, #tpu.memory_space<vmem>>, vector<2x1x18x64xf32>,
    %c0_18 = arith.constant 0 : index
    %c24 = arith.constant 24 : index
    %c7_19 = arith.constant 7 : index
    %c0_20 = arith.constant 0 : index
    %28 = vector.load %arg17[%c0_18, %c24, %c7_19, %c0_20] : memref<2x32x32x64xf32, #tpu.memory_space<vmem>>, vector<2x1x18x64xf32>
    tpu.vector_store %arg17[%c0_18, %c24, %c7_19, %c0_20], %25 {strides = array<i32>} : memref<2x32x32x64xf32, #tpu.memory_space<vmem>>, vector<2x1x18x64xf32>,
    %c0_21 = arith.constant 0 : index
    %c8 = arith.constant 8 : index
    %c7_22 = arith.constant 7 : index
    %c0_23 = arith.constant 0 : index
    %29 = vector.load %arg17[%c0_21, %c8, %c7_22, %c0_23] : memref<2x32x32x64xf32, #tpu.memory_space<vmem>>, vector<2x16x1x64xf32>
    tpu.vector_store %arg17[%c0_21, %c8, %c7_22, %c0_23], %26 {strides = array<i32>} : memref<2x32x32x64xf32, #tpu.memory_space<vmem>>, vector<2x16x1x64xf32>,
    %c0_24 = arith.constant 0 : index
    %c8_25 = arith.constant 8 : index
    %c24_26 = arith.constant 24 : index
    %c0_27 = arith.constant 0 : index
    %30 = vector.load %arg17[%c0_24, %c8_25, %c24_26, %c0_27] : memref<2x32x32x64xf32, #tpu.memory_space<vmem>>, vector<2x16x1x64xf32>
    tpu.vector_store %arg17[%c0_24, %c8_25, %c24_26, %c0_27], %26 {strides = array<i32>} : memref<2x32x32x64xf32, #tpu.memory_space<vmem>>, vector<2x16x1x64xf32>,
    %31 = vector.shape_cast %24 : vector<512x64xf32> to vector<2x16x16x64xf32>
    %c0_28 = arith.constant 0 : index
    %c8_29 = arith.constant 8 : index
    %c8_30 = arith.constant 8 : index
    %c0_31 = arith.constant 0 : index
    %32 = vector.load %arg17[%c0_28, %c8_29, %c8_30, %c0_31] : memref<2x32x32x64xf32, #tpu.memory_space<vmem>>, vector<2x16x16x64xf32>
    tpu.vector_store %arg17[%c0_28, %c8_29, %c8_30, %c0_31], %31 {strides = array<i32>} : memref<2x32x32x64xf32, #tpu.memory_space<vmem>>, vector<2x16x16x64xf32>,
    %cst_32 = arith.constant 0.000000e+00 : f32
    %33 = vector.broadcast %cst_32 : f32 to vector<2x16x16x64xf32>
    %c0_33 = arith.constant 0 : index
    %c7_34 = arith.constant 7 : index
    %c7_35 = arith.constant 7 : index
    %c0_36 = arith.constant 0 : index
    %34 = vector.load %arg17[%c0_33, %c7_34, %c7_35, %c0_36] : memref<2x32x32x64xf32, #tpu.memory_space<vmem>>, vector<2x16x16x64xf32>
    %c0_37 = arith.constant 0 : index
    %c0_38 = arith.constant 0 : index
    %c0_39 = arith.constant 0 : index
    %35 = vector.load %arg6[%c0_37, %c0_38, %c0_39] : memref<9x1x64xf32, #tpu.memory_space<vmem>>, vector<1x1x64xf32>
    %36 = vector.shape_cast %35 : vector<1x1x64xf32> to vector<1x64xf32>
    %37 = vector.shape_cast %36 : vector<1x64xf32> to vector<1x1x1x64xf32>
    %38 = vector.broadcast %37 : vector<1x1x1x64xf32> to vector<2x16x16x64xf32>
    %39 = arith.mulf %34, %38 : vector<2x16x16x64xf32>
    %40 = arith.addf %33, %39 : vector<2x16x16x64xf32>
    %c0_40 = arith.constant 0 : index
    %c7_41 = arith.constant 7 : index
    %c8_42 = arith.constant 8 : index
    %c0_43 = arith.constant 0 : index
    %41 = vector.load %arg17[%c0_40, %c7_41, %c8_42, %c0_43] : memref<2x32x32x64xf32, #tpu.memory_space<vmem>>, vector<2x16x16x64xf32>
    %c1 = arith.constant 1 : index
    %c0_44 = arith.constant 0 : index
    %c0_45 = arith.constant 0 : index
    %42 = vector.load %arg6[%c1, %c0_44, %c0_45] : memref<9x1x64xf32, #tpu.memory_space<vmem>>, vector<1x1x64xf32>
    %43 = vector.shape_cast %42 : vector<1x1x64xf32> to vector<1x64xf32>
    %44 = vector.shape_cast %43 : vector<1x64xf32> to vector<1x1x1x64xf32>
    %45 = vector.broadcast %44 : vector<1x1x1x64xf32> to vector<2x16x16x64xf32>
    %46 = arith.mulf %41, %45 : vector<2x16x16x64xf32>
    %47 = arith.addf %40, %46 : vector<2x16x16x64xf32>
    %c0_46 = arith.constant 0 : index
    %c7_47 = arith.constant 7 : index
    %c9 = arith.constant 9 : index
    %c0_48 = arith.constant 0 : index
    %48 = vector.load %arg17[%c0_46, %c7_47, %c9, %c0_48] : memref<2x32x32x64xf32, #tpu.memory_space<vmem>>, vector<2x16x16x64xf32>
    %c2 = arith.constant 2 : index
    %c0_49 = arith.constant 0 : index
    %c0_50 = arith.constant 0 : index
    %49 = vector.load %arg6[%c2, %c0_49, %c0_50] : memref<9x1x64xf32, #tpu.memory_space<vmem>>, vector<1x1x64xf32>
    %50 = vector.shape_cast %49 : vector<1x1x64xf32> to vector<1x64xf32>
    %51 = vector.shape_cast %50 : vector<1x64xf32> to vector<1x1x1x64xf32>
    %52 = vector.broadcast %51 : vector<1x1x1x64xf32> to vector<2x16x16x64xf32>
    %53 = arith.mulf %48, %52 : vector<2x16x16x64xf32>
    %54 = arith.addf %47, %53 : vector<2x16x16x64xf32>
    %c0_51 = arith.constant 0 : index
    %c8_52 = arith.constant 8 : index
    %c7_53 = arith.constant 7 : index
    %c0_54 = arith.constant 0 : index
    %55 = vector.load %arg17[%c0_51, %c8_52, %c7_53, %c0_54] : memref<2x32x32x64xf32, #tpu.memory_space<vmem>>, vector<2x16x16x64xf32>
    %c3 = arith.constant 3 : index
    %c0_55 = arith.constant 0 : index
    %c0_56 = arith.constant 0 : index
    %56 = vector.load %arg6[%c3, %c0_55, %c0_56] : memref<9x1x64xf32, #tpu.memory_space<vmem>>, vector<1x1x64xf32>
    %57 = vector.shape_cast %56 : vector<1x1x64xf32> to vector<1x64xf32>
    %58 = vector.shape_cast %57 : vector<1x64xf32> to vector<1x1x1x64xf32>
    %59 = vector.broadcast %58 : vector<1x1x1x64xf32> to vector<2x16x16x64xf32>
    %60 = arith.mulf %55, %59 : vector<2x16x16x64xf32>
    %61 = arith.addf %54, %60 : vector<2x16x16x64xf32>
    %c0_57 = arith.constant 0 : index
    %c8_58 = arith.constant 8 : index
    %c8_59 = arith.constant 8 : index
    %c0_60 = arith.constant 0 : index
    %62 = vector.load %arg17[%c0_57, %c8_58, %c8_59, %c0_60] : memref<2x32x32x64xf32, #tpu.memory_space<vmem>>, vector<2x16x16x64xf32>
    %c4 = arith.constant 4 : index
    %c0_61 = arith.constant 0 : index
    %c0_62 = arith.constant 0 : index
    %63 = vector.load %arg6[%c4, %c0_61, %c0_62] : memref<9x1x64xf32, #tpu.memory_space<vmem>>, vector<1x1x64xf32>
    %64 = vector.shape_cast %63 : vector<1x1x64xf32> to vector<1x64xf32>
    %65 = vector.shape_cast %64 : vector<1x64xf32> to vector<1x1x1x64xf32>
    %66 = vector.broadcast %65 : vector<1x1x1x64xf32> to vector<2x16x16x64xf32>
    %67 = arith.mulf %62, %66 : vector<2x16x16x64xf32>
    %68 = arith.addf %61, %67 : vector<2x16x16x64xf32>
    %c0_63 = arith.constant 0 : index
    %c8_64 = arith.constant 8 : index
    %c9_65 = arith.constant 9 : index
    %c0_66 = arith.constant 0 : index
    %69 = vector.load %arg17[%c0_63, %c8_64, %c9_65, %c0_66] : memref<2x32x32x64xf32, #tpu.memory_space<vmem>>, vector<2x16x16x64xf32>
    %c5 = arith.constant 5 : index
    %c0_67 = arith.constant 0 : index
    %c0_68 = arith.constant 0 : index
    %70 = vector.load %arg6[%c5, %c0_67, %c0_68] : memref<9x1x64xf32, #tpu.memory_space<vmem>>, vector<1x1x64xf32>
    %71 = vector.shape_cast %70 : vector<1x1x64xf32> to vector<1x64xf32>
    %72 = vector.shape_cast %71 : vector<1x64xf32> to vector<1x1x1x64xf32>
    %73 = vector.broadcast %72 : vector<1x1x1x64xf32> to vector<2x16x16x64xf32>
    %74 = arith.mulf %69, %73 : vector<2x16x16x64xf32>
    %75 = arith.addf %68, %74 : vector<2x16x16x64xf32>
    %c0_69 = arith.constant 0 : index
    %c9_70 = arith.constant 9 : index
    %c7_71 = arith.constant 7 : index
    %c0_72 = arith.constant 0 : index
    %76 = vector.load %arg17[%c0_69, %c9_70, %c7_71, %c0_72] : memref<2x32x32x64xf32, #tpu.memory_space<vmem>>, vector<2x16x16x64xf32>
    %c6 = arith.constant 6 : index
    %c0_73 = arith.constant 0 : index
    %c0_74 = arith.constant 0 : index
    %77 = vector.load %arg6[%c6, %c0_73, %c0_74] : memref<9x1x64xf32, #tpu.memory_space<vmem>>, vector<1x1x64xf32>
    %78 = vector.shape_cast %77 : vector<1x1x64xf32> to vector<1x64xf32>
    %79 = vector.shape_cast %78 : vector<1x64xf32> to vector<1x1x1x64xf32>
    %80 = vector.broadcast %79 : vector<1x1x1x64xf32> to vector<2x16x16x64xf32>
    %81 = arith.mulf %76, %80 : vector<2x16x16x64xf32>
    %82 = arith.addf %75, %81 : vector<2x16x16x64xf32>
    %c0_75 = arith.constant 0 : index
    %c9_76 = arith.constant 9 : index
    %c8_77 = arith.constant 8 : index
    %c0_78 = arith.constant 0 : index
    %83 = vector.load %arg17[%c0_75, %c9_76, %c8_77, %c0_78] : memref<2x32x32x64xf32, #tpu.memory_space<vmem>>, vector<2x16x16x64xf32>
    %c7_79 = arith.constant 7 : index
    %c0_80 = arith.constant 0 : index
    %c0_81 = arith.constant 0 : index
    %84 = vector.load %arg6[%c7_79, %c0_80, %c0_81] : memref<9x1x64xf32, #tpu.memory_space<vmem>>, vector<1x1x64xf32>
    %85 = vector.shape_cast %84 : vector<1x1x64xf32> to vector<1x64xf32>
    %86 = vector.shape_cast %85 : vector<1x64xf32> to vector<1x1x1x64xf32>
    %87 = vector.broadcast %86 : vector<1x1x1x64xf32> to vector<2x16x16x64xf32>
    %88 = arith.mulf %83, %87 : vector<2x16x16x64xf32>
    %89 = arith.addf %82, %88 : vector<2x16x16x64xf32>
    %c0_82 = arith.constant 0 : index
    %c9_83 = arith.constant 9 : index
    %c9_84 = arith.constant 9 : index
    %c0_85 = arith.constant 0 : index
    %90 = vector.load %arg17[%c0_82, %c9_83, %c9_84, %c0_85] : memref<2x32x32x64xf32, #tpu.memory_space<vmem>>, vector<2x16x16x64xf32>
    %c8_86 = arith.constant 8 : index
    %c0_87 = arith.constant 0 : index
    %c0_88 = arith.constant 0 : index
    %91 = vector.load %arg6[%c8_86, %c0_87, %c0_88] : memref<9x1x64xf32, #tpu.memory_space<vmem>>, vector<1x1x64xf32>
    %92 = vector.shape_cast %91 : vector<1x1x64xf32> to vector<1x64xf32>
    %93 = vector.shape_cast %92 : vector<1x64xf32> to vector<1x1x1x64xf32>
    %94 = vector.broadcast %93 : vector<1x1x1x64xf32> to vector<2x16x16x64xf32>
    %95 = arith.mulf %90, %94 : vector<2x16x16x64xf32>
    %96 = arith.addf %89, %95 : vector<2x16x16x64xf32>
    %c0_89 = arith.constant 0 : index
    %c0_90 = arith.constant 0 : index
    %97 = vector.load %arg7[%c0_89, %c0_90] : memref<1x64xf32, #tpu.memory_space<vmem>>, vector<1x64xf32>
    %98 = vector.shape_cast %97 : vector<1x64xf32> to vector<1x1x1x64xf32>
    %99 = vector.broadcast %98 : vector<1x1x1x64xf32> to vector<2x16x16x64xf32>
    %100 = arith.addf %96, %99 : vector<2x16x16x64xf32>
    %101 = arith.negf %100 : vector<2x16x16x64xf32>
    %102 = math.exp %101 : vector<2x16x16x64xf32>
    %cst_91 = arith.constant 1.000000e+00 : f32
    %103 = vector.broadcast %cst_91 : f32 to vector<2x16x16x64xf32>
    %104 = arith.addf %103, %102 : vector<2x16x16x64xf32>
    %105 = arith.divf %103, %104 : vector<2x16x16x64xf32>
    %106 = arith.mulf %100, %105 : vector<2x16x16x64xf32>
    %107 = vector.shape_cast %106 : vector<2x16x16x64xf32> to vector<2x256x64xf32>
    %cst_92 = arith.constant dense<0.000000e+00> : vector<2x64xf32>
    %108 = vector.multi_reduction <add>, %107, %cst_92 [1] : vector<2x256x64xf32> to vector<2x64xf32>
    %cst_93 = arith.constant 3.906250e-03 : f32
    %109 = vector.broadcast %cst_93 : f32 to vector<2x64xf32>
    %110 = arith.mulf %108, %109 : vector<2x64xf32>
    %111 = arith.truncf %110 : vector<2x64xf32> to vector<2x64xbf16>
    %c0_94 = arith.constant 0 : index
    %c0_95 = arith.constant 0 : index
    %112 = vector.load %arg8[%c0_94, %c0_95] : memref<64x4xbf16, #tpu.memory_space<vmem>>, vector<64x4xbf16>
    %cst_96 = arith.constant dense<0.000000e+00> : vector<2x4xf32>
    %113 = tpu.matmul %111, %112, %cst_96 {dimension_numbers = #tpu.dot_dimension_numbers<[1], [0], [0], [1], [0, 0, 1, 1], [], []>} : vector<2x64xbf16>, vector<64x4xbf16>, vector<2x4xf32> -> vector<2x4xf32>
    %c0_97 = arith.constant 0 : index
    %c0_98 = arith.constant 0 : index
    %114 = vector.load %arg9[%c0_97, %c0_98] : memref<1x4xf32, #tpu.memory_space<vmem>>, vector<1x4xf32>
    %115 = vector.broadcast %114 : vector<1x4xf32> to vector<2x4xf32>
    %116 = arith.addf %113, %115 : vector<2x4xf32>
    %117 = arith.negf %116 : vector<2x4xf32>
    %118 = math.exp %117 : vector<2x4xf32>
    %cst_99 = arith.constant 1.000000e+00 : f32
    %119 = vector.broadcast %cst_99 : f32 to vector<2x4xf32>
    %120 = arith.addf %119, %118 : vector<2x4xf32>
    %121 = arith.divf %119, %120 : vector<2x4xf32>
    %122 = arith.mulf %116, %121 : vector<2x4xf32>
    %123 = arith.truncf %122 : vector<2x4xf32> to vector<2x4xbf16>
    %c0_100 = arith.constant 0 : index
    %c0_101 = arith.constant 0 : index
    %124 = vector.load %arg10[%c0_100, %c0_101] : memref<4x64xbf16, #tpu.memory_space<vmem>>, vector<4x64xbf16>
    %cst_102 = arith.constant dense<0.000000e+00> : vector<2x64xf32>
    %125 = tpu.matmul %123, %124, %cst_102 {dimension_numbers = #tpu.dot_dimension_numbers<[1], [0], [0], [1], [0, 0, 1, 1], [], []>} : vector<2x4xbf16>, vector<4x64xbf16>, vector<2x64xf32> -> vector<2x64xf32>
    %c0_103 = arith.constant 0 : index
    %c0_104 = arith.constant 0 : index
    %126 = vector.load %arg11[%c0_103, %c0_104] : memref<1x64xf32, #tpu.memory_space<vmem>>, vector<1x64xf32>
    %127 = vector.broadcast %126 : vector<1x64xf32> to vector<2x64xf32>
    %128 = arith.addf %125, %127 : vector<2x64xf32>
    %129 = arith.negf %128 : vector<2x64xf32>
    %130 = math.exp %129 : vector<2x64xf32>
    %cst_105 = arith.constant 1.000000e+00 : f32
    %131 = vector.broadcast %cst_105 : f32 to vector<2x64xf32>
    %132 = arith.addf %131, %130 : vector<2x64xf32>
    %133 = arith.divf %131, %132 : vector<2x64xf32>
    %134 = vector.shape_cast %133 : vector<2x64xf32> to vector<2x1x64xf32>
    %135 = vector.broadcast %134 : vector<2x1x64xf32> to vector<2x256x64xf32>
    %136 = arith.mulf %107, %135 : vector<2x256x64xf32>
    %137 = vector.shape_cast %136 : vector<2x256x64xf32> to vector<512x64xf32>
    %138 = arith.truncf %137 : vector<512x64xf32> to vector<512x64xbf16>
    %c0_106 = arith.constant 0 : index
    %c0_107 = arith.constant 0 : index
    %139 = vector.load %arg12[%c0_106, %c0_107] : memref<64x16xbf16, #tpu.memory_space<vmem>>, vector<64x16xbf16>
    %cst_108 = arith.constant dense<0.000000e+00> : vector<512x16xf32>
    %140 = tpu.matmul %138, %139, %cst_108 {dimension_numbers = #tpu.dot_dimension_numbers<[1], [0], [0], [1], [0, 0, 1, 1], [], []>} : vector<512x64xbf16>, vector<64x16xbf16>, vector<512x16xf32> -> vector<512x16xf32>
    %c0_109 = arith.constant 0 : index
    %c0_110 = arith.constant 0 : index
    %141 = vector.load %arg13[%c0_109, %c0_110] : memref<1x16xf32, #tpu.memory_space<vmem>>, vector<1x16xf32>
    %142 = vector.broadcast %141 : vector<1x16xf32> to vector<512x16xf32>
    %143 = arith.addf %140, %142 : vector<512x16xf32>
    %144 = arith.addf %143, %12 : vector<512x16xf32>
    %145 = arith.truncf %144 : vector<512x16xf32> to vector<512x16xbf16>
    %c0_111 = arith.constant 0 : index
    %c0_112 = arith.constant 0 : index
    %146 = vector.load %arg14[%c0_111, %c0_112] : memref<16x64xbf16, #tpu.memory_space<vmem>>, vector<16x64xbf16>
    %cst_113 = arith.constant dense<0.000000e+00> : vector<512x64xf32>
    %147 = tpu.matmul %145, %146, %cst_113 {dimension_numbers = #tpu.dot_dimension_numbers<[1], [0], [0], [1], [0, 0, 1, 1], [], []>} : vector<512x16xbf16>, vector<16x64xbf16>, vector<512x64xf32> -> vector<512x64xf32>
    %c0_114 = arith.constant 0 : index
    %c0_115 = arith.constant 0 : index
    %148 = vector.load %arg15[%c0_114, %c0_115] : memref<1x64xf32, #tpu.memory_space<vmem>>, vector<1x64xf32>
    %149 = vector.broadcast %148 : vector<1x64xf32> to vector<512x64xf32>
    %150 = arith.addf %147, %149 : vector<512x64xf32>
    %151 = arith.negf %150 : vector<512x64xf32>
    %152 = math.exp %151 : vector<512x64xf32>
    %cst_116 = arith.constant 1.000000e+00 : f32
    %153 = vector.broadcast %cst_116 : f32 to vector<512x64xf32>
    %154 = arith.addf %153, %152 : vector<512x64xf32>
    %155 = arith.divf %153, %154 : vector<512x64xf32>
    %156 = arith.mulf %150, %155 : vector<512x64xf32>
    %157 = vector.shape_cast %156 : vector<512x64xf32> to vector<2x256x64xf32>
    %158 = arith.truncf %157 : vector<2x256x64xf32> to vector<2x256x64xbf16>
    %c0_117 = arith.constant 0 : index
    %c0_118 = arith.constant 0 : index
    %c0_119 = arith.constant 0 : index
    %159 = vector.load %arg16[%c0_117, %c0_118, %c0_119] : memref<2x256x64xbf16, #tpu.memory_space<vmem>>, vector<2x256x64xbf16>
    tpu.vector_store %arg16[%c0_117, %c0_118, %c0_119], %158 {strides = array<i32>} : memref<2x256x64xbf16, #tpu.memory_space<vmem>>, vector<2x256x64xbf16>,
    return
  }
  func.func @transform_0(%arg0: i32) -> (i32, i32, i32) {
    %c0_i32 = arith.constant 0 : i32
    %c0_i32_0 = arith.constant 0 : i32
    %c0_i32_1 = arith.constant 0 : i32
    return %arg0, %c0_i32, %c0_i32_0 : i32, i32, i32
  }
  func.func @transform_1(%arg0: i32) -> (i32, i32) {
    %c0_i32 = arith.constant 0 : i32
    %c0_i32_0 = arith.constant 0 : i32
    %c0_i32_1 = arith.constant 0 : i32
    return %c0_i32, %c0_i32_0 : i32, i32
  }
  func.func @transform_2(%arg0: i32) -> (i32, i32) {
    %c0_i32 = arith.constant 0 : i32
    %c0_i32_0 = arith.constant 0 : i32
    %c0_i32_1 = arith.constant 0 : i32
    return %c0_i32, %c0_i32_0 : i32, i32
  }
  func.func @transform_3(%arg0: i32) -> (i32, i32) {
    %c0_i32 = arith.constant 0 : i32
    %c0_i32_0 = arith.constant 0 : i32
    %c0_i32_1 = arith.constant 0 : i32
    return %c0_i32, %c0_i32_0 : i32, i32
  }
  func.func @transform_4(%arg0: i32) -> (i32, i32) {
    %c0_i32 = arith.constant 0 : i32
    %c0_i32_0 = arith.constant 0 : i32
    %c0_i32_1 = arith.constant 0 : i32
    return %c0_i32, %c0_i32_0 : i32, i32
  }
  func.func @transform_5(%arg0: i32) -> (i32, i32, i32) {
    %c0_i32 = arith.constant 0 : i32
    %c0_i32_0 = arith.constant 0 : i32
    %c0_i32_1 = arith.constant 0 : i32
    %c0_i32_2 = arith.constant 0 : i32
    return %c0_i32, %c0_i32_0, %c0_i32_1 : i32, i32, i32
  }
  func.func @transform_6(%arg0: i32) -> (i32, i32) {
    %c0_i32 = arith.constant 0 : i32
    %c0_i32_0 = arith.constant 0 : i32
    %c0_i32_1 = arith.constant 0 : i32
    return %c0_i32, %c0_i32_0 : i32, i32
  }
  func.func @transform_7(%arg0: i32) -> (i32, i32) {
    %c0_i32 = arith.constant 0 : i32
    %c0_i32_0 = arith.constant 0 : i32
    %c0_i32_1 = arith.constant 0 : i32
    return %c0_i32, %c0_i32_0 : i32, i32
  }
  func.func @transform_8(%arg0: i32) -> (i32, i32) {
    %c0_i32 = arith.constant 0 : i32
    %c0_i32_0 = arith.constant 0 : i32
    %c0_i32_1 = arith.constant 0 : i32
    return %c0_i32, %c0_i32_0 : i32, i32
  }
  func.func @transform_9(%arg0: i32) -> (i32, i32) {
    %c0_i32 = arith.constant 0 : i32
    %c0_i32_0 = arith.constant 0 : i32
    %c0_i32_1 = arith.constant 0 : i32
    return %c0_i32, %c0_i32_0 : i32, i32
  }
  func.func @transform_10(%arg0: i32) -> (i32, i32) {
    %c0_i32 = arith.constant 0 : i32
    %c0_i32_0 = arith.constant 0 : i32
    %c0_i32_1 = arith.constant 0 : i32
    return %c0_i32, %c0_i32_0 : i32, i32
  }
  func.func @transform_11(%arg0: i32) -> (i32, i32) {
    %c0_i32 = arith.constant 0 : i32
    %c0_i32_0 = arith.constant 0 : i32
    %c0_i32_1 = arith.constant 0 : i32
    return %c0_i32, %c0_i32_0 : i32, i32
  }
  func.func @transform_12(%arg0: i32) -> (i32, i32) {
    %c0_i32 = arith.constant 0 : i32
    %c0_i32_0 = arith.constant 0 : i32
    %c0_i32_1 = arith.constant 0 : i32
    return %c0_i32, %c0_i32_0 : i32, i32
  }
  func.func @transform_13(%arg0: i32) -> (i32, i32) {
    %c0_i32 = arith.constant 0 : i32
    %c0_i32_0 = arith.constant 0 : i32
    %c0_i32_1 = arith.constant 0 : i32
    return %c0_i32, %c0_i32_0 : i32, i32
  }
  func.func @transform_14(%arg0: i32) -> (i32, i32) {
    %c0_i32 = arith.constant 0 : i32
    %c0_i32_0 = arith.constant 0 : i32
    %c0_i32_1 = arith.constant 0 : i32
    return %c0_i32, %c0_i32_0 : i32, i32
  }
  func.func @transform_15(%arg0: i32) -> (i32, i32, i32) {
    %c0_i32 = arith.constant 0 : i32
    %c0_i32_0 = arith.constant 0 : i32
    %c0_i32_1 = arith.constant 0 : i32
    return %arg0, %c0_i32, %c0_i32_0 : i32, i32, i32
  }
}

module attributes {stable_mosaic.version = 11 : i64} {
  func.func @_block2_head_pool_kernel(%arg0: i32, %arg1: memref<2x36x16x64xbf16, #tpu.memory_space<vmem>>, %arg2: memref<9x1x64xf32, #tpu.memory_space<vmem>>, %arg3: memref<1x64xf32, #tpu.memory_space<vmem>>, %arg4: memref<64x4xbf16, #tpu.memory_space<vmem>>, %arg5: memref<1x4xf32, #tpu.memory_space<vmem>>, %arg6: memref<4x64xbf16, #tpu.memory_space<vmem>>, %arg7: memref<1x64xf32, #tpu.memory_space<vmem>>, %arg8: memref<64x24xbf16, #tpu.memory_space<vmem>>, %arg9: memref<1x24xf32, #tpu.memory_space<vmem>>, %arg10: memref<24x64xbf16, #tpu.memory_space<vmem>>, %arg11: memref<1x64xf32, #tpu.memory_space<vmem>>, %arg12: memref<2x64xf32, #tpu.memory_space<vmem>>) attributes {dimension_semantics = [#tpu.dimension_semantics<parallel>], iteration_bounds = array<i64: 1>, scalar_prefetch = 0 : i64, scratch_operands = 0 : i64, tpu.core_type = #tpu.core_type<tc>, window_params = [{transform_indices = @transform_0, window_bounds = array<i64: 2, 36, 16, 64>}, {pipeline_mode = #tpu.pipeline_mode<synchronous>, transform_indices = @transform_1, window_bounds = array<i64: 9, 1, 64>}, {pipeline_mode = #tpu.pipeline_mode<synchronous>, transform_indices = @transform_2, window_bounds = array<i64: 1, 64>}, {pipeline_mode = #tpu.pipeline_mode<synchronous>, transform_indices = @transform_3, window_bounds = array<i64: 64, 4>}, {pipeline_mode = #tpu.pipeline_mode<synchronous>, transform_indices = @transform_4, window_bounds = array<i64: 1, 4>}, {pipeline_mode = #tpu.pipeline_mode<synchronous>, transform_indices = @transform_5, window_bounds = array<i64: 4, 64>}, {pipeline_mode = #tpu.pipeline_mode<synchronous>, transform_indices = @transform_6, window_bounds = array<i64: 1, 64>}, {pipeline_mode = #tpu.pipeline_mode<synchronous>, transform_indices = @transform_7, window_bounds = array<i64: 64, 24>}, {pipeline_mode = #tpu.pipeline_mode<synchronous>, transform_indices = @transform_8, window_bounds = array<i64: 1, 24>}, {pipeline_mode = #tpu.pipeline_mode<synchronous>, transform_indices = @transform_9, window_bounds = array<i64: 24, 64>}, {pipeline_mode = #tpu.pipeline_mode<synchronous>, transform_indices = @transform_10, window_bounds = array<i64: 1, 64>}, {transform_indices = @transform_11, window_bounds = array<i64: 2, 64>}]} {
    %cst = arith.constant 0.000000e+00 : f32
    %0 = vector.broadcast %cst : f32 to vector<2x8x8x64xf32>
    %c0 = arith.constant 0 : index
    %c27 = arith.constant 27 : index
    %c0_0 = arith.constant 0 : index
    %c0_1 = arith.constant 0 : index
    %1 = vector.load %arg1[%c0, %c27, %c0_0, %c0_1] : memref<2x36x16x64xbf16, #tpu.memory_space<vmem>>, vector<2x8x8x64xbf16>
    %2 = arith.extf %1 : vector<2x8x8x64xbf16> to vector<2x8x8x64xf32>
    %c0_2 = arith.constant 0 : index
    %c0_3 = arith.constant 0 : index
    %c0_4 = arith.constant 0 : index
    %3 = vector.load %arg2[%c0_2, %c0_3, %c0_4] : memref<9x1x64xf32, #tpu.memory_space<vmem>>, vector<1x1x64xf32>
    %4 = vector.shape_cast %3 : vector<1x1x64xf32> to vector<1x64xf32>
    %5 = vector.shape_cast %4 : vector<1x64xf32> to vector<1x1x1x64xf32>
    %6 = vector.broadcast %5 : vector<1x1x1x64xf32> to vector<2x8x8x64xf32>
    %7 = arith.mulf %2, %6 : vector<2x8x8x64xf32>
    %8 = arith.addf %0, %7 : vector<2x8x8x64xf32>
    %c0_5 = arith.constant 0 : index
    %c18 = arith.constant 18 : index
    %c0_6 = arith.constant 0 : index
    %c0_7 = arith.constant 0 : index
    %9 = vector.load %arg1[%c0_5, %c18, %c0_6, %c0_7] : memref<2x36x16x64xbf16, #tpu.memory_space<vmem>>, vector<2x8x8x64xbf16>
    %10 = arith.extf %9 : vector<2x8x8x64xbf16> to vector<2x8x8x64xf32>
    %c1 = arith.constant 1 : index
    %c0_8 = arith.constant 0 : index
    %c0_9 = arith.constant 0 : index
    %11 = vector.load %arg2[%c1, %c0_8, %c0_9] : memref<9x1x64xf32, #tpu.memory_space<vmem>>, vector<1x1x64xf32>
    %12 = vector.shape_cast %11 : vector<1x1x64xf32> to vector<1x64xf32>
    %13 = vector.shape_cast %12 : vector<1x64xf32> to vector<1x1x1x64xf32>
    %14 = vector.broadcast %13 : vector<1x1x1x64xf32> to vector<2x8x8x64xf32>
    %15 = arith.mulf %10, %14 : vector<2x8x8x64xf32>
    %16 = arith.addf %8, %15 : vector<2x8x8x64xf32>
    %c0_10 = arith.constant 0 : index
    %c27_11 = arith.constant 27 : index
    %c1_12 = arith.constant 1 : index
    %c0_13 = arith.constant 0 : index
    %17 = vector.load %arg1[%c0_10, %c27_11, %c1_12, %c0_13] : memref<2x36x16x64xbf16, #tpu.memory_space<vmem>>, vector<2x8x8x64xbf16>
    %18 = arith.extf %17 : vector<2x8x8x64xbf16> to vector<2x8x8x64xf32>
    %c2 = arith.constant 2 : index
    %c0_14 = arith.constant 0 : index
    %c0_15 = arith.constant 0 : index
    %19 = vector.load %arg2[%c2, %c0_14, %c0_15] : memref<9x1x64xf32, #tpu.memory_space<vmem>>, vector<1x1x64xf32>
    %20 = vector.shape_cast %19 : vector<1x1x64xf32> to vector<1x64xf32>
    %21 = vector.shape_cast %20 : vector<1x64xf32> to vector<1x1x1x64xf32>
    %22 = vector.broadcast %21 : vector<1x1x1x64xf32> to vector<2x8x8x64xf32>
    %23 = arith.mulf %18, %22 : vector<2x8x8x64xf32>
    %24 = arith.addf %16, %23 : vector<2x8x8x64xf32>
    %c0_16 = arith.constant 0 : index
    %c9 = arith.constant 9 : index
    %c0_17 = arith.constant 0 : index
    %c0_18 = arith.constant 0 : index
    %25 = vector.load %arg1[%c0_16, %c9, %c0_17, %c0_18] : memref<2x36x16x64xbf16, #tpu.memory_space<vmem>>, vector<2x8x8x64xbf16>
    %26 = arith.extf %25 : vector<2x8x8x64xbf16> to vector<2x8x8x64xf32>
    %c3 = arith.constant 3 : index
    %c0_19 = arith.constant 0 : index
    %c0_20 = arith.constant 0 : index
    %27 = vector.load %arg2[%c3, %c0_19, %c0_20] : memref<9x1x64xf32, #tpu.memory_space<vmem>>, vector<1x1x64xf32>
    %28 = vector.shape_cast %27 : vector<1x1x64xf32> to vector<1x64xf32>
    %29 = vector.shape_cast %28 : vector<1x64xf32> to vector<1x1x1x64xf32>
    %30 = vector.broadcast %29 : vector<1x1x1x64xf32> to vector<2x8x8x64xf32>
    %31 = arith.mulf %26, %30 : vector<2x8x8x64xf32>
    %32 = arith.addf %24, %31 : vector<2x8x8x64xf32>
    %c0_21 = arith.constant 0 : index
    %c0_22 = arith.constant 0 : index
    %c0_23 = arith.constant 0 : index
    %c0_24 = arith.constant 0 : index
    %33 = vector.load %arg1[%c0_21, %c0_22, %c0_23, %c0_24] : memref<2x36x16x64xbf16, #tpu.memory_space<vmem>>, vector<2x8x8x64xbf16>
    %34 = arith.extf %33 : vector<2x8x8x64xbf16> to vector<2x8x8x64xf32>
    %c4 = arith.constant 4 : index
    %c0_25 = arith.constant 0 : index
    %c0_26 = arith.constant 0 : index
    %35 = vector.load %arg2[%c4, %c0_25, %c0_26] : memref<9x1x64xf32, #tpu.memory_space<vmem>>, vector<1x1x64xf32>
    %36 = vector.shape_cast %35 : vector<1x1x64xf32> to vector<1x64xf32>
    %37 = vector.shape_cast %36 : vector<1x64xf32> to vector<1x1x1x64xf32>
    %38 = vector.broadcast %37 : vector<1x1x1x64xf32> to vector<2x8x8x64xf32>
    %39 = arith.mulf %34, %38 : vector<2x8x8x64xf32>
    %40 = arith.addf %32, %39 : vector<2x8x8x64xf32>
    %c0_27 = arith.constant 0 : index
    %c9_28 = arith.constant 9 : index
    %c1_29 = arith.constant 1 : index
    %c0_30 = arith.constant 0 : index
    %41 = vector.load %arg1[%c0_27, %c9_28, %c1_29, %c0_30] : memref<2x36x16x64xbf16, #tpu.memory_space<vmem>>, vector<2x8x8x64xbf16>
    %42 = arith.extf %41 : vector<2x8x8x64xbf16> to vector<2x8x8x64xf32>
    %c5 = arith.constant 5 : index
    %c0_31 = arith.constant 0 : index
    %c0_32 = arith.constant 0 : index
    %43 = vector.load %arg2[%c5, %c0_31, %c0_32] : memref<9x1x64xf32, #tpu.memory_space<vmem>>, vector<1x1x64xf32>
    %44 = vector.shape_cast %43 : vector<1x1x64xf32> to vector<1x64xf32>
    %45 = vector.shape_cast %44 : vector<1x64xf32> to vector<1x1x1x64xf32>
    %46 = vector.broadcast %45 : vector<1x1x1x64xf32> to vector<2x8x8x64xf32>
    %47 = arith.mulf %42, %46 : vector<2x8x8x64xf32>
    %48 = arith.addf %40, %47 : vector<2x8x8x64xf32>
    %c0_33 = arith.constant 0 : index
    %c28 = arith.constant 28 : index
    %c0_34 = arith.constant 0 : index
    %c0_35 = arith.constant 0 : index
    %49 = vector.load %arg1[%c0_33, %c28, %c0_34, %c0_35] : memref<2x36x16x64xbf16, #tpu.memory_space<vmem>>, vector<2x8x8x64xbf16>
    %50 = arith.extf %49 : vector<2x8x8x64xbf16> to vector<2x8x8x64xf32>
    %c6 = arith.constant 6 : index
    %c0_36 = arith.constant 0 : index
    %c0_37 = arith.constant 0 : index
    %51 = vector.load %arg2[%c6, %c0_36, %c0_37] : memref<9x1x64xf32, #tpu.memory_space<vmem>>, vector<1x1x64xf32>
    %52 = vector.shape_cast %51 : vector<1x1x64xf32> to vector<1x64xf32>
    %53 = vector.shape_cast %52 : vector<1x64xf32> to vector<1x1x1x64xf32>
    %54 = vector.broadcast %53 : vector<1x1x1x64xf32> to vector<2x8x8x64xf32>
    %55 = arith.mulf %50, %54 : vector<2x8x8x64xf32>
    %56 = arith.addf %48, %55 : vector<2x8x8x64xf32>
    %c0_38 = arith.constant 0 : index
    %c19 = arith.constant 19 : index
    %c0_39 = arith.constant 0 : index
    %c0_40 = arith.constant 0 : index
    %57 = vector.load %arg1[%c0_38, %c19, %c0_39, %c0_40] : memref<2x36x16x64xbf16, #tpu.memory_space<vmem>>, vector<2x8x8x64xbf16>
    %58 = arith.extf %57 : vector<2x8x8x64xbf16> to vector<2x8x8x64xf32>
    %c7 = arith.constant 7 : index
    %c0_41 = arith.constant 0 : index
    %c0_42 = arith.constant 0 : index
    %59 = vector.load %arg2[%c7, %c0_41, %c0_42] : memref<9x1x64xf32, #tpu.memory_space<vmem>>, vector<1x1x64xf32>
    %60 = vector.shape_cast %59 : vector<1x1x64xf32> to vector<1x64xf32>
    %61 = vector.shape_cast %60 : vector<1x64xf32> to vector<1x1x1x64xf32>
    %62 = vector.broadcast %61 : vector<1x1x1x64xf32> to vector<2x8x8x64xf32>
    %63 = arith.mulf %58, %62 : vector<2x8x8x64xf32>
    %64 = arith.addf %56, %63 : vector<2x8x8x64xf32>
    %c0_43 = arith.constant 0 : index
    %c28_44 = arith.constant 28 : index
    %c1_45 = arith.constant 1 : index
    %c0_46 = arith.constant 0 : index
    %65 = vector.load %arg1[%c0_43, %c28_44, %c1_45, %c0_46] : memref<2x36x16x64xbf16, #tpu.memory_space<vmem>>, vector<2x8x8x64xbf16>
    %66 = arith.extf %65 : vector<2x8x8x64xbf16> to vector<2x8x8x64xf32>
    %c8 = arith.constant 8 : index
    %c0_47 = arith.constant 0 : index
    %c0_48 = arith.constant 0 : index
    %67 = vector.load %arg2[%c8, %c0_47, %c0_48] : memref<9x1x64xf32, #tpu.memory_space<vmem>>, vector<1x1x64xf32>
    %68 = vector.shape_cast %67 : vector<1x1x64xf32> to vector<1x64xf32>
    %69 = vector.shape_cast %68 : vector<1x64xf32> to vector<1x1x1x64xf32>
    %70 = vector.broadcast %69 : vector<1x1x1x64xf32> to vector<2x8x8x64xf32>
    %71 = arith.mulf %66, %70 : vector<2x8x8x64xf32>
    %72 = arith.addf %64, %71 : vector<2x8x8x64xf32>
    %c0_49 = arith.constant 0 : index
    %c0_50 = arith.constant 0 : index
    %73 = vector.load %arg3[%c0_49, %c0_50] : memref<1x64xf32, #tpu.memory_space<vmem>>, vector<1x64xf32>
    %74 = vector.shape_cast %73 : vector<1x64xf32> to vector<1x1x1x64xf32>
    %75 = vector.broadcast %74 : vector<1x1x1x64xf32> to vector<2x8x8x64xf32>
    %76 = arith.addf %72, %75 : vector<2x8x8x64xf32>
    %77 = arith.negf %76 : vector<2x8x8x64xf32>
    %78 = math.exp %77 : vector<2x8x8x64xf32>
    %cst_51 = arith.constant 1.000000e+00 : f32
    %79 = vector.broadcast %cst_51 : f32 to vector<2x8x8x64xf32>
    %80 = arith.addf %79, %78 : vector<2x8x8x64xf32>
    %81 = arith.divf %79, %80 : vector<2x8x8x64xf32>
    %82 = arith.mulf %76, %81 : vector<2x8x8x64xf32>
    %83 = vector.shape_cast %82 : vector<2x8x8x64xf32> to vector<2x64x64xf32>
    %cst_52 = arith.constant dense<0.000000e+00> : vector<2x64xf32>
    %84 = vector.multi_reduction <add>, %83, %cst_52 [1] : vector<2x64x64xf32> to vector<2x64xf32>
    %cst_53 = arith.constant 1.562500e-02 : f32
    %85 = vector.broadcast %cst_53 : f32 to vector<2x64xf32>
    %86 = arith.mulf %84, %85 : vector<2x64xf32>
    %87 = arith.truncf %86 : vector<2x64xf32> to vector<2x64xbf16>
    %c0_54 = arith.constant 0 : index
    %c0_55 = arith.constant 0 : index
    %88 = vector.load %arg4[%c0_54, %c0_55] : memref<64x4xbf16, #tpu.memory_space<vmem>>, vector<64x4xbf16>
    %cst_56 = arith.constant dense<0.000000e+00> : vector<2x4xf32>
    %89 = tpu.matmul %87, %88, %cst_56 {dimension_numbers = #tpu.dot_dimension_numbers<[1], [0], [0], [1], [0, 0, 1, 1], [], []>} : vector<2x64xbf16>, vector<64x4xbf16>, vector<2x4xf32> -> vector<2x4xf32>
    %c0_57 = arith.constant 0 : index
    %c0_58 = arith.constant 0 : index
    %90 = vector.load %arg5[%c0_57, %c0_58] : memref<1x4xf32, #tpu.memory_space<vmem>>, vector<1x4xf32>
    %91 = vector.broadcast %90 : vector<1x4xf32> to vector<2x4xf32>
    %92 = arith.addf %89, %91 : vector<2x4xf32>
    %93 = arith.negf %92 : vector<2x4xf32>
    %94 = math.exp %93 : vector<2x4xf32>
    %cst_59 = arith.constant 1.000000e+00 : f32
    %95 = vector.broadcast %cst_59 : f32 to vector<2x4xf32>
    %96 = arith.addf %95, %94 : vector<2x4xf32>
    %97 = arith.divf %95, %96 : vector<2x4xf32>
    %98 = arith.mulf %92, %97 : vector<2x4xf32>
    %99 = arith.truncf %98 : vector<2x4xf32> to vector<2x4xbf16>
    %c0_60 = arith.constant 0 : index
    %c0_61 = arith.constant 0 : index
    %100 = vector.load %arg6[%c0_60, %c0_61] : memref<4x64xbf16, #tpu.memory_space<vmem>>, vector<4x64xbf16>
    %cst_62 = arith.constant dense<0.000000e+00> : vector<2x64xf32>
    %101 = tpu.matmul %99, %100, %cst_62 {dimension_numbers = #tpu.dot_dimension_numbers<[1], [0], [0], [1], [0, 0, 1, 1], [], []>} : vector<2x4xbf16>, vector<4x64xbf16>, vector<2x64xf32> -> vector<2x64xf32>
    %c0_63 = arith.constant 0 : index
    %c0_64 = arith.constant 0 : index
    %102 = vector.load %arg7[%c0_63, %c0_64] : memref<1x64xf32, #tpu.memory_space<vmem>>, vector<1x64xf32>
    %103 = vector.broadcast %102 : vector<1x64xf32> to vector<2x64xf32>
    %104 = arith.addf %101, %103 : vector<2x64xf32>
    %105 = arith.negf %104 : vector<2x64xf32>
    %106 = math.exp %105 : vector<2x64xf32>
    %cst_65 = arith.constant 1.000000e+00 : f32
    %107 = vector.broadcast %cst_65 : f32 to vector<2x64xf32>
    %108 = arith.addf %107, %106 : vector<2x64xf32>
    %109 = arith.divf %107, %108 : vector<2x64xf32>
    %110 = vector.shape_cast %109 : vector<2x64xf32> to vector<2x1x64xf32>
    %111 = vector.broadcast %110 : vector<2x1x64xf32> to vector<2x64x64xf32>
    %112 = arith.mulf %83, %111 : vector<2x64x64xf32>
    %113 = vector.shape_cast %112 : vector<2x64x64xf32> to vector<128x64xf32>
    %114 = arith.truncf %113 : vector<128x64xf32> to vector<128x64xbf16>
    %c0_66 = arith.constant 0 : index
    %c0_67 = arith.constant 0 : index
    %115 = vector.load %arg8[%c0_66, %c0_67] : memref<64x24xbf16, #tpu.memory_space<vmem>>, vector<64x24xbf16>
    %cst_68 = arith.constant dense<0.000000e+00> : vector<128x24xf32>
    %116 = tpu.matmul %114, %115, %cst_68 {dimension_numbers = #tpu.dot_dimension_numbers<[1], [0], [0], [1], [0, 0, 1, 1], [], []>} : vector<128x64xbf16>, vector<64x24xbf16>, vector<128x24xf32> -> vector<128x24xf32>
    %c0_69 = arith.constant 0 : index
    %c0_70 = arith.constant 0 : index
    %117 = vector.load %arg9[%c0_69, %c0_70] : memref<1x24xf32, #tpu.memory_space<vmem>>, vector<1x24xf32>
    %118 = vector.broadcast %117 : vector<1x24xf32> to vector<128x24xf32>
    %119 = arith.addf %116, %118 : vector<128x24xf32>
    %120 = arith.truncf %119 : vector<128x24xf32> to vector<128x24xbf16>
    %c0_71 = arith.constant 0 : index
    %c0_72 = arith.constant 0 : index
    %121 = vector.load %arg10[%c0_71, %c0_72] : memref<24x64xbf16, #tpu.memory_space<vmem>>, vector<24x64xbf16>
    %cst_73 = arith.constant dense<0.000000e+00> : vector<128x64xf32>
    %122 = tpu.matmul %120, %121, %cst_73 {dimension_numbers = #tpu.dot_dimension_numbers<[1], [0], [0], [1], [0, 0, 1, 1], [], []>} : vector<128x24xbf16>, vector<24x64xbf16>, vector<128x64xf32> -> vector<128x64xf32>
    %c0_74 = arith.constant 0 : index
    %c0_75 = arith.constant 0 : index
    %123 = vector.load %arg11[%c0_74, %c0_75] : memref<1x64xf32, #tpu.memory_space<vmem>>, vector<1x64xf32>
    %124 = vector.broadcast %123 : vector<1x64xf32> to vector<128x64xf32>
    %125 = arith.addf %122, %124 : vector<128x64xf32>
    %126 = arith.negf %125 : vector<128x64xf32>
    %127 = math.exp %126 : vector<128x64xf32>
    %cst_76 = arith.constant 1.000000e+00 : f32
    %128 = vector.broadcast %cst_76 : f32 to vector<128x64xf32>
    %129 = arith.addf %128, %127 : vector<128x64xf32>
    %130 = arith.divf %128, %129 : vector<128x64xf32>
    %131 = arith.mulf %125, %130 : vector<128x64xf32>
    %132 = vector.shape_cast %131 : vector<128x64xf32> to vector<2x64x64xf32>
    %cst_77 = arith.constant dense<0.000000e+00> : vector<2x64xf32>
    %133 = vector.multi_reduction <add>, %132, %cst_77 [1] : vector<2x64x64xf32> to vector<2x64xf32>
    %cst_78 = arith.constant 1.562500e-02 : f32
    %134 = vector.broadcast %cst_78 : f32 to vector<2x64xf32>
    %135 = arith.mulf %133, %134 : vector<2x64xf32>
    %c0_79 = arith.constant 0 : index
    %c0_80 = arith.constant 0 : index
    %136 = vector.load %arg12[%c0_79, %c0_80] : memref<2x64xf32, #tpu.memory_space<vmem>>, vector<2x64xf32>
    tpu.vector_store %arg12[%c0_79, %c0_80], %135 {strides = array<i32>} : memref<2x64xf32, #tpu.memory_space<vmem>>, vector<2x64xf32>,
    return
  }
  func.func @transform_0(%arg0: i32) -> (i32, i32, i32, i32) {
    %c0_i32 = arith.constant 0 : i32
    %c0_i32_0 = arith.constant 0 : i32
    %c0_i32_1 = arith.constant 0 : i32
    %c0_i32_2 = arith.constant 0 : i32
    return %arg0, %c0_i32, %c0_i32_0, %c0_i32_1 : i32, i32, i32, i32
  }
  func.func @transform_1(%arg0: i32) -> (i32, i32, i32) {
    %c0_i32 = arith.constant 0 : i32
    %c0_i32_0 = arith.constant 0 : i32
    %c0_i32_1 = arith.constant 0 : i32
    %c0_i32_2 = arith.constant 0 : i32
    return %c0_i32, %c0_i32_0, %c0_i32_1 : i32, i32, i32
  }
  func.func @transform_2(%arg0: i32) -> (i32, i32) {
    %c0_i32 = arith.constant 0 : i32
    %c0_i32_0 = arith.constant 0 : i32
    %c0_i32_1 = arith.constant 0 : i32
    return %c0_i32, %c0_i32_0 : i32, i32
  }
  func.func @transform_3(%arg0: i32) -> (i32, i32) {
    %c0_i32 = arith.constant 0 : i32
    %c0_i32_0 = arith.constant 0 : i32
    %c0_i32_1 = arith.constant 0 : i32
    return %c0_i32, %c0_i32_0 : i32, i32
  }
  func.func @transform_4(%arg0: i32) -> (i32, i32) {
    %c0_i32 = arith.constant 0 : i32
    %c0_i32_0 = arith.constant 0 : i32
    %c0_i32_1 = arith.constant 0 : i32
    return %c0_i32, %c0_i32_0 : i32, i32
  }
  func.func @transform_5(%arg0: i32) -> (i32, i32) {
    %c0_i32 = arith.constant 0 : i32
    %c0_i32_0 = arith.constant 0 : i32
    %c0_i32_1 = arith.constant 0 : i32
    return %c0_i32, %c0_i32_0 : i32, i32
  }
  func.func @transform_6(%arg0: i32) -> (i32, i32) {
    %c0_i32 = arith.constant 0 : i32
    %c0_i32_0 = arith.constant 0 : i32
    %c0_i32_1 = arith.constant 0 : i32
    return %c0_i32, %c0_i32_0 : i32, i32
  }
  func.func @transform_7(%arg0: i32) -> (i32, i32) {
    %c0_i32 = arith.constant 0 : i32
    %c0_i32_0 = arith.constant 0 : i32
    %c0_i32_1 = arith.constant 0 : i32
    return %c0_i32, %c0_i32_0 : i32, i32
  }
  func.func @transform_8(%arg0: i32) -> (i32, i32) {
    %c0_i32 = arith.constant 0 : i32
    %c0_i32_0 = arith.constant 0 : i32
    %c0_i32_1 = arith.constant 0 : i32
    return %c0_i32, %c0_i32_0 : i32, i32
  }
  func.func @transform_9(%arg0: i32) -> (i32, i32) {
    %c0_i32 = arith.constant 0 : i32
    %c0_i32_0 = arith.constant 0 : i32
    %c0_i32_1 = arith.constant 0 : i32
    return %c0_i32, %c0_i32_0 : i32, i32
  }
  func.func @transform_10(%arg0: i32) -> (i32, i32) {
    %c0_i32 = arith.constant 0 : i32
    %c0_i32_0 = arith.constant 0 : i32
    %c0_i32_1 = arith.constant 0 : i32
    return %c0_i32, %c0_i32_0 : i32, i32
  }
  func.func @transform_11(%arg0: i32) -> (i32, i32) {
    %c0_i32 = arith.constant 0 : i32
    %c0_i32_0 = arith.constant 0 : i32
    return %arg0, %c0_i32 : i32, i32
  }
}

module attributes {stable_mosaic.version = 11 : i64} {
  func.func @_fc_ce_kernel(%arg0: memref<2x64xf32, #tpu.memory_space<vmem>>, %arg1: memref<64x10xbf16, #tpu.memory_space<vmem>>, %arg2: memref<1x10xf32, #tpu.memory_space<vmem>>, %arg3: memref<2x10xf32, #tpu.memory_space<vmem>>, %arg4: memref<2x10xf32, #tpu.memory_space<vmem>>, %arg5: memref<1x1xf32, #tpu.memory_space<vmem>>) attributes {dimension_semantics = [], scalar_prefetch = 0 : i64, scratch_operands = 0 : i64, tpu.core_type = #tpu.core_type<tc>} {
    %c0 = arith.constant 0 : index
    %c0_0 = arith.constant 0 : index
    %0 = vector.load %arg0[%c0, %c0_0] : memref<2x64xf32, #tpu.memory_space<vmem>>, vector<2x64xf32>
    %1 = arith.truncf %0 : vector<2x64xf32> to vector<2x64xbf16>
    %c0_1 = arith.constant 0 : index
    %c0_2 = arith.constant 0 : index
    %2 = vector.load %arg1[%c0_1, %c0_2] : memref<64x10xbf16, #tpu.memory_space<vmem>>, vector<64x10xbf16>
    %cst = arith.constant dense<0.000000e+00> : vector<2x10xf32>
    %3 = tpu.matmul %1, %2, %cst {dimension_numbers = #tpu.dot_dimension_numbers<[1], [0], [0], [1], [0, 0, 1, 1], [], []>} : vector<2x64xbf16>, vector<64x10xbf16>, vector<2x10xf32> -> vector<2x10xf32>
    %c0_3 = arith.constant 0 : index
    %c0_4 = arith.constant 0 : index
    %4 = vector.load %arg2[%c0_3, %c0_4] : memref<1x10xf32, #tpu.memory_space<vmem>>, vector<1x10xf32>
    %5 = vector.broadcast %4 : vector<1x10xf32> to vector<2x10xf32>
    %6 = arith.addf %3, %5 : vector<2x10xf32>
    %cst_5 = arith.constant dense<0xFF800000> : vector<2xf32>
    %7 = vector.multi_reduction <maximumf>, %6, %cst_5 [1] : vector<2x10xf32> to vector<2xf32>
    %8 = vector.shape_cast %7 : vector<2xf32> to vector<2x1xf32>
    %9 = vector.broadcast %8 : vector<2x1xf32> to vector<2x10xf32>
    %10 = arith.subf %6, %9 : vector<2x10xf32>
    %11 = math.exp %10 : vector<2x10xf32>
    %cst_6 = arith.constant dense<0.000000e+00> : vector<2xf32>
    %12 = vector.multi_reduction <add>, %11, %cst_6 [1] : vector<2x10xf32> to vector<2xf32>
    %13 = vector.shape_cast %12 : vector<2xf32> to vector<2x1xf32>
    %14 = math.log %13 : vector<2x1xf32>
    %15 = arith.addf %14, %8 : vector<2x1xf32>
    %c0_7 = arith.constant 0 : index
    %c0_8 = arith.constant 0 : index
    %16 = vector.load %arg3[%c0_7, %c0_8] : memref<2x10xf32, #tpu.memory_space<vmem>>, vector<2x10xf32>
    %17 = vector.broadcast %15 : vector<2x1xf32> to vector<2x10xf32>
    %18 = arith.subf %6, %17 : vector<2x10xf32>
    %19 = arith.mulf %16, %18 : vector<2x10xf32>
    %cst_9 = arith.constant dense<0.000000e+00> : vector<2xf32>
    %20 = vector.multi_reduction <add>, %19, %cst_9 [1] : vector<2x10xf32> to vector<2xf32>
    %21 = vector.shape_cast %20 : vector<2xf32> to vector<2x1xf32>
    %cst_10 = arith.constant 0.000000e+00 : f32
    %22 = vector.broadcast %cst_10 : f32 to vector<2x1xf32>
    %23 = arith.subf %22, %21 : vector<2x1xf32>
    %c0_11 = arith.constant 0 : index
    %c0_12 = arith.constant 0 : index
    %24 = vector.load %arg4[%c0_11, %c0_12] : memref<2x10xf32, #tpu.memory_space<vmem>>, vector<2x10xf32>
    tpu.vector_store %arg4[%c0_11, %c0_12], %6 {strides = array<i32>} : memref<2x10xf32, #tpu.memory_space<vmem>>, vector<2x10xf32>,
    %cst_13 = arith.constant dense<0.000000e+00> : vector<1xf32>
    %25 = vector.multi_reduction <add>, %23, %cst_13 [0] : vector<2x1xf32> to vector<1xf32>
    %26 = vector.shape_cast %25 : vector<1xf32> to vector<1x1xf32>
    %cst_14 = arith.constant 5.000000e-01 : f32
    %27 = vector.broadcast %cst_14 : f32 to vector<1x1xf32>
    %28 = arith.mulf %26, %27 : vector<1x1xf32>
    %c0_15 = arith.constant 0 : index
    %c0_16 = arith.constant 0 : index
    %29 = vector.load %arg5[%c0_15, %c0_16] : memref<1x1xf32, #tpu.memory_space<vmem>>, vector<1x1xf32>
    tpu.vector_store %arg5[%c0_15, %c0_16], %28 {strides = array<i32>} : memref<1x1xf32, #tpu.memory_space<vmem>>, vector<1x1xf32>,
    return
  }
}

</mosaic_0001>

<bundles_post_ra>
// kernel: efficientnet_backbone_forward.5
= control target key start
LH: loop header
LB: loop body
LE: loop exit
PB: predicated region body
PF: predicated region fallthrough
CT: control target
= control target key end

     0   :  { %11 = vsyncpa [#allocation3], 0  ;;  %v250_v1 = vmov 0.0   ;;  %vm251_vm0 = vmmov 0   ;;  %s333_s0 = inlined_call_operand.vmem [shape: f32[2,64], index: 0, kind: input, shape index: {}]   ;;  %s334_s1 = inlined_call_operand.vmem [shape: bf16[64,10], index: 1, kind: input, shape index: {}]   ;;  %s335_s2 = inlined_call_operand.vmem [shape: f32[1,10], index: 2, kind: input, shape index: {}]   ;;  %s336_s3 = inlined_call_operand.vmem [shape: f32[2,10], index: 3, kind: input, shape index: {}]   ;;  %s337_s4 = inlined_call_operand.hbm [shape: f32[2,10], index: 4, kind: output, shape index: {0}]   ;;  %s338_s5 = inlined_call_operand.hbm [shape: f32[1,1], index: 5, kind: output, shape index: {1}]  }
   0x1   :  { %v194_v0 = vld [vmem:[%s334_s1] sm:$0xff]   ;;  %178 = vmatprep.subr.bf16.mxu0 %v250_v1  ;;  %v195_v2 = vld [vmem:[%s334_s1 + $0x8] sm:$0xff]   ;;  %186 = vmatprep.mubr.msk.bf16.mxu0 %vm251_vm0, %v250_v1 }
   0x2   :  { %179 = vmatpush3.bf16.msra.mxu0 %v194_v0 }
   0x3   :  { %180 = vmatprep.subr.bf16.mxu0 %v250_v1 }
   0x4   :  { %12 = vsyncpa [#allocation5], 0  ;;  %v196_v3 = vld [vmem:[%s334_s1 + $0x10] sm:$0xff]   ;;  %v197_v4 = vld [vmem:[%s334_s1 + $0x18] sm:$0xff]   ;;  %vm63_vm1 = vcmask 523264   ;;  %vm107_vm2 = vcmask 74752  }
   0x5   :  { %v22_v5 = vld [vmem:[%s333_s0] sm:$0x3] }
   0x6   :  { %181 = vmatpush3.bf16.msra.mxu0 %v195_v2  ;;  %v23_v6 = vpack.c.bf16 %v22_v5, %v22_v5  ;;  %v167_v7 = vld [vmem:[%s335_s2] ss:$0 sm:$0xff]  ;;  %s252_s2 = smov [#allocation2]  }
   0x7   :  { %182 = vmatprep.subr.bf16.mxu0 %v250_v1  ;;  %v120_v23 = vld [vmem:[%s336_s3] sm:$0x3]  ;;  %s145_s30 = sshll.u32 %s252_s2, 4  ;;  %s146_s30 = int_to_ptr.vmem [resolvable:$true] %s145_s30 }
   0x8   :  { %s202_s6 = scalar_lea.vmem %s146_s30, 32  ;;  %p207_p1 = scmp.lt.s32.totalorder %s146_s30, %s146_s30 }
   0x9   :  { %p203_p0 = scmp.ne.s32.totalorder %s146_s30, %s202_s6  ;;  %p208_p2 = scmp.lt.s32.totalorder %s202_s6, %s202_s6 }
   0xa   :  { %183 = vmatpush3.bf16.msra.mxu0 %v196_v3 }
   0xb   :  { %184 = vmatprep.subr.bf16.mxu0 %v250_v1  ;;  %p209_p3 = por %p208_p2, %p207_p1 }
   0xd   :  { %p210_p4 = pnand %p209_p3, %p203_p0 }
   0xe   :  { %185 = vmatpush3.bf16.msra.mxu0 %v197_v4 }
  0x11   :  { %187 = vmatmul.mubr.msk.bf16.vlgmr.msra.gmra.mrb[0].mxu0 %vm63_vm1, %v23_v6 }
  0xe4   :  { %v101_v8 = vpop.f32.mrb[0].mxu0 }
  0xe5   :  { %v102_v9 = vadd.f32 %v167_v7, %v101_v8  ;;  %v188_v10 = vpop.f32.mrb[1].mxu0 }
  0xe6   :  { %v104_v11 = vpop.f32.mrb[2].mxu0 }
  0xe7   :  { %v189_v12 = vpop.f32.mrb[3].mxu0  ;;  %v108_v13 = vsel %vm107_vm2, %v102_v9, -inf  ;;  %127 = vst.msk [vmem:[#allocation2] sm:$0x3] %vm107_vm2, %v102_v9 }
  0xe8   :  { %109 = vmax.xlane.f32.xlu0 %v108_v13 }
 0x175   :  { %v110_v14 = vpop.xlane.xlu0 %109 }
 0x176   :  { %v111_v15 = vsub.f32 %v102_v9, %v110_v14 }
 0x178   :  { %v112_v16 = vmul.f32 1.442695, %v111_v15 }
 0x17a   :  { %198 = vpow2.f32 %v112_v16 }
 0x184   :  { %v199_v17 = vpop.eup %198 }
 0x185   :  { %v114_v18 = vsel %vm107_vm2, %v199_v17, 0.0 }
 0x186   :  { %115 = vadd.xlane.f32.xlu0 %v114_v18 }
 0x213   :  { %v116_v19 = vpop.xlane.xlu0 %115 }
 0x214   :  { %200 = vlog2.f32 %v116_v19 }
 0x21e   :  { %v201_v20 = vpop.eup %200 }
 0x21f   :  { %v118_v21 = vmul.f32 0.6931472, %v201_v20 }
 0x221   :  { %v119_v22 = vadd.f32 %v118_v21, %v110_v14 }
 0x223   :  { %v121_v24 = vsub.f32 %v102_v9, %v119_v22 }
 0x225   :  { %v122_v25 = vmul.f32 %v121_v24, %v120_v23 }
 0x227   :  { %v123_v26 = vsel %vm107_vm2, %v122_v25, 0.0 }
 0x228   :  { %124 = vadd.xlane.f32.xlu1 %v123_v26 }
 0x229   :  { %213 = shalt.err (!%p210_p4)
}
 0x22a   :  { %s214_s9 = scalar_lea.hbm %s337_s4, 32 }
 0x22b   :  { %p215_p5 = scmp.ne.s32.totalorder %s337_s4, %s214_s9  ;;  %p218_p6 = scmp.lt.u32.totalorder %s214_s9, %s337_s4 }
 0x22d   :  { %p220_p7 = pnand %p218_p6, %p215_p5 }
 0x22f   :  { %223 = shalt.err (!%p220_p7)
}
 0x230   :  { %148 = dma.vmem_to_hbm [thread:$0]  %s146_s30, 32, %s337_s4, [#allocation3]   ;;  %vm128_vm3 = vcmask 1041408   ;;  %vm137_vm4 = vcmask 0  }
 0x231   :  { %s253_s15 = smov [#allocation4]  }
 0x232   :  { %s155_s16 = sshll.u32 %s253_s15, 4  ;;  %s156_s16 = int_to_ptr.vmem [resolvable:$true] %s155_s16 }
 0x233   :  { %s224_s17 = scalar_lea.vmem %s156_s16, 16  ;;  %s228_s18 = scalar_lea.vmem %s156_s16, 32 }
 0x234   :  { %p225_p8 = scmp.ne.s32.totalorder %s156_s16, %s224_s17  ;;  %p229_p9 = scmp.lt.s32.totalorder %s156_s16, %s156_s16 }
 0x235   :  { %p230_p10 = scmp.lt.s32.totalorder %s228_s18, %s224_s17 }
 0x237   :  { %p231_p11 = por %p230_p10, %p229_p9 }
 0x239   :  { %p232_p12 = pnand %p231_p11, %p225_p8 }
 0x2b5   :  { %v125_v27 = vpop.xlane.xlu1 %124 }
 0x2b6   :  { %v126_v28 = vsub.f32 0.0, %v125_v27 }
 0x2b8   :  { %v129_v29 = vsel %vm128_vm3, %v126_v28, 0.0 }
 0x2b9   :  { %v130_v30 = vrot.slane %v129_v29, 4 }
 0x2bb   :  { %v131_v31 = vadd.f32 %v130_v30, %v129_v29 }
 0x2bd   :  { %v132_v32 = vrot.slane %v131_v31, 2 }
 0x2bf   :  { %v133_v33 = vadd.f32 %v132_v32, %v131_v31 }
 0x2c1   :  { %v134_v34 = vrot.slane %v133_v33, 1 }
 0x2c3   :  { %v135_v35 = vadd.f32 %v134_v34, %v133_v33 }
 0x2c5   :  { %v136_v36 = vmul.f32 0.5, %v135_v35 }
 0x2c7   :  { %138 = vst.msk [vmem:[#allocation4] sm:$0x1] %vm137_vm4, %v136_v36 }
 0x2c8   :  { %235 = shalt.err (!%p232_p12)
}
 0x2c9   :  { %s236_s20 = scalar_lea.hbm %s338_s5, 16 }
 0x2ca   :  { %p237_p13 = scmp.ne.s32.totalorder %s338_s5, %s236_s20  ;;  %p240_p0 = scmp.lt.u32.totalorder %s236_s20, %s338_s5 }
 0x2cc   :  { %p242_p1 = pnand %p240_p0, %p237_p13 }
 0x2ce   :  { %245 = shalt.err (!%p242_p1)
}
 0x2cf   :  { %158 = dma.vmem_to_hbm [thread:$0]  %s156_s16, 16, %s338_s5, [#allocation5]  }
 0x2d0   :  { %246 = dma.done.wait [#allocation3], 32  }
 0x2d1   :  { %247 = vsyncadd [#allocation3], 4294967264 }
 0x2d2   :  { %248 = dma.done.wait [#allocation5], 16  }
 0x2d3   :  { %249 = vsyncadd [#allocation5], 4294967280 }
 0x2d4   :  { %165 = vsyncpa [#allocation3], 1 }
 0x2d5   :  { %166 = vsyncpa [#allocation5], 1 }

// kernel: efficientnet_backbone_forward.4
= control target key start
LH: loop header
LB: loop body
LE: loop exit
PB: predicated region body
PF: predicated region fallthrough
CT: control target
= control target key end

     0   :  { %v2358_v0 = vmov 0.0   ;;  %vm2359_vm0 = vmmov 0   ;;  %vm288_vm1 = vcmask 1046528   ;;  %vm1163_vm2 = vcmask 523264   ;;  %s3588_s3 = inlined_call_operand.vmem [shape: bf16[64,4], index: 3, kind: input, shape index: {}]   ;;  %s3589_s0 = inlined_call_operand.vmem [shape: bf16[2,36,16,64], index: 0, kind: input, shape index: {}]   ;;  %s3590_s1 = inlined_call_operand.vmem [shape: f32[9,1,64], index: 1, kind: input, shape index: {}]   ;;  %s3591_s2 = inlined_call_operand.vmem [shape: f32[1,64], index: 2, kind: input, shape index: {}]   ;;  %s3592_s5 = inlined_call_operand.vmem [shape: bf16[4,64], index: 5, kind: input, shape index: {}]   ;;  %s3593_s4 = inlined_call_operand.vmem [shape: f32[1,4], index: 4, kind: input, shape index: {}]   ;;  %s3594_s7 = inlined_call_operand.vmem [shape: bf16[64,24], index: 7, kind: input, shape index: {}]   ;;  %s3595_s6 = inlined_call_operand.vmem [shape: f32[1,64], index: 6, kind: input, shape index: {}]   ;;  %s3596_s9 = inlined_call_operand.vmem [shape: bf16[24,64], index: 9, kind: input, shape index: {}]   ;;  %s3597_s8 = inlined_call_operand.vmem [shape: f32[1,24], index: 8, kind: input, shape index: {}]   ;;  %s3598_s10 = inlined_call_operand.vmem [shape: f32[1,64], index: 10, kind: input, shape index: {}]   ;;  %s3599_s11 = inlined_call_operand.vmem [shape: f32[2,64], index: 11, kind: output, shape index: {}]  }
   0x1   :  { %2146 = vmatprep.subr.bf16.mxu0 %v2358_v0  ;;  %v2212_v1 = vld [vmem:[%s3588_s3] sm:$0xff]   ;;  %2154 = vmatprep.mubr.msk.bf16.mxu0 %vm2359_vm0, %v2358_v0  ;;  %v2213_v2 = vld [vmem:[%s3588_s3 + $0x8] sm:$0xff]   ;;  %v2214_v3 = vld [vmem:[%s3588_s3 + $0x10] sm:$0xff]   ;;  %vm1229_vm3 = vcmask 1041409   ;;  %vm1319_vm4 = vcmask 1041408   ;;  %vm1315_vm5 = vcmask 31744  }
   0x2   :  { %2158 = vmatprep.subr.bf16.mxu1 %v2358_v0  ;;  %2160 = vmatprep.mubr.msk.bf16.mxu1 %vm2359_vm0, %v2358_v0  ;;  %v2433_v4 = vld [vmem:[%s3589_s0 + $0xd8] ss:$8 sps:$4 sm:$0xff]   ;;  %v2438_v5 = vld [vmem:[%s3589_s0 + $0xe8] ss:$8 sps:$4 sm:$0xff]   ;;  %vm1638_vm6 = vcmask 1043456   ;;  %vm1613_vm7 = vcmask 195584  }
   0x3   :  { %2147 = vmatpush3.bf16.msra.mxu0 %v2212_v1  ;;  %v2443_v6 = vld [vmem:[%s3589_s0 + $0xf8] ss:$8 sps:$4 sm:$0xff]   ;;  %v2448_v7 = vld [vmem:[%s3589_s0 + $0x108] ss:$8 sps:$4 sm:$0xff]   ;;  %v56_v12 = vunpack.c.l.bf16 %v2433_v4  ;;  %v57_v13 = vunpack.c.h.bf16 %v2433_v4  ;;  %v58_v14 = vunpack.c.l.bf16 %v2438_v5  ;;  %v59_v15 = vunpack.c.h.bf16 %v2438_v5 }
   0x4   :  { %2148 = vmatprep.subr.bf16.mxu0 %v2358_v0  ;;  %v2453_v8 = vld [vmem:[%s3589_s0 + $0x1f8] ss:$8 sps:$4 sm:$0xff]   ;;  %v2458_v9 = vld [vmem:[%s3589_s0 + $0x208] ss:$8 sps:$4 sm:$0xff]   ;;  %v60_v17 = vunpack.c.l.bf16 %v2443_v6  ;;  %v3610_v18 = vunpack.c.h.bf16 %v2443_v6  ;;  %v3609_v19 = vunpack.c.l.bf16 %v2448_v7  ;;  %v3608_v20 = vunpack.c.h.bf16 %v2448_v7 }
   0x5   :  { %v2463_v10 = vld [vmem:[%s3589_s0 + $0x218] ss:$8 sps:$4 sm:$0xff]   ;;  %v2468_v11 = vld [vmem:[%s3589_s0 + $0x228] ss:$8 sps:$4 sm:$0xff]   ;;  %v3607_v22 = vunpack.c.l.bf16 %v2453_v8  ;;  %v3606_v23 = vunpack.c.h.bf16 %v2453_v8  ;;  %v3605_v24 = vunpack.c.l.bf16 %v2458_v9  ;;  %v3604_v25 = vunpack.c.h.bf16 %v2458_v9 }
   0x6   :  { %v2215_v16 = vld [vmem:[%s3588_s3 + $0x18] sm:$0xff]   ;;  %v1921_v21 = vld [vmem:[%s3590_s1] ss:$0 sm:$0xff]  ;;  %v3603_v26 = vunpack.c.l.bf16 %v2463_v10  ;;  %v3602_v27 = vunpack.c.h.bf16 %v2463_v10  ;;  %v3601_v28 = vunpack.c.l.bf16 %v2468_v11  ;;  %v3600_v29 = vunpack.c.h.bf16 %v2468_v11  ;;  %v1939_v62 = vld [vmem:[%s3590_s1 + $0x1] ss:$0 sm:$0xff] }
   0x7   :  { %2149 = vmatpush3.bf16.msra.mxu0 %v2213_v2  ;;  %v79_v30 = vmul.f32 %v1921_v21, %v56_v12  ;;  %v80_v31 = vmul.f32 %v1921_v21, %v57_v13  ;;  %v81_v32 = vmul.f32 %v1921_v21, %v58_v14  ;;  %v82_v33 = vmul.f32 %v1921_v21, %v59_v15  ;;  %v1922_v38 = vld [vmem:[%s3589_s0 + $0x90] ss:$8 sps:$4 sm:$0xff]   ;;  %v1924_v39 = vld [vmem:[%s3589_s0 + $0xa0] ss:$8 sps:$4 sm:$0xff]  }
   0x8   :  { %2150 = vmatprep.subr.bf16.mxu0 %v2358_v0  ;;  %v83_v34 = vmul.f32 %v1921_v21, %v60_v17  ;;  %v84_v35 = vmul.f32 %v1921_v21, %v3610_v18  ;;  %v85_v36 = vmul.f32 %v1921_v21, %v3609_v19  ;;  %v86_v37 = vmul.f32 %v1921_v21, %v3608_v20  ;;  %v1926_v44 = vld [vmem:[%s3589_s0 + $0xb0] ss:$8 sps:$4 sm:$0xff]   ;;  %v1928_v45 = vld [vmem:[%s3589_s0 + $0xc0] ss:$8 sps:$4 sm:$0xff]  }
   0x9   :  { %v87_v40 = vmul.f32 %v1921_v21, %v3607_v22  ;;  %v88_v41 = vmul.f32 %v1921_v21, %v3606_v23  ;;  %v89_v42 = vmul.f32 %v1921_v21, %v3605_v24  ;;  %v90_v43 = vmul.f32 %v1921_v21, %v3604_v25  ;;  %v1930_v50 = vld [vmem:[%s3589_s0 + $0x1b0] ss:$8 sps:$4 sm:$0xff]   ;;  %v1932_v51 = vld [vmem:[%s3589_s0 + $0x1c0] ss:$8 sps:$4 sm:$0xff]  }
   0xa   :  { %v2530_v46 = vmul.f32 %v1921_v21, %v3603_v26  ;;  %v2534_v47 = vmul.f32 %v1921_v21, %v3602_v27  ;;  %v2538_v48 = vmul.f32 %v1921_v21, %v3601_v28  ;;  %v2542_v49 = vmul.f32 %v1921_v21, %v3600_v29  ;;  %v1934_v52 = vld [vmem:[%s3589_s0 + $0x1d0] ss:$8 sps:$4 sm:$0xff]   ;;  %v1936_v53 = vld [vmem:[%s3589_s0 + $0x1e0] ss:$8 sps:$4 sm:$0xff]  }
   0xb   :  { %2151 = vmatpush3.bf16.msra.mxu0 %v2214_v3  ;;  %v128_v54 = vunpack.c.l.bf16 %v1922_v38  ;;  %v129_v55 = vunpack.c.h.bf16 %v1922_v38  ;;  %v130_v56 = vunpack.c.l.bf16 %v1924_v39  ;;  %v131_v57 = vunpack.c.h.bf16 %v1924_v39 }
   0xc   :  { %2152 = vmatprep.subr.bf16.mxu0 %v2358_v0  ;;  %v132_v58 = vunpack.c.l.bf16 %v1926_v44  ;;  %v133_v59 = vunpack.c.h.bf16 %v1926_v44  ;;  %v134_v60 = vunpack.c.l.bf16 %v1928_v45  ;;  %v135_v61 = vunpack.c.h.bf16 %v1928_v45 }
   0xd   :  { %v136_v63 = vunpack.c.l.bf16 %v1930_v50  ;;  %v137_v0 = vunpack.c.h.bf16 %v1930_v50  ;;  %v138_v1 = vunpack.c.l.bf16 %v1932_v51  ;;  %v139_v2 = vunpack.c.h.bf16 %v1932_v51 }
   0xe   :  { %v140_v3 = vunpack.c.l.bf16 %v1934_v52  ;;  %v142_v21 = vunpack.c.l.bf16 %v1936_v53  ;;  %v143_v29 = vunpack.c.h.bf16 %v1936_v53  ;;  %v152_v28 = vmul.f32 %v1939_v62, %v128_v54 }
   0xf   :  { %2153 = vmatpush3.bf16.msra.mxu0 %v2215_v16  ;;  %v141_v16 = vunpack.c.h.bf16 %v1934_v52  ;;  %v153_v38 = vmul.f32 %v1939_v62, %v129_v55  ;;  %v154_v27 = vmul.f32 %v1939_v62, %v130_v56  ;;  %v155_v39 = vmul.f32 %v1939_v62, %v131_v57  ;;  %v1940_v52 = vld [vmem:[%s3589_s0 + $0xdc] sm:$0x1]  ;;  %v1941_v57 = vld [vmem:[%s3589_s0 + $0xe4] sm:$0x1] }
  0x10   :  { %v156_v26 = vmul.f32 %v1939_v62, %v132_v58  ;;  %v157_v44 = vmul.f32 %v1939_v62, %v133_v59  ;;  %v158_v25 = vmul.f32 %v1939_v62, %v134_v60  ;;  %v159_v45 = vmul.f32 %v1939_v62, %v135_v61  ;;  %v1943_v58 = vld [vmem:[%s3589_s0 + $0xf4] sm:$0x1]  ;;  %v1946_v59 = vld [vmem:[%s3589_s0 + $0x10c] sm:$0x1]  ;;  %v1949_v60 = vld [vmem:[%s3589_s0 + $0x204] sm:$0x1] }
  0x11   :  { %v160_v24 = vmul.f32 %v1939_v62, %v136_v63  ;;  %v161_v23 = vmul.f32 %v1939_v62, %v137_v0  ;;  %v162_v22 = vmul.f32 %v1939_v62, %v138_v1  ;;  %v163_v20 = vmul.f32 %v1939_v62, %v139_v2  ;;  %v1957_v1 = vld [vmem:[%s3590_s1 + $0x2] ss:$0 sm:$0xff] }
  0x12   :  { %v164_v19 = vmul.f32 %v1939_v62, %v140_v3  ;;  %v165_v50 = vmul.f32 %v1939_v62, %v141_v16  ;;  %v166_v18 = vmul.f32 %v1939_v62, %v142_v21  ;;  %v167_v51 = vmul.f32 %v1939_v62, %v143_v29  ;;  %v1942_v29 = vld [vmem:[%s3589_s0 + $0xec] sm:$0x1] }
  0x13   :  { %v2562_v53 = vadd.f32 %v152_v28, %v79_v30  ;;  %v2564_v54 = vadd.f32 %v153_v38, %v80_v31  ;;  %v2566_v55 = vadd.f32 %v154_v27, %v81_v32  ;;  %v2568_v56 = vadd.f32 %v155_v39, %v82_v33  ;;  %v1944_v32 = vld [vmem:[%s3589_s0 + $0xfc] sm:$0x1]  ;;  %v1945_v33 = vld [vmem:[%s3589_s0 + $0x104] sm:$0x1] }
  0x14   :  { %v2579_v28 = vadd.f32 %v156_v26, %v83_v34  ;;  %v2581_v30 = vadd.f32 %v157_v44, %v84_v35  ;;  %v2583_v27 = vadd.f32 %v158_v25, %v85_v36  ;;  %v2585_v31 = vadd.f32 %v159_v45, %v86_v37  ;;  %v1947_v36 = vld [vmem:[%s3589_s0 + $0x114] sm:$0x1]  ;;  %v1948_v37 = vld [vmem:[%s3589_s0 + $0x1fc] sm:$0x1] }
  0x15   :  { %v2596_v26 = vadd.f32 %v160_v24, %v87_v40  ;;  %v2598_v34 = vadd.f32 %v161_v23, %v88_v41  ;;  %v2600_v25 = vadd.f32 %v162_v22, %v89_v42  ;;  %v2602_v35 = vadd.f32 %v163_v20, %v90_v43  ;;  %v1950_v40 = vld [vmem:[%s3589_s0 + $0x20c] sm:$0x1]  ;;  %v1951_v41 = vld [vmem:[%s3589_s0 + $0x214] sm:$0x1] }
  0x16   :  { %v2614_v24 = vadd.f32 %v164_v19, %v2530_v46  ;;  %v2617_v22 = vadd.f32 %v165_v50, %v2534_v47  ;;  %v2620_v20 = vadd.f32 %v166_v18, %v2538_v48  ;;  %v2623_v23 = vadd.f32 %v167_v51, %v2542_v49  ;;  %v1952_v19 = vld [vmem:[%s3589_s0 + $0x21c] sm:$0x1]  ;;  %v1953_v18 = vld [vmem:[%s3589_s0 + $0x224] sm:$0x1]  ;;  %v1954_v42 = vld [vmem:[%s3589_s0 + $0x22c] sm:$0x1] }
  0x17   :  { %v1955_v43 = vld [vmem:[%s3589_s0 + $0x234] sm:$0x1]  ;;  %v200_v46 = vunpack.c.l.bf16 %v1940_v52  ;;  %v201_v47 = vunpack.c.l.bf16 %v1941_v57  ;;  %v202_v48 = vunpack.c.l.bf16 %v1942_v29  ;;  %v203_v49 = vunpack.c.l.bf16 %v1943_v58 }
  0x18   :  { %3633 = vst [vmem:[#allocation2_spill] sm:$0xff] %v2623_v23  ;;  %v204_v61 = vunpack.c.l.bf16 %v1944_v32  ;;  %v205_v62 = vunpack.c.l.bf16 %v1945_v33  ;;  %v206_v63 = vunpack.c.l.bf16 %v1946_v59  ;;  %v207_v0 = vunpack.c.l.bf16 %v1947_v36 }
  0x19   :  { %v208_v2 = vunpack.c.l.bf16 %v1948_v37  ;;  %v209_v3 = vunpack.c.l.bf16 %v1949_v60  ;;  %v210_v16 = vunpack.c.l.bf16 %v1950_v40  ;;  %v211_v21 = vunpack.c.l.bf16 %v1951_v41 }
  0x1a   :  { %v212_v38 = vunpack.c.l.bf16 %v1952_v19  ;;  %v213_v39 = vunpack.c.l.bf16 %v1953_v18  ;;  %v214_v44 = vunpack.c.l.bf16 %v1954_v42  ;;  %v215_v45 = vunpack.c.l.bf16 %v1955_v43 }
  0x1b   :  { %v224_v50 = vmul.f32 %v1957_v1, %v56_v12  ;;  %v225_v51 = vmul.f32 %v1957_v1, %v200_v46  ;;  %v226_v52 = vmul.f32 %v1957_v1, %v57_v13  ;;  %v227_v57 = vmul.f32 %v1957_v1, %v201_v47 }
  0x1c   :  { %v228_v29 = vmul.f32 %v1957_v1, %v58_v14  ;;  %v229_v58 = vmul.f32 %v1957_v1, %v202_v48  ;;  %v230_v32 = vmul.f32 %v1957_v1, %v59_v15  ;;  %v231_v33 = vmul.f32 %v1957_v1, %v203_v49 }
  0x1d   :  { %v232_v59 = vmul.f32 %v1957_v1, %v60_v17  ;;  %v233_v36 = vmul.f32 %v1957_v1, %v204_v61  ;;  %v3634_v37 = vunpack.c.h.bf16 %v2443_v6  ;;  %v235_v60 = vmul.f32 %v1957_v1, %v205_v62 }
  0x1e   :  { %v3635_v4 = vunpack.c.l.bf16 %v2448_v7  ;;  %v237_v40 = vmul.f32 %v1957_v1, %v206_v63  ;;  %v3636_v41 = vunpack.c.h.bf16 %v2448_v7  ;;  %v239_v19 = vmul.f32 %v1957_v1, %v207_v0 }
  0x1f   :  { %v234_v12 = vmul.f32 %v1957_v1, %v3634_v37  ;;  %v3637_v5 = vunpack.c.l.bf16 %v2453_v8  ;;  %v241_v18 = vmul.f32 %v1957_v1, %v208_v2  ;;  %v3638_v42 = vunpack.c.h.bf16 %v2453_v8 }
  0x20   :  { %v236_v13 = vmul.f32 %v1957_v1, %v3635_v4  ;;  %v238_v14 = vmul.f32 %v1957_v1, %v3636_v41  ;;  %v243_v43 = vmul.f32 %v1957_v1, %v209_v3  ;;  %v3639_v6 = vunpack.c.l.bf16 %v2458_v9 }
  0x21   :  { %v240_v15 = vmul.f32 %v1957_v1, %v3637_v5  ;;  %v242_v17 = vmul.f32 %v1957_v1, %v3638_v42  ;;  %v245_v47 = vmul.f32 %v1957_v1, %v210_v16  ;;  %v3640_v48 = vunpack.c.h.bf16 %v2458_v9 }
  0x22   :  { %v244_v46 = vmul.f32 %v1957_v1, %v3639_v6  ;;  %v247_v61 = vmul.f32 %v1957_v1, %v211_v21  ;;  %v289_v62 = vrot.slane %v224_v50, 1  ;;  %v290_v7 = vrot.slane %v225_v51, 1 }
  0x23   :  { %v246_v49 = vmul.f32 %v1957_v1, %v3640_v48  ;;  %v292_v63 = vrot.slane %v226_v52, 1  ;;  %v293_v0 = vrot.slane %v227_v57, 1  ;;  %v295_v37 = vrot.slane %v228_v29, 1 }
  0x24   :  { %v296_v4 = vrot.slane %v229_v58, 1  ;;  %v298_v41 = vrot.slane %v230_v32, 1  ;;  %v299_v2 = vrot.slane %v231_v33, 1  ;;  %v3641_v8 = vunpack.c.l.bf16 %v2463_v10 }
  0x25   :  { %v249_v3 = vmul.f32 %v1957_v1, %v212_v38  ;;  %v3642_v42 = vunpack.c.h.bf16 %v2463_v10  ;;  %v251_v16 = vmul.f32 %v1957_v1, %v213_v39  ;;  %v3643_v9 = vunpack.c.l.bf16 %v2468_v11 }
  0x26   :  { %v248_v5 = vmul.f32 %v1957_v1, %v3641_v8  ;;  %v253_v21 = vmul.f32 %v1957_v1, %v214_v44  ;;  %v3644_v50 = vunpack.c.h.bf16 %v2468_v11  ;;  %v255_v52 = vmul.f32 %v1957_v1, %v215_v45 }
  0x27   :  { %v250_v6 = vmul.f32 %v1957_v1, %v3642_v42  ;;  %v252_v48 = vmul.f32 %v1957_v1, %v3643_v9  ;;  %v291_v57 = vsel %vm288_vm1, %v289_v62, %v290_v7  ;;  %v294_v29 = vsel %vm288_vm1, %v292_v63, %v293_v0 }
  0x28   :  { %v254_v51 = vmul.f32 %v1957_v1, %v3644_v50  ;;  %v301_v58 = vrot.slane %v232_v59, 1  ;;  %v302_v32 = vrot.slane %v233_v36, 1  ;;  %v297_v38 = vsel %vm288_vm1, %v295_v37, %v296_v4 }
  0x29   :  { %v300_v10 = vsel %vm288_vm1, %v298_v41, %v299_v2  ;;  %v304_v33 = vrot.slane %v234_v12, 1  ;;  %v305_v39 = vrot.slane %v235_v60, 1  ;;  %v307_v8 = vrot.slane %v236_v13, 1 }
  0x2a   :  { %v308_v42 = vrot.slane %v237_v40, 1  ;;  %v310_v9 = vrot.slane %v238_v14, 1  ;;  %v311_v44 = vrot.slane %v239_v19, 1  ;;  %v313_v23 = vrot.slane %v240_v15, 1 }
  0x2b   :  { %v314_v11 = vrot.slane %v241_v18, 1  ;;  %v316_v50 = vrot.slane %v242_v17, 1  ;;  %v317_v1 = vrot.slane %v243_v43, 1  ;;  %v319_v45 = vrot.slane %v244_v46, 1 }
  0x2c   :  { %v320_v62 = vrot.slane %v245_v47, 1  ;;  %v322_v7 = vrot.slane %v246_v49, 1  ;;  %v323_v63 = vrot.slane %v247_v61, 1  ;;  %v325_v59 = vrot.slane %v248_v5, 1 }
  0x2d   :  { %v326_v36 = vrot.slane %v249_v3, 1  ;;  %v328_v0 = vrot.slane %v250_v6, 1  ;;  %v329_v37 = vrot.slane %v251_v16, 1  ;;  %v331_v4 = vrot.slane %v252_v48, 1 }
  0x2e   :  { %v332_v41 = vrot.slane %v253_v21, 1  ;;  %v334_v12 = vrot.slane %v254_v51, 1  ;;  %v335_v60 = vrot.slane %v255_v52, 1  ;;  %v303_v13 = vsel %vm288_vm1, %v301_v58, %v302_v32  ;;  %v3645_v52 = vld [vmem:[#allocation2_spill] sm:$0xff] }
  0x2f   :  { %v306_v40 = vsel %vm288_vm1, %v304_v33, %v305_v39  ;;  %v309_v14 = vsel %vm288_vm1, %v307_v8, %v308_v42  ;;  %v312_v19 = vsel %vm288_vm1, %v310_v9, %v311_v44  ;;  %v315_v15 = vsel %vm288_vm1, %v313_v23, %v314_v11  ;;  %v1975_v8 = vld [vmem:[%s3590_s1 + $0x3] ss:$0 sm:$0xff] }
  0x30   :  { %v318_v18 = vsel %vm288_vm1, %v316_v50, %v317_v1  ;;  %v321_v17 = vsel %vm288_vm1, %v319_v45, %v320_v62  ;;  %v324_v43 = vsel %vm288_vm1, %v322_v7, %v323_v63  ;;  %v327_v46 = vsel %vm288_vm1, %v325_v59, %v326_v36 }
  0x31   :  { %v330_v47 = vsel %vm288_vm1, %v328_v0, %v329_v37  ;;  %v353_v49 = vadd.f32 %v291_v57, %v2562_v53  ;;  %v354_v61 = vadd.f32 %v294_v29, %v2564_v54  ;;  %v333_v2 = vsel %vm288_vm1, %v331_v4, %v332_v41  ;;  %v2705_v53 = vld [vmem:[%s3589_s0 + $0x48] ss:$8 sps:$4 sm:$0xff]   ;;  %v2710_v54 = vld [vmem:[%s3589_s0 + $0x58] ss:$8 sps:$4 sm:$0xff]  }
  0x32   :  { %v336_v5 = vsel %vm288_vm1, %v334_v12, %v335_v60  ;;  %v355_v23 = vadd.f32 %v297_v38, %v2566_v55  ;;  %v356_v3 = vadd.f32 %v300_v10, %v2568_v56  ;;  %v357_v6 = vadd.f32 %v303_v13, %v2579_v28  ;;  %v2738_v57 = vld [vmem:[%s3589_s0 + $0x178] ss:$8 sps:$4 sm:$0xff]  }
  0x33   :  { %v358_v16 = vadd.f32 %v306_v40, %v2581_v30  ;;  %v359_v48 = vadd.f32 %v309_v14, %v2583_v27  ;;  %v360_v21 = vadd.f32 %v312_v19, %v2585_v31  ;;  %v361_v55 = vadd.f32 %v315_v15, %v2596_v26  ;;  %v2719_v27 = vld [vmem:[%s3589_s0 + $0x68] ss:$8 sps:$4 sm:$0xff]   ;;  %v2724_v31 = vld [vmem:[%s3589_s0 + $0x78] ss:$8 sps:$4 sm:$0xff]  }
  0x34   :  { %v362_v56 = vadd.f32 %v318_v18, %v2598_v34  ;;  %v363_v28 = vadd.f32 %v321_v17, %v2600_v25  ;;  %v364_v30 = vadd.f32 %v324_v43, %v2602_v35  ;;  %v365_v51 = vadd.f32 %v327_v46, %v2614_v24  ;;  %v2733_v35 = vld [vmem:[%s3589_s0 + $0x168] ss:$8 sps:$4 sm:$0xff]  }
  0x35   :  { %v366_v26 = vadd.f32 %v330_v47, %v2617_v22  ;;  %v367_v34 = vadd.f32 %v333_v2, %v2620_v20  ;;  %v368_v25 = vadd.f32 %v336_v5, %v3645_v52  ;;  %v2743_v24 = vld [vmem:[%s3589_s0 + $0x188] ss:$8 sps:$4 sm:$0xff]   ;;  %v2748_v22 = vld [vmem:[%s3589_s0 + $0x198] ss:$8 sps:$4 sm:$0xff]   ;;  %v386_v20 = vunpack.c.l.bf16 %v2705_v53 }
  0x36   :  { %v387_v29 = vunpack.c.h.bf16 %v2705_v53  ;;  %v388_v58 = vunpack.c.l.bf16 %v2710_v54  ;;  %v389_v32 = vunpack.c.h.bf16 %v2710_v54  ;;  %v390_v38 = vunpack.c.l.bf16 %v2719_v27 }
  0x37   :  { %v3621_v10 = vunpack.c.h.bf16 %v2719_v27  ;;  %v3620_v33 = vunpack.c.l.bf16 %v2724_v31  ;;  %v3619_v39 = vunpack.c.h.bf16 %v2724_v31  ;;  %v3618_v42 = vunpack.c.l.bf16 %v2733_v35 }
  0x38   :  { %v3616_v9 = vunpack.c.h.bf16 %v2733_v35  ;;  %v3615_v44 = vunpack.c.l.bf16 %v2738_v57  ;;  %v3611_v11 = vunpack.c.h.bf16 %v2738_v57  ;;  %v3612_v50 = vunpack.c.l.bf16 %v2743_v24 }
  0x39   :  { %v3613_v1 = vunpack.c.h.bf16 %v2743_v24  ;;  %v3614_v45 = vunpack.c.l.bf16 %v2748_v22  ;;  %v3617_v62 = vunpack.c.h.bf16 %v2748_v22  ;;  %v410_v7 = vmul.f32 %v1975_v8, %v386_v20 }
  0x3a   :  { %v411_v63 = vmul.f32 %v1975_v8, %v387_v29  ;;  %v412_v59 = vmul.f32 %v1975_v8, %v388_v58  ;;  %v413_v36 = vmul.f32 %v1975_v8, %v389_v32  ;;  %v414_v0 = vmul.f32 %v1975_v8, %v390_v38 }
  0x3b   :  { %v415_v37 = vmul.f32 %v1975_v8, %v3621_v10  ;;  %v416_v4 = vmul.f32 %v1975_v8, %v3620_v33  ;;  %v417_v41 = vmul.f32 %v1975_v8, %v3619_v39  ;;  %v418_v12 = vmul.f32 %v1975_v8, %v3618_v42 }
  0x3c   :  { %v419_v60 = vmul.f32 %v1975_v8, %v3616_v9  ;;  %v420_v13 = vmul.f32 %v1975_v8, %v3615_v44  ;;  %v421_v40 = vmul.f32 %v1975_v8, %v3611_v11  ;;  %v422_v14 = vmul.f32 %v1975_v8, %v3612_v50  ;;  %v442_v50 = vld [vmem:[%s3589_s0] ss:$8 sps:$4 sm:$0xff]  }
  0x3d   :  { %v423_v19 = vmul.f32 %v1975_v8, %v3613_v1  ;;  %v424_v15 = vmul.f32 %v1975_v8, %v3614_v45  ;;  %v425_v18 = vmul.f32 %v1975_v8, %v3617_v62  ;;  %v426_v17 = vadd.f32 %v410_v7, %v353_v49  ;;  %v444_v1 = vld [vmem:[%s3589_s0 + $0x10] ss:$8 sps:$4 sm:$0xff]   ;;  %v446_v49 = vld [vmem:[%s3589_s0 + $0x20] ss:$8 sps:$4 sm:$0xff]  }
  0x3e   :  { %v427_v43 = vadd.f32 %v411_v63, %v354_v61  ;;  %v428_v46 = vadd.f32 %v412_v59, %v355_v23  ;;  %v429_v47 = vadd.f32 %v413_v36, %v356_v3  ;;  %v430_v2 = vadd.f32 %v414_v0, %v357_v6  ;;  %v448_v61 = vld [vmem:[%s3589_s0 + $0x30] ss:$8 sps:$4 sm:$0xff]   ;;  %v1977_v59 = vld [vmem:[%s3590_s1 + $0x4] ss:$0 sm:$0xff] }
  0x3f   :  { %v431_v5 = vadd.f32 %v415_v37, %v358_v16  ;;  %v432_v52 = vadd.f32 %v416_v4, %v359_v48  ;;  %v433_v11 = vadd.f32 %v417_v41, %v360_v21  ;;  %v434_v45 = vadd.f32 %v418_v12, %v361_v55  ;;  %v450_v48 = vld [vmem:[%s3589_s0 + $0x120] ss:$8 sps:$4 sm:$0xff]   ;;  %v452_v21 = vld [vmem:[%s3589_s0 + $0x130] ss:$8 sps:$4 sm:$0xff]  }
  0x40   :  { %v435_v44 = vadd.f32 %v419_v60, %v362_v56  ;;  %v436_v9 = vadd.f32 %v420_v13, %v363_v28  ;;  %v437_v8 = vadd.f32 %v421_v40, %v364_v30  ;;  %v2813_v23 = vadd.f32 %v422_v14, %v365_v51  ;;  %v454_v55 = vld [vmem:[%s3589_s0 + $0x140] ss:$8 sps:$4 sm:$0xff]   ;;  %v456_v56 = vld [vmem:[%s3589_s0 + $0x150] ss:$8 sps:$4 sm:$0xff]  }
  0x41   :  { %v2815_v3 = vadd.f32 %v423_v19, %v366_v26  ;;  %v2817_v6 = vadd.f32 %v424_v15, %v367_v34  ;;  %v2819_v16 = vadd.f32 %v425_v18, %v368_v25  ;;  %v458_v28 = vunpack.c.l.bf16 %v442_v50 }
  0x42   :  { %v459_v30 = vunpack.c.h.bf16 %v442_v50  ;;  %v460_v51 = vunpack.c.l.bf16 %v444_v1  ;;  %v461_v26 = vunpack.c.h.bf16 %v444_v1  ;;  %v462_v34 = vunpack.c.l.bf16 %v446_v49 }
  0x43   :  { %v463_v25 = vunpack.c.h.bf16 %v446_v49  ;;  %v464_v7 = vunpack.c.l.bf16 %v448_v61  ;;  %v465_v63 = vunpack.c.h.bf16 %v448_v61  ;;  %v466_v36 = vunpack.c.l.bf16 %v450_v48 }
  0x44   :  { %v467_v0 = vunpack.c.h.bf16 %v450_v48  ;;  %v468_v37 = vunpack.c.l.bf16 %v452_v21  ;;  %v469_v4 = vunpack.c.h.bf16 %v452_v21  ;;  %v470_v41 = vunpack.c.l.bf16 %v454_v55 }
  0x45   :  { %v471_v12 = vunpack.c.h.bf16 %v454_v55  ;;  %v472_v60 = vunpack.c.l.bf16 %v456_v56  ;;  %v473_v13 = vunpack.c.h.bf16 %v456_v56  ;;  %v482_v40 = vmul.f32 %v1977_v59, %v458_v28  ;;  %v1978_v55 = vld [vmem:[%s3589_s0 + $0x4c] sm:$0x1] }
  0x46   :  { %v483_v50 = vmul.f32 %v1977_v59, %v459_v30  ;;  %v484_v14 = vmul.f32 %v1977_v59, %v460_v51  ;;  %v485_v1 = vmul.f32 %v1977_v59, %v461_v26  ;;  %v486_v19 = vmul.f32 %v1977_v59, %v462_v34  ;;  %v1979_v26 = vld [vmem:[%s3589_s0 + $0x54] sm:$0x1]  ;;  %v1980_v34 = vld [vmem:[%s3589_s0 + $0x5c] sm:$0x1] }
  0x47   :  { %v487_v15 = vmul.f32 %v1977_v59, %v463_v25  ;;  %v488_v18 = vmul.f32 %v1977_v59, %v464_v7  ;;  %v489_v49 = vmul.f32 %v1977_v59, %v465_v63  ;;  %v490_v61 = vmul.f32 %v1977_v59, %v466_v36  ;;  %v1981_v25 = vld [vmem:[%s3589_s0 + $0x64] sm:$0x1]  ;;  %v1982_v7 = vld [vmem:[%s3589_s0 + $0x6c] sm:$0x1]  ;;  %v1983_v63 = vld [vmem:[%s3589_s0 + $0x74] sm:$0x1] }
  0x48   :  { %v491_v62 = vmul.f32 %v1977_v59, %v467_v0  ;;  %v492_v42 = vmul.f32 %v1977_v59, %v468_v37  ;;  %v493_v39 = vmul.f32 %v1977_v59, %v469_v4  ;;  %v494_v33 = vmul.f32 %v1977_v59, %v470_v41  ;;  %v1985_v36 = vld [vmem:[%s3589_s0 + $0x84] sm:$0x1]  ;;  %v1986_v0 = vld [vmem:[%s3589_s0 + $0x16c] sm:$0x1]  ;;  %v1987_v37 = vld [vmem:[%s3589_s0 + $0x174] sm:$0x1] }
  0x49   :  { %v495_v48 = vmul.f32 %v1977_v59, %v471_v12  ;;  %v496_v10 = vmul.f32 %v1977_v59, %v472_v60  ;;  %v497_v21 = vmul.f32 %v1977_v59, %v473_v13  ;;  %v2839_v56 = vadd.f32 %v482_v40, %v426_v17  ;;  %v1984_v59 = vld [vmem:[%s3589_s0 + $0x7c] sm:$0x1]  ;;  %v1995_v40 = vld [vmem:[%s3590_s1 + $0x5] ss:$0 sm:$0xff] }
  0x4a   :  { %v2841_v28 = vadd.f32 %v483_v50, %v427_v43  ;;  %v2843_v30 = vadd.f32 %v484_v14, %v428_v46  ;;  %v2845_v51 = vadd.f32 %v485_v1, %v429_v47  ;;  %v2856_v17 = vadd.f32 %v486_v19, %v430_v2 }
  0x4b   :  { %v2858_v43 = vadd.f32 %v487_v15, %v431_v5  ;;  %v2860_v46 = vadd.f32 %v488_v18, %v432_v52  ;;  %v2862_v47 = vadd.f32 %v489_v49, %v433_v11  ;;  %v2873_v2 = vadd.f32 %v490_v61, %v434_v45 }
  0x4c   :  { %v2875_v5 = vadd.f32 %v491_v62, %v435_v44  ;;  %v2877_v52 = vadd.f32 %v492_v42, %v436_v9  ;;  %v2879_v11 = vadd.f32 %v493_v39, %v437_v8  ;;  %v2891_v45 = vadd.f32 %v494_v33, %v2813_v23  ;;  %v1988_v44 = vld [vmem:[%s3589_s0 + $0x17c] sm:$0x1]  ;;  %v1989_v62 = vld [vmem:[%s3589_s0 + $0x184] sm:$0x1]  ;;  %v1990_v33 = vld [vmem:[%s3589_s0 + $0x18c] sm:$0x1] }
  0x4d   :  { %v2894_v42 = vadd.f32 %v495_v48, %v2815_v3  ;;  %v2897_v39 = vadd.f32 %v496_v10, %v2817_v6  ;;  %v2900_v9 = vadd.f32 %v497_v21, %v2819_v16  ;;  %v1991_v10 = vld [vmem:[%s3589_s0 + $0x194] sm:$0x1]  ;;  %v1992_v8 = vld [vmem:[%s3589_s0 + $0x19c] sm:$0x1]  ;;  %v1993_v23 = vld [vmem:[%s3589_s0 + $0x1a4] sm:$0x1]  ;;  %v530_v3 = vunpack.c.l.bf16 %v1978_v55 }
  0x4e   :  { %v531_v6 = vunpack.c.l.bf16 %v1979_v26  ;;  %v532_v16 = vunpack.c.l.bf16 %v1980_v34  ;;  %v533_v4 = vunpack.c.l.bf16 %v1981_v25  ;;  %v534_v41 = vunpack.c.l.bf16 %v1982_v7 }
  0x4f   :  { %3646 = vst [vmem:[#allocation2_spill] sm:$0xff] %v2900_v9  ;;  %v535_v12 = vunpack.c.l.bf16 %v1983_v63  ;;  %v536_v60 = vunpack.c.l.bf16 %v1984_v59  ;;  %v537_v13 = vunpack.c.l.bf16 %v1985_v36  ;;  %v538_v50 = vunpack.c.l.bf16 %v1986_v0 }
  0x50   :  { %v539_v14 = vunpack.c.l.bf16 %v1987_v37  ;;  %v540_v1 = vunpack.c.l.bf16 %v1988_v44  ;;  %v541_v19 = vunpack.c.l.bf16 %v1989_v62  ;;  %v542_v15 = vunpack.c.l.bf16 %v1990_v33 }
  0x51   :  { %v543_v18 = vunpack.c.l.bf16 %v1991_v10  ;;  %v544_v49 = vunpack.c.l.bf16 %v1992_v8  ;;  %v545_v61 = vunpack.c.l.bf16 %v1993_v23  ;;  %v554_v48 = vmul.f32 %v1995_v40, %v386_v20 }
  0x52   :  { %v555_v21 = vmul.f32 %v1995_v40, %v530_v3  ;;  %v556_v55 = vmul.f32 %v1995_v40, %v387_v29  ;;  %v557_v26 = vmul.f32 %v1995_v40, %v531_v6  ;;  %v558_v34 = vmul.f32 %v1995_v40, %v388_v58 }
  0x53   :  { %v559_v25 = vmul.f32 %v1995_v40, %v532_v16  ;;  %v560_v7 = vmul.f32 %v1995_v40, %v389_v32  ;;  %v561_v63 = vmul.f32 %v1995_v40, %v533_v4  ;;  %v562_v59 = vmul.f32 %v1995_v40, %v390_v38 }
  0x54   :  { %v563_v36 = vmul.f32 %v1995_v40, %v534_v41  ;;  %v3647_v0 = vunpack.c.h.bf16 %v2719_v27  ;;  %v565_v37 = vmul.f32 %v1995_v40, %v535_v12  ;;  %v3648_v53 = vunpack.c.l.bf16 %v2724_v31 }
  0x55   :  { %v567_v44 = vmul.f32 %v1995_v40, %v536_v60  ;;  %v3649_v62 = vunpack.c.h.bf16 %v2724_v31  ;;  %v569_v33 = vmul.f32 %v1995_v40, %v537_v13  ;;  %v3650_v54 = vunpack.c.l.bf16 %v2733_v35 }
  0x56   :  { %v564_v20 = vmul.f32 %v1995_v40, %v3647_v0  ;;  %v566_v29 = vmul.f32 %v1995_v40, %v3648_v53  ;;  %v571_v10 = vmul.f32 %v1995_v40, %v538_v50  ;;  %v3651_v8 = vunpack.c.h.bf16 %v2733_v35 }
  0x57   :  { %v568_v58 = vmul.f32 %v1995_v40, %v3649_v62  ;;  %v570_v32 = vmul.f32 %v1995_v40, %v3650_v54  ;;  %v573_v23 = vmul.f32 %v1995_v40, %v539_v14  ;;  %v3652_v27 = vunpack.c.l.bf16 %v2738_v57 }
  0x58   :  { %v572_v38 = vmul.f32 %v1995_v40, %v3651_v8  ;;  %v575_v6 = vmul.f32 %v1995_v40, %v540_v1  ;;  %v3653_v16 = vunpack.c.h.bf16 %v2738_v57  ;;  %v577_v41 = vmul.f32 %v1995_v40, %v541_v19 }
  0x59   :  { %v574_v3 = vmul.f32 %v1995_v40, %v3652_v27  ;;  %v618_v12 = vrot.slane %v554_v48, 1  ;;  %v619_v31 = vrot.slane %v555_v21, 1  ;;  %v621_v60 = vrot.slane %v556_v55, 1 }
  0x5a   :  { %v576_v4 = vmul.f32 %v1995_v40, %v3653_v16  ;;  %v622_v13 = vrot.slane %v557_v26, 1  ;;  %v624_v0 = vrot.slane %v558_v34, 1  ;;  %v625_v53 = vrot.slane %v559_v25, 1 }
  0x5b   :  { %v627_v62 = vrot.slane %v560_v7, 1  ;;  %v628_v50 = vrot.slane %v561_v63, 1  ;;  %v3654_v35 = vunpack.c.l.bf16 %v2743_v24  ;;  %v579_v14 = vmul.f32 %v1995_v40, %v542_v15 }
  0x5c   :  { %v3655_v8 = vunpack.c.h.bf16 %v2743_v24  ;;  %v581_v1 = vmul.f32 %v1995_v40, %v543_v18  ;;  %v3656_v57 = vunpack.c.l.bf16 %v2748_v22  ;;  %v583_v19 = vmul.f32 %v1995_v40, %v544_v49 }
  0x5d   :  { %v578_v54 = vmul.f32 %v1995_v40, %v3654_v35  ;;  %v3657_v48 = vunpack.c.h.bf16 %v2748_v22  ;;  %v585_v55 = vmul.f32 %v1995_v40, %v545_v61  ;;  %v620_v26 = vsel %vm288_vm1, %v618_v12, %v619_v31 }
  0x5e   :  { %v580_v27 = vmul.f32 %v1995_v40, %v3655_v8  ;;  %v582_v16 = vmul.f32 %v1995_v40, %v3656_v57  ;;  %v623_v34 = vsel %vm288_vm1, %v621_v60, %v622_v13  ;;  %v630_v25 = vrot.slane %v562_v59, 1 }
  0x5f   :  { %v584_v21 = vmul.f32 %v1995_v40, %v3657_v48  ;;  %v631_v7 = vrot.slane %v563_v36, 1  ;;  %v626_v15 = vsel %vm288_vm1, %v624_v0, %v625_v53  ;;  %v629_v24 = vsel %vm288_vm1, %v627_v62, %v628_v50 }
  0x60   :  { %v633_v63 = vrot.slane %v564_v20, 1  ;;  %v634_v18 = vrot.slane %v565_v37, 1  ;;  %v636_v35 = vrot.slane %v566_v29, 1  ;;  %v637_v8 = vrot.slane %v567_v44, 1 }
  0x61   :  { %v639_v57 = vrot.slane %v568_v58, 1  ;;  %v640_v49 = vrot.slane %v569_v33, 1  ;;  %v642_v9 = vrot.slane %v570_v32, 1  ;;  %v643_v22 = vrot.slane %v571_v10, 1 }
  0x62   :  { %v645_v48 = vrot.slane %v572_v38, 1  ;;  %v646_v40 = vrot.slane %v573_v23, 1  ;;  %v648_v61 = vrot.slane %v574_v3, 1  ;;  %v649_v12 = vrot.slane %v575_v6, 1 }
  0x63   :  { %v651_v31 = vrot.slane %v576_v4, 1  ;;  %v652_v60 = vrot.slane %v577_v41, 1  ;;  %v654_v59 = vrot.slane %v578_v54, 1  ;;  %v655_v36 = vrot.slane %v579_v14, 1 }
  0x64   :  { %v657_v13 = vrot.slane %v580_v27, 1  ;;  %v658_v0 = vrot.slane %v581_v1, 1  ;;  %v660_v53 = vrot.slane %v582_v16, 1  ;;  %v661_v62 = vrot.slane %v583_v19, 1 }
  0x65   :  { %v663_v20 = vrot.slane %v584_v21, 1  ;;  %v664_v37 = vrot.slane %v585_v55, 1  ;;  %v632_v29 = vsel %vm288_vm1, %v630_v25, %v631_v7  ;;  %v635_v44 = vsel %vm288_vm1, %v633_v63, %v634_v18  ;;  %v3658_v55 = vld [vmem:[#allocation2_spill] sm:$0xff] }
  0x66   :  { %v638_v58 = vsel %vm288_vm1, %v636_v35, %v637_v8  ;;  %v641_v33 = vsel %vm288_vm1, %v639_v57, %v640_v49  ;;  %v644_v32 = vsel %vm288_vm1, %v642_v9, %v643_v22  ;;  %v647_v10 = vsel %vm288_vm1, %v645_v48, %v646_v40  ;;  %v2013_v35 = vld [vmem:[%s3590_s1 + $0x6] ss:$0 sm:$0xff] }
  0x67   :  { %v650_v38 = vsel %vm288_vm1, %v648_v61, %v649_v12  ;;  %v653_v23 = vsel %vm288_vm1, %v651_v31, %v652_v60  ;;  %v656_v3 = vsel %vm288_vm1, %v654_v59, %v655_v36  ;;  %v659_v6 = vsel %vm288_vm1, %v657_v13, %v658_v0 }
  0x68   :  { %v682_v4 = vadd.f32 %v620_v26, %v2839_v56  ;;  %v683_v41 = vadd.f32 %v623_v34, %v2841_v28  ;;  %v662_v50 = vsel %vm288_vm1, %v660_v53, %v661_v62  ;;  %v665_v54 = vsel %vm288_vm1, %v663_v20, %v664_v37  ;;  %v2982_v56 = vld [vmem:[%s3589_s0 + $0xe0] ss:$8 sps:$4 sm:$0xff]   ;;  %v2987_v28 = vld [vmem:[%s3589_s0 + $0xf0] ss:$8 sps:$4 sm:$0xff]  }
  0x69   :  { %v684_v9 = vadd.f32 %v626_v15, %v2843_v30  ;;  %v685_v14 = vadd.f32 %v629_v24, %v2845_v51  ;;  %v686_v27 = vadd.f32 %v632_v29, %v2856_v17  ;;  %v687_v1 = vadd.f32 %v635_v44, %v2858_v43  ;;  %v3015_v26 = vld [vmem:[%s3589_s0 + $0x210] ss:$8 sps:$4 sm:$0xff]  }
  0x6a   :  { %v688_v16 = vadd.f32 %v638_v58, %v2860_v46  ;;  %v689_v19 = vadd.f32 %v641_v33, %v2862_v47  ;;  %v690_v30 = vadd.f32 %v644_v32, %v2873_v2  ;;  %v691_v51 = vadd.f32 %v647_v10, %v2875_v5  ;;  %v2996_v46 = vld [vmem:[%s3589_s0 + $0x100] ss:$8 sps:$4 sm:$0xff]   ;;  %v3001_v47 = vld [vmem:[%s3589_s0 + $0x110] ss:$8 sps:$4 sm:$0xff]  }
  0x6b   :  { %v692_v17 = vadd.f32 %v650_v38, %v2877_v52  ;;  %v693_v43 = vadd.f32 %v653_v23, %v2879_v11  ;;  %v694_v21 = vadd.f32 %v656_v3, %v2891_v45  ;;  %v695_v2 = vadd.f32 %v659_v6, %v2894_v42  ;;  %v3010_v11 = vld [vmem:[%s3589_s0 + $0x200] ss:$8 sps:$4 sm:$0xff]   ;;  %v3025_v42 = vld [vmem:[%s3589_s0 + $0x230] ss:$8 sps:$4 sm:$0xff]  }
  0x6c   :  { %v696_v5 = vadd.f32 %v662_v50, %v2897_v39  ;;  %v697_v52 = vadd.f32 %v665_v54, %v3658_v55  ;;  %v3020_v45 = vld [vmem:[%s3589_s0 + $0x220] ss:$8 sps:$4 sm:$0xff]   ;;  %v715_v39 = vunpack.c.l.bf16 %v2982_v56  ;;  %v716_v34 = vunpack.c.h.bf16 %v2982_v56 }
  0x6d   :  { %v717_v25 = vunpack.c.l.bf16 %v2987_v28  ;;  %v718_v7 = vunpack.c.h.bf16 %v2987_v28  ;;  %v719_v15 = vunpack.c.l.bf16 %v2996_v46  ;;  %v3632_v24 = vunpack.c.h.bf16 %v2996_v46 }
  0x6e   :  { %v3631_v63 = vunpack.c.l.bf16 %v3001_v47  ;;  %v3630_v18 = vunpack.c.h.bf16 %v3001_v47  ;;  %v3629_v8 = vunpack.c.l.bf16 %v3010_v11  ;;  %v3627_v57 = vunpack.c.h.bf16 %v3010_v11 }
  0x6f   :  { %v3626_v49 = vunpack.c.l.bf16 %v3015_v26  ;;  %v3622_v22 = vunpack.c.h.bf16 %v3015_v26  ;;  %v3623_v48 = vunpack.c.l.bf16 %v3020_v45  ;;  %v3624_v40 = vunpack.c.h.bf16 %v3020_v45 }
  0x70   :  { %v3625_v61 = vunpack.c.l.bf16 %v3025_v42  ;;  %v3628_v12 = vunpack.c.h.bf16 %v3025_v42  ;;  %v739_v31 = vmul.f32 %v2013_v35, %v715_v39  ;;  %v740_v60 = vmul.f32 %v2013_v35, %v716_v34 }
  0x71   :  { %v741_v59 = vmul.f32 %v2013_v35, %v717_v25  ;;  %v742_v36 = vmul.f32 %v2013_v35, %v718_v7  ;;  %v743_v13 = vmul.f32 %v2013_v35, %v719_v15  ;;  %v744_v0 = vmul.f32 %v2013_v35, %v3632_v24 }
  0x72   :  { %v745_v53 = vmul.f32 %v2013_v35, %v3631_v63  ;;  %v746_v62 = vmul.f32 %v2013_v35, %v3630_v18  ;;  %v747_v20 = vmul.f32 %v2013_v35, %v3629_v8  ;;  %v748_v37 = vmul.f32 %v2013_v35, %v3627_v57 }
  0x73   :  { %v749_v29 = vmul.f32 %v2013_v35, %v3626_v49  ;;  %v750_v44 = vmul.f32 %v2013_v35, %v3622_v22  ;;  %v751_v58 = vmul.f32 %v2013_v35, %v3623_v48  ;;  %v752_v33 = vmul.f32 %v2013_v35, %v3624_v40  ;;  %v2014_v48 = vld [vmem:[%s3589_s0 + $0x98] ss:$8 sps:$4 sm:$0xff]   ;;  %v2016_v40 = vld [vmem:[%s3589_s0 + $0xa8] ss:$8 sps:$4 sm:$0xff]  }
  0x74   :  { %v753_v32 = vmul.f32 %v2013_v35, %v3625_v61  ;;  %v754_v10 = vmul.f32 %v2013_v35, %v3628_v12  ;;  %v755_v38 = vadd.f32 %v739_v31, %v682_v4  ;;  %v756_v23 = vadd.f32 %v740_v60, %v683_v41  ;;  %v2018_v4 = vld [vmem:[%s3589_s0 + $0xb8] ss:$8 sps:$4 sm:$0xff]   ;;  %v2020_v41 = vld [vmem:[%s3589_s0 + $0xc8] ss:$8 sps:$4 sm:$0xff]  }
  0x75   :  { %v757_v3 = vadd.f32 %v741_v59, %v684_v9  ;;  %v758_v6 = vadd.f32 %v742_v36, %v685_v14  ;;  %v759_v50 = vadd.f32 %v743_v13, %v686_v27  ;;  %v760_v54 = vadd.f32 %v744_v0, %v687_v1  ;;  %v2031_v59 = vld [vmem:[%s3590_s1 + $0x7] ss:$0 sm:$0xff] }
  0x76   :  { %v761_v55 = vadd.f32 %v745_v53, %v688_v16  ;;  %v762_v22 = vadd.f32 %v746_v62, %v689_v19  ;;  %v763_v61 = vadd.f32 %v747_v20, %v690_v30  ;;  %v764_v49 = vadd.f32 %v748_v37, %v691_v51  ;;  %v2022_v16 = vld [vmem:[%s3589_s0 + $0x1b8] ss:$8 sps:$4 sm:$0xff]   ;;  %v2024_v19 = vld [vmem:[%s3589_s0 + $0x1c8] ss:$8 sps:$4 sm:$0xff]  }
  0x77   :  { %v765_v57 = vadd.f32 %v749_v29, %v692_v17  ;;  %v766_v35 = vadd.f32 %v750_v44, %v693_v43  ;;  %v3090_v9 = vadd.f32 %v751_v58, %v694_v21  ;;  %v3092_v14 = vadd.f32 %v752_v33, %v695_v2  ;;  %v2026_v30 = vld [vmem:[%s3589_s0 + $0x1d8] ss:$8 sps:$4 sm:$0xff]   ;;  %v2028_v51 = vld [vmem:[%s3589_s0 + $0x1e8] ss:$8 sps:$4 sm:$0xff]  }
  0x78   :  { %v3094_v27 = vadd.f32 %v753_v32, %v696_v5  ;;  %v3096_v1 = vadd.f32 %v754_v10, %v697_v52  ;;  %v788_v17 = vunpack.c.l.bf16 %v2014_v48  ;;  %v789_v43 = vunpack.c.h.bf16 %v2014_v48 }
  0x79   :  { %v790_v21 = vunpack.c.l.bf16 %v2016_v40  ;;  %v791_v2 = vunpack.c.h.bf16 %v2016_v40  ;;  %v792_v5 = vunpack.c.l.bf16 %v2018_v4  ;;  %v793_v52 = vunpack.c.h.bf16 %v2018_v4 }
  0x7a   :  { %v794_v31 = vunpack.c.l.bf16 %v2020_v41  ;;  %v795_v60 = vunpack.c.h.bf16 %v2020_v41  ;;  %v796_v36 = vunpack.c.l.bf16 %v2022_v16  ;;  %v797_v13 = vunpack.c.h.bf16 %v2022_v16 }
  0x7b   :  { %v798_v0 = vunpack.c.l.bf16 %v2024_v19  ;;  %v799_v53 = vunpack.c.h.bf16 %v2024_v19  ;;  %v800_v62 = vunpack.c.l.bf16 %v2026_v30  ;;  %v801_v20 = vunpack.c.h.bf16 %v2026_v30  ;;  %v2032_v30 = vld [vmem:[%s3589_s0 + $0xe4] sm:$0x1] }
  0x7c   :  { %v802_v37 = vunpack.c.l.bf16 %v2028_v51  ;;  %v803_v29 = vunpack.c.h.bf16 %v2028_v51  ;;  %v812_v44 = vmul.f32 %v2031_v59, %v788_v17  ;;  %v813_v48 = vmul.f32 %v2031_v59, %v789_v43 }
  0x7d   :  { %v814_v58 = vmul.f32 %v2031_v59, %v790_v21  ;;  %v815_v40 = vmul.f32 %v2031_v59, %v791_v2  ;;  %v816_v33 = vmul.f32 %v2031_v59, %v792_v5  ;;  %v817_v32 = vmul.f32 %v2031_v59, %v793_v52  ;;  %v2033_v2 = vld [vmem:[%s3589_s0 + $0xec] sm:$0x1]  ;;  %v2034_v5 = vld [vmem:[%s3589_s0 + $0xf4] sm:$0x1]  ;;  %v2035_v52 = vld [vmem:[%s3589_s0 + $0xfc] sm:$0x1] }
  0x7e   :  { %v818_v10 = vmul.f32 %v2031_v59, %v794_v31  ;;  %v819_v4 = vmul.f32 %v2031_v59, %v795_v60  ;;  %v820_v41 = vmul.f32 %v2031_v59, %v796_v36  ;;  %v821_v12 = vmul.f32 %v2031_v59, %v797_v13  ;;  %v2036_v31 = vld [vmem:[%s3589_s0 + $0x104] sm:$0x1]  ;;  %v2037_v60 = vld [vmem:[%s3589_s0 + $0x10c] sm:$0x1]  ;;  %v2039_v36 = vld [vmem:[%s3589_s0 + $0x11c] sm:$0x1] }
  0x7f   :  { %v822_v8 = vmul.f32 %v2031_v59, %v798_v0  ;;  %v823_v18 = vmul.f32 %v2031_v59, %v799_v53  ;;  %v824_v63 = vmul.f32 %v2031_v59, %v800_v62  ;;  %v825_v16 = vmul.f32 %v2031_v59, %v801_v20  ;;  %v2040_v13 = vld [vmem:[%s3589_s0 + $0x204] sm:$0x1]  ;;  %v2041_v0 = vld [vmem:[%s3589_s0 + $0x20c] sm:$0x1] }
  0x80   :  { %v826_v24 = vmul.f32 %v2031_v59, %v802_v37  ;;  %v827_v19 = vmul.f32 %v2031_v59, %v803_v29  ;;  %v3116_v51 = vadd.f32 %v812_v44, %v755_v38  ;;  %v3118_v17 = vadd.f32 %v813_v48, %v756_v23  ;;  %v2038_v59 = vld [vmem:[%s3589_s0 + $0x114] sm:$0x1]  ;;  %v2049_v44 = vld [vmem:[%s3590_s1 + $0x8] ss:$0 sm:$0xff] }
  0x81   :  { %v3120_v43 = vadd.f32 %v814_v58, %v757_v3  ;;  %v3122_v21 = vadd.f32 %v815_v40, %v758_v6  ;;  %v3133_v38 = vadd.f32 %v816_v33, %v759_v50  ;;  %v3135_v23 = vadd.f32 %v817_v32, %v760_v54 }
  0x82   :  { %v3137_v3 = vadd.f32 %v818_v10, %v761_v55  ;;  %v3139_v6 = vadd.f32 %v819_v4, %v762_v22  ;;  %v3150_v50 = vadd.f32 %v820_v41, %v763_v61  ;;  %v3152_v54 = vadd.f32 %v821_v12, %v764_v49  ;;  %v2042_v49 = vld [vmem:[%s3589_s0 + $0x214] sm:$0x1]  ;;  %v2043_v12 = vld [vmem:[%s3589_s0 + $0x21c] sm:$0x1] }
  0x83   :  { %v3154_v55 = vadd.f32 %v822_v8, %v765_v57  ;;  %v3156_v22 = vadd.f32 %v823_v18, %v766_v35  ;;  %v3168_v61 = vadd.f32 %v824_v63, %v3090_v9  ;;  %v3171_v8 = vadd.f32 %v825_v16, %v3092_v14  ;;  %v2044_v63 = vld [vmem:[%s3589_s0 + $0x224] sm:$0x1]  ;;  %v2046_v35 = vld [vmem:[%s3589_s0 + $0x234] sm:$0x1]  ;;  %v2047_v9 = vld [vmem:[%s3589_s0 + $0x23c] sm:$0x1] }
  0x84   :  { %v3174_v18 = vadd.f32 %v826_v24, %v3094_v27  ;;  %v3177_v57 = vadd.f32 %v827_v19, %v3096_v1  ;;  %v2045_v24 = vld [vmem:[%s3589_s0 + $0x22c] sm:$0x1]  ;;  %v860_v14 = vunpack.c.l.bf16 %v2032_v30  ;;  %v861_v27 = vunpack.c.l.bf16 %v2033_v2 }
  0x85   :  { %3659 = vst [vmem:[#allocation2_spill] sm:$0xff] %v3171_v8  ;;  %v862_v1 = vunpack.c.l.bf16 %v2034_v5  ;;  %v863_v53 = vunpack.c.l.bf16 %v2035_v52  ;;  %v864_v62 = vunpack.c.l.bf16 %v2036_v31  ;;  %v865_v20 = vunpack.c.l.bf16 %v2037_v60 }
  0x86   :  { %3660 = vst [vmem:[#allocation3_spill] sm:$0xff] %v3174_v18  ;;  %3661 = vst [vmem:[#allocation4_spill] sm:$0xff] %v3177_v57  ;;  %v866_v37 = vunpack.c.l.bf16 %v2038_v59  ;;  %v867_v29 = vunpack.c.l.bf16 %v2039_v36  ;;  %v868_v48 = vunpack.c.l.bf16 %v2040_v13  ;;  %v869_v58 = vunpack.c.l.bf16 %v2041_v0 }
  0x87   :  { %v870_v40 = vunpack.c.l.bf16 %v2042_v49  ;;  %v871_v33 = vunpack.c.l.bf16 %v2043_v12  ;;  %v872_v32 = vunpack.c.l.bf16 %v2044_v63  ;;  %v873_v10 = vunpack.c.l.bf16 %v2045_v24 }
  0x88   :  { %v874_v4 = vunpack.c.l.bf16 %v2046_v35  ;;  %v875_v41 = vunpack.c.l.bf16 %v2047_v9  ;;  %v884_v16 = vmul.f32 %v2049_v44, %v715_v39  ;;  %v885_v19 = vmul.f32 %v2049_v44, %v860_v14 }
  0x89   :  { %v886_v30 = vmul.f32 %v2049_v44, %v716_v34  ;;  %v887_v2 = vmul.f32 %v2049_v44, %v861_v27  ;;  %v888_v5 = vmul.f32 %v2049_v44, %v717_v25  ;;  %v889_v52 = vmul.f32 %v2049_v44, %v862_v1 }
  0x8a   :  { %v890_v31 = vmul.f32 %v2049_v44, %v718_v7  ;;  %v891_v60 = vmul.f32 %v2049_v44, %v863_v53  ;;  %v892_v59 = vmul.f32 %v2049_v44, %v719_v15  ;;  %v893_v36 = vmul.f32 %v2049_v44, %v864_v62 }
  0x8b   :  { %v3662_v13 = vunpack.c.h.bf16 %v2996_v46  ;;  %v895_v0 = vmul.f32 %v2049_v44, %v865_v20  ;;  %v3663_v56 = vunpack.c.l.bf16 %v3001_v47  ;;  %v897_v49 = vmul.f32 %v2049_v44, %v866_v37 }
  0x8c   :  { %v3664_v12 = vunpack.c.h.bf16 %v3001_v47  ;;  %v899_v63 = vmul.f32 %v2049_v44, %v867_v29  ;;  %v3665_v28 = vunpack.c.l.bf16 %v3010_v11  ;;  %v901_v24 = vmul.f32 %v2049_v44, %v868_v48 }
  0x8d   :  { %v894_v39 = vmul.f32 %v2049_v44, %v3662_v13  ;;  %v896_v34 = vmul.f32 %v2049_v44, %v3663_v56  ;;  %v3666_v35 = vunpack.c.h.bf16 %v3010_v11  ;;  %v903_v9 = vmul.f32 %v2049_v44, %v869_v58 }
  0x8e   :  { %v898_v25 = vmul.f32 %v2049_v44, %v3664_v12  ;;  %v900_v7 = vmul.f32 %v2049_v44, %v3665_v28  ;;  %v3667_v46 = vunpack.c.l.bf16 %v3015_v26  ;;  %v905_v27 = vmul.f32 %v2049_v44, %v870_v40 }
  0x8f   :  { %v902_v15 = vmul.f32 %v2049_v44, %v3666_v35  ;;  %v3668_v1 = vunpack.c.h.bf16 %v3015_v26  ;;  %v907_v62 = vmul.f32 %v2049_v44, %v871_v33  ;;  %v3669_v47 = vunpack.c.l.bf16 %v3020_v45 }
  0x90   :  { %v904_v14 = vmul.f32 %v2049_v44, %v3667_v46  ;;  %v3228_v37 = vmul.f32 %v2049_v44, %v872_v32  ;;  %v3670_v29 = vunpack.c.h.bf16 %v3020_v45  ;;  %v3234_v11 = vmul.f32 %v2049_v44, %v873_v10 }
  0x91   :  { %v906_v53 = vmul.f32 %v2049_v44, %v3668_v1  ;;  %v3226_v20 = vmul.f32 %v2049_v44, %v3669_v47  ;;  %v3671_v58 = vunpack.c.l.bf16 %v3025_v42  ;;  %v3240_v40 = vmul.f32 %v2049_v44, %v874_v4 }
  0x92   :  { %v3232_v48 = vmul.f32 %v2049_v44, %v3670_v29  ;;  %v3672_v26 = vunpack.c.h.bf16 %v3025_v42  ;;  %v3246_v56 = vmul.f32 %v2049_v44, %v875_v41  ;;  %v948_v32 = vrot.slane %v884_v16, 1 }
  0x93   :  { %v3238_v13 = vmul.f32 %v2049_v44, %v3671_v58  ;;  %v949_v12 = vrot.slane %v885_v19, 1  ;;  %v951_v28 = vrot.slane %v886_v30, 1  ;;  %v952_v45 = vrot.slane %v887_v2, 1 }
  0x94   :  { %v3244_v33 = vmul.f32 %v2049_v44, %v3672_v26  ;;  %v954_v35 = vrot.slane %v888_v5, 1  ;;  %v955_v46 = vrot.slane %v889_v52, 1  ;;  %v957_v10 = vrot.slane %v890_v31, 1 }
  0x95   :  { %v958_v1 = vrot.slane %v891_v60, 1  ;;  %v960_v47 = vrot.slane %v892_v59, 1  ;;  %v961_v29 = vrot.slane %v893_v36, 1  ;;  %v963_v58 = vrot.slane %v894_v39, 1 }
  0x96   :  { %v964_v57 = vrot.slane %v895_v0, 1  ;;  %v966_v4 = vrot.slane %v896_v34, 1  ;;  %v967_v18 = vrot.slane %v897_v49, 1  ;;  %v969_v8 = vrot.slane %v898_v25, 1 }
  0x97   :  { %v970_v42 = vrot.slane %v899_v63, 1  ;;  %v950_v26 = vsel %vm288_vm1, %v948_v32, %v949_v12  ;;  %v953_v44 = vsel %vm288_vm1, %v951_v28, %v952_v45  ;;  %v972_v41 = vrot.slane %v900_v7, 1 }
  0x98   :  { %v973_v16 = vrot.slane %v901_v24, 1  ;;  %v956_v19 = vsel %vm288_vm1, %v954_v35, %v955_v46  ;;  %v959_v30 = vsel %vm288_vm1, %v957_v10, %v958_v1  ;;  %v975_v2 = vrot.slane %v902_v15, 1 }
  0x99   :  { %v976_v5 = vrot.slane %v903_v9, 1  ;;  %v962_v52 = vsel %vm288_vm1, %v960_v47, %v961_v29  ;;  %v965_v31 = vsel %vm288_vm1, %v963_v58, %v964_v57  ;;  %v978_v60 = vrot.slane %v904_v14, 1 }
  0x9a   :  { %v979_v59 = vrot.slane %v905_v27, 1  ;;  %v968_v36 = vsel %vm288_vm1, %v966_v4, %v967_v18  ;;  %v971_v39 = vsel %vm288_vm1, %v969_v8, %v970_v42  ;;  %v981_v0 = vrot.slane %v906_v53, 1  ;;  %v2050_v8 = vld [vmem:[%s3591_s2] ss:$0 sm:$0xff] }
  0x9b   :  { %v982_v34 = vrot.slane %v907_v62, 1  ;;  %v974_v49 = vsel %vm288_vm1, %v972_v41, %v973_v16  ;;  %v1012_v25 = vadd.f32 %v950_v26, %v3116_v51  ;;  %v1013_v63 = vadd.f32 %v953_v44, %v3118_v17  ;;  %v3673_v4 = vld [vmem:[#allocation2_spill] sm:$0xff]  ;;  %v3674_v41 = vld [vmem:[#allocation3_spill] sm:$0xff] }
  0x9c   :  { %v1014_v7 = vadd.f32 %v956_v19, %v3120_v43  ;;  %v977_v24 = vsel %vm288_vm1, %v975_v2, %v976_v5  ;;  %v984_v57 = vrot.slane %v3226_v20, 1  ;;  %v985_v15 = vrot.slane %v3228_v37, 1 }
  0x9d   :  { %v1015_v18 = vadd.f32 %v959_v30, %v3122_v21  ;;  %v980_v9 = vsel %vm288_vm1, %v978_v60, %v979_v59  ;;  %v987_v51 = vrot.slane %v3232_v48, 1  ;;  %v988_v17 = vrot.slane %v3234_v11, 1 }
  0x9e   :  { %v1016_v43 = vadd.f32 %v962_v52, %v3133_v38  ;;  %v983_v14 = vsel %vm288_vm1, %v981_v0, %v982_v34  ;;  %v990_v27 = vrot.slane %v3238_v13, 1  ;;  %v991_v53 = vrot.slane %v3240_v40, 1 }
  0x9f   :  { %v1017_v21 = vadd.f32 %v965_v31, %v3135_v23  ;;  %v1018_v62 = vadd.f32 %v968_v36, %v3137_v3  ;;  %v3276_v20 = vadd.f32 %v2050_v8, %v1012_v25  ;;  %v3278_v37 = vadd.f32 %v2050_v8, %v1013_v63 }
  0xa0   :  { %v3280_v32 = vadd.f32 %v2050_v8, %v1014_v7  ;;  %v993_v48 = vrot.slane %v3244_v33, 1  ;;  %v994_v38 = vrot.slane %v3246_v56, 1  ;;  %v1019_v11 = vadd.f32 %v971_v39, %v3139_v6 }
  0xa1   :  { %v3285_v12 = vadd.f32 %v2050_v8, %v1015_v18  ;;  %v986_v13 = vsel %vm288_vm1, %v984_v57, %v985_v15  ;;  %v989_v23 = vsel %vm288_vm1, %v987_v51, %v988_v17  ;;  %v1020_v3 = vadd.f32 %v974_v49, %v3150_v50 }
  0xa2   :  { %v3290_v40 = vadd.f32 %v2050_v8, %v1016_v43  ;;  %v992_v28 = vsel %vm288_vm1, %v990_v27, %v991_v53  ;;  %v1021_v45 = vadd.f32 %v977_v24, %v3152_v54  ;;  %v1022_v33 = vadd.f32 %v980_v9, %v3154_v55 }
  0xa3   :  { %v3295_v35 = vadd.f32 %v2050_v8, %v1017_v21  ;;  %v3297_v56 = vadd.f32 %v2050_v8, %v1018_v62  ;;  %v2051_v6 = vmul.f32 -1.442695, %v3276_v20  ;;  %v2052_v46 = vmul.f32 -1.442695, %v3278_v37 }
  0xa4   :  { %v2053_v10 = vmul.f32 -1.442695, %v3280_v32  ;;  %v995_v50 = vsel %vm288_vm1, %v993_v48, %v994_v38  ;;  %v1023_v1 = vadd.f32 %v983_v14, %v3156_v22  ;;  %v3304_v47 = vadd.f32 %v2050_v8, %v1019_v11 }
  0xa5   :  { %v2054_v54 = vmul.f32 -1.442695, %v3285_v12  ;;  %v1024_v55 = vadd.f32 %v986_v13, %v3168_v61  ;;  %v3308_v29 = vadd.f32 %v2050_v8, %v1020_v3  ;;  %2222 = vpow2.f32 %v2051_v6  ;;  %v3675_v61 = vld [vmem:[#allocation4_spill] sm:$0xff] }
  0xa6   :  { %v2055_v58 = vmul.f32 -1.442695, %v3290_v40  ;;  %v1025_v42 = vadd.f32 %v989_v23, %v3673_v4  ;;  %v3312_v26 = vadd.f32 %v2050_v8, %v1021_v45  ;;  %2224 = vpow2.f32 %v2052_v46 }
  0xa7   :  { %v2056_v44 = vmul.f32 -1.442695, %v3295_v35  ;;  %v1026_v22 = vadd.f32 %v992_v28, %v3674_v41  ;;  %v3316_v16 = vadd.f32 %v2050_v8, %v1022_v33  ;;  %2226 = vpow2.f32 %v2053_v10 }
  0xa8   :  { %v2057_v19 = vmul.f32 -1.442695, %v3297_v56  ;;  %v1027_v30 = vadd.f32 %v995_v50, %v3675_v61  ;;  %v3320_v2 = vadd.f32 %v2050_v8, %v1023_v1  ;;  %2228 = vpow2.f32 %v2054_v54 }
  0xa9   :  { %v2058_v5 = vmul.f32 -1.442695, %v3304_v47  ;;  %v3323_v52 = vadd.f32 %v2050_v8, %v1024_v55  ;;  %2230 = vpow2.f32 %v2055_v58  ;;  %v2059_v31 = vmul.f32 -1.442695, %v3308_v29 }
  0xaa   :  { %v3326_v60 = vadd.f32 %v2050_v8, %v1025_v42  ;;  %2232 = vpow2.f32 %v2056_v44  ;;  %v2060_v59 = vmul.f32 -1.442695, %v3312_v26  ;;  %v3329_v36 = vadd.f32 %v2050_v8, %v1026_v22 }
  0xab   :  { %2234 = vpow2.f32 %v2057_v19  ;;  %v2061_v39 = vmul.f32 -1.442695, %v3316_v16  ;;  %v3332_v0 = vadd.f32 %v2050_v8, %v1027_v30  ;;  %v2062_v34 = vmul.f32 -1.442695, %v3320_v2 }
  0xac   :  { %2236 = vpow2.f32 %v2058_v5  ;;  %v2063_v49 = vmul.f32 -1.442695, %v3323_v52  ;;  %v2064_v25 = vmul.f32 -1.442695, %v3326_v60  ;;  %v2065_v7 = vmul.f32 -1.442695, %v3329_v36 }
  0xad   :  { %2238 = vpow2.f32 %v2059_v31  ;;  %v2066_v57 = vmul.f32 -1.442695, %v3332_v0  ;;  %vm1899_vm8 = vcmask 517120  }
  0xae   :  { %2240 = vpow2.f32 %v2060_v59 }
  0xaf   :  { %v2223_v63 = vpop.eup %2222  ;;  %2242 = vpow2.f32 %v2061_v39 }
  0xb0   :  { %v2225_v24 = vpop.eup %2224  ;;  %2244 = vpow2.f32 %v2062_v34  ;;  %v1099_v18 = vadd.f32 1.0, %v2223_v63 }
  0xb1   :  { %v2227_v15 = vpop.eup %2226  ;;  %2246 = vpow2.f32 %v2063_v49  ;;  %v1100_v9 = vadd.f32 1.0, %v2225_v24 }
  0xb2   :  { %v2229_v8 = vpop.eup %2228  ;;  %2248 = vpow2.f32 %v2064_v25  ;;  %v1101_v17 = vadd.f32 1.0, %v2227_v15 }
  0xb3   :  { %v2231_v51 = vpop.eup %2230  ;;  %2250 = vpow2.f32 %v2065_v7  ;;  %v1102_v14 = vadd.f32 1.0, %v2229_v8 }
  0xb4   :  { %v2233_v43 = vpop.eup %2232  ;;  %2252 = vpow2.f32 %v2066_v57  ;;  %v1103_v53 = vadd.f32 1.0, %v2231_v51 }
  0xb5   :  { %v2235_v27 = vpop.eup %2234  ;;  %2254 = vrcp.f32 %v1099_v18  ;;  %v1104_v62 = vadd.f32 1.0, %v2233_v43 }
  0xb6   :  { %v2237_v21 = vpop.eup %2236  ;;  %2256 = vrcp.f32 %v1100_v9  ;;  %v1105_v38 = vadd.f32 1.0, %v2235_v27 }
  0xb7   :  { %v2239_v48 = vpop.eup %2238  ;;  %2258 = vrcp.f32 %v1101_v17  ;;  %v1106_v13 = vadd.f32 1.0, %v2237_v21 }
  0xb8   :  { %v2241_v11 = vpop.eup %2240  ;;  %2260 = vrcp.f32 %v1102_v14  ;;  %v1107_v3 = vadd.f32 1.0, %v2239_v48 }
  0xb9   :  { %v2243_v23 = vpop.eup %2242  ;;  %2262 = vrcp.f32 %v1103_v53  ;;  %v1108_v45 = vadd.f32 1.0, %v2241_v11 }
  0xba   :  { %v2245_v28 = vpop.eup %2244  ;;  %2264 = vrcp.f32 %v1104_v62  ;;  %v1109_v6 = vadd.f32 1.0, %v2243_v23 }
  0xbb   :  { %v2247_v33 = vpop.eup %2246  ;;  %2266 = vrcp.f32 %v1105_v38  ;;  %v1110_v10 = vadd.f32 1.0, %v2245_v28 }
  0xbc   :  { %v2249_v46 = vpop.eup %2248  ;;  %2268 = vrcp.f32 %v1106_v13  ;;  %v1111_v1 = vadd.f32 1.0, %v2247_v33 }
  0xbd   :  { %v2251_v50 = vpop.eup %2250  ;;  %2270 = vrcp.f32 %v1107_v3  ;;  %v1112_v55 = vadd.f32 1.0, %v2249_v46 }
  0xbe   :  { %v2253_v54 = vpop.eup %2252  ;;  %2272 = vrcp.f32 %v1108_v45  ;;  %v1113_v4 = vadd.f32 1.0, %v2251_v50 }
  0xbf   :  { %v2255_v58 = vpop.eup %2254  ;;  %2274 = vrcp.f32 %v1109_v6  ;;  %v1114_v44 = vadd.f32 1.0, %v2253_v54 }
  0xc0   :  { %v2257_v42 = vpop.eup %2256  ;;  %2276 = vrcp.f32 %v1110_v10  ;;  %v3340_v41 = vmul.f32 %v2255_v58, %v3276_v20 }
  0xc1   :  { %v2259_v22 = vpop.eup %2258  ;;  %2278 = vrcp.f32 %v1111_v1  ;;  %v3343_v19 = vmul.f32 %v2257_v42, %v3278_v37 }
  0xc2   :  { %v2261_v61 = vpop.eup %2260  ;;  %2280 = vrcp.f32 %v1112_v55  ;;  %v3346_v30 = vmul.f32 %v2259_v22, %v3280_v32  ;;  %v1164_v5 = vsel %vm1163_vm2, %v3340_v41, 0.0 }
  0xc3   :  { %v2263_v31 = vpop.eup %2262  ;;  %2282 = vrcp.f32 %v1113_v4  ;;  %v3351_v59 = vmul.f32 %v2261_v61, %v3285_v12  ;;  %v1165_v20 = vsel %vm1163_vm2, %v3343_v19, 0.0 }
  0xc4   :  { %v2265_v39 = vpop.eup %2264  ;;  %2284 = vrcp.f32 %v1114_v44  ;;  %v3356_v37 = vmul.f32 %v2263_v31, %v3290_v40  ;;  %v1166_v34 = vadd.f32 %v1165_v20, %v1164_v5  ;;  %v1167_v32 = vsel %vm1163_vm2, %v3346_v30, 0.0 }
  0xc5   :  { %v2267_v49 = vpop.eup %2266  ;;  %v3361_v25 = vmul.f32 %v2265_v39, %v3295_v35  ;;  %v1169_v12 = vsel %vm1163_vm2, %v3351_v59, 0.0 }
  0xc6   :  { %v2269_v63 = vpop.eup %2268  ;;  %v1168_v7 = vadd.f32 %v1167_v32, %v1166_v34  ;;  %v3366_v57 = vmul.f32 %v2267_v49, %v3297_v56  ;;  %v1171_v40 = vsel %vm1163_vm2, %v3356_v37, 0.0 }
  0xc7   :  { %v2271_v24 = vpop.eup %2270  ;;  %v3374_v35 = vmul.f32 %v2269_v63, %v3304_v47  ;;  %v1173_v17 = vsel %vm1163_vm2, %v3361_v25, 0.0 }
  0xc8   :  { %v2273_v15 = vpop.eup %2272  ;;  %v3371_v18 = vmul.f32 %v2271_v24, %v3308_v29  ;;  %v1170_v8 = vadd.f32 %v1169_v12, %v1168_v7  ;;  %v1175_v47 = vsel %vm1163_vm2, %v3366_v57, 0.0 }
  0xc9   :  { %v2275_v9 = vpop.eup %2274  ;;  %v3377_v51 = vmul.f32 %v2273_v15, %v3312_v26 }
  0xca   :  { %v2277_v56 = vpop.eup %2276  ;;  %v3382_v43 = vmul.f32 %v2275_v9, %v3316_v16  ;;  %v1172_v14 = vadd.f32 %v1171_v40, %v1170_v8  ;;  %v1185_v29 = vsel %vm1163_vm2, %v3371_v18, 0.0  ;;  %v1307_v9 = vld [vmem:[%s3592_s5] sm:$0x3] }
  0xcb   :  { %v2279_v27 = vpop.eup %2278  ;;  %v3387_v53 = vmul.f32 %v2277_v56, %v3320_v2  ;;  %v1186_v26 = vsel %vm1163_vm2, %v3377_v51, 0.0  ;;  %v1177_v2 = vsel %vm1163_vm2, %v3374_v35, 0.0  ;;  %v2067_v56 = vld [vmem:[%s3593_s4] ss:$0 sm:$0xff] }
  0xcc   :  { %v2281_v21 = vpop.eup %2280  ;;  %v3394_v62 = vmul.f32 %v2279_v27, %v3323_v52  ;;  %v1174_v16 = vadd.f32 %v1173_v17, %v1172_v14  ;;  %v1187_v48 = vadd.f32 %v1186_v26, %v1185_v29  ;;  %v1188_v38 = vsel %vm1163_vm2, %v3382_v43, 0.0 }
  0xcd   :  { %v2283_v11 = vpop.eup %2282  ;;  %v3399_v13 = vmul.f32 %v2281_v21, %v3326_v60  ;;  %v1190_v23 = vsel %vm1163_vm2, %v3387_v53, 0.0  ;;  %v1321_v17 = vsel %vm1319_vm4, %v1307_v9, 0 }
  0xce   :  { %v2285_v3 = vpop.eup %2284  ;;  %v1176_v28 = vadd.f32 %v1175_v47, %v1174_v16  ;;  %v1189_v45 = vadd.f32 %v1188_v38, %v1187_v48  ;;  %v3406_v52 = vmul.f32 %v2283_v11, %v3329_v36  ;;  %v1192_v33 = vsel %vm1163_vm2, %v3394_v62, 0.0  ;;  %2159 = vmatpush3.bf16.msra.mxu1 %v1321_v17 }
  0xcf   :  { %v3411_v60 = vmul.f32 %v2285_v3, %v3332_v0  ;;  %v1194_v10 = vsel %vm1163_vm2, %v3399_v13, 0.0  ;;  %v2217_v3 = vld [vmem:[%s3594_s7 + $0x8] sm:$0xff]  }
  0xd0   :  { %v1178_v6 = vadd.f32 %v1177_v2, %v1176_v28  ;;  %v1191_v46 = vadd.f32 %v1190_v23, %v1189_v45  ;;  %v1196_v54 = vsel %vm1163_vm2, %v3406_v52, 0.0  ;;  %v2216_v23 = vld [vmem:[%s3594_s7] sm:$0xff]   ;;  %v2218_v28 = vld [vmem:[%s3594_s7 + $0x10] sm:$0xff]   ;;  %v2219_v45 = vld [vmem:[%s3594_s7 + $0x18] sm:$0xff]  }
  0xd1   :  { %v1198_v36 = vsel %vm1163_vm2, %v3411_v60, 0.0  ;;  %2164 = vmatprep.subr.bf16.mxu1 %v2216_v23 }
  0xd2   :  { %v1179_v50 = vrot.slane %v1178_v6, 4  ;;  %v1193_v1 = vadd.f32 %v1192_v33, %v1191_v46  ;;  %v2074_v33 = vld [vmem:[%s3595_s6] ss:$0 sm:$0xff] }
  0xd4   :  { %v1180_v55 = vadd.f32 %v1179_v50, %v1178_v6  ;;  %v1195_v58 = vadd.f32 %v1194_v10, %v1193_v1 }
  0xd6   :  { %v1181_v4 = vrot.slane %v1180_v55, 2  ;;  %v1197_v42 = vadd.f32 %v1196_v54, %v1195_v58 }
  0xd8   :  { %v1182_v44 = vadd.f32 %v1181_v4, %v1180_v55  ;;  %v1199_v22 = vadd.f32 %v1198_v36, %v1197_v42  ;;  %v2360_v36 = vmov 1966171168   ;;  %v1373_v42 = vlaneseq }
  0xd9   :  { %v1371_v4 = vunpack.c.l.s4 %v2360_v36 }
  0xda   :  { %v1183_v61 = vrot.slane %v1182_v44, 1  ;;  %v1200_v0 = vrot.slane %v1199_v22, 4 }
  0xdc   :  { %v1184_v5 = vadd.f32 %v1183_v61, %v1182_v44  ;;  %v1201_v31 = vadd.f32 %v1200_v0, %v1199_v22  ;;  %v1372_v44 = vunpack.c.0.s8 %v1371_v4  ;;  %v1374_v22 = vshrl.u32 %v1373_v42, 7 }
  0xde   :  { %v1202_v20 = vrot.slane %v1201_v31, 2  ;;  %v1206_v34 = vmul.f32 0.015625, %v1184_v5  ;;  %v1375_v61 = vsub.s32 %v1372_v44, %v1374_v22 }
  0xe0   :  { %v1203_v39 = vadd.f32 %v1202_v20, %v1201_v31  ;;  %v1208_v12 = vpack.c.bf16 %v1206_v34, %v1206_v34  ;;  %v1394_v31 = vsub.s32 0, %v1374_v22 }
  0xe2   :  { %v1204_v32 = vrot.slane %v1203_v39, 1  ;;  %v1227_v24 = vunpack.c.l.b16 %v1208_v12 }
  0xe4   :  { %v1205_v49 = vadd.f32 %v1204_v32, %v1203_v39 }
  0xe6   :  { %v1207_v63 = vmul.f32 0.015625, %v1205_v49 }
  0xe8   :  { %v1209_v7 = vpack.c.bf16 %v1207_v63, %v1207_v63 }
  0xea   :  { %v1228_v40 = vunpack.c.l.b16 %v1209_v7 }
  0xec   :  { %v1230_v15 = vsel %vm1229_vm3, %v1228_v40, %v1227_v24 }
  0xed   :  { %v1231_v8 = vpack.c.b16 %v1230_v15, %v1230_v15 }
  0xef   :  { %2155 = vmatmul.mubr.msk.bf16.vlgmr.msra.gmra.mrb[0].mxu0 %vm1163_vm2, %v1231_v8 }
 0x1c2   :  { %v1293_v14 = vpop.f32.mrb[0].mxu0 }
 0x1c3   :  { %v1294_v29 = vadd.f32 %v2067_v56, %v1293_v14  ;;  %v2156_v27 = vpop.f32.mrb[1].mxu0 }
 0x1c4   :  { %v1296_v47 = vpop.f32.mrb[2].mxu0 }
 0x1c5   :  { %v2073_v26 = vmul.f32 -1.442695, %v1294_v29  ;;  %v2157_v21 = vpop.f32.mrb[3].mxu0 }
 0x1c7   :  { %2286 = vpow2.f32 %v2073_v26 }
 0x1d1   :  { %v2287_v16 = vpop.eup %2286 }
 0x1d2   :  { %v1302_v48 = vadd.f32 1.0, %v2287_v16 }
 0x1d4   :  { %2288 = vrcp.f32 %v1302_v48 }
 0x1de   :  { %v2289_v38 = vpop.eup %2288 }
 0x1df   :  { %v1305_v11 = vmul.f32 %v2289_v38, %v1294_v29 }
 0x1e1   :  { %v1306_v2 = vpack.c.bf16 %v1305_v11, %v1305_v11 }
 0x1e3   :  { %2161 = vmatmul.mubr.msk.bf16.vlgmr.msra.gmra.mrb[0].mxu1 %vm1315_vm5, %v1306_v2 }
 0x1e4   :  { %2165 = vmatpush3.bf16.msra.mxu1 %v2216_v23 }
 0x1e5   :  { %2166 = vmatprep.subr.bf16.mxu1 %v2217_v3 }
 0x1e8   :  { %2167 = vmatpush3.bf16.msra.mxu1 %v2217_v3 }
 0x1e9   :  { %2168 = vmatprep.subr.bf16.mxu1 %v2218_v28 }
 0x1ec   :  { %2169 = vmatpush3.bf16.msra.mxu1 %v2218_v28 }
 0x1ed   :  { %2170 = vmatprep.subr.bf16.mxu1 %v2219_v45 }
 0x1f0   :  { %2171 = vmatpush3.bf16.msra.mxu1 %v2219_v45 }
 0x2b6   :  { %v1357_v6 = vpop.f32.mrb[0].mxu1 }
 0x2b7   :  { %v1358_v46 = vadd.f32 %v2074_v33, %v1357_v6  ;;  %v2162_v10 = vpop.f32.mrb[1].mxu1 }
 0x2b8   :  { %v1360_v50 = vpop.f32.mrb[2].mxu1 }
 0x2b9   :  { %v2076_v1 = vmul.f32 -1.442695, %v1358_v46  ;;  %v2163_v54 = vpop.f32.mrb[3].mxu1 }
 0x2bb   :  { %2290 = vpow2.f32 %v2076_v1 }
 0x2c5   :  { %v2291_v55 = vpop.eup %2290 }
 0x2c6   :  { %v1366_v58 = vadd.f32 1.0, %v2291_v55 }
 0x2c8   :  { %2292 = vrcp.f32 %v1366_v58 }
 0x2d2   :  { %v2293_v0 = vpop.eup %2292 }
 0x2d3   :  { %v1376_v5 = vrot.slane %v2293_v0, %v1375_v61 }
 0x2d5   :  { %v1377_v20 = vcombine.high %v1376_v5, %v1376_v5  ;;  %v1384_v39 = vrot.slane %v1376_v5, %v1375_v61 }
 0x2d7   :  { %v1395_v34 = vrot.slane %v1384_v39, %v1394_v31  ;;  %v1391_v32 = vrot.slane %v1377_v20, %v1375_v61 }
 0x2d9   :  { %v1402_v49 = vmul.f32 %v1395_v34, %v3340_v41  ;;  %v1403_v12 = vmul.f32 %v1395_v34, %v3343_v19  ;;  %v1404_v63 = vmul.f32 %v1395_v34, %v3346_v30  ;;  %v1405_v7 = vmul.f32 %v1395_v34, %v3351_v59 }
 0x2da   :  { %v1406_v24 = vmul.f32 %v1395_v34, %v3356_v37  ;;  %v1407_v40 = vmul.f32 %v1395_v34, %v3361_v25  ;;  %v1399_v9 = vrot.slane %v1391_v32, %v1394_v31  ;;  %v1408_v41 = vmul.f32 %v1395_v34, %v3366_v57 }
 0x2db   :  { %v1418_v15 = vpack.c.bf16 %v1403_v12, %v1402_v49  ;;  %v1419_v8 = vpack.c.bf16 %v1405_v7, %v1404_v63  ;;  %v1409_v19 = vmul.f32 %v1395_v34, %v3374_v35 }
 0x2dc   :  { %v1420_v17 = vpack.c.bf16 %v1407_v40, %v1406_v24  ;;  %v1410_v30 = vmul.f32 %v1399_v9, %v3371_v18  ;;  %v1411_v59 = vmul.f32 %v1399_v9, %v3377_v51  ;;  %v1412_v56 = vmul.f32 %v1399_v9, %v3382_v43  ;;  %v2220_v43 = vld [vmem:[%s3596_s9] sm:$0xff]  }
 0x2dd   :  { %2172 = vmatprep.mubr.msk.bf16.mxu1 %vm1163_vm2, %v1418_v15  ;;  %v1421_v37 = vpack.c.bf16 %v1409_v19, %v1408_v41  ;;  %v1413_v14 = vmul.f32 %v1399_v9, %v3387_v53  ;;  %v1414_v29 = vmul.f32 %v1399_v9, %v3394_v62  ;;  %v1415_v57 = vmul.f32 %v1399_v9, %v3399_v13  ;;  %v2221_v53 = vld [vmem:[%s3596_s9 + $0x8] ss:$0 sps:$4 sm:$0xff]   ;;  %v3486_v40 = vld [vmem:[%s3598_s10] ss:$0 sm:$0xff] }
 0x2de   :  { %2173 = vmatmul.mubr.msk.bf16.vlgmr.msra.gmra.mrb[4].mxu1 %vm1163_vm2, %v1419_v8  ;;  %v1422_v25 = vpack.c.bf16 %v1411_v59, %v1410_v30  ;;  %v1416_v18 = vmul.f32 %v1399_v9, %v3406_v52  ;;  %v1417_v51 = vmul.f32 %v1399_v9, %v3411_v60  ;;  %2188 = vmatprep.subr.bf16.mxu0 %v2220_v43  ;;  %v1640_v62 = vsel %vm1638_vm6, %v2221_v53, 0  ;;  %v2077_v52 = vld [vmem:[%s3597_s8] ss:$0 sm:$0xff] }
 0x2df   :  { %2176 = vmatprep.mubr.msk.bf16.mxu1 %vm1163_vm2, %v1420_v17  ;;  %v1423_v27 = vpack.c.bf16 %v1413_v14, %v1412_v56  ;;  %v1424_v35 = vpack.c.bf16 %v1415_v57, %v1414_v29  ;;  %2189 = vmatpush3.bf16.msra.mxu0 %v2220_v43 }
 0x2e0   :  { %v1425_v47 = vpack.c.bf16 %v1417_v51, %v1416_v18  ;;  %2208 = vmatprep.subr.msk.bf16.mxu0 %vm1638_vm6, %v2221_v53 }
 0x2e3   :  { %2191 = vmatpush3.bf16.msra.mxu0 %v1640_v62 }
 0x2e6   :  { %2177 = vmatmul.mubr.msk.bf16.gmra.mrb[8].mxu1 %vm1163_vm2, %v1421_v37 }
 0x2e7   :  { %2180 = vmatprep.mubr.msk.bf16.mxu1 %vm1163_vm2, %v1422_v25 }
 0x2ee   :  { %2181 = vmatmul.mubr.msk.bf16.gmra.mrb[12].mxu1 %vm1163_vm2, %v1423_v27 }
 0x2ef   :  { %2184 = vmatprep.mubr.msk.bf16.mxu1 %vm1163_vm2, %v1424_v35 }
 0x2f6   :  { %2185 = vmatmul.mubr.msk.bf16.gmra.mrb[16].mxu1 %vm1163_vm2, %v1425_v47 }
 0x3b1   :  { %v2174_v13 = vpop.f32.mrb[4].mxu1 }
 0x3b2   :  { %v1523_v60 = vpop.f32.mrb[5].mxu1  ;;  %v1532_v21 = vadd.f32 %v2174_v13, %v2077_v52 }
 0x3b3   :  { %v2175_v26 = vpop.f32.mrb[6].mxu1  ;;  %v1524_v38 = vadd.f32 %v2077_v52, %v1523_v60 }
 0x3b4   :  { %v1535_v16 = vadd.f32 %v2175_v26, %v2077_v52  ;;  %v1526_v48 = vpop.f32.mrb[7].mxu1 }
 0x3b5   :  { %v1527_v11 = vadd.f32 %v2077_v52, %v1526_v48 }
 0x3b6   :  { %v1587_v2 = vpack.c.bf16 %v1535_v16, %v1532_v21 }
 0x3b7   :  { %v1586_v23 = vpack.c.bf16 %v1527_v11, %v1524_v38 }
 0x3b9   :  { %v2178_v3 = vpop.f32.mrb[8].mxu1  ;;  %2192 = vmatprep.mubr.msk.bf16.mxu0 %vm1613_vm7, %v1586_v23 }
 0x3ba   :  { %v1539_v28 = vpop.f32.mrb[9].mxu1  ;;  %2193 = vmatmul.mubr.msk.bf16.vlgmr.msra.gmra.mrb[4].mxu0 %vm1613_vm7, %v1587_v2  ;;  %v1548_v33 = vadd.f32 %v2178_v3, %v2077_v52 }
 0x3bb   :  { %v2179_v45 = vpop.f32.mrb[10].mxu1  ;;  %v1540_v10 = vadd.f32 %v2077_v52, %v1539_v28 }
 0x3bc   :  { %v1551_v6 = vadd.f32 %v2179_v45, %v2077_v52  ;;  %v1542_v46 = vpop.f32.mrb[11].mxu1 }
 0x3bd   :  { %v1543_v50 = vadd.f32 %v2077_v52, %v1542_v46 }
 0x3be   :  { %v1589_v1 = vpack.c.bf16 %v1551_v6, %v1548_v33 }
 0x3bf   :  { %v1588_v54 = vpack.c.bf16 %v1543_v50, %v1540_v10 }
 0x3c1   :  { %v2182_v55 = vpop.f32.mrb[12].mxu1  ;;  %2196 = vmatprep.mubr.msk.bf16.mxu0 %vm1613_vm7, %v1588_v54 }
 0x3c2   :  { %v1555_v58 = vpop.f32.mrb[13].mxu1  ;;  %2197 = vmatmul.mubr.msk.bf16.gmra.mrb[8].mxu0 %vm1613_vm7, %v1589_v1  ;;  %v1564_v4 = vadd.f32 %v2182_v55, %v2077_v52 }
 0x3c3   :  { %v2183_v36 = vpop.f32.mrb[14].mxu1  ;;  %v1556_v22 = vadd.f32 %v2077_v52, %v1555_v58 }
 0x3c4   :  { %v1567_v42 = vadd.f32 %v2183_v36, %v2077_v52  ;;  %v1558_v44 = vpop.f32.mrb[15].mxu1 }
 0x3c5   :  { %v1559_v61 = vadd.f32 %v2077_v52, %v1558_v44 }
 0x3c6   :  { %v1591_v0 = vpack.c.bf16 %v1567_v42, %v1564_v4 }
 0x3c7   :  { %v1590_v5 = vpack.c.bf16 %v1559_v61, %v1556_v22 }
 0x3c9   :  { %v2186_v31 = vpop.f32.mrb[16].mxu1  ;;  %2200 = vmatprep.mubr.msk.bf16.mxu0 %vm1613_vm7, %v1590_v5 }
 0x3ca   :  { %v1571_v20 = vpop.f32.mrb[17].mxu1  ;;  %2201 = vmatmul.mubr.msk.bf16.gmra.mrb[12].mxu0 %vm1613_vm7, %v1591_v0  ;;  %v1580_v34 = vadd.f32 %v2186_v31, %v2077_v52 }
 0x3cb   :  { %v2187_v39 = vpop.f32.mrb[18].mxu1  ;;  %v1572_v12 = vadd.f32 %v2077_v52, %v1571_v20 }
 0x3cc   :  { %v1583_v32 = vadd.f32 %v2187_v39, %v2077_v52  ;;  %v1574_v49 = vpop.f32.mrb[19].mxu1 }
 0x3cd   :  { %v1575_v63 = vadd.f32 %v2077_v52, %v1574_v49 }
 0x3ce   :  { %v1593_v7 = vpack.c.bf16 %v1583_v32, %v1580_v34 }
 0x3cf   :  { %v1592_v24 = vpack.c.bf16 %v1575_v63, %v1572_v12 }
 0x3d1   :  { %2204 = vmatprep.mubr.msk.bf16.mxu0 %vm1613_vm7, %v1592_v24 }
 0x3d2   :  { %2205 = vmatmul.mubr.msk.bf16.gmra.mrb[16].mxu0 %vm1613_vm7, %v1593_v7 }
 0x48d   :  { %v2194_v15 = vpop.f32.mrb[4].mxu0 }
 0x48e   :  { %v3489_v8 = vadd.f32 %v2194_v15, %v3486_v40  ;;  %v1676_v9 = vpop.f32.mrb[5].mxu0 }
 0x48f   :  { %v3492_v17 = vadd.f32 %v3486_v40, %v1676_v9  ;;  %v2195_v41 = vpop.f32.mrb[6].mxu0 }
 0x490   :  { %v2103_v19 = vmul.f32 -1.442695, %v3489_v8  ;;  %v3496_v30 = vadd.f32 %v2195_v41, %v3486_v40  ;;  %v1679_v59 = vpop.f32.mrb[7].mxu0 }
 0x491   :  { %v2101_v37 = vmul.f32 -1.442695, %v3492_v17  ;;  %v3500_v25 = vadd.f32 %v3486_v40, %v1679_v59 }
 0x492   :  { %2294 = vpow2.f32 %v2103_v19  ;;  %v2104_v56 = vmul.f32 -1.442695, %v3496_v30 }
 0x493   :  { %2296 = vpow2.f32 %v2101_v37  ;;  %v2102_v14 = vmul.f32 -1.442695, %v3500_v25 }
 0x494   :  { %2298 = vpow2.f32 %v2104_v56 }
 0x495   :  { %2300 = vpow2.f32 %v2102_v14  ;;  %v2198_v29 = vpop.f32.mrb[8].mxu0 }
 0x496   :  { %v3505_v57 = vadd.f32 %v2198_v29, %v3486_v40  ;;  %v1692_v27 = vpop.f32.mrb[9].mxu0 }
 0x497   :  { %v3508_v35 = vadd.f32 %v3486_v40, %v1692_v27  ;;  %v2199_v18 = vpop.f32.mrb[10].mxu0 }
 0x498   :  { %v2107_v51 = vmul.f32 -1.442695, %v3505_v57  ;;  %v3512_v47 = vadd.f32 %v2199_v18, %v3486_v40  ;;  %v1695_v43 = vpop.f32.mrb[11].mxu0 }
 0x499   :  { %v2105_v53 = vmul.f32 -1.442695, %v3508_v35  ;;  %v3516_v62 = vadd.f32 %v3486_v40, %v1695_v43 }
 0x49a   :  { %2302 = vpow2.f32 %v2107_v51  ;;  %v2108_v13 = vmul.f32 -1.442695, %v3512_v47 }
 0x49b   :  { %2304 = vpow2.f32 %v2105_v53  ;;  %v2106_v52 = vmul.f32 -1.442695, %v3516_v62 }
 0x49c   :  { %v2295_v60 = vpop.eup %2294  ;;  %2306 = vpow2.f32 %v2108_v13 }
 0x49d   :  { %v2297_v26 = vpop.eup %2296  ;;  %v1789_v21 = vadd.f32 1.0, %v2295_v60  ;;  %2308 = vpow2.f32 %v2106_v52  ;;  %v2202_v16 = vpop.f32.mrb[12].mxu0 }
 0x49e   :  { %v2299_v48 = vpop.eup %2298  ;;  %v1787_v38 = vadd.f32 1.0, %v2297_v26  ;;  %v3521_v11 = vadd.f32 %v2202_v16, %v3486_v40  ;;  %v1708_v2 = vpop.f32.mrb[13].mxu0 }
 0x49f   :  { %v2301_v23 = vpop.eup %2300  ;;  %2310 = vrcp.f32 %v1789_v21  ;;  %v1790_v3 = vadd.f32 1.0, %v2299_v48  ;;  %v3524_v28 = vadd.f32 %v3486_v40, %v1708_v2  ;;  %v2203_v45 = vpop.f32.mrb[14].mxu0 }
 0x4a0   :  { %2312 = vrcp.f32 %v1787_v38  ;;  %v1788_v33 = vadd.f32 1.0, %v2301_v23  ;;  %v2111_v6 = vmul.f32 -1.442695, %v3521_v11  ;;  %v3528_v46 = vadd.f32 %v2203_v45, %v3486_v40  ;;  %v1711_v10 = vpop.f32.mrb[15].mxu0 }
 0x4a1   :  { %2314 = vrcp.f32 %v1790_v3  ;;  %v2109_v50 = vmul.f32 -1.442695, %v3524_v28  ;;  %v3532_v1 = vadd.f32 %v3486_v40, %v1711_v10 }
 0x4a2   :  { %2316 = vrcp.f32 %v1788_v33  ;;  %v2112_v54 = vmul.f32 -1.442695, %v3528_v46 }
 0x4a3   :  { %2318 = vpow2.f32 %v2111_v6  ;;  %v2110_v55 = vmul.f32 -1.442695, %v3532_v1 }
 0x4a4   :  { %v2303_v58 = vpop.eup %2302  ;;  %2320 = vpow2.f32 %v2109_v50 }
 0x4a5   :  { %v2305_v36 = vpop.eup %2304  ;;  %v1793_v4 = vadd.f32 1.0, %v2303_v58  ;;  %2322 = vpow2.f32 %v2112_v54  ;;  %v2206_v42 = vpop.f32.mrb[16].mxu0 }
 0x4a6   :  { %v2307_v44 = vpop.eup %2306  ;;  %v1791_v22 = vadd.f32 1.0, %v2305_v36  ;;  %2324 = vpow2.f32 %v2110_v55  ;;  %v3537_v61 = vadd.f32 %v2206_v42, %v3486_v40  ;;  %v1724_v0 = vpop.f32.mrb[17].mxu0 }
 0x4a7   :  { %v2309_v5 = vpop.eup %2308  ;;  %2326 = vrcp.f32 %v1793_v4  ;;  %v1794_v31 = vadd.f32 1.0, %v2307_v44  ;;  %v3540_v20 = vadd.f32 %v3486_v40, %v1724_v0  ;;  %v2207_v39 = vpop.f32.mrb[18].mxu0 }
 0x4a8   :  { %2328 = vrcp.f32 %v1791_v22  ;;  %v1792_v34 = vadd.f32 1.0, %v2309_v5  ;;  %v2115_v32 = vmul.f32 -1.442695, %v3537_v61  ;;  %v3544_v49 = vadd.f32 %v2207_v39, %v3486_v40  ;;  %v1727_v12 = vpop.f32.mrb[19].mxu0 }
 0x4a9   :  { %v2311_v63 = vpop.eup %2310  ;;  %2330 = vrcp.f32 %v1794_v31  ;;  %v2113_v7 = vmul.f32 -1.442695, %v3540_v20  ;;  %v3548_v24 = vadd.f32 %v3486_v40, %v1727_v12 }
 0x4aa   :  { %v2313_v15 = vpop.eup %2312  ;;  %2332 = vrcp.f32 %v1792_v34  ;;  %v2116_v9 = vmul.f32 -1.442695, %v3544_v49  ;;  %v1837_v14 = vmul.f32 %v2311_v63, %v3489_v8 }
 0x4ab   :  { %v2315_v41 = vpop.eup %2314  ;;  %v1835_v19 = vmul.f32 %v2313_v15, %v3492_v17  ;;  %2334 = vpow2.f32 %v2115_v32  ;;  %v2114_v59 = vmul.f32 -1.442695, %v3548_v24 }
 0x4ac   :  { %v2317_v37 = vpop.eup %2316  ;;  %2336 = vpow2.f32 %v2113_v7  ;;  %v1838_v43 = vmul.f32 %v2315_v41, %v3496_v30  ;;  %v1854_v8 = vsel %vm1163_vm2, %v1837_v14, 0.0 }
 0x4ad   :  { %v2319_v56 = vpop.eup %2318  ;;  %v1836_v29 = vmul.f32 %v2317_v37, %v3500_v25  ;;  %2338 = vpow2.f32 %v2116_v9  ;;  %v1851_v51 = vsel %vm1163_vm2, %v1835_v19, 0.0 }
 0x4ae   :  { %v2321_v40 = vpop.eup %2320  ;;  %v1797_v27 = vadd.f32 1.0, %v2319_v56  ;;  %2340 = vpow2.f32 %v2114_v59  ;;  %v1856_v38 = vsel %vm1163_vm2, %v1838_v43, 0.0 }
 0x4af   :  { %v2323_v18 = vpop.eup %2322  ;;  %v1852_v17 = vsel %vm1163_vm2, %v1836_v29, 0.0  ;;  %v1795_v53 = vadd.f32 1.0, %v2321_v40 }
 0x4b0   :  { %v2325_v13 = vpop.eup %2324  ;;  %v1853_v52 = vadd.f32 %v1852_v17, %v1851_v51  ;;  %2342 = vrcp.f32 %v1797_v27  ;;  %v1798_v60 = vadd.f32 1.0, %v2323_v18 }
 0x4b1   :  { %v2327_v26 = vpop.eup %2326  ;;  %2344 = vrcp.f32 %v1795_v53  ;;  %v1796_v25 = vadd.f32 1.0, %v2325_v13 }
 0x4b2   :  { %v2329_v21 = vpop.eup %2328  ;;  %v1855_v16 = vadd.f32 %v1854_v8, %v1853_v52  ;;  %2346 = vrcp.f32 %v1798_v60  ;;  %v1841_v45 = vmul.f32 %v2327_v26, %v3505_v57 }
 0x4b3   :  { %v2331_v48 = vpop.eup %2330  ;;  %v1839_v30 = vmul.f32 %v2329_v21, %v3508_v35  ;;  %2348 = vrcp.f32 %v1796_v25 }
 0x4b4   :  { %v2333_v2 = vpop.eup %2332  ;;  %v1857_v23 = vadd.f32 %v1856_v38, %v1855_v16  ;;  %v1842_v58 = vmul.f32 %v2331_v48, %v3512_v47  ;;  %v1862_v22 = vsel %vm1163_vm2, %v1841_v45, 0.0 }
 0x4b5   :  { %v2335_v3 = vpop.eup %2334  ;;  %v1858_v33 = vsel %vm1163_vm2, %v1839_v30, 0.0  ;;  %v1840_v6 = vmul.f32 %v2333_v2, %v3516_v62 }
 0x4b6   :  { %v2337_v10 = vpop.eup %2336  ;;  %v1859_v50 = vadd.f32 %v1858_v33, %v1857_v23  ;;  %v1801_v54 = vadd.f32 1.0, %v2335_v3  ;;  %v1864_v31 = vsel %vm1163_vm2, %v1842_v58, 0.0 }
 0x4b7   :  { %v2339_v55 = vpop.eup %2338  ;;  %v1860_v36 = vsel %vm1163_vm2, %v1840_v6, 0.0  ;;  %v1799_v4 = vadd.f32 1.0, %v2337_v10 }
 0x4b8   :  { %v2341_v35 = vpop.eup %2340  ;;  %v1861_v42 = vadd.f32 %v1860_v36, %v1859_v50  ;;  %2350 = vrcp.f32 %v1801_v54  ;;  %v1802_v44 = vadd.f32 1.0, %v2339_v55 }
 0x4b9   :  { %2352 = vrcp.f32 %v1799_v4  ;;  %v1800_v57 = vadd.f32 1.0, %v2341_v35 }
 0x4ba   :  { %v2343_v0 = vpop.eup %2342  ;;  %v1863_v5 = vadd.f32 %v1862_v22, %v1861_v42  ;;  %2354 = vrcp.f32 %v1802_v44 }
 0x4bb   :  { %v2345_v62 = vpop.eup %2344  ;;  %2356 = vrcp.f32 %v1800_v57  ;;  %v1845_v12 = vmul.f32 %v2343_v0, %v3521_v11 }
 0x4bc   :  { %v2347_v39 = vpop.eup %2346  ;;  %v1865_v47 = vadd.f32 %v1864_v31, %v1863_v5  ;;  %v1843_v34 = vmul.f32 %v2345_v62, %v3524_v28 }
 0x4bd   :  { %v2349_v32 = vpop.eup %2348  ;;  %v1846_v15 = vmul.f32 %v2347_v39, %v3528_v46  ;;  %v1875_v59 = vsel %vm1163_vm2, %v1845_v12, 0.0 }
 0x4be   :  { %v1844_v63 = vmul.f32 %v2349_v32, %v3532_v1  ;;  %v1872_v7 = vsel %vm1163_vm2, %v1843_v34, 0.0  ;;  %v1866_v56 = vrot.slane %v1865_v47, 4 }
 0x4bf   :  { %v1877_v28 = vsel %vm1163_vm2, %v1846_v15, 0.0 }
 0x4c0   :  { %v1873_v9 = vsel %vm1163_vm2, %v1844_v63, 0.0  ;;  %v1867_v51 = vadd.f32 %v1866_v56, %v1865_v47 }
 0x4c1   :  { %v1874_v41 = vadd.f32 %v1873_v9, %v1872_v7 }
 0x4c2   :  { %v2351_v19 = vpop.eup %2350  ;;  %v1868_v60 = vrot.slane %v1867_v51, 2 }
 0x4c3   :  { %v2353_v37 = vpop.eup %2352  ;;  %v1876_v14 = vadd.f32 %v1875_v59, %v1874_v41  ;;  %v1849_v27 = vmul.f32 %v2351_v19, %v3537_v61 }
 0x4c4   :  { %v2355_v29 = vpop.eup %2354  ;;  %v1847_v11 = vmul.f32 %v2353_v37, %v3540_v20  ;;  %v1869_v25 = vadd.f32 %v1868_v60, %v1867_v51 }
 0x4c5   :  { %v2357_v40 = vpop.eup %2356  ;;  %v1878_v1 = vadd.f32 %v1877_v28, %v1876_v14  ;;  %v1850_v17 = vmul.f32 %v2355_v29, %v3544_v49  ;;  %v1883_v52 = vsel %vm1163_vm2, %v1849_v27, 0.0 }
 0x4c6   :  { %v1879_v46 = vsel %vm1163_vm2, %v1847_v11, 0.0  ;;  %v1848_v18 = vmul.f32 %v2357_v40, %v3548_v24  ;;  %v1870_v16 = vrot.slane %v1869_v25, 1 }
 0x4c7   :  { %v1880_v43 = vadd.f32 %v1879_v46, %v1878_v1  ;;  %v1885_v20 = vsel %vm1163_vm2, %v1850_v17, 0.0 }
 0x4c8   :  { %v1881_v53 = vsel %vm1163_vm2, %v1848_v18, 0.0  ;;  %v1871_v38 = vadd.f32 %v1870_v16, %v1869_v25 }
 0x4c9   :  { %v1882_v13 = vadd.f32 %v1881_v53, %v1880_v43 }
 0x4ca   :  { %v1893_v49 = vmul.f32 0.015625, %v1871_v38 }
 0x4cb   :  { %v1884_v26 = vadd.f32 %v1883_v52, %v1882_v13 }
 0x4cd   :  { %v1886_v8 = vadd.f32 %v1885_v20, %v1884_v26 }
 0x4cf   :  { %v1887_v61 = vrot.slane %v1886_v8, 4 }
 0x4d1   :  { %v1888_v21 = vadd.f32 %v1887_v61, %v1886_v8 }
 0x4d3   :  { %v1889_v48 = vrot.slane %v1888_v21, 2 }
 0x4d5   :  { %v1890_v24 = vadd.f32 %v1889_v48, %v1888_v21 }
 0x4d7   :  { %v1891_v30 = vrot.slane %v1890_v24, 1 }
 0x4d9   :  { %v1892_v2 = vadd.f32 %v1891_v30, %v1890_v24 }
 0x4db   :  { %v1894_v23 = vmul.f32 0.015625, %v1892_v2 }
 0x4dd   :  { %v1897_v3 = vsel %vm1229_vm3, %v1894_v23, %v1893_v49 }
 0x4de   :  { %1900 = vst.msk [vmem:[%s3599_s11] sm:$0x3] %vm1899_vm8, %v1897_v3 }

// kernel: efficientnet_backbone_forward.3
= control target key start
LH: loop header
LB: loop body
LE: loop exit
PB: predicated region body
PF: predicated region fallthrough
CT: control target
= control target key end

     0   :  { %vm394_vm0 = vcmask 1044480   ;;  %vm395_vm1 = vcmask 1045504   ;;  %vm297_vm2 = vcmask 220160   ;;  %v8749_v1 = vmov 65535   ;;  %s13448_s1 = inlined_call_operand.vmem [shape: bf16[27,16], index: 1, kind: input, shape index: {}]   ;;  %s13449_s0 = inlined_call_operand.vmem [shape: bf16[2,256,27], index: 0, kind: input, shape index: {}]   ;;  %s13450_s3 = inlined_call_operand.vmem [shape: bf16[16,64], index: 3, kind: input, shape index: {}]   ;;  %s13451_s2 = inlined_call_operand.vmem [shape: f32[1,16], index: 2, kind: input, shape index: {}]   ;;  %s13452_s4 = inlined_call_operand.vmem [shape: f32[1,64], index: 4, kind: input, shape index: {}]   ;;  %s13453_s5 = inlined_call_operand.vmem [shape: f32[9,1,64], index: 5, kind: input, shape index: {}]   ;;  %s13454_s6 = inlined_call_operand.vmem [shape: f32[1,64], index: 6, kind: input, shape index: {}]   ;;  %s13455_s7 = inlined_call_operand.vmem [shape: bf16[64,4], index: 7, kind: input, shape index: {}]   ;;  %s13456_s9 = inlined_call_operand.vmem [shape: bf16[4,64], index: 9, kind: input, shape index: {}]   ;;  %s13457_s8 = inlined_call_operand.vmem [shape: f32[1,4], index: 8, kind: input, shape index: {}]   ;;  %s13458_s11 = inlined_call_operand.vmem [shape: bf16[64,16], index: 11, kind: input, shape index: {}]   ;;  %s13459_s10 = inlined_call_operand.vmem [shape: f32[1,64], index: 10, kind: input, shape index: {}]   ;;  %s13460_s13 = inlined_call_operand.vmem [shape: bf16[16,64], index: 13, kind: input, shape index: {}]   ;;  %s13461_s12 = inlined_call_operand.vmem [shape: f32[1,16], index: 12, kind: input, shape index: {}]   ;;  %s13462_s14 = inlined_call_operand.vmem [shape: f32[1,64], index: 14, kind: input, shape index: {}]   ;;  %s13463_s15 = inlined_call_operand.vmem [shape: bf16[2,256,64], index: 15, kind: output, shape index: {}]  }
   0x1   :  { %v7628_v0 = vld [vmem:[%s13448_s1] sm:$0xff]   ;;  %v396_v2 = vsel %vm394_vm0, 4294967295, %v8749_v1  ;;  %v7629_v3 = vld [vmem:[%s13448_s1 + $0x8] sm:$0x3f]   ;;  %v7632_v8 = vld [vmem:[%s13449_s0 + $0x10] sm:$0xff]   ;;  %vm1185_vm3 = vcmask 130048  }
   0x2   :  { %7334 = vmatprep.subr.bf16.mxu0 %v7628_v0  ;;  %v397_v4 = vsel %vm395_vm1, %v396_v2, 0  ;;  %v7630_v5 = vld [vmem:[%s13449_s0] sm:$0xff]   ;;  %v7631_v7 = vld [vmem:[%s13449_s0 + $0x8] sm:$0xff]   ;;  %v7633_v9 = vld [vmem:[%s13449_s0 + $0x18] sm:$0xff]   ;;  %vm2020_vm4 = vcmask 523264   ;;  %vm2036_vm5 = vcmask 516096  }
   0x3   :  { %7335 = vmatpush3.bf16.msra.mxu0 %v7628_v0  ;;  %v399_v6 = vand.u32 %v7629_v3, %v397_v4  ;;  %7338 = vmatprep.mubr.msk.bf16.mxu0 %vm297_vm2, %v7630_v5  ;;  %v7634_v10 = vld [vmem:[%s13449_s0 + $0x20] sm:$0xff]   ;;  %v7635_v11 = vld [vmem:[%s13449_s0 + $0x28] sm:$0xff]   ;;  %v7636_v12 = vld [vmem:[%s13449_s0 + $0x30] sm:$0xff]   ;;  %vm2023_vm6 = vcmask 517120   ;;  %vm8751_vm7 = vmmov 0   ;;  %vm4735_vm8 = vcmask 1041408  }
   0x4   :  { %v7637_v13 = vld [vmem:[%s13449_s0 + $0x38] sm:$0xff]   ;;  %v7638_v14 = vld [vmem:[%s13449_s0 + $0x40] sm:$0xff]   ;;  %v7639_v15 = vld [vmem:[%s13449_s0 + $0x48] sm:$0xff]   ;;  %vm4645_vm9 = vcmask 1041409   ;;  %vm4731_vm10 = vcmask 31744   ;;  %vm6538_vm11 = vcmask 519168  }
   0x5   :  { %7336 = vmatprep.subr.bf16.mxu0 %v399_v6  ;;  %v7640_v16 = vld [vmem:[%s13449_s0 + $0x50] sm:$0xff]   ;;  %v7641_v17 = vld [vmem:[%s13449_s0 + $0x58] sm:$0xff]   ;;  %v7642_v18 = vld [vmem:[%s13449_s0 + $0x60] sm:$0xff]  }
   0x6   :  { %v7643_v19 = vld [vmem:[%s13449_s0 + $0x68] sm:$0xff]   ;;  %v7644_v20 = vld [vmem:[%s13449_s0 + $0x70] sm:$0xff]   ;;  %v7645_v21 = vld [vmem:[%s13449_s0 + $0x78] sm:$0xff]  }
   0x7   :  { %7337 = vmatpush3.bf16.msra.mxu0 %v399_v6  ;;  %v7646_v22 = vld [vmem:[%s13449_s0 + $0x80] sm:$0xff]   ;;  %v7647_v23 = vld [vmem:[%s13449_s0 + $0x88] sm:$0xff]   ;;  %v7648_v24 = vld [vmem:[%s13449_s0 + $0x90] sm:$0xff]  }
   0x8   :  { %v7649_v25 = vld [vmem:[%s13449_s0 + $0x98] sm:$0xff]   ;;  %v7650_v26 = vld [vmem:[%s13449_s0 + $0xa0] sm:$0xff]   ;;  %v7651_v27 = vld [vmem:[%s13449_s0 + $0xa8] sm:$0xff]  }
   0x9   :  { %v7652_v28 = vld [vmem:[%s13449_s0 + $0xb0] sm:$0xff]   ;;  %v7653_v29 = vld [vmem:[%s13449_s0 + $0xb8] sm:$0xff]   ;;  %v7654_v30 = vld [vmem:[%s13449_s0 + $0xc0] sm:$0xff]  }
   0xa   :  { %7339 = vmatmul.mubr.msk.bf16.vlgmr.msra.gmra.mrb[0].mxu0 %vm297_vm2, %v7631_v7  ;;  %v7655_v31 = vld [vmem:[%s13449_s0 + $0xc8] sm:$0xff]   ;;  %v7656_v32 = vld [vmem:[%s13449_s0 + $0xd0] sm:$0xff]   ;;  %v7657_v33 = vld [vmem:[%s13449_s0 + $0xd8] sm:$0xff]  }
   0xb   :  { %7342 = vmatprep.mubr.msk.bf16.mxu0 %vm297_vm2, %v7632_v8  ;;  %v7658_v34 = vld [vmem:[%s13449_s0 + $0xe0] sm:$0xff]   ;;  %v7659_v35 = vld [vmem:[%s13449_s0 + $0xe8] sm:$0xff]   ;;  %v7660_v36 = vld [vmem:[%s13449_s0 + $0xf0] sm:$0xff]  }
   0xc   :  { %v7661_v37 = vld [vmem:[%s13449_s0 + $0xf8] sm:$0xff]   ;;  %v7662_v38 = vld [vmem:[%s13450_s3] sm:$0xff]  }
   0xd   :  { %7402 = vmatprep.subr.bf16.mxu1 %v7662_v38  ;;  %v8973_v39 = vld [vmem:[%s13451_s2] ss:$0 sm:$0xff] }
   0xe   :  { %7403 = vmatpush3.bf16.msra.mxu1 %v7662_v38 }
  0x12   :  { %7343 = vmatmul.mubr.msk.bf16.gmra.mrb[4].mxu0 %vm297_vm2, %v7633_v9 }
  0x13   :  { %7346 = vmatprep.mubr.msk.bf16.mxu0 %vm297_vm2, %v7634_v10 }
  0x1a   :  { %7347 = vmatmul.mubr.msk.bf16.gmra.mrb[8].mxu0 %vm297_vm2, %v7635_v11 }
  0x1b   :  { %7350 = vmatprep.mubr.msk.bf16.mxu0 %vm297_vm2, %v7636_v12 }
  0x22   :  { %7351 = vmatmul.mubr.msk.bf16.gmra.mrb[12].mxu0 %vm297_vm2, %v7637_v13 }
  0x23   :  { %7354 = vmatprep.mubr.msk.bf16.mxu0 %vm297_vm2, %v7638_v14 }
  0x2a   :  { %7355 = vmatmul.mubr.msk.bf16.gmra.mrb[16].mxu0 %vm297_vm2, %v7639_v15 }
  0x2b   :  { %7358 = vmatprep.mubr.msk.bf16.mxu0 %vm297_vm2, %v7640_v16 }
  0x32   :  { %7359 = vmatmul.mubr.msk.bf16.gmra.mrb[20].mxu0 %vm297_vm2, %v7641_v17 }
  0x33   :  { %7362 = vmatprep.mubr.msk.bf16.mxu0 %vm297_vm2, %v7642_v18 }
  0x3a   :  { %7363 = vmatmul.mubr.msk.bf16.gmra.mrb[24].mxu0 %vm297_vm2, %v7643_v19 }
  0x3b   :  { %7366 = vmatprep.mubr.msk.bf16.mxu0 %vm297_vm2, %v7644_v20 }
  0x42   :  { %7367 = vmatmul.mubr.msk.bf16.gmra.mrb[28].mxu0 %vm297_vm2, %v7645_v21 }
  0x43   :  { %7370 = vmatprep.mubr.msk.bf16.mxu0 %vm297_vm2, %v7646_v22 }
  0x4a   :  { %7371 = vmatmul.mubr.msk.bf16.gmra.mrb[32].mxu0 %vm297_vm2, %v7647_v23 }
  0x4b   :  { %7374 = vmatprep.mubr.msk.bf16.mxu0 %vm297_vm2, %v7648_v24 }
  0x52   :  { %7375 = vmatmul.mubr.msk.bf16.gmra.mrb[36].mxu0 %vm297_vm2, %v7649_v25 }
  0x53   :  { %7378 = vmatprep.mubr.msk.bf16.mxu0 %vm297_vm2, %v7650_v26 }
  0x5a   :  { %7379 = vmatmul.mubr.msk.bf16.gmra.mrb[40].mxu0 %vm297_vm2, %v7651_v27 }
  0x5b   :  { %7382 = vmatprep.mubr.msk.bf16.mxu0 %vm297_vm2, %v7652_v28 }
  0x62   :  { %7383 = vmatmul.mubr.msk.bf16.gmra.mrb[44].mxu0 %vm297_vm2, %v7653_v29 }
  0x63   :  { %7386 = vmatprep.mubr.msk.bf16.mxu0 %vm297_vm2, %v7654_v30 }
  0x6a   :  { %7387 = vmatmul.mubr.msk.bf16.gmra.mrb[48].mxu0 %vm297_vm2, %v7655_v31 }
  0x6b   :  { %7390 = vmatprep.mubr.msk.bf16.mxu0 %vm297_vm2, %v7656_v32 }
  0x72   :  { %7391 = vmatmul.mubr.msk.bf16.gmra.mrb[52].mxu0 %vm297_vm2, %v7657_v33 }
  0x73   :  { %7394 = vmatprep.mubr.msk.bf16.mxu0 %vm297_vm2, %v7658_v34 }
  0x7a   :  { %7395 = vmatmul.mubr.msk.bf16.gmra.mrb[56].mxu0 %vm297_vm2, %v7659_v35 }
  0x7b   :  { %7398 = vmatprep.mubr.msk.bf16.mxu0 %vm297_vm2, %v7660_v36 }
  0x82   :  { %7399 = vmatmul.mubr.msk.bf16.gmra.mrb[60].mxu0 %vm297_vm2, %v7661_v37 }
  0xdd   :  { %v7340_v40 = vpop.f32.mrb[0].mxu0 }
  0xde   :  { %v8976_v41 = vadd.f32 %v7340_v40, %v8973_v39  ;;  %v435_v42 = vpop.f32.mrb[1].mxu0 }
  0xdf   :  { %v8979_v43 = vadd.f32 %v8973_v39, %v435_v42  ;;  %v7341_v44 = vpop.f32.mrb[2].mxu0 }
  0xe0   :  { %v6676_v45 = vmul.f32 -1.442695, %v8976_v41  ;;  %v8983_v46 = vadd.f32 %v7341_v44, %v8973_v39  ;;  %v438_v47 = vpop.f32.mrb[3].mxu0 }
  0xe1   :  { %v6674_v48 = vmul.f32 -1.442695, %v8979_v43  ;;  %v8987_v49 = vadd.f32 %v8973_v39, %v438_v47 }
  0xe2   :  { %7672 = vpow2.f32 %v6676_v45  ;;  %v6677_v50 = vmul.f32 -1.442695, %v8983_v46 }
  0xe3   :  { %7674 = vpow2.f32 %v6674_v48  ;;  %v6675_v51 = vmul.f32 -1.442695, %v8987_v49 }
  0xe4   :  { %7676 = vpow2.f32 %v6677_v50 }
  0xe5   :  { %7678 = vpow2.f32 %v6675_v51  ;;  %v7344_v52 = vpop.f32.mrb[4].mxu0 }
  0xe6   :  { %v8992_v53 = vadd.f32 %v7344_v52, %v8973_v39  ;;  %v451_v54 = vpop.f32.mrb[5].mxu0 }
  0xe7   :  { %v8995_v55 = vadd.f32 %v8973_v39, %v451_v54  ;;  %v7345_v56 = vpop.f32.mrb[6].mxu0 }
  0xe8   :  { %v6680_v57 = vmul.f32 -1.442695, %v8992_v53  ;;  %v8999_v58 = vadd.f32 %v7345_v56, %v8973_v39  ;;  %v454_v59 = vpop.f32.mrb[7].mxu0 }
  0xe9   :  { %v6678_v60 = vmul.f32 -1.442695, %v8995_v55  ;;  %v9003_v61 = vadd.f32 %v8973_v39, %v454_v59 }
  0xea   :  { %7680 = vpow2.f32 %v6680_v57  ;;  %v6681_v62 = vmul.f32 -1.442695, %v8999_v58 }
  0xeb   :  { %7682 = vpow2.f32 %v6678_v60  ;;  %v6679_v63 = vmul.f32 -1.442695, %v9003_v61 }
  0xec   :  { %v7673_v0 = vpop.eup %7672  ;;  %7684 = vpow2.f32 %v6681_v62 }
  0xed   :  { %v7675_v1 = vpop.eup %7674  ;;  %v884_v2 = vadd.f32 1.0, %v7673_v0  ;;  %7686 = vpow2.f32 %v6679_v63  ;;  %v7348_v3 = vpop.f32.mrb[8].mxu0 }
  0xee   :  { %v7677_v4 = vpop.eup %7676  ;;  %v882_v5 = vadd.f32 1.0, %v7675_v1  ;;  %v9008_v6 = vadd.f32 %v7348_v3, %v8973_v39  ;;  %v467_v7 = vpop.f32.mrb[9].mxu0 }
  0xef   :  { %v7679_v8 = vpop.eup %7678  ;;  %7688 = vrcp.f32 %v884_v2  ;;  %v885_v9 = vadd.f32 1.0, %v7677_v4  ;;  %v9011_v10 = vadd.f32 %v8973_v39, %v467_v7  ;;  %v7349_v11 = vpop.f32.mrb[10].mxu0 }
  0xf0   :  { %7690 = vrcp.f32 %v882_v5  ;;  %v883_v12 = vadd.f32 1.0, %v7679_v8  ;;  %v6684_v13 = vmul.f32 -1.442695, %v9008_v6  ;;  %v9015_v14 = vadd.f32 %v7349_v11, %v8973_v39  ;;  %v470_v15 = vpop.f32.mrb[11].mxu0 }
  0xf1   :  { %7692 = vrcp.f32 %v885_v9  ;;  %v6682_v16 = vmul.f32 -1.442695, %v9011_v10  ;;  %v9019_v17 = vadd.f32 %v8973_v39, %v470_v15 }
  0xf2   :  { %7694 = vrcp.f32 %v883_v12  ;;  %v6685_v18 = vmul.f32 -1.442695, %v9015_v14 }
  0xf3   :  { %7696 = vpow2.f32 %v6684_v13  ;;  %v6683_v19 = vmul.f32 -1.442695, %v9019_v17 }
  0xf4   :  { %v7681_v20 = vpop.eup %7680  ;;  %7698 = vpow2.f32 %v6682_v16 }
  0xf5   :  { %v7683_v21 = vpop.eup %7682  ;;  %v888_v22 = vadd.f32 1.0, %v7681_v20  ;;  %7700 = vpow2.f32 %v6685_v18  ;;  %v7352_v23 = vpop.f32.mrb[12].mxu0 }
  0xf6   :  { %v7685_v24 = vpop.eup %7684  ;;  %v886_v25 = vadd.f32 1.0, %v7683_v21  ;;  %7702 = vpow2.f32 %v6683_v19  ;;  %v9024_v26 = vadd.f32 %v7352_v23, %v8973_v39  ;;  %v483_v27 = vpop.f32.mrb[13].mxu0 }
  0xf7   :  { %v7687_v28 = vpop.eup %7686  ;;  %7704 = vrcp.f32 %v888_v22  ;;  %v889_v29 = vadd.f32 1.0, %v7685_v24  ;;  %v9027_v30 = vadd.f32 %v8973_v39, %v483_v27  ;;  %v7353_v31 = vpop.f32.mrb[14].mxu0 }
  0xf8   :  { %7706 = vrcp.f32 %v886_v25  ;;  %v887_v32 = vadd.f32 1.0, %v7687_v28  ;;  %v6688_v33 = vmul.f32 -1.442695, %v9024_v26  ;;  %v9031_v34 = vadd.f32 %v7353_v31, %v8973_v39  ;;  %v486_v35 = vpop.f32.mrb[15].mxu0 }
  0xf9   :  { %v7689_v36 = vpop.eup %7688  ;;  %7708 = vrcp.f32 %v889_v29  ;;  %v6686_v37 = vmul.f32 -1.442695, %v9027_v30  ;;  %v9035_v38 = vadd.f32 %v8973_v39, %v486_v35 }
  0xfa   :  { %v7691_v40 = vpop.eup %7690  ;;  %7710 = vrcp.f32 %v887_v32  ;;  %v6689_v42 = vmul.f32 -1.442695, %v9031_v34  ;;  %v9043_v51 = vmul.f32 %v7689_v36, %v8976_v41 }
  0xfb   :  { %v7693_v44 = vpop.eup %7692  ;;  %7712 = vpow2.f32 %v6688_v33  ;;  %v6687_v45 = vmul.f32 -1.442695, %v9035_v38  ;;  %v9046_v52 = vmul.f32 %v7691_v40, %v8979_v43 }
  0xfc   :  { %v7695_v47 = vpop.eup %7694  ;;  %v9040_v48 = vmul.f32 %v7693_v44, %v8983_v46  ;;  %7714 = vpow2.f32 %v6686_v37  ;;  %13623 = vst [vmem:[#allocation4_spill] sm:$0xff] %v9043_v51 }
  0xfd   :  { %v7697_v50 = vpop.eup %7696  ;;  %13624 = vst [vmem:[#allocation5_spill] sm:$0xff] %v9046_v52  ;;  %v9049_v54 = vmul.f32 %v7695_v47, %v8987_v49  ;;  %7716 = vpow2.f32 %v6689_v42  ;;  %v7356_v56 = vpop.f32.mrb[16].mxu0 }
  0xfe   :  { %13622 = vst [vmem:[#allocation3_spill] sm:$0xff] %v9040_v48  ;;  %v7699_v57 = vpop.eup %7698  ;;  %v892_v59 = vadd.f32 1.0, %v7697_v50  ;;  %7718 = vpow2.f32 %v6687_v45  ;;  %v9052_v60 = vadd.f32 %v7356_v56, %v8973_v39  ;;  %v499_v46 = vpop.f32.mrb[17].mxu0  ;;  %v1139_v41 = vpack.c.bf16 %v9040_v48, %v9043_v51 }
  0xff   :  { %13625 = vst [vmem:[#allocation6_spill] sm:$0xff] %v9049_v54  ;;  %v7701_v62 = vpop.eup %7700  ;;  %v890_v63 = vadd.f32 1.0, %v7699_v57  ;;  %v9057_v43 = vadd.f32 %v8973_v39, %v499_v46  ;;  %v7357_v49 = vpop.f32.mrb[18].mxu0  ;;  %v1138_v0 = vpack.c.bf16 %v9049_v54, %v9046_v52 }
 0x100   :  { %v7703_v1 = vpop.eup %7702  ;;  %7720 = vrcp.f32 %v892_v59  ;;  %v893_v2 = vadd.f32 1.0, %v7701_v62  ;;  %v6692_v3 = vmul.f32 -1.442695, %v9052_v60  ;;  %v9063_v4 = vadd.f32 %v7357_v49, %v8973_v39  ;;  %v502_v5 = vpop.f32.mrb[19].mxu0 }
 0x101   :  { %v7705_v7 = vpop.eup %7704  ;;  %7722 = vrcp.f32 %v890_v63  ;;  %v891_v8 = vadd.f32 1.0, %v7703_v1  ;;  %v6690_v9 = vmul.f32 -1.442695, %v9057_v43  ;;  %v9067_v11 = vadd.f32 %v8973_v39, %v502_v5  ;;  %7404 = vmatprep.mubr.msk.bf16.mxu1 %vm1185_vm3, %v1138_v0 }
 0x102   :  { %v7707_v12 = vpop.eup %7706  ;;  %7724 = vrcp.f32 %v893_v2  ;;  %v6693_v13 = vmul.f32 -1.442695, %v9063_v4  ;;  %7405 = vmatmul.mubr.msk.bf16.vlgmr.msra.gmra.mrb[0].mxu1 %vm1185_vm3, %v1139_v41  ;;  %v9074_v19 = vmul.f32 %v7705_v7, %v8992_v53 }
 0x103   :  { %v7709_v15 = vpop.eup %7708  ;;  %7726 = vrcp.f32 %v891_v8  ;;  %v6691_v16 = vmul.f32 -1.442695, %v9067_v11  ;;  %v9080_v22 = vmul.f32 %v7707_v12, %v8995_v55 }
 0x104   :  { %v7711_v18 = vpop.eup %7710  ;;  %13626 = vst [vmem:[#allocation7_spill] sm:$0xff] %v9074_v19  ;;  %v9077_v20 = vmul.f32 %v7709_v15, %v8999_v58  ;;  %7728 = vpow2.f32 %v6692_v3 }
 0x105   :  { %v7713_v21 = vpop.eup %7712  ;;  %13628 = vst [vmem:[#allocation9_spill] sm:$0xff] %v9080_v22  ;;  %v9083_v23 = vmul.f32 %v7711_v18, %v9003_v61  ;;  %7730 = vpow2.f32 %v6690_v9  ;;  %v7360_v24 = vpop.f32.mrb[20].mxu0 }
 0x106   :  { %13627 = vst [vmem:[#allocation8_spill] sm:$0xff] %v9077_v20  ;;  %v7715_v25 = vpop.eup %7714  ;;  %v1141_v27 = vpack.c.bf16 %v9077_v20, %v9074_v19  ;;  %v896_v28 = vadd.f32 1.0, %v7713_v21  ;;  %7732 = vpow2.f32 %v6693_v13  ;;  %v9088_v53 = vadd.f32 %v7360_v24, %v8973_v39  ;;  %v515_v58 = vpop.f32.mrb[21].mxu0 }
 0x107   :  { %13629 = vst [vmem:[#allocation10_spill] sm:$0xff] %v9083_v23  ;;  %v7717_v29 = vpop.eup %7716  ;;  %v1140_v55 = vpack.c.bf16 %v9083_v23, %v9080_v22  ;;  %v894_v31 = vadd.f32 1.0, %v7715_v25  ;;  %7734 = vpow2.f32 %v6691_v16  ;;  %v9093_v61 = vadd.f32 %v8973_v39, %v515_v58  ;;  %v7361_v32 = vpop.f32.mrb[22].mxu0 }
 0x108   :  { %v7719_v33 = vpop.eup %7718  ;;  %7736 = vrcp.f32 %v896_v28  ;;  %v897_v35 = vadd.f32 1.0, %v7717_v29  ;;  %v6696_v36 = vmul.f32 -1.442695, %v9088_v53  ;;  %v9097_v37 = vadd.f32 %v7361_v32, %v8973_v39  ;;  %v518_v40 = vpop.f32.mrb[23].mxu0 }
 0x109   :  { %7738 = vrcp.f32 %v894_v31  ;;  %v895_v42 = vadd.f32 1.0, %v7719_v33  ;;  %v6694_v44 = vmul.f32 -1.442695, %v9093_v61  ;;  %v9101_v45 = vadd.f32 %v8973_v39, %v518_v40  ;;  %7408 = vmatprep.mubr.msk.bf16.mxu1 %vm1185_vm3, %v1140_v55 }
 0x10a   :  { %v7721_v47 = vpop.eup %7720  ;;  %7740 = vrcp.f32 %v897_v35  ;;  %v6697_v50 = vmul.f32 -1.442695, %v9097_v37  ;;  %7409 = vmatmul.mubr.msk.bf16.gmra.mrb[4].mxu1 %vm1185_vm3, %v1141_v27 }
 0x10b   :  { %v7723_v56 = vpop.eup %7722  ;;  %7742 = vrcp.f32 %v895_v42  ;;  %v6695_v57 = vmul.f32 -1.442695, %v9101_v45  ;;  %v9108_v62 = vmul.f32 %v7721_v47, %v9008_v6 }
 0x10c   :  { %v7725_v59 = vpop.eup %7724  ;;  %7744 = vpow2.f32 %v6696_v36  ;;  %v9114_v0 = vmul.f32 %v7723_v56, %v9011_v10 }
 0x10d   :  { %v7727_v46 = vpop.eup %7726  ;;  %13630 = vst [vmem:[#allocation11_spill] sm:$0xff] %v9108_v62  ;;  %v9111_v41 = vmul.f32 %v7725_v59, %v9015_v14  ;;  %7746 = vpow2.f32 %v6694_v44  ;;  %v7364_v63 = vpop.f32.mrb[24].mxu0 }
 0x10e   :  { %v7729_v49 = vpop.eup %7728  ;;  %13632 = vst [vmem:[#allocation13_spill] sm:$0xff] %v9114_v0  ;;  %v9117_v1 = vmul.f32 %v7727_v46, %v9019_v17  ;;  %7748 = vpow2.f32 %v6697_v50  ;;  %v9120_v2 = vadd.f32 %v7364_v63, %v8973_v39  ;;  %v531_v3 = vpop.f32.mrb[25].mxu0 }
 0x10f   :  { %13631 = vst [vmem:[#allocation12_spill] sm:$0xff] %v9111_v41  ;;  %v7731_v5 = vpop.eup %7730  ;;  %v900_v6 = vadd.f32 1.0, %v7729_v49  ;;  %7750 = vpow2.f32 %v6695_v57  ;;  %v9123_v14 = vadd.f32 %v8973_v39, %v531_v3  ;;  %v7365_v7 = vpop.f32.mrb[26].mxu0  ;;  %v1143_v10 = vpack.c.bf16 %v9111_v41, %v9108_v62 }
 0x110   :  { %13633 = vst [vmem:[#allocation14_spill] sm:$0xff] %v9117_v1  ;;  %v7733_v8 = vpop.eup %7732  ;;  %v1142_v17 = vpack.c.bf16 %v9117_v1, %v9114_v0  ;;  %v898_v9 = vadd.f32 1.0, %v7731_v5  ;;  %v9130_v12 = vadd.f32 %v7365_v7, %v8973_v39  ;;  %v534_v13 = vpop.f32.mrb[27].mxu0  ;;  %v6700_v18 = vmul.f32 -1.442695, %v9120_v2 }
 0x111   :  { %v7735_v15 = vpop.eup %7734  ;;  %7752 = vrcp.f32 %v900_v6  ;;  %v901_v16 = vadd.f32 1.0, %v7733_v8  ;;  %v9134_v21 = vadd.f32 %v8973_v39, %v534_v13  ;;  %v6698_v27 = vmul.f32 -1.442695, %v9123_v14 }
 0x112   :  { %v7737_v24 = vpop.eup %7736  ;;  %7754 = vrcp.f32 %v898_v9  ;;  %v899_v25 = vadd.f32 1.0, %v7735_v15  ;;  %7412 = vmatprep.mubr.msk.bf16.mxu1 %vm1185_vm3, %v1142_v17  ;;  %v6701_v58 = vmul.f32 -1.442695, %v9130_v12 }
 0x113   :  { %v7739_v28 = vpop.eup %7738  ;;  %7756 = vrcp.f32 %v901_v16  ;;  %7413 = vmatmul.mubr.msk.bf16.gmra.mrb[8].mxu1 %vm1185_vm3, %v1143_v10  ;;  %v6699_v55 = vmul.f32 -1.442695, %v9134_v21  ;;  %v9142_v32 = vmul.f32 %v7737_v24, %v9024_v26 }
 0x114   :  { %v7741_v29 = vpop.eup %7740  ;;  %7758 = vrcp.f32 %v899_v25  ;;  %v9148_v40 = vmul.f32 %v7739_v28, %v9027_v30 }
 0x115   :  { %v7743_v31 = vpop.eup %7742  ;;  %13634 = vst [vmem:[#allocation15_spill] sm:$0xff] %v9142_v32  ;;  %v9145_v33 = vmul.f32 %v7741_v29, %v9031_v34  ;;  %7760 = vpow2.f32 %v6700_v18  ;;  %v7368_v35 = vpop.f32.mrb[28].mxu0 }
 0x116   :  { %v7745_v36 = vpop.eup %7744  ;;  %13636 = vst [vmem:[#allocation17_spill] sm:$0xff] %v9148_v40  ;;  %v9151_v42 = vmul.f32 %v7743_v31, %v9035_v38  ;;  %7762 = vpow2.f32 %v6698_v27  ;;  %v9154_v44 = vadd.f32 %v7368_v35, %v8973_v39  ;;  %v547_v47 = vpop.f32.mrb[29].mxu0 }
 0x117   :  { %13635 = vst [vmem:[#allocation16_spill] sm:$0xff] %v9145_v33  ;;  %v7747_v50 = vpop.eup %7746  ;;  %v904_v26 = vadd.f32 1.0, %v7745_v36  ;;  %7764 = vpow2.f32 %v6701_v58  ;;  %v9157_v34 = vadd.f32 %v8973_v39, %v547_v47  ;;  %v7369_v56 = vpop.f32.mrb[30].mxu0  ;;  %v1145_v30 = vpack.c.bf16 %v9145_v33, %v9142_v32 }
 0x118   :  { %13637 = vst [vmem:[#allocation18_spill] sm:$0xff] %v9151_v42  ;;  %v7749_v57 = vpop.eup %7748  ;;  %v1144_v38 = vpack.c.bf16 %v9151_v42, %v9148_v40  ;;  %v902_v59 = vadd.f32 1.0, %v7747_v50  ;;  %7766 = vpow2.f32 %v6699_v55  ;;  %v550_v46 = vpop.f32.mrb[31].mxu0  ;;  %v6704_v3 = vmul.f32 -1.442695, %v9154_v44 }
 0x119   :  { %v7751_v63 = vpop.eup %7750  ;;  %7768 = vrcp.f32 %v904_v26  ;;  %v905_v49 = vadd.f32 1.0, %v7749_v57  ;;  %v9165_v5 = vadd.f32 %v7369_v56, %v8973_v39  ;;  %v6702_v7 = vmul.f32 -1.442695, %v9157_v34 }
 0x11a   :  { %7770 = vrcp.f32 %v902_v59  ;;  %v903_v6 = vadd.f32 1.0, %v7751_v63  ;;  %v9169_v8 = vadd.f32 %v8973_v39, %v550_v46  ;;  %7416 = vmatprep.mubr.msk.bf16.mxu1 %vm1185_vm3, %v1144_v38 }
 0x11b   :  { %v7753_v10 = vpop.eup %7752  ;;  %7772 = vrcp.f32 %v905_v49  ;;  %v6705_v17 = vmul.f32 -1.442695, %v9165_v5  ;;  %7417 = vmatmul.mubr.msk.bf16.gmra.mrb[12].mxu1 %vm1185_vm3, %v1145_v30 }
 0x11c   :  { %v7755_v9 = vpop.eup %7754  ;;  %7774 = vrcp.f32 %v903_v6  ;;  %v6703_v13 = vmul.f32 -1.442695, %v9169_v8  ;;  %v9176_v24 = vmul.f32 %v7753_v10, %v9052_v60 }
 0x11d   :  { %v7757_v15 = vpop.eup %7756  ;;  %7776 = vpow2.f32 %v6704_v3  ;;  %v7372_v16 = vpop.f32.mrb[32].mxu0  ;;  %v9185_v29 = vmul.f32 %v7755_v9, %v9057_v43 }
 0x11e   :  { %v7759_v18 = vpop.eup %7758  ;;  %13638 = vst [vmem:[#allocation19_spill] sm:$0xff] %v9176_v24  ;;  %v9179_v25 = vmul.f32 %v7757_v15, %v9063_v4  ;;  %7778 = vpow2.f32 %v6702_v7  ;;  %v9182_v27 = vadd.f32 %v7372_v16, %v8973_v39  ;;  %v563_v28 = vpop.f32.mrb[33].mxu0 }
 0x11f   :  { %v7761_v58 = vpop.eup %7760  ;;  %13640 = vst [vmem:[#allocation21_spill] sm:$0xff] %v9185_v29  ;;  %v9188_v55 = vmul.f32 %v7759_v18, %v9067_v11  ;;  %7780 = vpow2.f32 %v6705_v17  ;;  %v9191_v31 = vadd.f32 %v8973_v39, %v563_v28  ;;  %v7373_v60 = vpop.f32.mrb[34].mxu0 }
 0x120   :  { %13639 = vst [vmem:[#allocation20_spill] sm:$0xff] %v9179_v25  ;;  %v7763_v35 = vpop.eup %7762  ;;  %v908_v4 = vadd.f32 1.0, %v7761_v58  ;;  %7782 = vpow2.f32 %v6703_v13  ;;  %v566_v36 = vpop.f32.mrb[35].mxu0  ;;  %v1147_v50 = vpack.c.bf16 %v9179_v25, %v9176_v24  ;;  %v9198_v11 = vadd.f32 %v7373_v60, %v8973_v39 }
 0x121   :  { %13641 = vst [vmem:[#allocation22_spill] sm:$0xff] %v9188_v55  ;;  %v7765_v47 = vpop.eup %7764  ;;  %v1146_v43 = vpack.c.bf16 %v9188_v55, %v9185_v29  ;;  %v906_v26 = vadd.f32 1.0, %v7763_v35  ;;  %v6708_v30 = vmul.f32 -1.442695, %v9182_v27  ;;  %v9202_v38 = vadd.f32 %v8973_v39, %v566_v36 }
 0x122   :  { %v7767_v56 = vpop.eup %7766  ;;  %7784 = vrcp.f32 %v908_v4  ;;  %v909_v57 = vadd.f32 1.0, %v7765_v47  ;;  %v6706_v63 = vmul.f32 -1.442695, %v9191_v31  ;;  %v6709_v3 = vmul.f32 -1.442695, %v9198_v11 }
 0x123   :  { %v7769_v59 = vpop.eup %7768  ;;  %7786 = vrcp.f32 %v906_v26  ;;  %v907_v46 = vadd.f32 1.0, %v7767_v56  ;;  %7420 = vmatprep.mubr.msk.bf16.mxu1 %vm1185_vm3, %v1146_v43  ;;  %v6707_v7 = vmul.f32 -1.442695, %v9202_v38 }
 0x124   :  { %v7771_v49 = vpop.eup %7770  ;;  %7788 = vrcp.f32 %v909_v57  ;;  %7421 = vmatmul.mubr.msk.bf16.gmra.mrb[16].mxu1 %vm1185_vm3, %v1147_v50  ;;  %v9210_v9 = vmul.f32 %v7769_v59, %v9088_v53 }
 0x125   :  { %v7773_v6 = vpop.eup %7772  ;;  %7790 = vrcp.f32 %v907_v46  ;;  %v7376_v10 = vpop.f32.mrb[36].mxu0  ;;  %v9219_v28 = vmul.f32 %v7771_v49, %v9093_v61 }
 0x126   :  { %v7775_v17 = vpop.eup %7774  ;;  %13642 = vst [vmem:[#allocation23_spill] sm:$0xff] %v9210_v9  ;;  %v9213_v13 = vmul.f32 %v7773_v6, %v9097_v37  ;;  %7792 = vpow2.f32 %v6708_v30  ;;  %v9216_v15 = vadd.f32 %v7376_v10, %v8973_v39  ;;  %v579_v16 = vpop.f32.mrb[37].mxu0 }
 0x127   :  { %v7777_v18 = vpop.eup %7776  ;;  %13644 = vst [vmem:[#allocation25_spill] sm:$0xff] %v9219_v28  ;;  %v9222_v58 = vmul.f32 %v7775_v17, %v9101_v45  ;;  %7794 = vpow2.f32 %v6706_v63  ;;  %v9225_v60 = vadd.f32 %v8973_v39, %v579_v16  ;;  %v7377_v53 = vpop.f32.mrb[38].mxu0 }
 0x128   :  { %13643 = vst [vmem:[#allocation24_spill] sm:$0xff] %v9213_v13  ;;  %v7779_v35 = vpop.eup %7778  ;;  %v1149_v37 = vpack.c.bf16 %v9213_v13, %v9210_v9  ;;  %v912_v4 = vadd.f32 1.0, %v7777_v18  ;;  %7796 = vpow2.f32 %v6709_v3  ;;  %v582_v36 = vpop.f32.mrb[39].mxu0  ;;  %v6712_v45 = vmul.f32 -1.442695, %v9216_v15 }
 0x129   :  { %13645 = vst [vmem:[#allocation26_spill] sm:$0xff] %v9222_v58  ;;  %v7781_v47 = vpop.eup %7780  ;;  %v1148_v61 = vpack.c.bf16 %v9222_v58, %v9219_v28  ;;  %v910_v50 = vadd.f32 1.0, %v7779_v35  ;;  %7798 = vpow2.f32 %v6707_v7  ;;  %v9233_v56 = vadd.f32 %v7377_v53, %v8973_v39 }
 0x12a   :  { %v7783_v43 = vpop.eup %7782  ;;  %7800 = vrcp.f32 %v912_v4  ;;  %v913_v26 = vadd.f32 1.0, %v7781_v47  ;;  %v9236_v57 = vadd.f32 %v8973_v39, %v582_v36  ;;  %v6710_v59 = vmul.f32 -1.442695, %v9225_v60 }
 0x12b   :  { %7802 = vrcp.f32 %v910_v50  ;;  %v911_v30 = vadd.f32 1.0, %v7783_v43  ;;  %7424 = vmatprep.mubr.msk.bf16.mxu1 %vm1185_vm3, %v1148_v61  ;;  %v6713_v63 = vmul.f32 -1.442695, %v9233_v56 }
 0x12c   :  { %v7785_v46 = vpop.eup %7784  ;;  %7804 = vrcp.f32 %v913_v26  ;;  %7425 = vmatmul.mubr.msk.bf16.gmra.mrb[20].mxu1 %vm1185_vm3, %v1149_v37  ;;  %v6711_v3 = vmul.f32 -1.442695, %v9236_v57 }
 0x12d   :  { %v7787_v49 = vpop.eup %7786  ;;  %7806 = vrcp.f32 %v911_v30  ;;  %v7380_v6 = vpop.f32.mrb[40].mxu0  ;;  %v9244_v10 = vmul.f32 %v7785_v46, %v9120_v2 }
 0x12e   :  { %v7789_v7 = vpop.eup %7788  ;;  %7808 = vpow2.f32 %v6712_v45  ;;  %v9247_v17 = vadd.f32 %v7380_v6, %v8973_v39  ;;  %v595_v16 = vpop.f32.mrb[41].mxu0  ;;  %v9250_v53 = vmul.f32 %v7787_v49, %v9123_v14 }
 0x12f   :  { %13646 = vst [vmem:[#allocation27_spill] sm:$0xff] %v9244_v10  ;;  %v7791_v18 = vpop.eup %7790  ;;  %v9253_v35 = vmul.f32 %v7789_v7, %v9130_v12  ;;  %7810 = vpow2.f32 %v6710_v59  ;;  %v9256_v37 = vadd.f32 %v8973_v39, %v595_v16  ;;  %v7381_v4 = vpop.f32.mrb[42].mxu0 }
 0x130   :  { %13647 = vst [vmem:[#allocation28_spill] sm:$0xff] %v9250_v53  ;;  %v7793_v36 = vpop.eup %7792  ;;  %v9259_v2 = vmul.f32 %v7791_v18, %v9134_v21  ;;  %7812 = vpow2.f32 %v6713_v63  ;;  %v6716_v47 = vmul.f32 -1.442695, %v9247_v17  ;;  %v9263_v61 = vadd.f32 %v7381_v4, %v8973_v39  ;;  %v598_v14 = vpop.f32.mrb[43].mxu0 }
 0x131   :  { %13648 = vst [vmem:[#allocation29_spill] sm:$0xff] %v9253_v35  ;;  %v7795_v50 = vpop.eup %7794  ;;  %v916_v45 = vadd.f32 1.0, %v7793_v36  ;;  %7814 = vpow2.f32 %v6711_v3  ;;  %v1151_v43 = vpack.c.bf16 %v9253_v35, %v9244_v10  ;;  %v6714_v46 = vmul.f32 -1.442695, %v9256_v37 }
 0x132   :  { %13649 = vst [vmem:[#allocation30_spill] sm:$0xff] %v9259_v2  ;;  %v7797_v12 = vpop.eup %7796  ;;  %v1150_v26 = vpack.c.bf16 %v9259_v2, %v9250_v53  ;;  %v914_v30 = vadd.f32 1.0, %v7795_v50  ;;  %7816 = vpow2.f32 %v6716_v47  ;;  %v9271_v63 = vadd.f32 %v8973_v39, %v598_v14 }
 0x133   :  { %v7799_v21 = vpop.eup %7798  ;;  %7818 = vrcp.f32 %v916_v45  ;;  %v917_v59 = vadd.f32 1.0, %v7797_v12  ;;  %v6717_v6 = vmul.f32 -1.442695, %v9263_v61 }
 0x134   :  { %v7801_v49 = vpop.eup %7800  ;;  %7820 = vrcp.f32 %v914_v30  ;;  %v915_v3 = vadd.f32 1.0, %v7799_v21  ;;  %7428 = vmatprep.mubr.msk.bf16.mxu1 %vm1185_vm3, %v1150_v26  ;;  %v6715_v16 = vmul.f32 -1.442695, %v9271_v63 }
 0x135   :  { %v7803_v7 = vpop.eup %7802  ;;  %7822 = vrcp.f32 %v917_v59  ;;  %7429 = vmatmul.mubr.msk.bf16.gmra.mrb[24].mxu1 %vm1185_vm3, %v1151_v43  ;;  %v7384_v18 = vpop.f32.mrb[44].mxu0 }
 0x136   :  { %v7805_v4 = vpop.eup %7804  ;;  %7824 = vrcp.f32 %v915_v3  ;;  %v9278_v36 = vadd.f32 %v7384_v18, %v8973_v39  ;;  %v611_v47 = vpop.f32.mrb[45].mxu0  ;;  %v9281_v50 = vmul.f32 %v7803_v7, %v9157_v34  ;;  %v9294_v34 = vmul.f32 %v7801_v49, %v9154_v44 }
 0x137   :  { %v7807_v14 = vpop.eup %7806  ;;  %v9284_v45 = vmul.f32 %v7805_v4, %v9165_v5  ;;  %7826 = vpow2.f32 %v6714_v46  ;;  %v7385_v12 = vpop.f32.mrb[46].mxu0  ;;  %v9291_v21 = vadd.f32 %v8973_v39, %v611_v47 }
 0x138   :  { %13650 = vst [vmem:[#allocation31_spill] sm:$0xff] %v9281_v50  ;;  %v7809_v26 = vpop.eup %7808  ;;  %v9287_v30 = vmul.f32 %v7807_v14, %v9169_v8  ;;  %7828 = vpow2.f32 %v6717_v6  ;;  %v6720_v43 = vmul.f32 -1.442695, %v9278_v36  ;;  %v614_v59 = vpop.f32.mrb[47].mxu0  ;;  %13653 = vst [vmem:[#allocation34_spill] sm:$0xff] %v9294_v34  ;;  %v9297_v5 = vadd.f32 %v7385_v12, %v8973_v39 }
 0x139   :  { %13651 = vst [vmem:[#allocation32_spill] sm:$0xff] %v9284_v45  ;;  %v7811_v3 = vpop.eup %7810  ;;  %v920_v7 = vadd.f32 1.0, %v7809_v26  ;;  %7830 = vpow2.f32 %v6715_v16  ;;  %v1153_v4 = vpack.c.bf16 %v9284_v45, %v9294_v34  ;;  %v9304_v44 = vadd.f32 %v8973_v39, %v614_v59 }
 0x13a   :  { %13652 = vst [vmem:[#allocation33_spill] sm:$0xff] %v9287_v30  ;;  %v7813_v46 = vpop.eup %7812  ;;  %v1152_v8 = vpack.c.bf16 %v9287_v30, %v9281_v50  ;;  %v918_v6 = vadd.f32 1.0, %v7811_v3  ;;  %7832 = vpow2.f32 %v6720_v43  ;;  %v6718_v14 = vmul.f32 -1.442695, %v9291_v21 }
 0x13b   :  { %v7815_v18 = vpop.eup %7814  ;;  %7834 = vrcp.f32 %v920_v7  ;;  %v921_v47 = vadd.f32 1.0, %v7813_v46  ;;  %v6721_v43 = vmul.f32 -1.442695, %v9297_v5  ;;  %v6719_v59 = vmul.f32 -1.442695, %v9304_v44 }
 0x13c   :  { %v7817_v49 = vpop.eup %7816  ;;  %7836 = vrcp.f32 %v918_v6  ;;  %v919_v16 = vadd.f32 1.0, %v7815_v18  ;;  %7432 = vmatprep.mubr.msk.bf16.mxu1 %vm1185_vm3, %v1152_v8 }
 0x13d   :  { %v7819_v12 = vpop.eup %7818  ;;  %7838 = vrcp.f32 %v921_v47  ;;  %v924_v26 = vadd.f32 1.0, %v7817_v49  ;;  %7433 = vmatmul.mubr.msk.bf16.gmra.mrb[28].mxu1 %vm1185_vm3, %v1153_v4  ;;  %v7388_v3 = vpop.f32.mrb[48].mxu0 }
 0x13e   :  { %v7821_v7 = vpop.eup %7820  ;;  %7840 = vrcp.f32 %v919_v16  ;;  %v9312_v46 = vadd.f32 %v7388_v3, %v8973_v39  ;;  %v627_v6 = vpop.f32.mrb[49].mxu0 }
 0x13f   :  { %v7823_v18 = vpop.eup %7822  ;;  %7842 = vrcp.f32 %v924_v26  ;;  %v7389_v30 = vpop.f32.mrb[50].mxu0  ;;  %v9319_v4 = vadd.f32 %v8973_v39, %v627_v6  ;;  %v9322_v45 = vmul.f32 %v7821_v7, %v9191_v31 }
 0x140   :  { %v7825_v8 = vpop.eup %7824  ;;  %v9315_v47 = vmul.f32 %v7823_v18, %v9198_v11  ;;  %7844 = vpow2.f32 %v6718_v14  ;;  %v6724_v49 = vmul.f32 -1.442695, %v9312_v46  ;;  %v630_v16 = vpop.f32.mrb[51].mxu0  ;;  %v9328_v26 = vadd.f32 %v7389_v30, %v8973_v39 }
 0x141   :  { %v7827_v50 = vpop.eup %7826  ;;  %13655 = vst [vmem:[#allocation36_spill] sm:$0xff] %v9322_v45  ;;  %v9325_v3 = vmul.f32 %v7825_v8, %v9202_v38  ;;  %7846 = vpow2.f32 %v6721_v43  ;;  %v9331_v14 = vmul.f32 %v7819_v12, %v9182_v27  ;;  %v9334_v6 = vadd.f32 %v8973_v39, %v630_v16 }
 0x142   :  { %13654 = vst [vmem:[#allocation35_spill] sm:$0xff] %v9315_v47  ;;  %v7829_v11 = vpop.eup %7828  ;;  %v922_v18 = vadd.f32 1.0, %v7827_v50  ;;  %7848 = vpow2.f32 %v6719_v59  ;;  %v6722_v27 = vmul.f32 -1.442695, %v9319_v4  ;;  %v6725_v59 = vmul.f32 -1.442695, %v9328_v26 }
 0x143   :  { %13656 = vst [vmem:[#allocation37_spill] sm:$0xff] %v9325_v3  ;;  %13657 = vst [vmem:[#allocation38_spill] sm:$0xff] %v9331_v14  ;;  %v7831_v34 = vpop.eup %7830  ;;  %v1154_v31 = vpack.c.bf16 %v9325_v3, %v9322_v45  ;;  %v925_v7 = vadd.f32 1.0, %v7829_v11  ;;  %7850 = vpow2.f32 %v6724_v49  ;;  %v1155_v30 = vpack.c.bf16 %v9315_v47, %v9331_v14 }
 0x144   :  { %v7833_v38 = vpop.eup %7832  ;;  %7852 = vrcp.f32 %v922_v18  ;;  %v923_v43 = vadd.f32 1.0, %v7831_v34  ;;  %v6723_v49 = vmul.f32 -1.442695, %v9334_v6 }
 0x145   :  { %v7835_v12 = vpop.eup %7834  ;;  %7854 = vrcp.f32 %v925_v7  ;;  %v928_v50 = vadd.f32 1.0, %v7833_v38  ;;  %7436 = vmatprep.mubr.msk.bf16.mxu1 %vm1185_vm3, %v1154_v31  ;;  %v7392_v8 = vpop.f32.mrb[52].mxu0 }
 0x146   :  { %v7837_v16 = vpop.eup %7836  ;;  %7856 = vrcp.f32 %v923_v43  ;;  %7437 = vmatmul.mubr.msk.bf16.gmra.mrb[32].mxu1 %vm1185_vm3, %v1155_v30  ;;  %v9346_v11 = vadd.f32 %v7392_v8, %v8973_v39  ;;  %v643_v34 = vpop.f32.mrb[53].mxu0 }
 0x147   :  { %v7839_v18 = vpop.eup %7838  ;;  %7858 = vrcp.f32 %v928_v50  ;;  %v9349_v7 = vadd.f32 %v8973_v39, %v643_v34  ;;  %v7393_v38 = vpop.f32.mrb[54].mxu0  ;;  %v9352_v31 = vmul.f32 %v7837_v16, %v9225_v60  ;;  %v9366_v60 = vmul.f32 %v7835_v12, %v9216_v15 }
 0x148   :  { %v7841_v3 = vpop.eup %7840  ;;  %v9355_v43 = vmul.f32 %v7839_v18, %v9233_v56  ;;  %7860 = vpow2.f32 %v6722_v27  ;;  %v6728_v30 = vmul.f32 -1.442695, %v9346_v11  ;;  %v646_v45 = vpop.f32.mrb[55].mxu0  ;;  %v9363_v34 = vadd.f32 %v7393_v38, %v8973_v39 }
 0x149   :  { %13658 = vst [vmem:[#allocation39_spill] sm:$0xff] %v9352_v31  ;;  %v7843_v8 = vpop.eup %7842  ;;  %v9359_v47 = vmul.f32 %v7841_v3, %v9236_v57  ;;  %7862 = vpow2.f32 %v6725_v59  ;;  %v6726_v50 = vmul.f32 -1.442695, %v9349_v7  ;;  %13661 = vst [vmem:[#allocation42_spill] sm:$0xff] %v9366_v60  ;;  %v9369_v56 = vadd.f32 %v8973_v39, %v646_v45 }
 0x14a   :  { %13659 = vst [vmem:[#allocation40_spill] sm:$0xff] %v9355_v43  ;;  %v7845_v14 = vpop.eup %7844  ;;  %7864 = vpow2.f32 %v6723_v49  ;;  %v1157_v59 = vpack.c.bf16 %v9355_v43, %v9366_v60  ;;  %v6729_v12 = vmul.f32 -1.442695, %v9363_v34  ;;  %v9397_v43 = vmul.f32 %v7843_v8, %v9247_v17 }
 0x14b   :  { %13660 = vst [vmem:[#allocation41_spill] sm:$0xff] %v9359_v47  ;;  %v7847_v27 = vpop.eup %7846  ;;  %v1156_v16 = vpack.c.bf16 %v9359_v47, %v9352_v31  ;;  %v926_v57 = vadd.f32 1.0, %v7845_v14  ;;  %7866 = vpow2.f32 %v6728_v30  ;;  %v6727_v14 = vmul.f32 -1.442695, %v9369_v56 }
 0x14c   :  { %v7849_v3 = vpop.eup %7848  ;;  %v929_v18 = vadd.f32 1.0, %v7847_v27  ;;  %7868 = vpow2.f32 %v6726_v50  ;;  %13665 = vst [vmem:[#allocation46_spill] sm:$0xff] %v9397_v43 }
 0x14d   :  { %v7851_v38 = vpop.eup %7850  ;;  %7870 = vrcp.f32 %v926_v57  ;;  %v927_v15 = vadd.f32 1.0, %v7849_v3  ;;  %7440 = vmatprep.mubr.msk.bf16.mxu1 %vm1185_vm3, %v1156_v16  ;;  %v7396_v45 = vpop.f32.mrb[56].mxu0 }
 0x14e   :  { %v7853_v49 = vpop.eup %7852  ;;  %7872 = vrcp.f32 %v929_v18  ;;  %v932_v2 = vadd.f32 1.0, %v7851_v38  ;;  %7441 = vmatmul.mubr.msk.bf16.gmra.mrb[36].mxu1 %vm1185_vm3, %v1157_v59  ;;  %v9380_v30 = vadd.f32 %v7396_v45, %v8973_v39  ;;  %v659_v27 = vpop.f32.mrb[57].mxu0 }
 0x14f   :  { %v7855_v50 = vpop.eup %7854  ;;  %7874 = vrcp.f32 %v927_v15  ;;  %v9383_v57 = vadd.f32 %v8973_v39, %v659_v27  ;;  %v7397_v3 = vpop.f32.mrb[58].mxu0  ;;  %v9390_v59 = vmul.f32 %v7853_v49, %v9256_v37 }
 0x150   :  { %v7857_v47 = vpop.eup %7856  ;;  %v9386_v16 = vmul.f32 %v7855_v50, %v9263_v61  ;;  %7876 = vrcp.f32 %v932_v2  ;;  %v6732_v18 = vmul.f32 -1.442695, %v9380_v30  ;;  %v662_v38 = vpop.f32.mrb[59].mxu0  ;;  %v9400_v2 = vadd.f32 %v7397_v3, %v8973_v39 }
 0x151   :  { %v7859_v31 = vpop.eup %7858  ;;  %13663 = vst [vmem:[#allocation44_spill] sm:$0xff] %v9390_v59  ;;  %v9393_v45 = vmul.f32 %v7857_v47, %v9271_v63  ;;  %7878 = vpow2.f32 %v6729_v12  ;;  %v6730_v15 = vmul.f32 -1.442695, %v9383_v57  ;;  %v8704_v63 = vld [vmem:[%s13451_s2] ss:$0 sm:$0xff] }
 0x152   :  { %13662 = vst [vmem:[#allocation43_spill] sm:$0xff] %v9386_v16  ;;  %v7861_v27 = vpop.eup %7860  ;;  %7880 = vpow2.f32 %v6727_v14  ;;  %v9407_v47 = vadd.f32 %v8704_v63, %v662_v38  ;;  %v1159_v17 = vpack.c.bf16 %v9386_v16, %v9397_v43  ;;  %v9433_v60 = vmul.f32 %v7859_v31, %v9278_v36 }
 0x153   :  { %13664 = vst [vmem:[#allocation45_spill] sm:$0xff] %v9393_v45  ;;  %v7863_v61 = vpop.eup %7862  ;;  %v1158_v50 = vpack.c.bf16 %v9393_v45, %v9390_v59  ;;  %v930_v37 = vadd.f32 1.0, %v7861_v27  ;;  %7882 = vpow2.f32 %v6732_v18  ;;  %v6733_v27 = vmul.f32 -1.442695, %v9400_v2 }
 0x154   :  { %v7865_v12 = vpop.eup %7864  ;;  %v933_v8 = vadd.f32 1.0, %v7863_v61  ;;  %7884 = vpow2.f32 %v6730_v15  ;;  %v6731_v15 = vmul.f32 -1.442695, %v9407_v47  ;;  %13669 = vst [vmem:[#allocation50_spill] sm:$0xff] %v9433_v60 }
 0x155   :  { %v7867_v39 = vpop.eup %7866  ;;  %7886 = vrcp.f32 %v930_v37  ;;  %v931_v49 = vadd.f32 1.0, %v7865_v12  ;;  %7444 = vmatprep.mubr.msk.bf16.mxu1 %vm1185_vm3, %v1158_v50  ;;  %v7400_v14 = vpop.f32.mrb[60].mxu0 }
 0x156   :  { %v7869_v3 = vpop.eup %7868  ;;  %7888 = vrcp.f32 %v933_v8  ;;  %v936_v18 = vadd.f32 1.0, %v7867_v39  ;;  %7445 = vmatmul.mubr.msk.bf16.gmra.mrb[40].mxu1 %vm1185_vm3, %v1159_v17  ;;  %v9414_v38 = vadd.f32 %v8704_v63, %v7400_v14  ;;  %v675_v45 = vpop.f32.mrb[61].mxu0 }
 0x157   :  { %v7871_v59 = vpop.eup %7870  ;;  %7890 = vrcp.f32 %v931_v49  ;;  %v934_v61 = vadd.f32 1.0, %v7869_v3  ;;  %v9417_v37 = vadd.f32 %v8704_v63, %v675_v45  ;;  %v7401_v12 = vpop.f32.mrb[62].mxu0 }
 0x158   :  { %v7873_v50 = vpop.eup %7872  ;;  %7892 = vrcp.f32 %v936_v18  ;;  %v6736_v8 = vmul.f32 -1.442695, %v9414_v38  ;;  %v678_v39 = vpop.f32.mrb[63].mxu0  ;;  %v9425_v49 = vmul.f32 %v7871_v59, %v9291_v21  ;;  %v9430_v3 = vadd.f32 %v8704_v63, %v7401_v12 }
 0x159   :  { %v7875_v16 = vpop.eup %7874  ;;  %v9421_v43 = vmul.f32 %v7873_v50, %v9297_v5  ;;  %7894 = vrcp.f32 %v934_v61  ;;  %v6734_v17 = vmul.f32 -1.442695, %v9417_v37  ;;  %v9435_v5 = vadd.f32 %v8704_v63, %v678_v39 }
 0x15a   :  { %v7877_v14 = vpop.eup %7876  ;;  %13667 = vst [vmem:[#allocation48_spill] sm:$0xff] %v9425_v49  ;;  %v9428_v45 = vmul.f32 %v7875_v16, %v9304_v44  ;;  %7896 = vpow2.f32 %v6733_v27  ;;  %v6737_v36 = vmul.f32 -1.442695, %v9430_v3 }
 0x15b   :  { %13666 = vst [vmem:[#allocation47_spill] sm:$0xff] %v9421_v43  ;;  %v7879_v18 = vpop.eup %7878  ;;  %7898 = vpow2.f32 %v6731_v15  ;;  %v1161_v44 = vpack.c.bf16 %v9421_v43, %v9433_v60  ;;  %v6735_v63 = vmul.f32 -1.442695, %v9435_v5 }
 0x15c   :  { %13668 = vst [vmem:[#allocation49_spill] sm:$0xff] %v9428_v45  ;;  %v7881_v61 = vpop.eup %7880  ;;  %v1160_v50 = vpack.c.bf16 %v9428_v45, %v9425_v49  ;;  %v937_v53 = vadd.f32 1.0, %v7879_v18  ;;  %7900 = vpow2.f32 %v6736_v8 }
 0x15d   :  { %v7883_v21 = vpop.eup %7882  ;;  %v935_v16 = vadd.f32 1.0, %v7881_v61  ;;  %7902 = vpow2.f32 %v6734_v17 }
 0x15e   :  { %v7885_v59 = vpop.eup %7884  ;;  %7904 = vrcp.f32 %v937_v53  ;;  %7448 = vmatprep.mubr.msk.bf16.mxu1 %vm1185_vm3, %v1160_v50  ;;  %v940_v8 = vadd.f32 1.0, %v7883_v21  ;;  %v9455_v50 = vmul.f32 %v7877_v14, %v9312_v46 }
 0x15f   :  { %v7887_v31 = vpop.eup %7886  ;;  %7906 = vrcp.f32 %v935_v16  ;;  %7449 = vmatmul.mubr.msk.bf16.gmra.mrb[44].mxu1 %vm1185_vm3, %v1161_v44  ;;  %v938_v18 = vadd.f32 1.0, %v7885_v59 }
 0x160   :  { %v7889_v27 = vpop.eup %7888  ;;  %v9449_v17 = vmul.f32 %v7887_v31, %v9319_v4  ;;  %7908 = vpow2.f32 %v6737_v36  ;;  %13673 = vst [vmem:[#allocation54_spill] sm:$0xff] %v9455_v50 }
 0x161   :  { %v7891_v15 = vpop.eup %7890  ;;  %v9446_v12 = vmul.f32 %v7889_v27, %v9328_v26  ;;  %7910 = vpow2.f32 %v6735_v63 }
 0x162   :  { %v7893_v39 = vpop.eup %7892  ;;  %13671 = vst [vmem:[#allocation52_spill] sm:$0xff] %v9449_v17  ;;  %v9452_v53 = vmul.f32 %v7891_v15, %v9334_v6  ;;  %7912 = vrcp.f32 %v940_v8 }
 0x163   :  { %13670 = vst [vmem:[#allocation51_spill] sm:$0xff] %v9446_v12  ;;  %v7895_v61 = vpop.eup %7894  ;;  %v1163_v21 = vpack.c.bf16 %v9446_v12, %v9455_v50  ;;  %7914 = vrcp.f32 %v938_v18  ;;  %v9473_v18 = vmul.f32 %v7893_v39, %v9346_v11 }
 0x164   :  { %13672 = vst [vmem:[#allocation53_spill] sm:$0xff] %v9452_v53  ;;  %v7897_v44 = vpop.eup %7896  ;;  %v1162_v26 = vpack.c.bf16 %v9452_v53, %v9449_v17  ;;  %v9467_v27 = vmul.f32 %v7895_v61, %v9349_v7 }
 0x165   :  { %v7899_v16 = vpop.eup %7898  ;;  %v941_v4 = vadd.f32 1.0, %v7897_v44  ;;  %13677 = vst [vmem:[#allocation58_spill] sm:$0xff] %v9473_v18 }
 0x166   :  { %v7901_v31 = vpop.eup %7900  ;;  %v939_v6 = vadd.f32 1.0, %v7899_v16  ;;  %7452 = vmatprep.mubr.msk.bf16.mxu1 %vm1185_vm3, %v1162_v26  ;;  %13675 = vst [vmem:[#allocation56_spill] sm:$0xff] %v9467_v27 }
 0x167   :  { %v7903_v59 = vpop.eup %7902  ;;  %7916 = vrcp.f32 %v941_v4  ;;  %7453 = vmatmul.mubr.msk.bf16.gmra.mrb[48].mxu1 %vm1185_vm3, %v1163_v21  ;;  %v944_v63 = vadd.f32 1.0, %v7901_v31 }
 0x168   :  { %v7905_v46 = vpop.eup %7904  ;;  %7918 = vrcp.f32 %v939_v6  ;;  %v942_v8 = vadd.f32 1.0, %v7903_v59  ;;  %v13482_v59 = vmov 0.0  }
 0x169   :  { %v7907_v14 = vpop.eup %7906  ;;  %v9464_v36 = vmul.f32 %v7905_v46, %v9363_v34  ;;  %7920 = vrcp.f32 %v944_v63  ;;  %2038 = vst.msk [vmem:[#allocation2 + $0x127] sm:$0x1] %vm2036_vm5, %v13482_v59  ;;  %2037 = vst.msk [vmem:[#allocation2 + $0x107] sm:$0x1] %vm2036_vm5, %v13482_v59  ;;  %7468 = vmatprep.subr.bf16.mxu1 %v13482_v59  ;;  %7480 = vmatprep.subr.bf16.mxu0 %v13482_v59 }
 0x16a   :  { %v9470_v15 = vmul.f32 %v7907_v14, %v9369_v56  ;;  %v7909_v44 = vpop.eup %7908  ;;  %7922 = vrcp.f32 %v942_v8  ;;  %2021 = vst.msk [vmem:[#allocation2 + $0xe7] sm:$0xff] %vm2020_vm4, %v13482_v59  ;;  %2022 = vst.msk [vmem:[#allocation2 + $0xef] sm:$0xff] %vm2020_vm4, %v13482_v59 }
 0x16b   :  { %13674 = vst [vmem:[#allocation55_spill] sm:$0xff] %v9464_v36  ;;  %v7911_v16 = vpop.eup %7910  ;;  %v1165_v34 = vpack.c.bf16 %v9464_v36, %v9473_v18  ;;  %v945_v21 = vadd.f32 1.0, %v7909_v44  ;;  %2025 = vst.msk [vmem:[#allocation2 + $0x4e7] sm:$0xff] %vm2020_vm4, %v13482_v59 }
 0x16c   :  { %13676 = vst [vmem:[#allocation57_spill] sm:$0xff] %v9470_v15  ;;  %v1164_v26 = vpack.c.bf16 %v9470_v15, %v9467_v27  ;;  %v943_v7 = vadd.f32 1.0, %v7911_v16  ;;  %v9480_v56 = vpop.eup %7912  ;;  %2026 = vst.msk [vmem:[#allocation2 + $0x4ef] sm:$0xff] %vm2020_vm4, %v13482_v59 }
 0x16d   :  { %7924 = vrcp.f32 %v945_v21  ;;  %v7915_v11 = vpop.eup %7914  ;;  %2029 = vst.msk [vmem:[#allocation2 + $0x307] sm:$0xff] %vm2020_vm4, %v13482_v59  ;;  %2030 = vst.msk [vmem:[#allocation2 + $0x30f] sm:$0xff] %vm2020_vm4, %v13482_v59 }
 0x16e   :  { %7456 = vmatprep.mubr.msk.bf16.mxu1 %vm1185_vm3, %v1164_v26  ;;  %7926 = vrcp.f32 %v943_v7  ;;  %v9487_v31 = vmul.f32 %v7915_v11, %v9383_v57  ;;  %2032 = vst.msk [vmem:[#allocation2 + $0x707] sm:$0xff] %vm2020_vm4, %v13482_v59  ;;  %2033 = vst.msk [vmem:[#allocation2 + $0x70f] sm:$0xff] %vm2020_vm4, %v13482_v59  ;;  %v9640_v57 = vmul.f32 %v9480_v56, %v9380_v30 }
 0x16f   :  { %7457 = vmatmul.mubr.msk.bf16.gmra.mrb[52].mxu1 %vm1185_vm3, %v1165_v34  ;;  %2039 = vst.msk [vmem:[#allocation2 + $0x147] sm:$0x1] %vm2036_vm5, %v13482_v59  ;;  %2040 = vst.msk [vmem:[#allocation2 + $0x167] sm:$0x1] %vm2036_vm5, %v13482_v59 }
 0x170   :  { %13679 = vst [vmem:[#allocation60_spill] sm:$0xff] %v9487_v31  ;;  %2041 = vst.msk [vmem:[#allocation2 + $0x187] sm:$0x1] %vm2036_vm5, %v13482_v59 }
 0x171   :  { %v7917_v39 = vpop.eup %7916  ;;  %2042 = vst.msk [vmem:[#allocation2 + $0x1a7] sm:$0x1] %vm2036_vm5, %v13482_v59  ;;  %2043 = vst.msk [vmem:[#allocation2 + $0x1c7] sm:$0x1] %vm2036_vm5, %v13482_v59  ;;  %v2166_v50 = vld [vmem:[#allocation2 + $0xef] sm:$0xff] }
 0x172   :  { %v7919_v61 = vpop.eup %7918  ;;  %v9484_v4 = vmul.f32 %v7917_v39, %v9400_v2  ;;  %2044 = vst.msk [vmem:[#allocation2 + $0x1e7] sm:$0x1] %vm2036_vm5, %v13482_v59  ;;  %2045 = vst.msk [vmem:[#allocation2 + $0x207] sm:$0x1] %vm2036_vm5, %v13482_v59  ;;  %v2564_v58 = vld [vmem:[#allocation2 + $0xe9] sm:$0xff] }
 0x173   :  { %v9490_v6 = vmul.f32 %v7919_v61, %v9407_v47  ;;  %2046 = vst.msk [vmem:[#allocation2 + $0x227] sm:$0x1] %vm2036_vm5, %v13482_v59  ;;  %2047 = vst.msk [vmem:[#allocation2 + $0x247] sm:$0x1] %vm2036_vm5, %v13482_v59  ;;  %v7921_v46 = vpop.eup %7920 }
 0x174   :  { %13678 = vst [vmem:[#allocation59_spill] sm:$0xff] %v9484_v4  ;;  %2048 = vst.msk [vmem:[#allocation2 + $0x267] sm:$0x1] %vm2036_vm5, %v13482_v59  ;;  %v1167_v47 = vpack.c.bf16 %v9484_v4, %v9640_v57  ;;  %v7923_v14 = vpop.eup %7922  ;;  %v9662_v16 = vmul.f32 %v7921_v46, %v9414_v38 }
 0x175   :  { %13680 = vst [vmem:[#allocation61_spill] sm:$0xff] %v9490_v6  ;;  %2049 = vst.msk [vmem:[#allocation2 + $0x287] sm:$0x1] %vm2036_vm5, %v13482_v59  ;;  %v1166_v2 = vpack.c.bf16 %v9490_v6, %v9487_v31  ;;  %v9656_v44 = vmul.f32 %v7923_v14, %v9417_v37  ;;  %v9673_v37 = vld [vmem:[%s13452_s4] ss:$0 sm:$0xff] }
 0x176   :  { %2050 = vst.msk [vmem:[#allocation2 + $0x2a7] sm:$0x1] %vm2036_vm5, %v13482_v59  ;;  %2051 = vst.msk [vmem:[#allocation2 + $0x2c7] sm:$0x1] %vm2036_vm5, %v13482_v59 }
 0x177   :  { %2052 = vst.msk [vmem:[#allocation2 + $0x2e7] sm:$0x1] %vm2036_vm5, %v13482_v59  ;;  %2053 = vst.msk [vmem:[#allocation2 + $0x507] sm:$0x1] %vm2036_vm5, %v13482_v59  ;;  %7460 = vmatprep.mubr.msk.bf16.mxu1 %vm1185_vm3, %v1166_v2  ;;  %v7925_v63 = vpop.eup %7924 }
 0x178   :  { %2054 = vst.msk [vmem:[#allocation2 + $0x527] sm:$0x1] %vm2036_vm5, %v13482_v59  ;;  %2055 = vst.msk [vmem:[#allocation2 + $0x547] sm:$0x1] %vm2036_vm5, %v13482_v59  ;;  %7461 = vmatmul.mubr.msk.bf16.gmra.mrb[56].mxu1 %vm1185_vm3, %v1167_v47  ;;  %v7927_v30 = vpop.eup %7926  ;;  %v9653_v8 = vmul.f32 %v7925_v63, %v9430_v3 }
 0x179   :  { %2056 = vst.msk [vmem:[#allocation2 + $0x567] sm:$0x1] %vm2036_vm5, %v13482_v59  ;;  %2057 = vst.msk [vmem:[#allocation2 + $0x587] sm:$0x1] %vm2036_vm5, %v13482_v59  ;;  %v9659_v26 = vmul.f32 %v7927_v30, %v9435_v5 }
 0x17a   :  { %2058 = vst.msk [vmem:[#allocation2 + $0x5a7] sm:$0x1] %vm2036_vm5, %v13482_v59  ;;  %2059 = vst.msk [vmem:[#allocation2 + $0x5c7] sm:$0x1] %vm2036_vm5, %v13482_v59  ;;  %v1169_v21 = vpack.c.bf16 %v9653_v8, %v9662_v16 }
 0x17b   :  { %2060 = vst.msk [vmem:[#allocation2 + $0x5e7] sm:$0x1] %vm2036_vm5, %v13482_v59  ;;  %2061 = vst.msk [vmem:[#allocation2 + $0x607] sm:$0x1] %vm2036_vm5, %v13482_v59  ;;  %v1168_v34 = vpack.c.bf16 %v9659_v26, %v9656_v44 }
 0x17c   :  { %2062 = vst.msk [vmem:[#allocation2 + $0x627] sm:$0x1] %vm2036_vm5, %v13482_v59  ;;  %2063 = vst.msk [vmem:[#allocation2 + $0x647] sm:$0x1] %vm2036_vm5, %v13482_v59 }
 0x17d   :  { %2064 = vst.msk [vmem:[#allocation2 + $0x667] sm:$0x1] %vm2036_vm5, %v13482_v59  ;;  %2065 = vst.msk [vmem:[#allocation2 + $0x687] sm:$0x1] %vm2036_vm5, %v13482_v59  ;;  %7464 = vmatprep.mubr.msk.bf16.mxu1 %vm1185_vm3, %v1168_v34 }
 0x17e   :  { %2066 = vst.msk [vmem:[#allocation2 + $0x6a7] sm:$0x1] %vm2036_vm5, %v13482_v59  ;;  %2067 = vst.msk [vmem:[#allocation2 + $0x6c7] sm:$0x1] %vm2036_vm5, %v13482_v59 }
 0x17f   :  { %2068 = vst.msk [vmem:[#allocation2 + $0x6e7] sm:$0x1] %vm2036_vm5, %v13482_v59  ;;  %2069 = vst.msk [vmem:[#allocation2 + $0x118] sm:$0x1] %vm2036_vm5, %v13482_v59 }
 0x180   :  { %2070 = vst.msk [vmem:[#allocation2 + $0x138] sm:$0x1] %vm2036_vm5, %v13482_v59  ;;  %2071 = vst.msk [vmem:[#allocation2 + $0x158] sm:$0x1] %vm2036_vm5, %v13482_v59  ;;  %7465 = vmatmul.mubr.msk.bf16.gmra.mrb[60].mxu1 %vm1185_vm3, %v1169_v21 }
 0x181   :  { %2072 = vst.msk [vmem:[#allocation2 + $0x178] sm:$0x1] %vm2036_vm5, %v13482_v59  ;;  %2073 = vst.msk [vmem:[#allocation2 + $0x198] sm:$0x1] %vm2036_vm5, %v13482_v59 }
 0x182   :  { %2074 = vst.msk [vmem:[#allocation2 + $0x1b8] sm:$0x1] %vm2036_vm5, %v13482_v59  ;;  %2075 = vst.msk [vmem:[#allocation2 + $0x1d8] sm:$0x1] %vm2036_vm5, %v13482_v59 }
 0x183   :  { %2076 = vst.msk [vmem:[#allocation2 + $0x1f8] sm:$0x1] %vm2036_vm5, %v13482_v59  ;;  %2077 = vst.msk [vmem:[#allocation2 + $0x218] sm:$0x1] %vm2036_vm5, %v13482_v59 }
 0x184   :  { %2078 = vst.msk [vmem:[#allocation2 + $0x238] sm:$0x1] %vm2036_vm5, %v13482_v59  ;;  %2079 = vst.msk [vmem:[#allocation2 + $0x258] sm:$0x1] %vm2036_vm5, %v13482_v59 }
 0x185   :  { %2080 = vst.msk [vmem:[#allocation2 + $0x278] sm:$0x1] %vm2036_vm5, %v13482_v59  ;;  %2081 = vst.msk [vmem:[#allocation2 + $0x298] sm:$0x1] %vm2036_vm5, %v13482_v59 }
 0x186   :  { %2082 = vst.msk [vmem:[#allocation2 + $0x2b8] sm:$0x1] %vm2036_vm5, %v13482_v59  ;;  %2083 = vst.msk [vmem:[#allocation2 + $0x2d8] sm:$0x1] %vm2036_vm5, %v13482_v59 }
 0x187   :  { %2084 = vst.msk [vmem:[#allocation2 + $0x2f8] sm:$0x1] %vm2036_vm5, %v13482_v59  ;;  %2085 = vst.msk [vmem:[#allocation2 + $0x518] sm:$0x1] %vm2036_vm5, %v13482_v59 }
 0x188   :  { %2086 = vst.msk [vmem:[#allocation2 + $0x538] sm:$0x1] %vm2036_vm5, %v13482_v59  ;;  %2087 = vst.msk [vmem:[#allocation2 + $0x558] sm:$0x1] %vm2036_vm5, %v13482_v59 }
 0x189   :  { %2088 = vst.msk [vmem:[#allocation2 + $0x578] sm:$0x1] %vm2036_vm5, %v13482_v59  ;;  %2089 = vst.msk [vmem:[#allocation2 + $0x598] sm:$0x1] %vm2036_vm5, %v13482_v59 }
 0x18a   :  { %2090 = vst.msk [vmem:[#allocation2 + $0x5b8] sm:$0x1] %vm2036_vm5, %v13482_v59  ;;  %2091 = vst.msk [vmem:[#allocation2 + $0x5d8] sm:$0x1] %vm2036_vm5, %v13482_v59 }
 0x18b   :  { %2092 = vst.msk [vmem:[#allocation2 + $0x5f8] sm:$0x1] %vm2036_vm5, %v13482_v59  ;;  %2093 = vst.msk [vmem:[#allocation2 + $0x618] sm:$0x1] %vm2036_vm5, %v13482_v59 }
 0x18c   :  { %2094 = vst.msk [vmem:[#allocation2 + $0x638] sm:$0x1] %vm2036_vm5, %v13482_v59  ;;  %2095 = vst.msk [vmem:[#allocation2 + $0x658] sm:$0x1] %vm2036_vm5, %v13482_v59 }
 0x18d   :  { %2096 = vst.msk [vmem:[#allocation2 + $0x678] sm:$0x1] %vm2036_vm5, %v13482_v59  ;;  %2097 = vst.msk [vmem:[#allocation2 + $0x698] sm:$0x1] %vm2036_vm5, %v13482_v59 }
 0x18e   :  { %2098 = vst.msk [vmem:[#allocation2 + $0x6b8] sm:$0x1] %vm2036_vm5, %v13482_v59  ;;  %2099 = vst.msk [vmem:[#allocation2 + $0x6d8] sm:$0x1] %vm2036_vm5, %v13482_v59 }
 0x18f   :  { %2100 = vst.msk [vmem:[#allocation2 + $0x6f8] sm:$0x1] %vm2036_vm5, %v13482_v59  ;;  %13681 = vst [vmem:[#allocation62_spill] sm:$0xff] %v9640_v57 }
 0x190   :  { %2024 = vst.msk [vmem:[#allocation2 + $0xf7] sm:$0x3] %vm2023_vm6, %v13482_v59  ;;  %2027 = vst.msk [vmem:[#allocation2 + $0x4f7] sm:$0x3] %vm2023_vm6, %v13482_v59 }
 0x191   :  { %2031 = vst.msk [vmem:[#allocation2 + $0x317] sm:$0x3] %vm2023_vm6, %v13482_v59  ;;  %2034 = vst.msk [vmem:[#allocation2 + $0x717] sm:$0x3] %vm2023_vm6, %v13482_v59 }
 0x192   :  { %13682 = vst [vmem:[#allocation63_spill] sm:$0xff] %v9653_v8  ;;  %13683 = vst [vmem:[#allocation64_spill] sm:$0xff] %v9656_v44 }
 0x193   :  { %13684 = vst [vmem:[#allocation65_spill] sm:$0xff] %v9659_v26  ;;  %13685 = vst [vmem:[#allocation66_spill] sm:$0xff] %v9662_v16 }
 0x197   :  { %v2365_v45 = vld [vmem:[#allocation2 + $0xf0] sm:$0xff] }
 0x1d5   :  { %v7406_v3 = vpop.f32.mrb[0].mxu1 }
 0x1d6   :  { %v9676_v5 = vadd.f32 %v7406_v3, %v9673_v37  ;;  %v1316_v38 = vpop.f32.mrb[1].mxu1 }
 0x1d7   :  { %v9679_v7 = vadd.f32 %v9673_v37, %v1316_v38  ;;  %v7407_v56 = vpop.f32.mrb[2].mxu1 }
 0x1d8   :  { %v6774_v11 = vmul.f32 -1.442695, %v9676_v5  ;;  %v9683_v39 = vadd.f32 %v7407_v56, %v9673_v37  ;;  %v1319_v61 = vpop.f32.mrb[3].mxu1 }
 0x1d9   :  { %v6772_v2 = vmul.f32 -1.442695, %v9679_v7  ;;  %v9687_v47 = vadd.f32 %v9673_v37, %v1319_v61 }
 0x1da   :  { %7928 = vpow2.f32 %v6774_v11  ;;  %v6775_v46 = vmul.f32 -1.442695, %v9683_v39 }
 0x1db   :  { %7930 = vpow2.f32 %v6772_v2  ;;  %v6773_v14 = vmul.f32 -1.442695, %v9687_v47 }
 0x1dc   :  { %7932 = vpow2.f32 %v6775_v46 }
 0x1dd   :  { %7934 = vpow2.f32 %v6773_v14  ;;  %v7410_v63 = vpop.f32.mrb[4].mxu1 }
 0x1de   :  { %v9692_v30 = vadd.f32 %v7410_v63, %v9673_v37  ;;  %v1332_v34 = vpop.f32.mrb[5].mxu1 }
 0x1df   :  { %v9695_v21 = vadd.f32 %v9673_v37, %v1332_v34  ;;  %v7411_v3 = vpop.f32.mrb[6].mxu1 }
 0x1e0   :  { %v6778_v38 = vmul.f32 -1.442695, %v9692_v30  ;;  %v9699_v56 = vadd.f32 %v7411_v3, %v9673_v37  ;;  %v1335_v11 = vpop.f32.mrb[7].mxu1 }
 0x1e1   :  { %v6776_v61 = vmul.f32 -1.442695, %v9695_v21  ;;  %v9704_v46 = vadd.f32 %v9673_v37, %v1335_v11 }
 0x1e2   :  { %7936 = vpow2.f32 %v6778_v38  ;;  %v6779_v2 = vmul.f32 -1.442695, %v9699_v56 }
 0x1e3   :  { %7938 = vpow2.f32 %v6776_v61  ;;  %v6777_v16 = vmul.f32 -1.442695, %v9704_v46 }
 0x1e4   :  { %v7929_v14 = vpop.eup %7928  ;;  %7940 = vpow2.f32 %v6779_v2 }
 0x1e5   :  { %v7931_v63 = vpop.eup %7930  ;;  %v1765_v34 = vadd.f32 1.0, %v7929_v14 }
 0x1e6   :  { %v7933_v59 = vpop.eup %7932  ;;  %v1763_v26 = vadd.f32 1.0, %v7931_v63  ;;  %v7414_v44 = vpop.f32.mrb[8].mxu1 }
 0x1e7   :  { %v7935_v8 = vpop.eup %7934  ;;  %7942 = vrcp.f32 %v1765_v34  ;;  %v1766_v3 = vadd.f32 1.0, %v7933_v59  ;;  %v9708_v38 = vadd.f32 %v7414_v44, %v9673_v37  ;;  %v1348_v6 = vpop.f32.mrb[9].mxu1 }
 0x1e8   :  { %7944 = vrcp.f32 %v1763_v26  ;;  %v1764_v61 = vadd.f32 1.0, %v7935_v8  ;;  %v9711_v11 = vadd.f32 %v9673_v37, %v1348_v6  ;;  %v7415_v31 = vpop.f32.mrb[10].mxu1 }
 0x1e9   :  { %7946 = vrcp.f32 %v1766_v3  ;;  %v6782_v14 = vmul.f32 -1.442695, %v9708_v38  ;;  %v9715_v2 = vadd.f32 %v7415_v31, %v9673_v37  ;;  %v1351_v63 = vpop.f32.mrb[11].mxu1 }
 0x1ea   :  { %7948 = vrcp.f32 %v1764_v61  ;;  %v6780_v59 = vmul.f32 -1.442695, %v9711_v11  ;;  %v9719_v44 = vadd.f32 %v9673_v37, %v1351_v63 }
 0x1eb   :  { %7950 = vpow2.f32 %v6777_v16  ;;  %v6783_v8 = vmul.f32 -1.442695, %v9715_v2 }
 0x1ec   :  { %v7937_v26 = vpop.eup %7936  ;;  %7952 = vpow2.f32 %v6782_v14  ;;  %v6781_v3 = vmul.f32 -1.442695, %v9719_v44 }
 0x1ed   :  { %v7939_v6 = vpop.eup %7938  ;;  %v1769_v34 = vadd.f32 1.0, %v7937_v26  ;;  %7954 = vpow2.f32 %v6780_v59 }
 0x1ee   :  { %v1767_v4 = vadd.f32 1.0, %v7939_v6  ;;  %7956 = vpow2.f32 %v6783_v8  ;;  %v9723_v31 = vpop.f32.mrb[12].mxu1  ;;  %v7941_v57 = vpop.eup %7940 }
 0x1ef   :  { %7958 = vrcp.f32 %v1769_v34  ;;  %v9725_v61 = vpop.f32.mrb[13].mxu1 }
 0x1f0   :  { %7960 = vrcp.f32 %v1767_v4  ;;  %v9727_v63 = vpop.f32.mrb[14].mxu1 }
 0x1f1   :  { %v7943_v16 = vpop.eup %7942  ;;  %7962 = vpow2.f32 %v6781_v3  ;;  %v9729_v15 = vpop.f32.mrb[15].mxu1 }
 0x1f2   :  { %v7945_v14 = vpop.eup %7944  ;;  %v1957_v59 = vmul.f32 %v7943_v16, %v9676_v5 }
 0x1f3   :  { %v7947_v26 = vpop.eup %7946  ;;  %v1955_v6 = vmul.f32 %v7945_v14, %v9679_v7 }
 0x1f4   :  { %v7949_v8 = vpop.eup %7948  ;;  %2103 = vst.msk [vmem:[#allocation2 + $0x128] sm:$0xff] %vm2020_vm4, %v1957_v59  ;;  %v1958_v34 = vmul.f32 %v7947_v26, %v9683_v39  ;;  %v1770_v59 = vadd.f32 1.0, %v7941_v57 }
 0x1f5   :  { %v7951_v27 = vpop.eup %7950  ;;  %2101 = vst.msk [vmem:[#allocation2 + $0x108] sm:$0xff] %vm2020_vm4, %v1955_v6  ;;  %v1956_v4 = vmul.f32 %v7949_v8, %v9687_v47 }
 0x1f6   :  { %v7953_v36 = vpop.eup %7952  ;;  %2104 = vst.msk [vmem:[#allocation2 + $0x130] sm:$0xff] %vm2020_vm4, %v1958_v34  ;;  %v1768_v6 = vadd.f32 1.0, %v7951_v27  ;;  %7964 = vrcp.f32 %v1770_v59 }
 0x1f7   :  { %v7955_v3 = vpop.eup %7954  ;;  %2102 = vst.msk [vmem:[#allocation2 + $0x110] sm:$0xff] %vm2020_vm4, %v1956_v4  ;;  %v9739_v5 = vpop.f32.mrb[16].mxu1  ;;  %v1773_v53 = vadd.f32 1.0, %v7953_v36 }
 0x1f8   :  { %v7957_v16 = vpop.eup %7956  ;;  %v9741_v7 = vpop.f32.mrb[17].mxu1  ;;  %v1771_v4 = vadd.f32 1.0, %v7955_v3  ;;  %7966 = vrcp.f32 %v1768_v6  ;;  %v9871_v41 = vadd.f32 %v9739_v5, %v9673_v37 }
 0x1f9   :  { %v7959_v14 = vpop.eup %7958  ;;  %v9743_v18 = vpop.f32.mrb[18].mxu1  ;;  %v1774_v17 = vadd.f32 1.0, %v7957_v16  ;;  %7968 = vrcp.f32 %v1773_v53 }
 0x1fa   :  { %v7961_v39 = vpop.eup %7960  ;;  %v1961_v26 = vmul.f32 %v7959_v14, %v9692_v30  ;;  %v9746_v47 = vpop.f32.mrb[19].mxu1  ;;  %7970 = vrcp.f32 %v1771_v4  ;;  %v2364_v4 = vld [vmem:[#allocation2 + $0xe8] sm:$0xff] }
 0x1fb   :  { %v7963_v8 = vpop.eup %7962  ;;  %v1959_v34 = vmul.f32 %v7961_v39, %v9695_v21  ;;  %7972 = vrcp.f32 %v1774_v17  ;;  %v2169_v29 = vld [vmem:[#allocation2 + $0x127] sm:$0xff] }
 0x1fc   :  { %2107 = vst.msk [vmem:[#allocation2 + $0x168] sm:$0xff] %vm2020_vm4, %v1961_v26  ;;  %v1772_v57 = vadd.f32 1.0, %v7963_v8  ;;  %v9766_v26 = vld [vmem:[%s13453_s5] ss:$0 sm:$0xff]  ;;  %v9773_v8 = vld [vmem:[%s13453_s5 + $0x1] ss:$0 sm:$0xff] }
 0x1fd   :  { %2105 = vst.msk [vmem:[#allocation2 + $0x148] sm:$0xff] %vm2020_vm4, %v1959_v34  ;;  %v2165_v34 = vld [vmem:[#allocation2 + $0xe7] sm:$0xff]  ;;  %v2436_v10 = vmul.f32 %v9773_v8, %v2364_v4  ;;  %v9820_v4 = vld [vmem:[%s13453_s5 + $0x3] ss:$0 sm:$0xff] }
 0x1fe   :  { %7974 = vrcp.f32 %v1772_v57  ;;  %v2236_v35 = vmul.f32 %v9766_v26, %v2165_v34  ;;  %v2567_v9 = vld [vmem:[#allocation2 + $0x111] sm:$0xff]  ;;  %v2368_v25 = vld [vmem:[#allocation2 + $0x128] sm:$0xff] }
 0x1ff   :  { %v9751_v12 = vpop.f32.mrb[20].mxu1 }
 0x200   :  { %v9753_v27 = vpop.f32.mrb[21].mxu1  ;;  %v7965_v21 = vpop.eup %7964 }
 0x201   :  { %v9755_v30 = vpop.f32.mrb[22].mxu1  ;;  %v1962_v57 = vmul.f32 %v7965_v21, %v9699_v56 }
 0x202   :  { %v9757_v36 = vpop.f32.mrb[23].mxu1  ;;  %v7967_v3 = vpop.eup %7966 }
 0x203   :  { %v7969_v59 = vpop.eup %7968  ;;  %v1960_v49 = vmul.f32 %v7967_v3, %v9704_v46  ;;  %2108 = vst.msk [vmem:[#allocation2 + $0x170] sm:$0xff] %vm2020_vm4, %v1962_v57  ;;  %v9789_v46 = vld [vmem:[%s13453_s5 + $0x2] ss:$0 sm:$0xff]  ;;  %v2366_v3 = vld [vmem:[#allocation2 + $0x108] sm:$0xff] }
 0x204   :  { %v7971_v39 = vpop.eup %7970  ;;  %v1965_v43 = vmul.f32 %v7969_v59, %v9708_v38  ;;  %v2237_v38 = vmul.f32 %v9766_v26, %v2166_v50  ;;  %v2167_v50 = vld [vmem:[#allocation2 + $0x107] sm:$0xff]  ;;  %v2168_v59 = vld [vmem:[#allocation2 + $0x10f] sm:$0xff] }
 0x205   :  { %v7973_v53 = vpop.eup %7972  ;;  %v1963_v60 = vmul.f32 %v7971_v39, %v9711_v11  ;;  %2106 = vst.msk [vmem:[#allocation2 + $0x150] sm:$0xff] %vm2020_vm4, %v1960_v49  ;;  %v2437_v11 = vmul.f32 %v9773_v8, %v2365_v45  ;;  %v9796_v49 = vadd.f32 %v9723_v31, %v9673_v37  ;;  %v2500_v45 = vadd.f32 %v2436_v10, %v2236_v35  ;;  %v2367_v39 = vld [vmem:[#allocation2 + $0x110] sm:$0xff]  ;;  %v2370_v19 = vld [vmem:[#allocation2 + $0x148] sm:$0xff] }
 0x206   :  { %2111 = vst.msk [vmem:[#allocation2 + $0x1a8] sm:$0xff] %vm2020_vm4, %v1965_v43  ;;  %v1966_v56 = vmul.f32 %v7973_v53, %v9715_v2  ;;  %v2565_v43 = vld [vmem:[#allocation2 + $0xf1] sm:$0xff]  ;;  %v9802_v2 = vadd.f32 %v9673_v37, %v9725_v61  ;;  %v2636_v31 = vmul.f32 %v9789_v46, %v2564_v58  ;;  %v9813_v53 = vadd.f32 %v9673_v37, %v9729_v15  ;;  %v2566_v57 = vld [vmem:[#allocation2 + $0x109] sm:$0xff] }
 0x207   :  { %2109 = vst.msk [vmem:[#allocation2 + $0x188] sm:$0xff] %vm2020_vm4, %v1963_v60  ;;  %v9808_v60 = vadd.f32 %v9727_v63, %v9673_v37  ;;  %v2637_v61 = vmul.f32 %v9789_v46, %v2565_v43  ;;  %v6786_v34 = vmul.f32 -1.442695, %v9796_v49  ;;  %v2238_v10 = vmul.f32 %v9766_v26, %v2167_v50 }
 0x208   :  { %v9759_v14 = vpop.f32.mrb[24].mxu1  ;;  %v7975_v6 = vpop.eup %7974  ;;  %2112 = vst.msk [vmem:[#allocation2 + $0x1b0] sm:$0xff] %vm2020_vm4, %v1966_v56  ;;  %v2438_v58 = vmul.f32 %v9773_v8, %v2366_v3  ;;  %v6784_v35 = vmul.f32 -1.442695, %v9802_v2  ;;  %v2239_v63 = vmul.f32 %v9766_v26, %v2168_v59  ;;  %v2439_v15 = vmul.f32 %v9773_v8, %v2367_v39 }
 0x209   :  { %v9761_v16 = vpop.f32.mrb[25].mxu1  ;;  %v1964_v21 = vmul.f32 %v7975_v6, %v9719_v44  ;;  %v2501_v6 = vadd.f32 %v2437_v11, %v2237_v38  ;;  %v6787_v56 = vmul.f32 -1.442695, %v9808_v60  ;;  %v6785_v38 = vmul.f32 -1.442695, %v9813_v53 }
 0x20a   :  { %v9768_v17 = vpop.f32.mrb[26].mxu1  ;;  %v2836_v11 = vmul.f32 %v9820_v4, %v2167_v50  ;;  %v2837_v28 = vmul.f32 %v9820_v4, %v2168_v59  ;;  %7976 = vpow2.f32 %v6786_v34  ;;  %v2502_v13 = vadd.f32 %v2438_v58, %v2238_v10  ;;  %v2170_v10 = vld [vmem:[#allocation2 + $0x12f] sm:$0xff] }
 0x20b   :  { %2110 = vst.msk [vmem:[#allocation2 + $0x190] sm:$0xff] %vm2020_vm4, %v1964_v21  ;;  %v9804_v44 = vpop.f32.mrb[27].mxu1  ;;  %v2700_v21 = vadd.f32 %v2636_v31, %v2500_v45  ;;  %v2701_v43 = vadd.f32 %v2637_v61, %v2501_v6  ;;  %v2638_v55 = vmul.f32 %v9789_v46, %v2566_v57  ;;  %7978 = vpow2.f32 %v6784_v35  ;;  %v9837_v45 = vld [vmem:[%s13453_s5 + $0x4] ss:$0 sm:$0xff] }
 0x20c   :  { %v2503_v24 = vadd.f32 %v2439_v15, %v2239_v63  ;;  %7980 = vpow2.f32 %v6787_v56  ;;  %v2639_v59 = vmul.f32 %v9789_v46, %v2567_v9  ;;  %v2240_v61 = vmul.f32 %v9766_v26, %v2169_v29  ;;  %v9845_v63 = vld [vmem:[#allocation2 + $0x129] sm:$0xff] }
 0x20d   :  { %7982 = vpow2.f32 %v6785_v38  ;;  %v2900_v31 = vadd.f32 %v2836_v11, %v2700_v21  ;;  %v2901_v6 = vadd.f32 %v2837_v28, %v2701_v43  ;;  %v2440_v34 = vmul.f32 %v9773_v8, %v2368_v25  ;;  %v9852_v21 = vld [vmem:[%s13453_s5 + $0x5] ss:$0 sm:$0xff]  ;;  %v9857_v28 = vld [vmem:[%s13453_s5 + $0x6] ss:$0 sm:$0xff]  ;;  %v2369_v43 = vld [vmem:[#allocation2 + $0x130] sm:$0xff] }
 0x20e   :  { %v2702_v58 = vadd.f32 %v2638_v55, %v2502_v13  ;;  %v3036_v35 = vmul.f32 %v9837_v45, %v2366_v3  ;;  %v2703_v15 = vadd.f32 %v2639_v59, %v2503_v24  ;;  %v3037_v56 = vmul.f32 %v9837_v45, %v2367_v39  ;;  %v9862_v55 = vld [vmem:[%s13453_s5 + $0x7] ss:$0 sm:$0xff] }
 0x20f   :  { %v2838_v38 = vmul.f32 %v9820_v4, %v2169_v29  ;;  %v2839_v13 = vmul.f32 %v9820_v4, %v2170_v10  ;;  %v2171_v39 = vld [vmem:[#allocation2 + $0x147] sm:$0xff]  ;;  %v2504_v11 = vadd.f32 %v2440_v34, %v2240_v61  ;;  %v2640_v59 = vmul.f32 %v9789_v46, %v9845_v63 }
 0x210   :  { %v9832_v42 = vpop.f32.mrb[28].mxu1  ;;  %v3100_v24 = vadd.f32 %v3036_v35, %v2900_v31  ;;  %v3101_v3 = vadd.f32 %v3037_v56, %v2901_v6  ;;  %v3236_v1 = vmul.f32 %v9852_v21, %v2566_v57  ;;  %v3237_v0 = vmul.f32 %v9852_v21, %v2567_v9  ;;  %v2569_v35 = vld [vmem:[#allocation2 + $0x131] sm:$0xff] }
 0x211   :  { %13686 = vst [vmem:[#allocation67_spill] sm:$0xff] %v9832_v42  ;;  %v9839_v50 = vpop.f32.mrb[29].mxu1  ;;  %v2902_v40 = vadd.f32 %v2838_v38, %v2702_v58  ;;  %v2903_v32 = vadd.f32 %v2839_v13, %v2703_v15  ;;  %v3038_v6 = vmul.f32 %v9837_v45, %v2368_v25  ;;  %v3437_v61 = vmul.f32 %v9857_v28, %v2169_v29 }
 0x212   :  { %13687 = vst [vmem:[#allocation68_spill] sm:$0xff] %v9839_v50  ;;  %v3637_v34 = vmul.f32 %v9862_v55, %v2368_v25  ;;  %v2840_v58 = vmul.f32 %v9820_v4, %v2171_v39  ;;  %v2241_v15 = vmul.f32 %v9766_v26, %v2170_v10  ;;  %v3039_v57 = vmul.f32 %v9837_v45, %v2369_v43  ;;  %v9879_v13 = vpop.f32.mrb[30].mxu1 }
 0x213   :  { %v3300_v9 = vadd.f32 %v3236_v1, %v3100_v24  ;;  %v3301_v38 = vadd.f32 %v3237_v0, %v3101_v3  ;;  %13688 = vst [vmem:[#allocation69_spill] sm:$0xff] %v9879_v13  ;;  %v2441_v62 = vmul.f32 %v9773_v8, %v2369_v43  ;;  %v2704_v23 = vadd.f32 %v2640_v59, %v2504_v11  ;;  %v9887_v3 = vpop.f32.mrb[31].mxu1 }
 0x214   :  { %v7977_v33 = vpop.eup %7976  ;;  %v3102_v22 = vadd.f32 %v3038_v6, %v2902_v40  ;;  %v2641_v25 = vmul.f32 %v9789_v46, %v2569_v35  ;;  %v3438_v20 = vmul.f32 %v9857_v28, %v2170_v10  ;;  %v3103_v54 = vadd.f32 %v3039_v57, %v2903_v32  ;;  %13689 = vst [vmem:[#allocation70_spill] sm:$0xff] %v9887_v3  ;;  %v2172_v57 = vld [vmem:[#allocation2 + $0x14f] sm:$0xff] }
 0x215   :  { %v7979_v31 = vpop.eup %7978  ;;  %v1777_v29 = vadd.f32 1.0, %v7977_v33  ;;  %v3238_v48 = vmul.f32 %v9852_v21, %v9845_v63  ;;  %v3239_v0 = vmul.f32 %v9852_v21, %v2569_v35  ;;  %v2904_v1 = vadd.f32 %v2840_v58, %v2704_v23  ;;  %v9892_v33 = vld [vmem:[%s13453_s5 + $0x8] ss:$0 sm:$0xff] }
 0x216   :  { %v7981_v56 = vpop.eup %7980  ;;  %v1775_v52 = vadd.f32 1.0, %v7979_v31  ;;  %v3501_v40 = vadd.f32 %v3437_v61, %v3300_v9  ;;  %v3502_v11 = vadd.f32 %v3438_v20, %v3301_v38  ;;  %v2242_v10 = vmul.f32 %v9766_v26, %v2171_v39  ;;  %v2371_v9 = vld [vmem:[#allocation2 + $0x150] sm:$0xff] }
 0x217   :  { %v7983_v5 = vpop.eup %7982  ;;  %v1778_v24 = vadd.f32 1.0, %v7981_v56  ;;  %v2442_v59 = vmul.f32 %v9773_v8, %v2370_v19  ;;  %v3040_v31 = vmul.f32 %v9837_v45, %v2370_v19  ;;  %v3302_v6 = vadd.f32 %v3238_v48, %v3102_v22  ;;  %v2570_v56 = vld [vmem:[#allocation2 + $0x149] sm:$0xff] }
 0x218   :  { %v1776_v32 = vadd.f32 1.0, %v7983_v5  ;;  %7984 = vrcp.f32 %v1777_v29  ;;  %v2505_v23 = vadd.f32 %v2441_v62, %v2241_v15  ;;  %v3638_v58 = vmul.f32 %v9862_v55, %v2369_v43 }
 0x219   :  { %v3303_v51 = vadd.f32 %v3239_v0, %v3103_v54  ;;  %7986 = vrcp.f32 %v1775_v52  ;;  %v3838_v3 = vmul.f32 %v9892_v33, %v2569_v35  ;;  %v3104_v61 = vadd.f32 %v3040_v31, %v2904_v1  ;;  %v2173_v54 = vld [vmem:[#allocation2 + $0x167] sm:$0xff] }
 0x21a   :  { %v3439_v20 = vmul.f32 %v9857_v28, %v2171_v39  ;;  %7988 = vrcp.f32 %v1778_v24  ;;  %v3701_v38 = vadd.f32 %v3637_v34, %v3501_v40  ;;  %v3702_v5 = vadd.f32 %v3638_v58, %v3502_v11 }
 0x21b   :  { %v3440_v13 = vmul.f32 %v9857_v28, %v2172_v57  ;;  %7990 = vrcp.f32 %v1776_v32  ;;  %v2506_v48 = vadd.f32 %v2442_v59, %v2242_v10  ;;  %v2841_v62 = vmul.f32 %v9820_v4, %v2172_v57  ;;  %v2571_v59 = vld [vmem:[#allocation2 + $0x151] sm:$0xff] }
 0x21c   :  { %v3503_v22 = vadd.f32 %v3439_v20, %v3302_v6  ;;  %v3240_v43 = vmul.f32 %v9852_v21, %v2570_v56  ;;  %v2243_v52 = vmul.f32 %v9766_v26, %v2172_v57  ;;  %v2443_v35 = vmul.f32 %v9773_v8, %v2371_v9  ;;  %v9921_v57 = vld [vmem:[%s13454_s6] ss:$0 sm:$0xff] }
 0x21d   :  { %v2642_v39 = vmul.f32 %v9789_v46, %v2570_v56  ;;  %v3504_v15 = vadd.f32 %v3440_v13, %v3303_v51  ;;  %v2705_v29 = vadd.f32 %v2641_v25, %v2505_v23  ;;  %v3639_v34 = vmul.f32 %v9862_v55, %v2370_v19  ;;  %v2372_v13 = vld [vmem:[#allocation2 + $0x168] sm:$0xff] }
 0x21e   :  { %v3304_v0 = vadd.f32 %v3240_v43, %v3104_v61  ;;  %v3837_v1 = vmul.f32 %v9892_v33, %v9845_v63  ;;  %v3902_v24 = vadd.f32 %v3838_v3, %v3702_v5  ;;  %v3640_v40 = vmul.f32 %v9862_v55, %v2371_v9 }
 0x21f   :  { %v9912_v11 = vadd.f32 %v9673_v37, %v9741_v7  ;;  %v3441_v10 = vmul.f32 %v9857_v28, %v2173_v54  ;;  %v3703_v32 = vadd.f32 %v3639_v34, %v3503_v22  ;;  %v2905_v31 = vadd.f32 %v2841_v62, %v2705_v29 }
 0x220   :  { %v9916_v51 = vmul.f32 -1.442695, %v9871_v41  ;;  %v3901_v19 = vadd.f32 %v3837_v1, %v3701_v38  ;;  %v2507_v25 = vadd.f32 %v2443_v35, %v2243_v52  ;;  %v2706_v6 = vadd.f32 %v2642_v39, %v2506_v48  ;;  %v2174_v35 = vld [vmem:[#allocation2 + $0x16f] sm:$0xff] }
 0x221   :  { %v3704_v63 = vadd.f32 %v3640_v40, %v3504_v15  ;;  %v2244_v7 = vmul.f32 %v9766_v26, %v2173_v54  ;;  %v3041_v23 = vmul.f32 %v9837_v45, %v2371_v9  ;;  %v3505_v58 = vadd.f32 %v3441_v10, %v3304_v0  ;;  %v2572_v9 = vld [vmem:[#allocation2 + $0x169] sm:$0xff] }
 0x222   :  { %v7985_v3 = vpop.eup %7984  ;;  %v3839_v61 = vmul.f32 %v9892_v33, %v2570_v56  ;;  %v9927_v38 = vadd.f32 %v9921_v57, %v3902_v24  ;;  %v2842_v5 = vmul.f32 %v9820_v4, %v2173_v54  ;;  %v2643_v48 = vmul.f32 %v9789_v46, %v2571_v59 }
 0x223   :  { %v7987_v20 = vpop.eup %7986  ;;  %v3840_v22 = vmul.f32 %v9892_v33, %v2571_v59  ;;  %v2444_v43 = vmul.f32 %v9773_v8, %v2372_v13  ;;  %v3641_v52 = vmul.f32 %v9862_v55, %v2372_v13  ;;  %v3105_v39 = vadd.f32 %v3041_v23, %v2905_v31 }
 0x224   :  { %v7989_v62 = vpop.eup %7988  ;;  %v3903_v15 = vadd.f32 %v3839_v61, %v3703_v32  ;;  %v9935_v29 = vadd.f32 %v9921_v57, %v3901_v19  ;;  %v2707_v34 = vadd.f32 %v2643_v48, %v2507_v25  ;;  %v2906_v0 = vadd.f32 %v2842_v5, %v2706_v6  ;;  %v2373_v19 = vld [vmem:[#allocation2 + $0x170] sm:$0xff] }
 0x225   :  { %v7991_v56 = vpop.eup %7990  ;;  %v3904_v54 = vadd.f32 %v3840_v22, %v3704_v63  ;;  %v3241_v1 = vmul.f32 %v9852_v21, %v2571_v59  ;;  %v3705_v24 = vadd.f32 %v3641_v52, %v3505_v58  ;;  %v1969_v40 = vmul.f32 %v7985_v3, %v9796_v49  ;;  %v9951_v59 = vpop.f32.mrb[32].mxu1  ;;  %v9957_v3 = vld [vmem:[#allocation2 + $0x187] sm:$0xff] }
 0x226   :  { %v1967_v10 = vmul.f32 %v7987_v20, %v9802_v2  ;;  %v6855_v50 = vmul.f32 -1.442695, %v9927_v38  ;;  %v3042_v42 = vmul.f32 %v9837_v45, %v2372_v13  ;;  %v2843_v32 = vmul.f32 %v9820_v4, %v2174_v35 }
 0x227   :  { %v3841_v31 = vmul.f32 %v9892_v33, %v2572_v9  ;;  %v3305_v23 = vadd.f32 %v3241_v1, %v3105_v39  ;;  %v9945_v25 = vadd.f32 %v9921_v57, %v3903_v15  ;;  %2115 = vst.msk [vmem:[#allocation2 + $0x1e8] sm:$0xff] %vm2020_vm4, %v1969_v40  ;;  %v1970_v49 = vmul.f32 %v7989_v62, %v9808_v60  ;;  %v9966_v62 = vpop.f32.mrb[33].mxu1  ;;  %v2374_v1 = vld [vmem:[#allocation2 + $0x188] sm:$0xff] }
 0x228   :  { %2113 = vst.msk [vmem:[#allocation2 + $0x1c8] sm:$0xff] %vm2020_vm4, %v1967_v10  ;;  %v1968_v2 = vmul.f32 %v7991_v56, %v9813_v53  ;;  %v6854_v13 = vmul.f32 -1.442695, %v9935_v29  ;;  %v2907_v6 = vadd.f32 %v2843_v32, %v2707_v34  ;;  %v9955_v63 = vadd.f32 %v9921_v57, %v3904_v54  ;;  %v9984_v40 = vld [vmem:[#allocation2 + $0x18f] sm:$0xff] }
 0x229   :  { %v3106_v58 = vadd.f32 %v3042_v42, %v2906_v0  ;;  %v2508_v61 = vadd.f32 %v2444_v43, %v2244_v7  ;;  %v2644_v20 = vmul.f32 %v9789_v46, %v2572_v9  ;;  %v3442_v5 = vmul.f32 %v9857_v28, %v2174_v35  ;;  %2116 = vst.msk [vmem:[#allocation2 + $0x1f0] sm:$0xff] %vm2020_vm4, %v1970_v49  ;;  %v2573_v7 = vld [vmem:[#allocation2 + $0x171] sm:$0xff] }
 0x22a   :  { %v3905_v48 = vadd.f32 %v3841_v31, %v3705_v24  ;;  %2114 = vst.msk [vmem:[#allocation2 + $0x1d0] sm:$0xff] %vm2020_vm4, %v1968_v2  ;;  %7992 = vpow2.f32 %v6855_v50  ;;  %v2245_v60 = vmul.f32 %v9766_v26, %v2174_v35  ;;  %v3043_v53 = vmul.f32 %v9837_v45, %v2373_v19 }
 0x22b   :  { %v3242_v22 = vmul.f32 %v9852_v21, %v2572_v9  ;;  %v2445_v42 = vmul.f32 %v9773_v8, %v2373_v19  ;;  %v3506_v43 = vadd.f32 %v3442_v5, %v3305_v23  ;;  %v6856_v52 = vmul.f32 -1.442695, %v9945_v25  ;;  %v10000_v5 = vld [vmem:[#allocation2 + $0x189] sm:$0xff] }
 0x22c   :  { %v2844_v39 = vmul.f32 %v9820_v4, %v9957_v3  ;;  %7994 = vpow2.f32 %v6854_v13  ;;  %v6857_v50 = vmul.f32 -1.442695, %v9955_v63  ;;  %v3107_v35 = vadd.f32 %v3043_v53, %v2907_v6  ;;  %v9992_v13 = vpop.f32.mrb[34].mxu1 }
 0x22d   :  { %v3306_v15 = vadd.f32 %v3242_v22, %v3106_v58  ;;  %v2708_v56 = vadd.f32 %v2644_v20, %v2508_v61  ;;  %v3642_v34 = vmul.f32 %v9862_v55, %v2373_v19  ;;  %v9975_v9 = vadd.f32 %v9921_v57, %v3905_v48  ;;  %13690 = vst [vmem:[#allocation71_spill] sm:$0xff] %v9992_v13 }
 0x22e   :  { %v9979_v0 = vadd.f32 %v9743_v18, %v9673_v37  ;;  %v3243_v54 = vmul.f32 %v9852_v21, %v2573_v7  ;;  %v3443_v24 = vmul.f32 %v9857_v28, %v9957_v3  ;;  %v6788_v10 = vmul.f32 -1.442695, %v9912_v11 }
 0x22f   :  { %v9989_v32 = vadd.f32 %v9673_v37, %v9746_v47  ;;  %v2509_v31 = vadd.f32 %v2445_v42, %v2245_v60  ;;  %v3706_v19 = vadd.f32 %v3642_v34, %v3506_v43  ;;  %7996 = vpow2.f32 %v6856_v52  ;;  %v10009_v34 = vld [vmem:[#allocation2 + $0x1a7] sm:$0xff] }
 0x230   :  { %v2908_v23 = vadd.f32 %v2844_v39, %v2708_v56  ;;  %v2645_v18 = vmul.f32 %v9789_v46, %v2573_v7  ;;  %7998 = vpow2.f32 %v6857_v50  ;;  %v3507_v49 = vadd.f32 %v3443_v24, %v3306_v15 }
 0x231   :  { %v3307_v2 = vadd.f32 %v3243_v54, %v3107_v35  ;;  %v3842_v6 = vmul.f32 %v9892_v33, %v2573_v7  ;;  %v6858_v58 = vmul.f32 -1.442695, %v9975_v9  ;;  %v3044_v61 = vmul.f32 %v9837_v45, %v2374_v1  ;;  %v2375_v7 = vld [vmem:[#allocation2 + $0x190] sm:$0xff] }
 0x232   :  { %v2845_v47 = vmul.f32 %v9820_v4, %v9984_v40  ;;  %v3643_v20 = vmul.f32 %v9862_v55, %v2374_v1  ;;  %v3444_v48 = vmul.f32 %v9857_v28, %v9984_v40  ;;  %v6791_v60 = vmul.f32 -1.442695, %v9979_v0 }
 0x233   :  { %v2709_v53 = vadd.f32 %v2645_v18, %v2509_v31  ;;  %v3906_v22 = vadd.f32 %v3842_v6, %v3706_v19  ;;  %v3108_v42 = vadd.f32 %v3044_v61, %v2908_v23  ;;  %8000 = vpow2.f32 %v9916_v51 }
 0x234   :  { %v7993_v43 = vpop.eup %7992  ;;  %v3707_v52 = vadd.f32 %v3643_v20, %v3507_v49  ;;  %v3508_v39 = vadd.f32 %v3444_v48, %v3307_v2  ;;  %8002 = vpow2.f32 %v6788_v10  ;;  %v6789_v50 = vmul.f32 -1.442695, %v9989_v32  ;;  %v2575_v10 = vld [vmem:[#allocation2 + $0x191] sm:$0xff]  ;;  %v10020_v20 = vld [vmem:[#allocation2 + $0x1a8] sm:$0xff] }
 0x235   :  { %8004 = vpow2.f32 %v6858_v58  ;;  %v2909_v15 = vadd.f32 %v2845_v47, %v2709_v53  ;;  %v3244_v35 = vmul.f32 %v9852_v21, %v10000_v5  ;;  %v3644_v54 = vmul.f32 %v9862_v55, %v2375_v7 }
 0x236   :  { %v7995_v56 = vpop.eup %7994  ;;  %v3843_v24 = vmul.f32 %v9892_v33, %v10000_v5  ;;  %8006 = vpow2.f32 %v6791_v60  ;;  %v4229_v51 = vadd.f32 1.0, %v7993_v43  ;;  %v10015_v31 = vadd.f32 %v9921_v57, %v3906_v22 }
 0x237   :  { %v3045_v19 = vmul.f32 %v9837_v45, %v2375_v7  ;;  %v3308_v23 = vadd.f32 %v3244_v35, %v3108_v42  ;;  %v3708_v18 = vadd.f32 %v3644_v54, %v3508_v39  ;;  %8008 = vpow2.f32 %v6789_v50  ;;  %v10028_v39 = vld [vmem:[#allocation2 + $0x1af] sm:$0xff] }
 0x238   :  { %v3907_v49 = vadd.f32 %v3843_v24, %v3707_v52  ;;  %v4228_v6 = vadd.f32 1.0, %v7995_v56  ;;  %v3445_v58 = vmul.f32 %v9857_v28, %v10009_v34  ;;  %v2246_v48 = vmul.f32 %v9766_v26, %v9957_v3  ;;  %v10030_v50 = vld [vmem:[#allocation2 + $0x1a9] sm:$0xff] }
 0x239   :  { %v7997_v2 = vpop.eup %7996  ;;  %v3109_v61 = vadd.f32 %v3045_v19, %v2909_v15  ;;  %v2446_v60 = vmul.f32 %v9773_v8, %v2374_v1  ;;  %v3844_v53 = vmul.f32 %v9892_v33, %v2575_v10  ;;  %8010 = vrcp.f32 %v4229_v51 }
 0x23a   :  { %v7999_v47 = vpop.eup %7998  ;;  %v6859_v22 = vmul.f32 -1.442695, %v10015_v31  ;;  %v3245_v42 = vmul.f32 %v9852_v21, %v2575_v10  ;;  %v3509_v43 = vadd.f32 %v3445_v58, %v3308_v23  ;;  %v4230_v52 = vadd.f32 1.0, %v7997_v2  ;;  %v10048_v2 = vld [vmem:[#allocation2 + $0x1b0] sm:$0xff] }
 0x23b   :  { %v3908_v15 = vadd.f32 %v3844_v53, %v3708_v18  ;;  %v10033_v35 = vadd.f32 %v9921_v57, %v3907_v49  ;;  %v10037_v3 = vadd.f32 %v9751_v12, %v9673_v37  ;;  %8012 = vrcp.f32 %v4228_v6 }
 0x23c   :  { %v4231_v56 = vadd.f32 1.0, %v7999_v47  ;;  %v3645_v54 = vmul.f32 %v9862_v55, %v10020_v20  ;;  %v3309_v24 = vadd.f32 %v3245_v42, %v3109_v61  ;;  %v2510_v19 = vadd.f32 %v2446_v60, %v2246_v48 }
 0x23d   :  { %v8001_v1 = vpop.eup %8000  ;;  %v2247_v23 = vmul.f32 %v9766_v26, %v9984_v40  ;;  %v2447_v18 = vmul.f32 %v9773_v8, %v2375_v7  ;;  %v10046_v49 = vadd.f32 %v9673_v37, %v9753_v27  ;;  %8014 = vpow2.f32 %v6859_v22 }
 0x23e   :  { %v8003_v51 = vpop.eup %8002  ;;  %v3446_v6 = vmul.f32 %v9857_v28, %v10028_v39  ;;  %v3845_v58 = vmul.f32 %v9892_v33, %v10030_v50  ;;  %v3709_v61 = vadd.f32 %v3645_v54, %v3509_v43  ;;  %8016 = vrcp.f32 %v4230_v52 }
 0x23f   :  { %v8005_v12 = vpop.eup %8004  ;;  %v10055_v40 = vadd.f32 %v9921_v57, %v3908_v15  ;;  %v6860_v7 = vmul.f32 -1.442695, %v10033_v35  ;;  %v1781_v27 = vadd.f32 1.0, %v8001_v1  ;;  %8018 = vrcp.f32 %v4231_v56  ;;  %v10066_v56 = vld [vmem:[#allocation2 + $0x1b1] sm:$0xff] }
 0x240   :  { %v8007_v47 = vpop.eup %8006  ;;  %v2646_v48 = vmul.f32 %v9789_v46, %v10000_v5  ;;  %v3510_v60 = vadd.f32 %v3446_v6, %v3309_v24  ;;  %v1779_v53 = vadd.f32 1.0, %v8003_v51  ;;  %v3646_v42 = vmul.f32 %v9862_v55, %v10048_v2 }
 0x241   :  { %v8009_v22 = vpop.eup %8008  ;;  %v2511_v13 = vadd.f32 %v2447_v18, %v2247_v23  ;;  %8020 = vrcp.f32 %v1781_v27  ;;  %v10064_v43 = vadd.f32 %v9755_v30, %v9673_v37  ;;  %v4232_v52 = vadd.f32 1.0, %v8005_v12  ;;  %v10074_v12 = vpop.f32.mrb[35].mxu1 }
 0x242   :  { %v3909_v15 = vadd.f32 %v3845_v58, %v3709_v61  ;;  %8022 = vrcp.f32 %v1779_v53  ;;  %v1782_v1 = vadd.f32 1.0, %v8007_v47  ;;  %v2647_v5 = vmul.f32 %v9789_v46, %v2575_v10 }
 0x243   :  { %8024 = vpow2.f32 %v6860_v7  ;;  %v6861_v54 = vmul.f32 -1.442695, %v10055_v40  ;;  %v10072_v24 = vadd.f32 %v9673_v37, %v9757_v36  ;;  %v8011_v51 = vpop.eup %8010  ;;  %v2710_v23 = vadd.f32 %v2646_v48, %v2510_v19 }
 0x244   :  { %v3710_v18 = vadd.f32 %v3646_v42, %v3510_v60  ;;  %8026 = vrcp.f32 %v1782_v1  ;;  %v1780_v30 = vadd.f32 1.0, %v8009_v22  ;;  %v2248_v6 = vmul.f32 %v9766_v26, %v10009_v34 }
 0x245   :  { %v2448_v10 = vmul.f32 %v9773_v8, %v10020_v20  ;;  %v2846_v58 = vmul.f32 %v9820_v4, %v10009_v34  ;;  %v10083_v61 = vmul.f32 -1.442695, %v10037_v3  ;;  %v8013_v36 = vpop.eup %8012  ;;  %8028 = vrcp.f32 %v4232_v52 }
 0x246   :  { %v3846_v19 = vmul.f32 %v9892_v33, %v10066_v56  ;;  %v2711_v47 = vadd.f32 %v2647_v5, %v2511_v13  ;;  %v10088_v7 = vadd.f32 %v9921_v57, %v3909_v15  ;;  %v10091_v27 = vmul.f32 %v8011_v51, %v9927_v38 }
 0x247   :  { %v2249_v48 = vmul.f32 %v9766_v26, %v10028_v39  ;;  %v2449_v34 = vmul.f32 %v9773_v8, %v10048_v2  ;;  %8030 = vpow2.f32 %v6861_v54  ;;  %v8015_v60 = vpop.eup %8014  ;;  %v2847_v53 = vmul.f32 %v9820_v4, %v10028_v39 }
 0x248   :  { %13691 = vst [vmem:[#allocation72_spill] sm:$0xff] %v10091_v27  ;;  %v2910_v22 = vadd.f32 %v2846_v58, %v2710_v23  ;;  %v3910_v42 = vadd.f32 %v3846_v19, %v3710_v18  ;;  %8032 = vrcp.f32 %v1780_v30  ;;  %v8017_v13 = vpop.eup %8016  ;;  %v10100_v52 = vmul.f32 %v8013_v36, %v9935_v29  ;;  %v10116_v23 = vpop.f32.mrb[36].mxu1 }
 0x249   :  { %v10103_v38 = vmul.f32 -1.442695, %v10046_v49  ;;  %v10107_v15 = vadd.f32 %v9759_v14, %v9673_v37  ;;  %v10111_v1 = vadd.f32 %v9673_v37, %v9761_v16  ;;  %v8019_v5 = vpop.eup %8018  ;;  %v2512_v39 = vadd.f32 %v2448_v10, %v2248_v6  ;;  %13693 = vst [vmem:[#allocation74_spill] sm:$0xff] %v10116_v23  ;;  %v10124_v16 = vld [vmem:[#allocation2 + $0x1c7] sm:$0xff]  ;;  %v10126_v6 = vpop.f32.mrb[37].mxu1 }
 0x24a   :  { %13692 = vst [vmem:[#allocation73_spill] sm:$0xff] %v10100_v52  ;;  %v3046_v54 = vmul.f32 %v9837_v45, %v10020_v20  ;;  %v2911_v51 = vadd.f32 %v2847_v53, %v2711_v47  ;;  %v6862_v29 = vmul.f32 -1.442695, %v10088_v7  ;;  %v4485_v30 = vsel %vm2020_vm4, %v10091_v27, 0.0  ;;  %13694 = vst [vmem:[#allocation75_spill] sm:$0xff] %v10126_v6  ;;  %v10134_v47 = vld [vmem:[#allocation2 + $0x1cf] sm:$0xff] }
 0x24b   :  { %v8021_v18 = vpop.eup %8020  ;;  %v2513_v14 = vadd.f32 %v2449_v34, %v2249_v48  ;;  %v2648_v58 = vmul.f32 %v9789_v46, %v10030_v50  ;;  %v3047_v37 = vmul.f32 %v9837_v45, %v10048_v2  ;;  %v10129_v10 = vmul.f32 %v8017_v13, %v9945_v25  ;;  %v10137_v34 = vpop.f32.mrb[38].mxu1 }
 0x24c   :  { %v8023_v20 = vpop.eup %8022  ;;  %v10132_v36 = vadd.f32 %v9921_v57, %v3910_v42  ;;  %v3110_v19 = vadd.f32 %v3046_v54, %v2910_v22  ;;  %v1973_v48 = vmul.f32 %v8021_v18, %v9871_v41  ;;  %13696 = vst [vmem:[#allocation77_spill] sm:$0xff] %v10137_v34  ;;  %v4233_v2 = vadd.f32 1.0, %v8015_v60  ;;  %v10207_v34 = vld [vmem:[#allocation2 + $0x1ef] sm:$0xff] }
 0x24d   :  { %13695 = vst [vmem:[#allocation76_spill] sm:$0xff] %v10129_v10  ;;  %v8025_v53 = vpop.eup %8024  ;;  %v4484_v27 = vsel %vm2020_vm4, %v10100_v52, 0.0  ;;  %v2649_v6 = vmul.f32 %v9789_v46, %v10066_v56  ;;  %v1971_v25 = vmul.f32 %v8023_v20, %v9912_v11  ;;  %v3246_v22 = vmul.f32 %v9852_v21, %v10030_v50 }
 0x24e   :  { %v8027_v13 = vpop.eup %8026  ;;  %8034 = vpow2.f32 %v6862_v29  ;;  %v2848_v41 = vmul.f32 %v9820_v4, %v10124_v16  ;;  %v3111_v42 = vadd.f32 %v3047_v37, %v2911_v51  ;;  %2119 = vst.msk [vmem:[#allocation2 + $0x228] sm:$0xff] %vm2020_vm4, %v1973_v48  ;;  %v4486_v60 = vadd.f32 %v4485_v30, %v4484_v27 }
 0x24f   :  { %v2712_v54 = vadd.f32 %v2648_v58, %v2512_v39  ;;  %v2849_v18 = vmul.f32 %v9820_v4, %v10134_v47  ;;  %2117 = vst.msk [vmem:[#allocation2 + $0x208] sm:$0xff] %vm2020_vm4, %v1971_v25  ;;  %v1974_v11 = vmul.f32 %v8027_v13, %v9979_v0  ;;  %v8029_v20 = vpop.eup %8028  ;;  %v4487_v50 = vsel %vm2020_vm4, %v10129_v10, 0.0  ;;  %v2378_v58 = vld [vmem:[#allocation2 + $0x1c8] sm:$0xff]  ;;  %v2379_v10 = vld [vmem:[#allocation2 + $0x1d0] sm:$0xff] }
 0x250   :  { %v3247_v29 = vmul.f32 %v9852_v21, %v10066_v56  ;;  %v6863_v51 = vmul.f32 -1.442695, %v10132_v36  ;;  %v3310_v37 = vadd.f32 %v3246_v22, %v3110_v19  ;;  %8036 = vrcp.f32 %v4233_v2  ;;  %v10167_v19 = vld [vmem:[%s13452_s4] ss:$0 sm:$0xff]  ;;  %v10175_v22 = vpop.f32.mrb[39].mxu1 }
 0x251   :  { %v8031_v48 = vpop.eup %8030  ;;  %v10159_v27 = vmul.f32 %v8019_v5, %v9955_v63  ;;  %v2713_v39 = vadd.f32 %v2649_v6, %v2513_v14  ;;  %v4234_v30 = vadd.f32 1.0, %v8025_v53  ;;  %2120 = vst.msk [vmem:[#allocation2 + $0x230] sm:$0xff] %vm2020_vm4, %v1974_v11  ;;  %v2912_v25 = vadd.f32 %v2848_v41, %v2712_v54  ;;  %v2181_v14 = vld [vmem:[#allocation2 + $0x1e7] sm:$0xff]  ;;  %13698 = vst [vmem:[#allocation79_spill] sm:$0xff] %v10175_v22 }
 0x252   :  { %v8033_v0 = vpop.eup %8032  ;;  %v3447_v13 = vmul.f32 %v9857_v28, %v10124_v16  ;;  %v3311_v56 = vadd.f32 %v3247_v29, %v3111_v42  ;;  %v10171_v63 = vadd.f32 %v10167_v19, %v9768_v17  ;;  %v4488_v5 = vadd.f32 %v4487_v50, %v4486_v60  ;;  %v2380_v42 = vld [vmem:[#allocation2 + $0x1e8] sm:$0xff]  ;;  %v10189_v29 = vld [vmem:[#allocation2 + $0x1d1] sm:$0xff] }
 0x253   :  { %13697 = vst [vmem:[#allocation78_spill] sm:$0xff] %v10159_v27  ;;  %v2913_v6 = vadd.f32 %v2849_v18, %v2713_v39  ;;  %v1972_v53 = vmul.f32 %v8033_v0, %v9989_v32  ;;  %v6795_v2 = vmul.f32 -1.442695, %v10064_v43  ;;  %v10178_v41 = vmul.f32 %v8029_v20, %v9975_v9  ;;  %v2578_v18 = vld [vmem:[#allocation2 + $0x1c9] sm:$0xff] }
 0x254   :  { %8038 = vpow2.f32 %v6863_v51  ;;  %v3048_v54 = vmul.f32 %v9837_v45, %v2378_v58  ;;  %v3511_v11 = vadd.f32 %v3447_v13, %v3310_v37  ;;  %v4489_v17 = vsel %vm2020_vm4, %v10159_v27, 0.0 }
 0x255   :  { %13699 = vst [vmem:[#allocation80_spill] sm:$0xff] %v10178_v41  ;;  %v4235_v60 = vadd.f32 1.0, %v8031_v48  ;;  %8040 = vrcp.f32 %v4234_v30  ;;  %v3049_v32 = vmul.f32 %v9837_v45, %v2379_v10  ;;  %2118 = vst.msk [vmem:[#allocation2 + $0x210] sm:$0xff] %vm2020_vm4, %v1972_v53  ;;  %v10186_v50 = vmul.f32 %v9766_v26, %v2181_v14 }
 0x256   :  { %v3112_v9 = vadd.f32 %v3048_v54, %v2912_v25  ;;  %v3647_v20 = vmul.f32 %v9862_v55, %v2378_v58  ;;  %v6793_v51 = vmul.f32 -1.442695, %v10072_v24  ;;  %v2452_v37 = vmul.f32 %v9773_v8, %v2380_v42 }
 0x257   :  { %v10194_v48 = vmul.f32 %v9820_v4, %v2181_v14  ;;  %v10197_v39 = vmul.f32 %v9837_v45, %v2380_v42  ;;  %v3113_v30 = vadd.f32 %v3049_v32, %v2913_v6  ;;  %v4490_v13 = vadd.f32 %v4489_v17, %v4488_v5 }
 0x258   :  { %v8035_v0 = vpop.eup %8034  ;;  %v3711_v53 = vadd.f32 %v3647_v20, %v3511_v11  ;;  %v3248_v25 = vmul.f32 %v9852_v21, %v2578_v18  ;;  %v3448_v54 = vmul.f32 %v9857_v28, %v10134_v47  ;;  %v4491_v27 = vsel %vm2020_vm4, %v10178_v41, 0.0 }
 0x259   :  { %8042 = vrcp.f32 %v4235_v60  ;;  %v3449_v52 = vmul.f32 %v9857_v28, %v2181_v14  ;;  %v3249_v22 = vmul.f32 %v9852_v21, %v10189_v29  ;;  %v3847_v5 = vmul.f32 %v9892_v33, %v2578_v18 }
 0x25a   :  { %v3312_v6 = vadd.f32 %v3248_v25, %v3112_v9  ;;  %v3512_v32 = vadd.f32 %v3448_v54, %v3311_v56  ;;  %8044 = vpow2.f32 %v10083_v61  ;;  %v8037_v11 = vpop.eup %8036  ;;  %v4236_v17 = vadd.f32 1.0, %v8035_v0 }
 0x25b   :  { %v2250_v20 = vmul.f32 %v9766_v26, %v10124_v16  ;;  %v2450_v60 = vmul.f32 %v9773_v8, %v2378_v58  ;;  %v3313_v41 = vadd.f32 %v3249_v22, %v3113_v30  ;;  %v3648_v14 = vmul.f32 %v9862_v55, %v2379_v10  ;;  %v10222_v16 = vpop.f32.mrb[40].mxu1  ;;  %v10227_v30 = vld [vmem:[#allocation2 + $0x1f0] sm:$0xff] }
 0x25c   :  { %v3911_v23 = vadd.f32 %v3847_v5, %v3711_v53  ;;  %8046 = vpow2.f32 %v10103_v38  ;;  %v6798_v9 = vmul.f32 -1.442695, %v10107_v15  ;;  %v3450_v56 = vmul.f32 %v9857_v28, %v10207_v34 }
 0x25d   :  { %v2251_v61 = vmul.f32 %v9766_v26, %v10134_v47  ;;  %v2451_v0 = vmul.f32 %v9773_v8, %v2379_v10  ;;  %8048 = vpow2.f32 %v6795_v2  ;;  %v10225_v22 = vmul.f32 %v8037_v11, %v10015_v31 }
 0x25e   :  { %v8039_v58 = vpop.eup %8038  ;;  %v3513_v38 = vadd.f32 %v3449_v52, %v3312_v6  ;;  %v3712_v53 = vadd.f32 %v3648_v14, %v3512_v32  ;;  %8050 = vpow2.f32 %v6793_v51  ;;  %v3649_v28 = vmul.f32 %v9862_v55, %v2380_v42  ;;  %v2580_v52 = vld [vmem:[#allocation2 + $0x1e9] sm:$0xff] }
 0x25f   :  { %13700 = vst [vmem:[#allocation81_spill] sm:$0xff] %v10225_v22  ;;  %v8041_v25 = vpop.eup %8040  ;;  %8052 = vrcp.f32 %v4236_v17  ;;  %v2514_v54 = vadd.f32 %v2450_v60, %v2250_v20  ;;  %v3514_v26 = vadd.f32 %v3450_v56, %v3313_v41  ;;  %v2650_v8 = vmul.f32 %v9789_v46, %v2578_v18  ;;  %v10243_v18 = vld [vmem:[#allocation2 + $0x1f1] sm:$0xff]  ;;  %v10258_v20 = vld [vmem:[%s13453_s5 + $0x1] ss:$0 sm:$0xff] }
 0x260   :  { %v3848_v10 = vmul.f32 %v9892_v33, %v10189_v29  ;;  %v10234_v47 = vadd.f32 %v9921_v57, %v3911_v23  ;;  %8054 = vpow2.f32 %v6798_v9  ;;  %v4492_v31 = vadd.f32 %v4491_v27, %v4490_v13  ;;  %v10249_v27 = vld [vmem:[%s13453_s5] ss:$0 sm:$0xff] }
 0x261   :  { %v4237_v2 = vadd.f32 1.0, %v8039_v58  ;;  %v3650_v51 = vmul.f32 %v9862_v55, %v10227_v30  ;;  %v2515_v6 = vadd.f32 %v2451_v0, %v2251_v61  ;;  %v10239_v42 = vmul.f32 %v8041_v25, %v10033_v35  ;;  %v10274_v25 = vpop.f32.mrb[41].mxu1 }
 0x262   :  { %v4493_v41 = vsel %vm2020_vm4, %v10225_v22, 0.0  ;;  %v3713_v32 = vadd.f32 %v3649_v28, %v3513_v38  ;;  %v3912_v5 = vadd.f32 %v3848_v10, %v3712_v53  ;;  %v2516_v11 = vadd.f32 %v2452_v37, %v10186_v50 }
 0x263   :  { %13701 = vst [vmem:[#allocation82_spill] sm:$0xff] %v10239_v42  ;;  %v8043_v23 = vpop.eup %8042  ;;  %v2253_v55 = vmul.f32 %v10249_v27, %v10207_v34  ;;  %v2651_v35 = vmul.f32 %v9789_v46, %v10189_v29  ;;  %v3714_v13 = vadd.f32 %v3650_v51, %v3514_v26  ;;  %v2453_v50 = vmul.f32 %v10258_v20, %v10227_v30 }
 0x264   :  { %v8045_v17 = vpop.eup %8044  ;;  %v3849_v37 = vmul.f32 %v9892_v33, %v2580_v52  ;;  %v2714_v60 = vadd.f32 %v2650_v8, %v2514_v54  ;;  %v6864_v14 = vmul.f32 -1.442695, %v10234_v47  ;;  %8056 = vrcp.f32 %v4237_v2 }
 0x265   :  { %v4494_v9 = vadd.f32 %v4493_v41, %v4492_v31  ;;  %v3850_v29 = vmul.f32 %v9892_v33, %v10243_v18  ;;  %v2715_v56 = vadd.f32 %v2651_v35, %v2515_v6  ;;  %v10267_v0 = vmul.f32 %v8043_v23, %v10055_v40  ;;  %v10282_v31 = vld [vmem:[%s13453_s5 + $0x2] ss:$0 sm:$0xff]  ;;  %v10287_v6 = vld [vmem:[#allocation2 + $0x207] sm:$0xff] }
 0x266   :  { %v8047_v61 = vpop.eup %8046  ;;  %v4495_v58 = vsel %vm2020_vm4, %v10239_v42, 0.0  ;;  %v3913_v38 = vadd.f32 %v3849_v37, %v3713_v32  ;;  %v10272_v53 = vadd.f32 %v9921_v57, %v3912_v5  ;;  %v2652_v54 = vmul.f32 %v9789_v46, %v2580_v52 }
 0x267   :  { %13702 = vst [vmem:[#allocation83_spill] sm:$0xff] %v10267_v0  ;;  %v8049_v28 = vpop.eup %8048  ;;  %v2851_v33 = vmul.f32 %v9820_v4, %v10207_v34  ;;  %v3914_v26 = vadd.f32 %v3850_v29, %v3714_v13  ;;  %v1785_v8 = vadd.f32 1.0, %v8045_v17  ;;  %v2517_v40 = vadd.f32 %v2453_v50, %v2253_v55 }
 0x268   :  { %v8051_v10 = vpop.eup %8050  ;;  %v2653_v2 = vmul.f32 %v10282_v31, %v10243_v18  ;;  %v2914_v51 = vadd.f32 %v10194_v48, %v2714_v60  ;;  %8058 = vpow2.f32 %v6864_v14  ;;  %v4496_v41 = vadd.f32 %v4495_v58, %v4494_v9 }
 0x269   :  { %v8053_v46 = vpop.eup %8052  ;;  %v2915_v34 = vadd.f32 %v2851_v33, %v2715_v56  ;;  %8060 = vrcp.f32 %v1785_v8  ;;  %v1783_v32 = vadd.f32 1.0, %v8047_v61  ;;  %v4497_v23 = vsel %vm2020_vm4, %v10267_v0, 0.0  ;;  %v10307_v56 = vld [vmem:[#allocation2 + $0x20f] sm:$0xff] }
 0x26a   :  { %v8055_v5 = vpop.eup %8054  ;;  %v10292_v55 = vadd.f32 %v9921_v57, %v3913_v38  ;;  %v6865_v35 = vmul.f32 -1.442695, %v10272_v53  ;;  %v1786_v13 = vadd.f32 1.0, %v8049_v28  ;;  %v10296_v48 = vadd.f32 %v9921_v57, %v3914_v26  ;;  %v10310_v38 = vld [vmem:[#allocation2 + $0x208] sm:$0xff]  ;;  %v13704_v26 = vld [vmem:[#allocation67_spill] sm:$0xff] }
 0x26b   :  { %v2852_v17 = vmul.f32 %v9820_v4, %v10287_v6  ;;  %8062 = vrcp.f32 %v1783_v32  ;;  %v1784_v50 = vadd.f32 1.0, %v8051_v10  ;;  %v10301_v37 = vmul.f32 %v8053_v46, %v10088_v7  ;;  %v10335_v10 = vld [vmem:[%s13453_s5 + $0x4] ss:$0 sm:$0xff] }
 0x26c   :  { %v2716_v60 = vadd.f32 %v2652_v54, %v2516_v11  ;;  %v3051_v14 = vmul.f32 %v9837_v45, %v10227_v30  ;;  %8064 = vrcp.f32 %v1786_v13  ;;  %v3250_v9 = vmul.f32 %v9852_v21, %v2580_v52  ;;  %v10324_v54 = vld [vmem:[%s13453_s5 + $0x3] ss:$0 sm:$0xff] }
 0x26d   :  { %13703 = vst [vmem:[#allocation84_spill] sm:$0xff] %v10301_v37  ;;  %v3114_v29 = vadd.f32 %v10197_v39, %v2914_v51  ;;  %8066 = vrcp.f32 %v1784_v50  ;;  %v1789_v61 = vadd.f32 1.0, %v8055_v5  ;;  %v4498_v58 = vadd.f32 %v4497_v23, %v4496_v41 }
 0x26e   :  { %8068 = vpow2.f32 %v6865_v35  ;;  %v6866_v4 = vmul.f32 -1.442695, %v10292_v55  ;;  %v3115_v7 = vadd.f32 %v3051_v14, %v2915_v34  ;;  %v8057_v11 = vpop.eup %8056  ;;  %v6867_v28 = vmul.f32 -1.442695, %v10296_v48  ;;  %v10343_v34 = vld [vmem:[#allocation2 + $0x209] sm:$0xff] }
 0x26f   :  { %v2916_v45 = vadd.f32 %v2852_v17, %v2716_v60  ;;  %8070 = vrcp.f32 %v1789_v61  ;;  %v10315_v30 = vadd.f32 %v10167_v19, %v9804_v44  ;;  %v4499_v39 = vsel %vm2020_vm4, %v10301_v37, 0.0  ;;  %v10346_v35 = vld [vmem:[#allocation2 + $0x210] sm:$0xff]  ;;  %v10349_v17 = vpop.f32.mrb[42].mxu1 }
 0x270   :  { %v3251_v52 = vmul.f32 %v9852_v21, %v10243_v18  ;;  %v2853_v33 = vmul.f32 %v10324_v54, %v10307_v56  ;;  %v10330_v8 = vadd.f32 %v10167_v19, %v13704_v26  ;;  %v2717_v44 = vadd.f32 %v2653_v2, %v2517_v40  ;;  %v10377_v26 = vld [vmem:[#allocation2 + $0x211] sm:$0xff] }
 0x271   :  { %v3052_v21 = vmul.f32 %v10335_v10, %v10310_v38  ;;  %v3314_v18 = vadd.f32 %v3250_v9, %v3114_v29  ;;  %v6796_v51 = vmul.f32 -1.442695, %v10111_v1  ;;  %v10341_v41 = vmul.f32 %v8057_v11, %v10132_v36  ;;  %v10354_v36 = vld [vmem:[%s13453_s5 + $0x6] ss:$0 sm:$0xff] }
 0x272   :  { %v8059_v46 = vpop.eup %8058  ;;  %8072 = vpow2.f32 %v6866_v4  ;;  %v3315_v32 = vadd.f32 %v3251_v52, %v3115_v7  ;;  %v6799_v40 = vmul.f32 -1.442695, %v10171_v63  ;;  %v4500_v5 = vadd.f32 %v4499_v39, %v4498_v58  ;;  %v10363_v58 = vld [vmem:[%s13453_s5 + $0x5] ss:$0 sm:$0xff]  ;;  %v13706_v7 = vld [vmem:[#allocation68_spill] sm:$0xff] }
 0x273   :  { %13705 = vst [vmem:[#allocation67_spill] sm:$0xff] %v10341_v41  ;;  %v8061_v2 = vpop.eup %8060  ;;  %8074 = vpow2.f32 %v6867_v28  ;;  %v3116_v23 = vadd.f32 %v3052_v21, %v2916_v45  ;;  %v6797_v13 = vmul.f32 -1.442695, %v10315_v30  ;;  %v3451_v50 = vmul.f32 %v10354_v36, %v10287_v6  ;;  %v10371_v45 = vld [vmem:[#allocation2 + $0x227] sm:$0xff] }
 0x274   :  { %v2917_v60 = vadd.f32 %v2853_v33, %v2717_v44  ;;  %v1977_v14 = vmul.f32 %v8061_v2, %v10037_v3  ;;  %v6802_v9 = vmul.f32 -1.442695, %v10330_v8  ;;  %v4238_v61 = vadd.f32 1.0, %v8059_v46 }
 0x275   :  { %v8063_v29 = vpop.eup %8062  ;;  %v3252_v4 = vmul.f32 %v10363_v58, %v10343_v34  ;;  %8076 = vpow2.f32 %v6796_v51  ;;  %v10369_v11 = vadd.f32 %v10167_v19, %v13706_v7  ;;  %v3515_v3 = vadd.f32 %v3451_v50, %v3314_v18  ;;  %v10385_v18 = vld [vmem:[%s13453_s5 + $0x7] ss:$0 sm:$0xff] }
 0x276   :  { %v8065_v28 = vpop.eup %8064  ;;  %v3053_v39 = vmul.f32 %v10335_v10, %v10346_v35  ;;  %2123 = vst.msk [vmem:[#allocation2 + $0x268] sm:$0xff] %vm2020_vm4, %v1977_v14  ;;  %v1975_v52 = vmul.f32 %v8063_v29, %v10046_v49  ;;  %8078 = vpow2.f32 %v6799_v40  ;;  %v3452_v21 = vmul.f32 %v10354_v36, %v10307_v56  ;;  %v10398_v29 = vld [vmem:[#allocation2 + $0x228] sm:$0xff] }
 0x277   :  { %v8067_v33 = vpop.eup %8066  ;;  %v3316_v44 = vadd.f32 %v3252_v4, %v3116_v23  ;;  %v1978_v51 = vmul.f32 %v8065_v28, %v10064_v43  ;;  %8080 = vpow2.f32 %v6797_v13  ;;  %v3651_v49 = vmul.f32 %v10385_v18, %v10310_v38  ;;  %v10391_v23 = vpop.f32.mrb[43].mxu1 }
 0x278   :  { %v8069_v46 = vpop.eup %8068  ;;  %v3117_v40 = vadd.f32 %v3053_v39, %v2917_v60  ;;  %2121 = vst.msk [vmem:[#allocation2 + $0x248] sm:$0xff] %vm2020_vm4, %v1975_v52  ;;  %v1976_v2 = vmul.f32 %v8067_v33, %v10072_v24  ;;  %8082 = vpow2.f32 %v6802_v9  ;;  %13707 = vst [vmem:[#allocation68_spill] sm:$0xff] %v10391_v23  ;;  %v4501_v43 = vsel %vm2020_vm4, %v10341_v41, 0.0  ;;  %v13708_v9 = vld [vmem:[#allocation69_spill] sm:$0xff] }
 0x279   :  { %v8071_v50 = vpop.eup %8070  ;;  %v3453_v13 = vmul.f32 %v10354_v36, %v10371_v45  ;;  %v3516_v14 = vadd.f32 %v3452_v21, %v3315_v32  ;;  %2124 = vst.msk [vmem:[#allocation2 + $0x270] sm:$0xff] %vm2020_vm4, %v1978_v51  ;;  %v3715_v60 = vadd.f32 %v3651_v49, %v3515_v3  ;;  %v3253_v4 = vmul.f32 %v10363_v58, %v10377_v26  ;;  %v10408_v39 = vld [vmem:[#allocation2 + $0x22f] sm:$0xff] }
 0x27a   :  { %2122 = vst.msk [vmem:[#allocation2 + $0x250] sm:$0xff] %vm2020_vm4, %v1976_v2  ;;  %v1981_v24 = vmul.f32 %v8071_v50, %v10107_v15  ;;  %v10406_v7 = vadd.f32 %v10167_v19, %v13708_v9  ;;  %v4239_v28 = vadd.f32 1.0, %v8069_v46  ;;  %8084 = vrcp.f32 %v4238_v61  ;;  %v10417_v15 = vld [vmem:[%s13453_s5 + $0x8] ss:$0 sm:$0xff]  ;;  %v10431_v2 = vld [vmem:[#allocation2 + $0x229] sm:$0xff] }
 0x27b   :  { %v3517_v32 = vadd.f32 %v3453_v13, %v3316_v44  ;;  %v3652_v52 = vmul.f32 %v10385_v18, %v10346_v35  ;;  %v10412_v33 = vadd.f32 %v4501_v43, %v4500_v5  ;;  %v3317_v21 = vadd.f32 %v3253_v4, %v3117_v40  ;;  %v13709_v4 = vld [vmem:[#allocation70_spill] sm:$0xff] }
 0x27c   :  { %v8073_v3 = vpop.eup %8072  ;;  %v3851_v51 = vmul.f32 %v10417_v15, %v10343_v34  ;;  %2127 = vst.msk [vmem:[#allocation2 + $0x2a8] sm:$0xff] %vm2020_vm4, %v1981_v24  ;;  %v10423_v61 = vmul.f32 -1.442695, %v10369_v11  ;;  %v3653_v46 = vmul.f32 %v10385_v18, %v10398_v29  ;;  %v2254_v5 = vmul.f32 %v10249_v27, %v10287_v6  ;;  %v10442_v6 = vld [vmem:[#allocation2 + $0x230] sm:$0xff] }
 0x27d   :  { %v8075_v44 = vpop.eup %8074  ;;  %v2454_v49 = vmul.f32 %v10258_v20, %v10310_v38  ;;  %v3716_v40 = vadd.f32 %v3652_v52, %v3516_v14  ;;  %v3454_v50 = vmul.f32 %v10354_v36, %v10408_v39  ;;  %v10436_v13 = vmul.f32 -1.442695, %v10406_v7 }
 0x27e   :  { %v3915_v43 = vadd.f32 %v3851_v51, %v3715_v60  ;;  %v10440_v24 = vadd.f32 %v10167_v19, %v13709_v4  ;;  %8086 = vrcp.f32 %v4239_v28  ;;  %v3717_v41 = vadd.f32 %v3653_v46, %v3517_v32 }
 0x27f   :  { %v8077_v9 = vpop.eup %8076  ;;  %v3852_v38 = vmul.f32 %v10417_v15, %v10377_v26  ;;  %v10448_v14 = vadd.f32 %v10167_v19, %v9951_v59  ;;  %v4240_v52 = vadd.f32 1.0, %v8073_v3  ;;  %v2256_v51 = vmul.f32 %v10249_v27, %v10371_v45 }
 0x280   :  { %13710 = vst [vmem:[#allocation69_spill] sm:$0xff] %v10440_v24  ;;  %v8079_v60 = vpop.eup %8078  ;;  %v3518_v37 = vadd.f32 %v3454_v50, %v3317_v21  ;;  %v10454_v4 = vadd.f32 %v10167_v19, %v9966_v62  ;;  %v4241_v0 = vadd.f32 1.0, %v8075_v44  ;;  %v2518_v32 = vadd.f32 %v2454_v49, %v2254_v5  ;;  %v10465_v62 = vld [vmem:[#allocation2 + $0x231] sm:$0xff] }
 0x281   :  { %13711 = vst [vmem:[#allocation70_spill] sm:$0xff] %v10448_v14  ;;  %v8081_v28 = vpop.eup %8080  ;;  %v3853_v46 = vmul.f32 %v10417_v15, %v10431_v2  ;;  %v3916_v42 = vadd.f32 %v3852_v38, %v3716_v40  ;;  %v3654_v59 = vmul.f32 %v10385_v18, %v10442_v6  ;;  %v2654_v3 = vmul.f32 %v10282_v31, %v10343_v34  ;;  %v10471_v38 = vpop.f32.mrb[44].mxu1 }
 0x282   :  { %13712 = vst [vmem:[#allocation85_spill] sm:$0xff] %v10454_v4  ;;  %v8083_v22 = vpop.eup %8082  ;;  %v10463_v21 = vadd.f32 %v9921_v57, %v3915_v43  ;;  %v1787_v50 = vadd.f32 1.0, %v8077_v9  ;;  %v2255_v44 = vmul.f32 %v10249_v27, %v10307_v56  ;;  %v2455_v5 = vmul.f32 %v10258_v20, %v10346_v35  ;;  %13713 = vst [vmem:[#allocation86_spill] sm:$0xff] %v10471_v38  ;;  %v10478_v9 = vld [vmem:[%s13454_s6] ss:$0 sm:$0xff]  ;;  %v2197_v38 = vld [vmem:[#allocation2 + $0x4e7] sm:$0xff] }
 0x283   :  { %v3917_v49 = vadd.f32 %v3853_v46, %v3717_v41  ;;  %v1790_v40 = vadd.f32 1.0, %v8079_v60  ;;  %8088 = vrcp.f32 %v4240_v52  ;;  %v2456_v34 = vmul.f32 %v10258_v20, %v10398_v29  ;;  %v10486_v60 = vpop.f32.mrb[45].mxu1 }
 0x284   :  { %v3718_v23 = vadd.f32 %v3654_v59, %v3518_v37  ;;  %v1788_v57 = vadd.f32 1.0, %v8081_v28  ;;  %v8085_v43 = vpop.eup %8084  ;;  %8090 = vrcp.f32 %v4241_v0  ;;  %v10481_v56 = vadd.f32 %v10478_v9, %v3916_v42  ;;  %13714 = vst [vmem:[#allocation87_spill] sm:$0xff] %v10486_v60 }
 0x285   :  { %v1793_v41 = vadd.f32 1.0, %v8083_v22  ;;  %v10484_v35 = vmul.f32 -1.442695, %v10440_v24  ;;  %v3854_v37 = vmul.f32 %v10417_v15, %v10465_v62  ;;  %v2718_v52 = vadd.f32 %v2654_v3, %v2518_v32 }
 0x286   :  { %v6868_v0 = vmul.f32 -1.442695, %v10463_v21  ;;  %8092 = vrcp.f32 %v1787_v50  ;;  %v2854_v28 = vmul.f32 %v10324_v54, %v10371_v45  ;;  %v2519_v46 = vadd.f32 %v2455_v5, %v2255_v44  ;;  %v10504_v50 = vld [vmem:[#allocation2 + $0x247] sm:$0xff]  ;;  %v10506_v44 = vpop.f32.mrb[46].mxu1 }
 0x287   :  { %v10494_v42 = vadd.f32 %v10478_v9, %v3917_v49  ;;  %8094 = vrcp.f32 %v1790_v40  ;;  %v10497_v22 = vmul.f32 %v8085_v43, %v10234_v47  ;;  %v2520_v59 = vadd.f32 %v2456_v34, %v2256_v51  ;;  %13716 = vst [vmem:[#allocation89_spill] sm:$0xff] %v10506_v44  ;;  %v2596_v44 = vld [vmem:[#allocation2 + $0x4e9] sm:$0xff] }
 0x288   :  { %v3918_v60 = vadd.f32 %v3854_v37, %v3718_v23  ;;  %8096 = vrcp.f32 %v1788_v57  ;;  %v8087_v24 = vpop.eup %8086  ;;  %v2257_v32 = vmul.f32 %v10249_v27, %v10408_v39  ;;  %v2655_v3 = vmul.f32 %v10282_v31, %v10377_v26 }
 0x289   :  { %13715 = vst [vmem:[#allocation88_spill] sm:$0xff] %v10497_v22  ;;  %v6869_v45 = vmul.f32 -1.442695, %v10481_v56  ;;  %8098 = vrcp.f32 %v1793_v41  ;;  %v2457_v47 = vmul.f32 %v10258_v20, %v10442_v6  ;;  %v2656_v23 = vmul.f32 %v10282_v31, %v10431_v2 }
 0x28a   :  { %v2918_v51 = vadd.f32 %v2854_v28, %v2718_v52  ;;  %8100 = vpow2.f32 %v6868_v0  ;;  %v3054_v5 = vmul.f32 %v10335_v10, %v10398_v29  ;;  %v2719_v49 = vadd.f32 %v2655_v3, %v2519_v46 }
 0x28b   :  { %v6870_v26 = vmul.f32 -1.442695, %v10494_v42  ;;  %v10516_v40 = vmul.f32 %v10249_v27, %v2197_v38  ;;  %v10519_v34 = vmul.f32 %v8087_v24, %v10272_v53  ;;  %v4503_v57 = vsel %vm2020_vm4, %v10497_v22, 0.0  ;;  %v10542_v22 = vld [vmem:[#allocation2 + $0x24f] sm:$0xff] }
 0x28c   :  { %v10524_v43 = vadd.f32 %v10478_v9, %v3918_v60  ;;  %v2856_v41 = vmul.f32 %v10324_v54, %v10504_v50  ;;  %v2855_v29 = vmul.f32 %v10324_v54, %v10408_v39  ;;  %8102 = vpow2.f32 %v6869_v45  ;;  %v2396_v60 = vld [vmem:[#allocation2 + $0x4e8] sm:$0xff] }
 0x28d   :  { %13717 = vst [vmem:[#allocation90_spill] sm:$0xff] %v10519_v34  ;;  %v10531_v37 = vmul.f32 -1.442695, %v10448_v14  ;;  %v10534_v38 = vmul.f32 -1.442695, %v10454_v4  ;;  %v8089_v53 = vpop.eup %8088  ;;  %v2521_v24 = vadd.f32 %v2457_v47, %v2257_v32  ;;  %v2720_v52 = vadd.f32 %v2656_v23, %v2520_v59  ;;  %v10540_v45 = vld [vmem:[#allocation2 + $0x248] sm:$0xff] }
 0x28e   :  { %v3118_v0 = vadd.f32 %v3054_v5, %v2918_v51  ;;  %8104 = vpow2.f32 %v10423_v61  ;;  %v8091_v28 = vpop.eup %8090  ;;  %v4504_v46 = vadd.f32 %v4503_v57, %v10412_v33  ;;  %v3254_v39 = vmul.f32 %v10363_v58, %v10431_v2  ;;  %v13719_v57 = vld [vmem:[#allocation71_spill] sm:$0xff] }
 0x28f   :  { %v2919_v3 = vadd.f32 %v2855_v29, %v2719_v49  ;;  %8106 = vpow2.f32 %v6870_v26  ;;  %v4505_v59 = vsel %vm2020_vm4, %v10519_v34, 0.0  ;;  %v6871_v32 = vmul.f32 -1.442695, %v10524_v43 }
 0x290   :  { %v8093_v4 = vpop.eup %8092  ;;  %v2920_v61 = vadd.f32 %v2856_v41, %v2720_v52  ;;  %8108 = vpow2.f32 %v10436_v13  ;;  %v10549_v33 = vmul.f32 %v8089_v53, %v10292_v55  ;;  %v2657_v2 = vmul.f32 %v10282_v31, %v10465_v62  ;;  %v10564_v52 = vld [vmem:[#allocation2 + $0x249] sm:$0xff] }
 0x291   :  { %v8095_v47 = vpop.eup %8094  ;;  %v3055_v23 = vmul.f32 %v10335_v10, %v10442_v6  ;;  %v2468_v51 = vmul.f32 %v10258_v20, %v2396_v60  ;;  %v3056_v49 = vmul.f32 %v10335_v10, %v10540_v45  ;;  %v3318_v26 = vadd.f32 %v3254_v39, %v3118_v0 }
 0x292   :  { %13718 = vst [vmem:[#allocation91_spill] sm:$0xff] %v10549_v33  ;;  %v8097_v5 = vpop.eup %8096  ;;  %v2857_v13 = vmul.f32 %v10324_v54, %v10542_v22  ;;  %v10562_v55 = vadd.f32 %v10167_v19, %v13719_v57  ;;  %v4506_v29 = vadd.f32 %v4505_v59, %v4504_v46  ;;  %v2721_v53 = vadd.f32 %v2657_v2, %v2521_v24 }
 0x293   :  { %v8099_v41 = vpop.eup %8098  ;;  %v3119_v6 = vadd.f32 %v3055_v23, %v2919_v3  ;;  %v1979_v60 = vmul.f32 %v8093_v4, %v10111_v1  ;;  %8110 = vpow2.f32 %v6871_v32  ;;  %v3120_v14 = vadd.f32 %v3056_v49, %v2920_v61  ;;  %v10577_v3 = vld [vmem:[#allocation2 + $0x250] sm:$0xff]  ;;  %v10585_v61 = vld [vmem:[#allocation2 + $0x267] sm:$0xff] }
 0x294   :  { %13720 = vst [vmem:[#allocation71_spill] sm:$0xff] %v10562_v55  ;;  %v8101_v34 = vpop.eup %8100  ;;  %v3455_v0 = vmul.f32 %v10354_v36, %v10504_v50  ;;  %v1982_v39 = vmul.f32 %v8095_v47, %v10171_v63  ;;  %v10571_v57 = vmul.f32 %v8091_v28, %v10296_v48  ;;  %v4507_v24 = vsel %vm2020_vm4, %v10549_v33, 0.0 }
 0x295   :  { %v3255_v46 = vmul.f32 %v10363_v58, %v10465_v62  ;;  %2125 = vst.msk [vmem:[#allocation2 + $0x288] sm:$0xff] %vm2020_vm4, %v1979_v60  ;;  %v1980_v1 = vmul.f32 %v8097_v5, %v10315_v30  ;;  %v2921_v59 = vadd.f32 %v2857_v13, %v2721_v53  ;;  %v3256_v63 = vmul.f32 %v10363_v58, %v10564_v52  ;;  %v10597_v13 = vld [vmem:[#allocation2 + $0x251] sm:$0xff] }
 0x296   :  { %13721 = vst [vmem:[#allocation92_spill] sm:$0xff] %v10571_v57  ;;  %v3519_v4 = vadd.f32 %v3455_v0, %v3318_v26  ;;  %2128 = vst.msk [vmem:[#allocation2 + $0x2b0] sm:$0xff] %vm2020_vm4, %v1982_v39  ;;  %v1985_v48 = vmul.f32 %v8099_v41, %v10330_v8  ;;  %v8103_v28 = vpop.eup %8102  ;;  %v4242_v32 = vadd.f32 1.0, %v8101_v34  ;;  %v2532_v47 = vadd.f32 %v2468_v51, %v10516_v40  ;;  %v10608_v41 = vpop.f32.mrb[47].mxu1  ;;  %v10612_v0 = vld [vmem:[#allocation2 + $0x268] sm:$0xff] }
 0x297   :  { %v3319_v62 = vadd.f32 %v3255_v46, %v3119_v6  ;;  %2126 = vst.msk [vmem:[#allocation2 + $0x290] sm:$0xff] %vm2020_vm4, %v1980_v1  ;;  %v2668_v30 = vmul.f32 %v10282_v31, %v2596_v44  ;;  %v4508_v23 = vadd.f32 %v4507_v24, %v4506_v29  ;;  %v3655_v5 = vmul.f32 %v10385_v18, %v10540_v45  ;;  %v13723_v46 = vld [vmem:[#allocation74_spill] sm:$0xff] }
 0x298   :  { %v8105_v2 = vpop.eup %8104  ;;  %v3057_v49 = vmul.f32 %v10335_v10, %v10577_v3  ;;  %v3320_v8 = vadd.f32 %v3256_v63, %v3120_v14  ;;  %2131 = vst.msk [vmem:[#allocation2 + $0x2e8] sm:$0xff] %vm2020_vm4, %v1985_v48  ;;  %v4509_v26 = vsel %vm2020_vm4, %v10571_v57, 0.0  ;;  %v3456_v44 = vmul.f32 %v10354_v36, %v10542_v22 }
 0x299   :  { %v8107_v34 = vpop.eup %8106  ;;  %v10602_v40 = vmul.f32 -1.442695, %v10562_v55  ;;  %v10606_v51 = vadd.f32 %v10167_v19, %v10074_v12  ;;  %v4243_v29 = vadd.f32 1.0, %v8103_v28  ;;  %v3457_v53 = vmul.f32 %v10354_v36, %v10585_v61 }
 0x29a   :  { %v8109_v14 = vpop.eup %8108  ;;  %v3719_v6 = vadd.f32 %v3655_v5, %v3519_v4  ;;  %v3121_v60 = vadd.f32 %v3057_v49, %v2921_v59  ;;  %8112 = vrcp.f32 %v4242_v32  ;;  %v3520_v39 = vadd.f32 %v3456_v44, %v3319_v62  ;;  %v10624_v59 = vld [vmem:[#allocation2 + $0x26f] sm:$0xff] }
 0x29b   :  { %13722 = vst [vmem:[#allocation93_spill] sm:$0xff] %v10606_v51  ;;  %v1791_v24 = vadd.f32 1.0, %v8105_v2  ;;  %v10616_v1 = vadd.f32 %v10167_v19, %v13723_v46  ;;  %v10618_v12 = vadd.f32 %v4509_v26, %v4508_v23  ;;  %v3257_v63 = vmul.f32 %v10363_v58, %v10597_v13  ;;  %v2198_v2 = vld [vmem:[#allocation2 + $0x4ef] sm:$0xff] }
 0x29c   :  { %v3521_v48 = vadd.f32 %v3457_v53, %v3320_v8  ;;  %v3855_v28 = vmul.f32 %v10417_v15, %v10564_v52  ;;  %v4244_v4 = vadd.f32 1.0, %v8107_v34  ;;  %v3656_v32 = vmul.f32 %v10385_v18, %v10577_v3  ;;  %v2397_v5 = vld [vmem:[#allocation2 + $0x4f0] sm:$0xff] }
 0x29d   :  { %13724 = vst [vmem:[#allocation74_spill] sm:$0xff] %v10616_v1  ;;  %v1794_v62 = vadd.f32 1.0, %v8109_v14  ;;  %8114 = vpow2.f32 %v10484_v35  ;;  %v8111_v23 = vpop.eup %8110  ;;  %v3657_v49 = vmul.f32 %v10385_v18, %v10612_v0  ;;  %v3321_v8 = vadd.f32 %v3257_v63, %v3121_v60  ;;  %v2597_v44 = vld [vmem:[#allocation2 + $0x4f1] sm:$0xff]  ;;  %v10631_v53 = vld [vmem:[#allocation2 + $0x269] sm:$0xff] }
 0x29e   :  { %8116 = vrcp.f32 %v4243_v29  ;;  %v3919_v26 = vadd.f32 %v3855_v28, %v3719_v6  ;;  %v3720_v34 = vadd.f32 %v3656_v32, %v3520_v39  ;;  %v10633_v46 = vadd.f32 %v2668_v30, %v2532_v47  ;;  %v10642_v6 = vld [vmem:[#allocation2 + $0x270] sm:$0xff]  ;;  %v10647_v30 = vpop.f32.mrb[48].mxu1 }
 0x29f   :  { %8118 = vrcp.f32 %v1791_v24  ;;  %v10636_v14 = vmul.f32 -1.442695, %v10606_v51  ;;  %v3458_v35 = vmul.f32 %v10354_v36, %v10624_v59  ;;  %v3721_v57 = vadd.f32 %v3657_v49, %v3521_v48 }
 0x2a0   :  { %13725 = vst [vmem:[#allocation94_spill] sm:$0xff] %v10633_v46  ;;  %v2269_v29 = vmul.f32 %v10249_v27, %v2198_v2  ;;  %v2469_v33 = vmul.f32 %v10258_v20, %v2397_v5  ;;  %v4245_v60 = vadd.f32 1.0, %v8111_v23  ;;  %v3856_v39 = vmul.f32 %v10417_v15, %v10597_v13 }
 0x2a1   :  { %8120 = vrcp.f32 %v1794_v62  ;;  %v2669_v47 = vmul.f32 %v10282_v31, %v2597_v44  ;;  %v3857_v24 = vmul.f32 %v10417_v15, %v10631_v53  ;;  %v3522_v63 = vadd.f32 %v3458_v35, %v3321_v8  ;;  %v13726_v62 = vld [vmem:[#allocation75_spill] sm:$0xff]  ;;  %v13728_v8 = vld [vmem:[#allocation77_spill] sm:$0xff] }
 0x2a2   :  { %8122 = vrcp.f32 %v4244_v4  ;;  %v10652_v48 = vadd.f32 %v10478_v9, %v3919_v26  ;;  %v2258_v28 = vmul.f32 %v10249_v27, %v10504_v50  ;;  %v2458_v32 = vmul.f32 %v10258_v20, %v10540_v45  ;;  %v10671_v44 = vld [vmem:[#allocation2 + $0x271] sm:$0xff]  ;;  %v13730_v35 = vld [vmem:[#allocation79_spill] sm:$0xff] }
 0x2a3   :  { %v3920_v2 = vadd.f32 %v3856_v39, %v3720_v34  ;;  %v10660_v5 = vadd.f32 %v10167_v19, %v13726_v62  ;;  %v3658_v4 = vmul.f32 %v10385_v18, %v10642_v6  ;;  %v3921_v23 = vadd.f32 %v3857_v24, %v3721_v57 }
 0x2a4   :  { %v10665_v49 = vmul.f32 -1.442695, %v10616_v1  ;;  %v10669_v26 = vadd.f32 %v10167_v19, %v13728_v8  ;;  %v8113_v50 = vpop.eup %8112  ;;  %v2259_v45 = vmul.f32 %v10249_v27, %v10542_v22  ;;  %v2459_v34 = vmul.f32 %v10258_v20, %v10577_v3  ;;  %v10693_v3 = vpop.f32.mrb[49].mxu1 }
 0x2a5   :  { %13727 = vst [vmem:[#allocation75_spill] sm:$0xff] %v10660_v5  ;;  %8124 = vpow2.f32 %v10531_v37  ;;  %v10680_v57 = vadd.f32 %v10167_v19, %v13730_v35  ;;  %v3722_v39 = vadd.f32 %v3658_v4, %v3522_v63  ;;  %v6872_v24 = vmul.f32 -1.442695, %v10652_v48 }
 0x2a6   :  { %13729 = vst [vmem:[#allocation77_spill] sm:$0xff] %v10669_v26  ;;  %8126 = vrcp.f32 %v4245_v60  ;;  %v2533_v62 = vadd.f32 %v2469_v33, %v2269_v29  ;;  %v2522_v46 = vadd.f32 %v2458_v32, %v2258_v28  ;;  %v10684_v1 = vadd.f32 %v10478_v9, %v3920_v2 }
 0x2a7   :  { %13731 = vst [vmem:[#allocation79_spill] sm:$0xff] %v10680_v57  ;;  %v8115_v8 = vpop.eup %8114  ;;  %v10687_v22 = vmul.f32 -1.442695, %v10660_v5  ;;  %v10691_v37 = vadd.f32 %v10167_v19, %v10222_v16  ;;  %v10696_v60 = vmul.f32 %v8113_v50, %v10463_v21  ;;  %v3858_v33 = vmul.f32 %v10417_v15, %v10671_v44 }
 0x2a8   :  { %v8117_v35 = vpop.eup %8116  ;;  %v2658_v29 = vmul.f32 %v10282_v31, %v10564_v52  ;;  %v10703_v63 = vadd.f32 %v10478_v9, %v3921_v23  ;;  %v2260_v16 = vmul.f32 %v10249_v27, %v10585_v61  ;;  %v2460_v32 = vmul.f32 %v10258_v20, %v10612_v0  ;;  %v10715_v52 = vpop.f32.mrb[50].mxu1 }
 0x2a9   :  { %13732 = vst [vmem:[#allocation95_spill] sm:$0xff] %v10696_v60  ;;  %v8119_v28 = vpop.eup %8118  ;;  %v2523_v2 = vadd.f32 %v2459_v34, %v2259_v45  ;;  %v10710_v21 = vmul.f32 -1.442695, %v10669_v26  ;;  %v3922_v4 = vadd.f32 %v3858_v33, %v3722_v39  ;;  %8128 = vpow2.f32 %v6872_v24  ;;  %13733 = vst [vmem:[#allocation96_spill] sm:$0xff] %v10715_v52  ;;  %v10730_v26 = vld [vmem:[#allocation2 + $0x287] sm:$0xff] }
 0x2aa   :  { %v1792_v50 = vadd.f32 1.0, %v8115_v8  ;;  %v10713_v5 = vmul.f32 -1.442695, %v10680_v57  ;;  %v10718_v51 = vmul.f32 %v8117_v35, %v10481_v56  ;;  %v2659_v55 = vmul.f32 %v10282_v31, %v10597_v13 }
 0x2ab   :  { %v8121_v23 = vpop.eup %8120  ;;  %v6873_v45 = vmul.f32 -1.442695, %v10684_v1  ;;  %8130 = vpow2.f32 %v10534_v38  ;;  %v4511_v39 = vsel %vm2020_vm4, %v10696_v60, 0.0  ;;  %v2722_v24 = vadd.f32 %v2658_v29, %v2522_v46 }
 0x2ac   :  { %13734 = vst [vmem:[#allocation97_spill] sm:$0xff] %v10718_v51  ;;  %v8123_v34 = vpop.eup %8122  ;;  %v6874_v8 = vmul.f32 -1.442695, %v10703_v63  ;;  %v1983_v33 = vmul.f32 %v8119_v28, %v10369_v11  ;;  %v2524_v57 = vadd.f32 %v2460_v32, %v2260_v16  ;;  %v2858_v56 = vmul.f32 %v10324_v54, %v10585_v61 }
 0x2ad   :  { %v2723_v35 = vadd.f32 %v2659_v55, %v2523_v2  ;;  %v10732_v13 = vadd.f32 %v2669_v47, %v2533_v62  ;;  %v2660_v38 = vmul.f32 %v10282_v31, %v10631_v53  ;;  %v10737_v52 = vadd.f32 %v10478_v9, %v3922_v4  ;;  %v10747_v47 = vpop.f32.mrb[51].mxu1 }
 0x2ae   :  { %2129 = vst.msk [vmem:[#allocation2 + $0x2c8] sm:$0xff] %vm2020_vm4, %v1983_v33  ;;  %v1986_v46 = vmul.f32 %v8121_v23, %v10406_v7  ;;  %8132 = vrcp.f32 %v1792_v50  ;;  %v10742_v29 = vmul.f32 %v8123_v34, %v10494_v42  ;;  %v4512_v55 = vadd.f32 %v4511_v39, %v10618_v12 }
 0x2af   :  { %v8125_v11 = vpop.eup %8124  ;;  %v2859_v61 = vmul.f32 %v10324_v54, %v10624_v59  ;;  %8134 = vpow2.f32 %v6873_v45  ;;  %v4513_v28 = vsel %vm2020_vm4, %v10718_v51, 0.0  ;;  %v2922_v16 = vadd.f32 %v2858_v56, %v2722_v24  ;;  %v10773_v24 = vld [vmem:[#allocation2 + $0x288] sm:$0xff] }
 0x2b0   :  { %13735 = vst [vmem:[#allocation98_spill] sm:$0xff] %v10742_v29  ;;  %v8127_v62 = vpop.eup %8126  ;;  %8136 = vpow2.f32 %v6874_v8  ;;  %v2860_v7 = vmul.f32 %v10324_v54, %v10730_v26  ;;  %2132 = vst.msk [vmem:[#allocation2 + $0x2f0] sm:$0xff] %vm2020_vm4, %v1986_v46  ;;  %v2261_v42 = vmul.f32 %v10249_v27, %v10624_v59  ;;  %v2461_v12 = vmul.f32 %v10258_v20, %v10642_v6  ;;  %v2193_v46 = vld [vmem:[#allocation2 + $0x2a7] sm:$0xff] }
 0x2b1   :  { %v2923_v32 = vadd.f32 %v2859_v61, %v2723_v35  ;;  %v10759_v2 = vmul.f32 -1.442695, %v10691_v37  ;;  %v3058_v4 = vmul.f32 %v10335_v10, %v10612_v0  ;;  %v2724_v50 = vadd.f32 %v2660_v38, %v2524_v57  ;;  %v13738_v61 = vld [vmem:[#allocation68_spill] sm:$0xff] }
 0x2b2   :  { %v6875_v23 = vmul.f32 -1.442695, %v10737_v52  ;;  %v10766_v45 = vadd.f32 %v10167_v19, %v10274_v25  ;;  %v10769_v34 = vmul.f32 %v8127_v62, %v10524_v43  ;;  %v4514_v59 = vadd.f32 %v4513_v28, %v4512_v55 }
 0x2b3   :  { %v3059_v39 = vmul.f32 %v10335_v10, %v10642_v6  ;;  %v1797_v8 = vadd.f32 1.0, %v8125_v11  ;;  %v8129_v33 = vpop.eup %8128  ;;  %v4515_v0 = vsel %vm2020_vm4, %v10742_v29, 0.0  ;;  %v2924_v57 = vadd.f32 %v2860_v7, %v2724_v50  ;;  %v2392_v6 = vld [vmem:[#allocation2 + $0x2a8] sm:$0xff] }
 0x2b4   :  { %13736 = vst [vmem:[#allocation99_spill] sm:$0xff] %v10769_v34  ;;  %v3122_v56 = vadd.f32 %v3058_v4, %v2922_v16  ;;  %v10779_v25 = vadd.f32 %v10167_v19, %v10349_v17  ;;  %v2525_v43 = vadd.f32 %v2461_v12, %v2261_v42  ;;  %v2661_v38 = vmul.f32 %v10282_v31, %v10671_v44  ;;  %v10795_v12 = vld [vmem:[#allocation2 + $0x289] sm:$0xff] }
 0x2b5   :  { %v8131_v35 = vpop.eup %8130  ;;  %v3123_v55 = vadd.f32 %v3059_v39, %v2923_v32  ;;  %v10785_v11 = vadd.f32 %v10167_v19, %v13738_v61  ;;  %v3258_v62 = vmul.f32 %v10363_v58, %v10631_v53  ;;  %v3259_v28 = vmul.f32 %v10363_v58, %v10671_v44  ;;  %v10799_v44 = vld [vmem:[#allocation2 + $0x28f] sm:$0xff] }
 0x2b6   :  { %13737 = vst [vmem:[#allocation100_spill] sm:$0xff] %v10779_v25  ;;  %8138 = vpow2.f32 %v6875_v23  ;;  %v3060_v17 = vmul.f32 %v10335_v10, %v10773_v24  ;;  %v4516_v16 = vadd.f32 %v4515_v0, %v4514_v59  ;;  %v4246_v7 = vadd.f32 1.0, %v8129_v33 }
 0x2b7   :  { %13739 = vst [vmem:[#allocation68_spill] sm:$0xff] %v10785_v11  ;;  %v4517_v42 = vsel %vm2020_vm4, %v10769_v34, 0.0  ;;  %8140 = vrcp.f32 %v1797_v8  ;;  %v2264_v32 = vmul.f32 %v10249_v27, %v2193_v46  ;;  %v2464_v53 = vmul.f32 %v10258_v20, %v2392_v6 }
 0x2b8   :  { %v8133_v19 = vpop.eup %8132  ;;  %v3124_v4 = vadd.f32 %v3060_v17, %v2924_v57  ;;  %v3322_v50 = vadd.f32 %v3258_v62, %v3122_v56  ;;  %v3323_v39 = vadd.f32 %v3259_v28, %v3123_v55  ;;  %v1795_v61 = vadd.f32 1.0, %v8131_v35  ;;  %v13740_v62 = vld [vmem:[#allocation69_spill] sm:$0xff] }
 0x2b9   :  { %v8135_v23 = vpop.eup %8134  ;;  %v10802_v59 = vmul.f32 -1.442695, %v10766_v45  ;;  %v10805_v33 = vmul.f32 -1.442695, %v10779_v25  ;;  %v2725_v8 = vadd.f32 %v2661_v38, %v2525_v43  ;;  %v3459_v34 = vmul.f32 %v10354_v36, %v10730_v26  ;;  %v2391_v38 = vld [vmem:[#allocation2 + $0x290] sm:$0xff] }
 0x2ba   :  { %v8137_v0 = vpop.eup %8136  ;;  %v3260_v57 = vmul.f32 %v10363_v58, %v10795_v12  ;;  %v10812_v56 = vmul.f32 -1.442695, %v10785_v11  ;;  %8142 = vrcp.f32 %v4246_v7  ;;  %v10814_v55 = vadd.f32 %v4517_v42, %v4516_v16  ;;  %v10825_v16 = vld [vmem:[%s13452_s4] ss:$0 sm:$0xff]  ;;  %v13742_v7 = vld [vmem:[#allocation86_spill] sm:$0xff] }
 0x2bb   :  { %v3460_v35 = vmul.f32 %v10354_v36, %v10799_v44  ;;  %v1984_v28 = vmul.f32 %v8133_v19, %v13740_v62  ;;  %v4247_v17 = vadd.f32 1.0, %v8135_v23  ;;  %v10819_v29 = vadd.f32 %v2464_v53, %v2264_v32  ;;  %13741 = vst [vmem:[#allocation69_spill] sm:$0xff] %v10825_v16  ;;  %v13746_v62 = vld [vmem:[#allocation89_spill] sm:$0xff] }
 0x2bc   :  { %v3523_v43 = vadd.f32 %v3459_v34, %v3322_v50  ;;  %v3324_v51 = vadd.f32 %v3260_v57, %v3124_v4  ;;  %v4248_v60 = vadd.f32 1.0, %v8137_v0  ;;  %8144 = vrcp.f32 %v1795_v61 }
 0x2bd   :  { %v3524_v25 = vadd.f32 %v3460_v35, %v3323_v39  ;;  %2130 = vst.msk [vmem:[#allocation2 + $0x2d0] sm:$0xff] %vm2020_vm4, %v1984_v28  ;;  %v10829_v42 = vadd.f32 %v10825_v16, %v13742_v7  ;;  %v10832_v19 = vmul.f32 %v10324_v54, %v2193_v46  ;;  %v10835_v34 = vmul.f32 %v10335_v10, %v2392_v6  ;;  %v13744_v39 = vld [vmem:[#allocation87_spill] sm:$0xff]  ;;  %v10848_v35 = vld [vmem:[#allocation2 + $0x291] sm:$0xff] }
 0x2be   :  { %v3461_v32 = vmul.f32 %v10354_v36, %v2193_v46  ;;  %v3659_v53 = vmul.f32 %v10385_v18, %v10773_v24  ;;  %v3661_v4 = vmul.f32 %v10385_v18, %v2392_v6  ;;  %v2861_v50 = vmul.f32 %v10324_v54, %v10799_v44 }
 0x2bf   :  { %13743 = vst [vmem:[#allocation86_spill] sm:$0xff] %v10829_v42  ;;  %v3660_v23 = vmul.f32 %v10385_v18, %v2391_v38  ;;  %v10846_v61 = vadd.f32 %v10825_v16, %v13744_v39  ;;  %8146 = vrcp.f32 %v4247_v17  ;;  %v10852_v28 = vadd.f32 %v10825_v16, %v13746_v62 }
 0x2c0   :  { %v8139_v0 = vpop.eup %8138  ;;  %v3723_v57 = vadd.f32 %v3659_v53, %v3523_v43  ;;  %v3525_v46 = vadd.f32 %v3461_v32, %v3324_v51  ;;  %8148 = vrcp.f32 %v4248_v60  ;;  %v10855_v11 = vmul.f32 -1.442695, %v10829_v42  ;;  %v13749_v43 = vld [vmem:[#allocation70_spill] sm:$0xff]  ;;  %v10867_v53 = vpop.f32.mrb[52].mxu1 }
 0x2c1   :  { %13745 = vst [vmem:[#allocation87_spill] sm:$0xff] %v10846_v61  ;;  %13747 = vst [vmem:[#allocation89_spill] sm:$0xff] %v10852_v28  ;;  %v8141_v6 = vpop.eup %8140  ;;  %v3724_v7 = vadd.f32 %v3660_v23, %v3524_v25  ;;  %v10859_v39 = vadd.f32 %v10825_v16, %v10608_v41  ;;  %v2262_v17 = vmul.f32 %v10249_v27, %v10730_v26  ;;  %8150 = vpow2.f32 %v10602_v40  ;;  %v10871_v25 = vld [vmem:[#allocation2 + $0x2a9] sm:$0xff] }
 0x2c2   :  { %v3859_v51 = vmul.f32 %v10417_v15, %v10795_v12  ;;  %v1989_v32 = vmul.f32 %v8141_v6, %v13749_v43  ;;  %v2462_v60 = vmul.f32 %v10258_v20, %v10773_v24  ;;  %v2925_v23 = vadd.f32 %v2861_v50, %v2725_v8  ;;  %v2194_v8 = vld [vmem:[#allocation2 + $0x2af] sm:$0xff] }
 0x2c3   :  { %13748 = vst [vmem:[#allocation101_spill] sm:$0xff] %v10859_v39  ;;  %v3860_v41 = vmul.f32 %v10417_v15, %v10848_v35  ;;  %8152 = vpow2.f32 %v10636_v14  ;;  %v4249_v26 = vadd.f32 1.0, %v8139_v0  ;;  %v3725_v62 = vadd.f32 %v3661_v4, %v3525_v46  ;;  %v10883_v50 = vld [vmem:[#allocation2 + $0x2b0] sm:$0xff] }
 0x2c4   :  { %v3923_v42 = vadd.f32 %v3859_v51, %v3723_v57  ;;  %2135 = vst.msk [vmem:[#allocation2 + $0x528] sm:$0xff] %vm2020_vm4, %v1989_v32  ;;  %8154 = vpow2.f32 %v10665_v49  ;;  %v8143_v40 = vpop.eup %8142  ;;  %v3061_v6 = vmul.f32 %v10335_v10, %v2391_v38  ;;  %v10881_v24 = vmul.f32 -1.442695, %v10846_v61  ;;  %v10899_v32 = vld [vmem:[#allocation2 + $0x2b1] sm:$0xff] }
 0x2c5   :  { %v3924_v43 = vadd.f32 %v3860_v41, %v3724_v7  ;;  %8156 = vpow2.f32 %v10687_v22  ;;  %v3861_v14 = vmul.f32 %v10417_v15, %v10871_v25  ;;  %v2263_v4 = vmul.f32 %v10249_v27, %v10799_v44  ;;  %v10894_v7 = vpop.f32.mrb[53].mxu1 }
 0x2c6   :  { %v2463_v49 = vmul.f32 %v10258_v20, %v2391_v38  ;;  %8158 = vpow2.f32 %v10710_v21  ;;  %v8145_v0 = vpop.eup %8144  ;;  %v2526_v57 = vadd.f32 %v2462_v60, %v2262_v17  ;;  %v2662_v22 = vmul.f32 %v10282_v31, %v10795_v12  ;;  %13750 = vst [vmem:[#allocation70_spill] sm:$0xff] %v10894_v7  ;;  %v10907_v21 = vld [vmem:[%s13453_s5] ss:$0 sm:$0xff] }
 0x2c7   :  { %v3125_v46 = vadd.f32 %v3061_v6, %v2925_v23  ;;  %8160 = vpow2.f32 %v10713_v5  ;;  %v10897_v51 = vmul.f32 %v8143_v40, %v10652_v48  ;;  %v3925_v27 = vadd.f32 %v3861_v14, %v3725_v62  ;;  %v10913_v5 = vld [vmem:[%s13453_s5 + $0x1] ss:$0 sm:$0xff]  ;;  %v13753_v23 = vld [vmem:[#allocation85_spill] sm:$0xff] }
 0x2c8   :  { %8162 = vrcp.f32 %v4249_v26  ;;  %v10902_v20 = vadd.f32 %v10478_v9, %v3923_v42  ;;  %v2265_v12 = vmul.f32 %v10907_v21, %v2194_v8  ;;  %v2465_v48 = vmul.f32 %v10913_v5, %v10883_v50 }
 0x2c9   :  { %13751 = vst [vmem:[#allocation102_spill] sm:$0xff] %v10897_v51  ;;  %v3261_v44 = vmul.f32 %v10363_v58, %v10848_v35  ;;  %v10920_v38 = vadd.f32 %v10478_v9, %v3924_v43  ;;  %v8147_v42 = vpop.eup %8146  ;;  %v2664_v17 = vmul.f32 %v10282_v31, %v10871_v25  ;;  %v2527_v60 = vadd.f32 %v2463_v49, %v2263_v4  ;;  %v10938_v4 = vld [vmem:[%s13453_s5 + $0x2] ss:$0 sm:$0xff] }
 0x2ca   :  { %v1987_v41 = vmul.f32 %v8145_v0, %v13753_v23  ;;  %v10926_v26 = vmul.f32 -1.442695, %v10852_v28  ;;  %v8149_v62 = vpop.eup %8148  ;;  %v2665_v40 = vmul.f32 %v10282_v31, %v10899_v32  ;;  %v2726_v6 = vadd.f32 %v2662_v22, %v2526_v57 }
 0x2cb   :  { %13752 = vst [vmem:[#allocation103_spill] sm:$0xff] %v10920_v38  ;;  %v3325_v14 = vadd.f32 %v3261_v44, %v3125_v46  ;;  %v10931_v61 = vmul.f32 -1.442695, %v10859_v39  ;;  %v8151_v43 = vpop.eup %8150  ;;  %v4519_v7 = vsel %vm2020_vm4, %v10897_v51, 0.0  ;;  %v2663_v49 = vmul.f32 %v10938_v4, %v10848_v35 }
 0x2cc   :  { %v10943_v0 = vadd.f32 %v10478_v9, %v3925_v27  ;;  %v6876_v31 = vmul.f32 -1.442695, %v10902_v20  ;;  %2133 = vst.msk [vmem:[#allocation2 + $0x508] sm:$0xff] %vm2020_vm4, %v1987_v41  ;;  %v10948_v22 = vmul.f32 %v8147_v42, %v10684_v1  ;;  %v2529_v46 = vadd.f32 %v2465_v48, %v2265_v12 }
 0x2cd   :  { %13754 = vst [vmem:[#allocation85_spill] sm:$0xff] %v10931_v61  ;;  %v8153_v57 = vpop.eup %8152  ;;  %v3462_v44 = vmul.f32 %v10354_v36, %v2194_v8  ;;  %v6877_v23 = vmul.f32 -1.442695, %v10920_v38  ;;  %v10953_v39 = vadd.f32 %v2664_v17, %v10819_v29  ;;  %v2863_v9 = vmul.f32 %v10324_v54, %v2194_v8 }
 0x2ce   :  { %13755 = vst [vmem:[#allocation104_spill] sm:$0xff] %v10943_v0  ;;  %13756 = vst [vmem:[#allocation105_spill] sm:$0xff] %v10948_v22  ;;  %v8155_v51 = vpop.eup %8154  ;;  %v3063_v35 = vmul.f32 %v10335_v10, %v10883_v50  ;;  %v2727_v27 = vadd.f32 %v2663_v49, %v2527_v60  ;;  %v4520_v28 = vadd.f32 %v4519_v7, %v10814_v55  ;;  %8164 = vpow2.f32 %v6876_v31  ;;  %v2195_v31 = vld [vmem:[#allocation2 + $0x2c7] sm:$0xff] }
 0x2cf   :  { %v8157_v41 = vpop.eup %8156  ;;  %v3262_v1 = vmul.f32 %v10363_v58, %v10871_v25  ;;  %v2926_v36 = vadd.f32 %v10832_v19, %v2726_v6  ;;  %v3526_v12 = vadd.f32 %v3462_v44, %v3325_v14  ;;  %v6878_v29 = vmul.f32 -1.442695, %v10943_v0  ;;  %v10970_v6 = vpop.f32.mrb[54].mxu1 }
 0x2d0   :  { %v8159_v48 = vpop.eup %8158  ;;  %v1798_v42 = vadd.f32 1.0, %v8151_v43  ;;  %v1796_v17 = vadd.f32 1.0, %v8153_v57  ;;  %v10964_v8 = vmul.f32 %v8149_v62, %v10703_v63  ;;  %v4521_v10 = vsel %vm2020_vm4, %v10948_v22, 0.0  ;;  %13758 = vst [vmem:[#allocation107_spill] sm:$0xff] %v10970_v6  ;;  %v2794_v62 = vld [vmem:[#allocation2 + $0x2e7] sm:$0xff] }
 0x2d1   :  { %v8161_v54 = vpop.eup %8160  ;;  %8166 = vpow2.f32 %v6877_v23  ;;  %v1801_v55 = vadd.f32 1.0, %v8155_v51  ;;  %v10968_v25 = vadd.f32 %v2665_v40, %v2529_v46  ;;  %v2927_v19 = vadd.f32 %v2863_v9, %v2727_v27  ;;  %v2994_v51 = vld [vmem:[#allocation2 + $0x2e8] sm:$0xff] }
 0x2d2   :  { %13757 = vst [vmem:[#allocation106_spill] sm:$0xff] %v10964_v8  ;;  %v8163_v7 = vpop.eup %8162  ;;  %8168 = vrcp.f32 %v1798_v42  ;;  %v1799_v60 = vadd.f32 1.0, %v8157_v41  ;;  %v3263_v14 = vmul.f32 %v10363_v58, %v10899_v32  ;;  %v3662_v63 = vmul.f32 %v10385_v18, %v10883_v50  ;;  %v2394_v23 = vld [vmem:[#allocation2 + $0x2c8] sm:$0xff] }
 0x2d3   :  { %8170 = vrcp.f32 %v1796_v17  ;;  %v1802_v43 = vadd.f32 1.0, %v8159_v48  ;;  %v4522_v49 = vadd.f32 %v4521_v10, %v4520_v28  ;;  %v3126_v40 = vadd.f32 %v10835_v34, %v2926_v36  ;;  %v10987_v28 = vld [vmem:[%s13453_s5 + $0x3] ss:$0 sm:$0xff] }
 0x2d4   :  { %8172 = vpow2.f32 %v6878_v29  ;;  %v1800_v57 = vadd.f32 1.0, %v8161_v54  ;;  %v10978_v46 = vmul.f32 %v8163_v7, %v10737_v52  ;;  %v4523_v44 = vsel %vm2020_vm4, %v10964_v8, 0.0  ;;  %v10995_v52 = vld [vmem:[%s13453_s5 + $0x4] ss:$0 sm:$0xff]  ;;  %v11011_v29 = vpop.f32.mrb[55].mxu1 }
 0x2d5   :  { %v3726_v58 = vadd.f32 %v3662_v63, %v3526_v12  ;;  %8174 = vrcp.f32 %v1801_v55  ;;  %v3862_v50 = vmul.f32 %v10417_v15, %v10899_v32  ;;  %v10990_v34 = vmul.f32 %v10987_v28, %v2794_v62  ;;  %v11003_v32 = vld [vmem:[%s13453_s5 + $0x6] ss:$0 sm:$0xff]  ;;  %13761 = vst [vmem:[#allocation110_spill] sm:$0xff] %v11011_v29  ;;  %v2795_v55 = vld [vmem:[#allocation2 + $0x2ef] sm:$0xff] }
 0x2d6   :  { %13759 = vst [vmem:[#allocation108_spill] sm:$0xff] %v10978_v46  ;;  %v3127_v9 = vadd.f32 %v3063_v35, %v2927_v19  ;;  %8176 = vrcp.f32 %v1799_v60  ;;  %v10998_v27 = vmul.f32 %v10995_v52, %v2994_v51  ;;  %13760 = vst [vmem:[#allocation109_spill] sm:$0xff] %v11003_v32  ;;  %v11006_v41 = vmul.f32 %v11003_v32, %v2794_v62  ;;  %v2995_v19 = vld [vmem:[#allocation2 + $0x2f0] sm:$0xff] }
 0x2d7   :  { %v2864_v36 = vmul.f32 %v10987_v28, %v2195_v31  ;;  %8178 = vrcp.f32 %v1802_v43  ;;  %v4524_v35 = vadd.f32 %v4523_v44, %v4522_v49  ;;  %v2266_v12 = vmul.f32 %v10907_v21, %v2195_v31  ;;  %v3194_v60 = vld [vmem:[#allocation2 + $0x2e9] sm:$0xff] }
 0x2d8   :  { %v2466_v48 = vmul.f32 %v10913_v5, %v2394_v23  ;;  %8180 = vrcp.f32 %v1800_v57  ;;  %v11013_v42 = vadd.f32 %v3862_v50, %v3726_v58  ;;  %v4525_v17 = vsel %vm2020_vm4, %v10978_v46, 0.0  ;;  %v8165_v7 = vpop.eup %8164  ;;  %v13765_v49 = vld [vmem:[#allocation96_spill] sm:$0xff]  ;;  %v11048_v50 = vld [vmem:[%s13453_s5 + $0x7] ss:$0 sm:$0xff] }
 0x2d9   :  { %v11018_v54 = vmul.f32 %v10385_v18, %v2994_v51  ;;  %v3326_v10 = vadd.f32 %v3262_v1, %v3126_v40  ;;  %v11020_v63 = vadd.f32 %v3263_v14, %v3127_v9  ;;  %v11024_v62 = vadd.f32 %v10825_v16, %v10647_v30  ;;  %v3195_v40 = vld [vmem:[#allocation2 + $0x2f1] sm:$0xff] }
 0x2da   :  { %13762 = vst [vmem:[#allocation111_spill] sm:$0xff] %v11013_v42  ;;  %v11028_v43 = vadd.f32 %v10825_v16, %v10693_v3  ;;  %v11032_v57 = vadd.f32 %v10825_v16, %v13765_v49  ;;  %v2928_v1 = vadd.f32 %v2864_v36, %v10953_v39  ;;  %v3064_v51 = vmul.f32 %v10995_v52, %v2394_v23 }
 0x2db   :  { %13763 = vst [vmem:[#allocation112_spill] sm:$0xff] %v11024_v62  ;;  %v8167_v18 = vpop.eup %8166  ;;  %v3463_v14 = vmul.f32 %v11003_v32, %v2195_v31  ;;  %v11039_v30 = vadd.f32 %v10825_v16, %v10747_v47  ;;  %v11041_v58 = vadd.f32 %v4525_v17, %v4524_v35  ;;  %v11043_v3 = vadd.f32 %v2466_v48, %v2266_v12  ;;  %v11060_v35 = vld [vmem:[%s13453_s5 + $0x5] ss:$0 sm:$0xff] }
 0x2dc   :  { %13764 = vst [vmem:[#allocation113_spill] sm:$0xff] %v11028_v43  ;;  %13766 = vst [vmem:[#allocation96_spill] sm:$0xff] %v11032_v57  ;;  %v8169_v44 = vpop.eup %8168  ;;  %v3663_v39 = vmul.f32 %v11048_v50, %v2394_v23  ;;  %v11052_v9 = vmul.f32 %v10987_v28, %v2795_v55  ;;  %v11055_v47 = vmul.f32 %v10995_v52, %v2995_v19  ;;  %v13770_v48 = vld [vmem:[#allocation71_spill] sm:$0xff]  ;;  %v4250_v23 = vadd.f32 1.0, %v8165_v7 }
 0x2dd   :  { %13767 = vst [vmem:[#allocation114_spill] sm:$0xff] %v11039_v30  ;;  %13768 = vst [vmem:[#allocation115_spill] sm:$0xff] %v11041_v58  ;;  %v8171_v31 = vpop.eup %8170  ;;  %v3527_v36 = vadd.f32 %v3463_v14, %v3326_v10  ;;  %v11063_v12 = vmul.f32 %v11060_v35, %v3194_v60  ;;  %v1990_v17 = vmul.f32 %v8169_v44, %v13770_v48  ;;  %v13773_v14 = vld [vmem:[#allocation93_spill] sm:$0xff]  ;;  %v4251_v0 = vadd.f32 1.0, %v8167_v18  ;;  %v2199_v44 = vld [vmem:[#allocation2 + $0x507] sm:$0xff] }
 0x2de   :  { %v8173_v49 = vpop.eup %8172  ;;  %v11067_v46 = vmul.f32 %v11060_v35, %v3195_v40  ;;  %v11070_v10 = vmul.f32 %v11003_v32, %v2795_v55  ;;  %v1988_v8 = vmul.f32 %v8171_v31, %v13773_v14  ;;  %v3128_v58 = vadd.f32 %v3064_v51, %v2928_v1  ;;  %v11083_v55 = vld [vmem:[%s13453_s5 + $0x8] ss:$0 sm:$0xff]  ;;  %v2196_v18 = vld [vmem:[#allocation2 + $0x2cf] sm:$0xff] }
 0x2df   :  { %13769 = vst [vmem:[#allocation116_spill] sm:$0xff] %v11063_v12  ;;  %v8175_v22 = vpop.eup %8174  ;;  %v11074_v38 = vmul.f32 %v11048_v50, %v2995_v19  ;;  %v11077_v42 = vmul.f32 %v10417_v15, %v3194_v60  ;;  %2136 = vst.msk [vmem:[#allocation2 + $0x530] sm:$0xff] %vm2020_vm4, %v1990_v17  ;;  %v11086_v31 = vmul.f32 %v11083_v55, %v3195_v40  ;;  %v13777_v19 = vld [vmem:[#allocation74_spill] sm:$0xff]  ;;  %8182 = vpow2.f32 %v10759_v2  ;;  %v2395_v17 = vld [vmem:[#allocation2 + $0x2d0] sm:$0xff] }
 0x2e0   :  { %13771 = vst [vmem:[#allocation71_spill] sm:$0xff] %v11067_v46  ;;  %13772 = vst [vmem:[#allocation117_spill] sm:$0xff] %v11070_v10  ;;  %v8177_v7 = vpop.eup %8176  ;;  %v1993_v1 = vmul.f32 %v8175_v22, %v13777_v19  ;;  %v11092_v15 = vmul.f32 -1.442695, %v11024_v62  ;;  %v4252_v51 = vadd.f32 1.0, %v8173_v49  ;;  %v3727_v48 = vadd.f32 %v3663_v39, %v3527_v36  ;;  %v2594_v14 = vld [vmem:[#allocation2 + $0x2c9] sm:$0xff] }
 0x2e1   :  { %13774 = vst [vmem:[#allocation93_spill] sm:$0xff] %v11074_v38  ;;  %13775 = vst [vmem:[#allocation118_spill] sm:$0xff] %v11077_v42  ;;  %v8179_v60 = vpop.eup %8178  ;;  %v13779_v42 = vld [vmem:[#allocation75_spill] sm:$0xff]  ;;  %v11096_v40 = vmul.f32 -1.442695, %v11028_v43  ;;  %8184 = vrcp.f32 %v4250_v23  ;;  %v2868_v22 = vmul.f32 %v10987_v28, %v2199_v44  ;;  %v13781_v2 = vld [vmem:[#allocation77_spill] sm:$0xff] }
 0x2e2   :  { %13776 = vst [vmem:[#allocation119_spill] sm:$0xff] %v11086_v31  ;;  %2134 = vst.msk [vmem:[#allocation2 + $0x510] sm:$0xff] %vm2020_vm4, %v1988_v8  ;;  %v1991_v38 = vmul.f32 %v8177_v7, %v13779_v42  ;;  %v8181_v31 = vpop.eup %8180  ;;  %v2398_v8 = vld [vmem:[#allocation2 + $0x508] sm:$0xff]  ;;  %v1994_v19 = vmul.f32 %v8179_v60, %v13781_v2  ;;  %v11102_v62 = vmul.f32 -1.442695, %v11032_v57  ;;  %v11104_v39 = vpop.f32.mrb[56].mxu1  ;;  %8186 = vrcp.f32 %v4251_v0 }
 0x2e3   :  { %13778 = vst [vmem:[#allocation74_spill] sm:$0xff] %v11092_v15  ;;  %13780 = vst [vmem:[#allocation75_spill] sm:$0xff] %v11096_v40  ;;  %v2267_v42 = vmul.f32 %v10907_v21, %v2196_v18  ;;  %v13784_v36 = vld [vmem:[#allocation79_spill] sm:$0xff]  ;;  %v11110_v23 = vmul.f32 -1.442695, %v11039_v30  ;;  %v2467_v7 = vmul.f32 %v10913_v5, %v2395_v17  ;;  %v2666_v60 = vmul.f32 %v10938_v4, %v2594_v14  ;;  %v13786_v43 = vld [vmem:[#allocation94_spill] sm:$0xff] }
 0x2e4   :  { %2139 = vst.msk [vmem:[#allocation2 + $0x568] sm:$0xff] %vm2020_vm4, %v1993_v1  ;;  %13782 = vst [vmem:[#allocation77_spill] sm:$0xff] %v11102_v62  ;;  %v1992_v49 = vmul.f32 %v8181_v31, %v13784_v36  ;;  %v2595_v1 = vld [vmem:[#allocation2 + $0x2d1] sm:$0xff]  ;;  %v3464_v2 = vmul.f32 %v11003_v32, %v2196_v18  ;;  %v3863_v57 = vmul.f32 %v11083_v55, %v2594_v14  ;;  %8188 = vrcp.f32 %v4252_v51 }
 0x2e5   :  { %13783 = vst [vmem:[#allocation120_spill] sm:$0xff] %v11104_v39  ;;  %2137 = vst.msk [vmem:[#allocation2 + $0x548] sm:$0xff] %vm2020_vm4, %v1991_v38  ;;  %v2865_v0 = vmul.f32 %v10987_v28, %v2196_v18  ;;  %v2270_v38 = vmul.f32 %v10907_v21, %v2199_v44  ;;  %v2470_v31 = vmul.f32 %v10913_v5, %v2398_v8  ;;  %8190 = vpow2.f32 %v10802_v59 }
 0x2e6   :  { %13785 = vst [vmem:[#allocation79_spill] sm:$0xff] %v11110_v23  ;;  %2140 = vst.msk [vmem:[#allocation2 + $0x570] sm:$0xff] %vm2020_vm4, %v1994_v19  ;;  %v3528_v36 = vadd.f32 %v3464_v2, %v11020_v63  ;;  %v3927_v30 = vadd.f32 %v3863_v57, %v3727_v48  ;;  %v2932_v46 = vadd.f32 %v2868_v22, %v13786_v43  ;;  %v11137_v63 = vpop.f32.mrb[57].mxu1  ;;  %v2400_v48 = vld [vmem:[#allocation2 + $0x528] sm:$0xff]  ;;  %8192 = vpow2.f32 %v10805_v33 }
 0x2e7   :  { %2138 = vst.msk [vmem:[#allocation2 + $0x550] sm:$0xff] %vm2020_vm4, %v1992_v49  ;;  %v11125_v23 = vadd.f32 %v10825_v16, %v10867_v53  ;;  %v11128_v19 = vmul.f32 %v10938_v4, %v2595_v1  ;;  %v11131_v18 = vmul.f32 %v10995_v52, %v2395_v17  ;;  %v3264_v44 = vmul.f32 %v11060_v35, %v2594_v14  ;;  %v2201_v49 = vld [vmem:[#allocation2 + $0x527] sm:$0xff] }
 0x2e8   :  { %v11135_v51 = vmul.f32 %v11060_v35, %v2595_v1  ;;  %13788 = vst [vmem:[#allocation121_spill] sm:$0xff] %v11137_v63  ;;  %v11139_v57 = vadd.f32 %v2467_v7, %v2267_v42  ;;  %v11142_v43 = vadd.f32 %v2666_v60, %v11043_v3  ;;  %v3664_v53 = vmul.f32 %v11048_v50, %v2395_v17  ;;  %v11155_v3 = vld [vmem:[%s13454_s6] ss:$0 sm:$0xff] }
 0x2e9   :  { %13787 = vst [vmem:[#allocation94_spill] sm:$0xff] %v11125_v23  ;;  %v3068_v22 = vmul.f32 %v10995_v52, %v2398_v8  ;;  %v2200_v2 = vld [vmem:[#allocation2 + $0x50f] sm:$0xff]  ;;  %v11147_v14 = vadd.f32 %v2865_v0, %v10968_v25  ;;  %v11149_v39 = vadd.f32 %v3264_v44, %v3128_v58  ;;  %v3864_v29 = vmul.f32 %v11083_v55, %v2595_v1  ;;  %v8183_v7 = vpop.eup %8182 }
 0x2ea   :  { %v2598_v12 = vld [vmem:[#allocation2 + $0x509] sm:$0xff]  ;;  %v2534_v63 = vadd.f32 %v2470_v31, %v2270_v38  ;;  %v3728_v62 = vadd.f32 %v3664_v53, %v3528_v36  ;;  %v11158_v17 = vadd.f32 %v11155_v3, %v3927_v30  ;;  %v2272_v8 = vmul.f32 %v10907_v21, %v2201_v49  ;;  %v2599_v44 = vld [vmem:[#allocation2 + $0x511] sm:$0xff] }
 0x2eb   :  { %v2399_v42 = vld [vmem:[#allocation2 + $0x510] sm:$0xff]  ;;  %v3132_v25 = vadd.f32 %v3068_v22, %v2932_v46  ;;  %v2472_v58 = vmul.f32 %v10913_v5, %v2400_v48  ;;  %v2870_v60 = vmul.f32 %v10987_v28, %v2201_v49  ;;  %v2670_v1 = vmul.f32 %v10938_v4, %v2598_v12  ;;  %v8185_v38 = vpop.eup %8184 }
 0x2ec   :  { %13789 = vst [vmem:[#allocation122_spill] sm:$0xff] %v11158_v17  ;;  %v2869_v0 = vmul.f32 %v10987_v28, %v2200_v2  ;;  %v2271_v31 = vmul.f32 %v10907_v21, %v2200_v2  ;;  %v2471_v36 = vmul.f32 %v10913_v5, %v2399_v42  ;;  %v3268_v30 = vmul.f32 %v11060_v35, %v2598_v12  ;;  %v11169_v53 = vpop.eup %8186  ;;  %v2600_v46 = vld [vmem:[#allocation2 + $0x529] sm:$0xff] }
 0x2ed   :  { %13790 = vst [vmem:[#allocation123_spill] sm:$0xff] %v11169_v53  ;;  %v2734_v22 = vadd.f32 %v2670_v1, %v2534_v63  ;;  %v3069_v40 = vmul.f32 %v10995_v52, %v2399_v42  ;;  %v1805_v16 = vadd.f32 1.0, %v8183_v7  ;;  %v3928_v23 = vadd.f32 %v3864_v29, %v3728_v62  ;;  %v2202_v2 = vld [vmem:[#allocation2 + $0x52f] sm:$0xff]  ;;  %v11179_v1 = vld [vmem:[#allocation2 + $0x547] sm:$0xff] }
 0x2ee   :  { %v2933_v6 = vadd.f32 %v2869_v0, %v10732_v13  ;;  %v6880_v15 = vmul.f32 -1.442695, %v11158_v17  ;;  %v3332_v61 = vadd.f32 %v3268_v30, %v3132_v25  ;;  %v11175_v10 = vpop.eup %8188  ;;  %v3070_v59 = vmul.f32 %v10995_v52, %v2400_v48  ;;  %v2401_v29 = vld [vmem:[#allocation2 + $0x530] sm:$0xff] }
 0x2ef   :  { %13791 = vst [vmem:[#allocation124_spill] sm:$0xff] %v11175_v10  ;;  %v2934_v12 = vadd.f32 %v2870_v60, %v2734_v22  ;;  %v3269_v63 = vmul.f32 %v11060_v35, %v2599_v44  ;;  %v2536_v13 = vadd.f32 %v2472_v58, %v2272_v8  ;;  %v3469_v42 = vmul.f32 %v11003_v32, %v2201_v49  ;;  %v11188_v8 = vpop.f32.mrb[58].mxu1  ;;  %v2601_v58 = vld [vmem:[#allocation2 + $0x531] sm:$0xff] }
 0x2f0   :  { %v3133_v53 = vadd.f32 %v3069_v40, %v2933_v6  ;;  %v2672_v62 = vmul.f32 %v10938_v4, %v2600_v46  ;;  %v2535_v7 = vadd.f32 %v2471_v36, %v2271_v31  ;;  %v2273_v25 = vmul.f32 %v10907_v21, %v2202_v2 }
 0x2f1   :  { %v3470_v33 = vmul.f32 %v11003_v32, %v2202_v2  ;;  %8194 = vrcp.f32 %v1805_v16  ;;  %v2671_v60 = vmul.f32 %v10938_v4, %v2599_v44  ;;  %v3533_v6 = vadd.f32 %v3469_v42, %v3332_v61  ;;  %v8191_v42 = vpop.eup %8190 }
 0x2f2   :  { %v3333_v0 = vadd.f32 %v3269_v63, %v3133_v53  ;;  %v2872_v40 = vmul.f32 %v10987_v28, %v11179_v1  ;;  %v3134_v30 = vadd.f32 %v3070_v59, %v2934_v12  ;;  %v2473_v49 = vmul.f32 %v10913_v5, %v2401_v29  ;;  %v11197_v59 = vld [vmem:[#allocation2 + $0x548] sm:$0xff] }
 0x2f3   :  { %v3270_v31 = vmul.f32 %v11060_v35, %v2600_v46  ;;  %v3670_v36 = vmul.f32 %v11048_v50, %v2401_v29  ;;  %8196 = vpow2.f32 %v6880_v15  ;;  %v3669_v16 = vmul.f32 %v11048_v50, %v2400_v48 }
 0x2f4   :  { %v3534_v22 = vadd.f32 %v3470_v33, %v3333_v0  ;;  %v2736_v53 = vadd.f32 %v2672_v62, %v2536_v13  ;;  %v2735_v44 = vadd.f32 %v2671_v60, %v2535_v7  ;;  %v11195_v61 = vadd.f32 %v11155_v3, %v3928_v23  ;;  %v8193_v62 = vpop.eup %8192  ;;  %v11211_v60 = vld [vmem:[#allocation2 + $0x54f] sm:$0xff] }
 0x2f5   :  { %v3334_v12 = vadd.f32 %v3270_v31, %v3134_v30  ;;  %8198 = vpow2.f32 %v10812_v56  ;;  %v2871_v17 = vmul.f32 %v10987_v28, %v2202_v2  ;;  %v3870_v10 = vmul.f32 %v11083_v55, %v2601_v58 }
 0x2f6   :  { %13792 = vst [vmem:[#allocation125_spill] sm:$0xff] %v11195_v61  ;;  %v3734_v63 = vadd.f32 %v3670_v36, %v3534_v22  ;;  %v3733_v33 = vadd.f32 %v3669_v16, %v3533_v6  ;;  %v2936_v15 = vadd.f32 %v2872_v40, %v2736_v53  ;;  %v11203_v48 = vmul.f32 %v8185_v38, %v10902_v20  ;;  %v11231_v53 = vld [vmem:[#allocation2 + $0x56f] sm:$0xff] }
 0x2f7   :  { %v2537_v13 = vadd.f32 %v2473_v49, %v2273_v25  ;;  %v3471_v23 = vmul.f32 %v11003_v32, %v11179_v1  ;;  %8200 = vpow2.f32 %v10855_v11  ;;  %v3869_v7 = vmul.f32 %v11083_v55, %v2600_v46  ;;  %v11215_v25 = vld [vmem:[#allocation2 + $0x549] sm:$0xff] }
 0x2f8   :  { %13793 = vst [vmem:[#allocation126_spill] sm:$0xff] %v11203_v48  ;;  %v2935_v56 = vadd.f32 %v2871_v17, %v2735_v44  ;;  %v3934_v0 = vadd.f32 %v3870_v10, %v3734_v63  ;;  %v3072_v2 = vmul.f32 %v10995_v52, %v11197_v59  ;;  %v6881_v6 = vmul.f32 -1.442695, %v11195_v61  ;;  %v11219_v46 = vld [vmem:[#allocation2 + $0x567] sm:$0xff]  ;;  %v11221_v17 = vld [vmem:[#allocation2 + $0x550] sm:$0xff] }
 0x2f9   :  { %v2673_v20 = vmul.f32 %v10938_v4, %v2601_v58  ;;  %v3535_v38 = vadd.f32 %v3471_v23, %v3334_v12  ;;  %8202 = vpow2.f32 %v10881_v24  ;;  %v3071_v11 = vmul.f32 %v10995_v52, %v2401_v29  ;;  %v11233_v44 = vld [vmem:[#allocation2 + $0x551] sm:$0xff] }
 0x2fa   :  { %v3933_v40 = vadd.f32 %v3869_v7, %v3733_v33  ;;  %v3136_v10 = vadd.f32 %v3072_v2, %v2936_v15  ;;  %v1803_v30 = vadd.f32 1.0, %v8191_v42  ;;  %v3671_v36 = vmul.f32 %v11048_v50, %v11197_v59 }
 0x2fb   :  { %v8195_v49 = vpop.eup %8194  ;;  %v2737_v31 = vadd.f32 %v2673_v20, %v2537_v13  ;;  %v2873_v22 = vmul.f32 %v10987_v28, %v11211_v60  ;;  %v1806_v16 = vadd.f32 1.0, %v8193_v62  ;;  %v3271_v24 = vmul.f32 %v11060_v35, %v2601_v58 }
 0x2fc   :  { %v11229_v29 = vadd.f32 %v11155_v3, %v3934_v0  ;;  %v3135_v63 = vadd.f32 %v3071_v11, %v2935_v56  ;;  %v3272_v12 = vmul.f32 %v11060_v35, %v11215_v25  ;;  %v3473_v42 = vmul.f32 %v11003_v32, %v11219_v46 }
 0x2fd   :  { %v3735_v33 = vadd.f32 %v3671_v36, %v3535_v38  ;;  %v2937_v15 = vadd.f32 %v2873_v22, %v2737_v31  ;;  %v3073_v13 = vmul.f32 %v10995_v52, %v11221_v17  ;;  %v11241_v58 = vpop.eup %8196  ;;  %v11244_v23 = vadd.f32 %v11155_v3, %v3933_v40  ;;  %v11255_v40 = vld [vmem:[#allocation2 + $0x568] sm:$0xff] }
 0x2fe   :  { %13794 = vst [vmem:[#allocation127_spill] sm:$0xff] %v11229_v29  ;;  %v3335_v62 = vadd.f32 %v3271_v24, %v3135_v63  ;;  %v3336_v7 = vadd.f32 %v3272_v12, %v3136_v10  ;;  %v3472_v56 = vmul.f32 %v11003_v32, %v11211_v60  ;;  %v3474_v2 = vmul.f32 %v11003_v32, %v11231_v53 }
 0x2ff   :  { %v8199_v0 = vpop.eup %8198  ;;  %v3137_v20 = vadd.f32 %v3073_v13, %v2937_v15  ;;  %v3273_v38 = vmul.f32 %v11060_v35, %v11233_v44  ;;  %v3871_v11 = vmul.f32 %v11083_v55, %v11215_v25  ;;  %v6887_v31 = vmul.f32 -1.442695, %v11229_v29 }
 0x300   :  { %v3536_v36 = vadd.f32 %v3472_v56, %v3335_v62  ;;  %v3672_v10 = vmul.f32 %v11048_v50, %v11221_v17  ;;  %v1997_v22 = vmul.f32 %v8195_v49, %v10691_v37  ;;  %v3537_v12 = vadd.f32 %v3473_v42, %v3336_v7  ;;  %v11268_v42 = vld [vmem:[#allocation2 + $0x570] sm:$0xff] }
 0x301   :  { %v8201_v24 = vpop.eup %8200  ;;  %v3337_v63 = vadd.f32 %v3273_v38, %v3137_v20  ;;  %v3935_v15 = vadd.f32 %v3871_v11, %v3735_v33  ;;  %8204 = vrcp.f32 %v1803_v30  ;;  %v3872_v61 = vmul.f32 %v11083_v55, %v11233_v44  ;;  %v11270_v30 = vld [vmem:[#allocation2 + $0x569] sm:$0xff] }
 0x302   :  { %v3736_v13 = vadd.f32 %v3672_v10, %v3536_v36  ;;  %2143 = vst.msk [vmem:[#allocation2 + $0x5a8] sm:$0xff] %vm2020_vm4, %v1997_v22  ;;  %8206 = vrcp.f32 %v1806_v16  ;;  %v1804_v29 = vadd.f32 1.0, %v8199_v0  ;;  %v2731_v62 = vadd.f32 %v11128_v19, %v11139_v57  ;;  %v11272_v16 = vpop.f32.mrb[59].mxu1 }
 0x303   :  { %v8203_v32 = vpop.eup %8202  ;;  %8208 = vpow2.f32 %v6881_v6  ;;  %v6886_v37 = vmul.f32 -1.442695, %v11244_v23  ;;  %v3673_v49 = vmul.f32 %v11048_v50, %v11255_v40  ;;  %v3538_v33 = vadd.f32 %v3474_v2, %v3337_v63 }
 0x304   :  { %v3936_v7 = vadd.f32 %v3872_v61, %v3736_v13  ;;  %8210 = vrcp.f32 %v1804_v29  ;;  %v1809_v56 = vadd.f32 1.0, %v8201_v24  ;;  %v2930_v0 = vadd.f32 %v10990_v34, %v11142_v43  ;;  %v11287_v34 = vld [vmem:[#allocation2 + $0x571] sm:$0xff]  ;;  %v11320_v13 = vpop.f32.mrb[60].mxu1 }
 0x305   :  { %8212 = vpow2.f32 %v6887_v31  ;;  %v3737_v19 = vadd.f32 %v3673_v49, %v3537_v12  ;;  %v11277_v57 = vadd.f32 %v11155_v3, %v3935_v15  ;;  %v3129_v6 = vadd.f32 %v11131_v18, %v11147_v14  ;;  %v7663_v15 = vld [vmem:[%s13455_s7] sm:$0xff]  }
 0x306   :  { %v3674_v20 = vmul.f32 %v11048_v50, %v11268_v42  ;;  %8214 = vrcp.f32 %v1809_v56  ;;  %v1807_v61 = vadd.f32 1.0, %v8203_v32  ;;  %v2274_v29 = vmul.f32 %v10907_v21, %v11179_v1  ;;  %7469 = vmatpush3.bf16.msra.mxu1 %v7663_v15 }
 0x307   :  { %v2474_v2 = vmul.f32 %v10913_v5, %v11197_v59  ;;  %v3873_v43 = vmul.f32 %v11083_v55, %v11270_v30  ;;  %v11292_v38 = vadd.f32 %v11155_v3, %v3936_v7  ;;  %8216 = vpow2.f32 %v6886_v37  ;;  %v13796_v37 = vld [vmem:[#allocation100_spill] sm:$0xff]  ;;  %v13797_v7 = vld [vmem:[#allocation117_spill] sm:$0xff] }
 0x308   :  { %v2275_v18 = vmul.f32 %v10907_v21, %v11211_v60  ;;  %v2475_v32 = vmul.f32 %v10913_v5, %v11221_v17  ;;  %v3738_v14 = vadd.f32 %v3674_v20, %v3538_v33  ;;  %v3529_v1 = vadd.f32 %v11006_v41, %v11149_v39 }
 0x309   :  { %v3937_v59 = vadd.f32 %v3873_v43, %v3737_v19  ;;  %v6888_v11 = vmul.f32 -1.442695, %v11277_v57  ;;  %8218 = vrcp.f32 %v1807_v61  ;;  %v11303_v31 = vsel %vm2020_vm4, %v11203_v48, 0.0  ;;  %v13800_v61 = vld [vmem:[#allocation74_spill] sm:$0xff]  ;;  %v13803_v43 = vld [vmem:[#allocation69_spill] sm:$0xff] }
 0x30a   :  { %13795 = vst [vmem:[#allocation128_spill] sm:$0xff] %v11303_v31  ;;  %v2931_v36 = vadd.f32 %v11052_v9, %v2731_v62  ;;  %v3329_v10 = vadd.f32 %v11135_v51, %v3129_v6  ;;  %v3874_v60 = vmul.f32 %v11083_v55, %v11287_v34  ;;  %v11310_v22 = vadd.f32 %v10998_v27, %v2930_v0  ;;  %v13799_v6 = vld [vmem:[#allocation68_spill] sm:$0xff] }
 0x30b   :  { %v8205_v17 = vpop.eup %8204  ;;  %v2538_v41 = vadd.f32 %v2474_v2, %v2274_v29  ;;  %v6889_v39 = vmul.f32 -1.442695, %v11292_v38  ;;  %8220 = vpow2.f32 %v10926_v26  ;;  %v2539_v63 = vadd.f32 %v2475_v32, %v2275_v18  ;;  %v13802_v2 = vld [vmem:[#allocation70_spill] sm:$0xff] }
 0x30c   :  { %v8207_v24 = vpop.eup %8206  ;;  %v2674_v12 = vmul.f32 %v10938_v4, %v11215_v25  ;;  %v3938_v9 = vadd.f32 %v3874_v60, %v3738_v14  ;;  %v1995_v51 = vmul.f32 %v8205_v17, %v10766_v45  ;;  %v11323_v62 = vadd.f32 %v11018_v54, %v3529_v1  ;;  %v11329_v25 = vpop.f32.mrb[61].mxu1  ;;  %v13798_v54 = vld [vmem:[#allocation85_spill] sm:$0xff]  ;;  %v13808_v17 = vld [vmem:[#allocation107_spill] sm:$0xff] }
 0x30d   :  { %v8209_v27 = vpop.eup %8208  ;;  %v11326_v26 = vadd.f32 %v11155_v3, %v3937_v59  ;;  %8222 = vpow2.f32 %v6888_v11  ;;  %v1998_v49 = vmul.f32 %v8207_v24, %v13796_v37  ;;  %v11332_v45 = vadd.f32 %v11055_v47, %v2931_v36  ;;  %v13801_v47 = vld [vmem:[#allocation94_spill] sm:$0xff]  ;;  %v13806_v11 = vld [vmem:[#allocation75_spill] sm:$0xff] }
 0x30e   :  { %v8211_v33 = vpop.eup %8210  ;;  %v11335_v56 = vadd.f32 %v13797_v7, %v3329_v10  ;;  %v2675_v0 = vmul.f32 %v10938_v4, %v11233_v44  ;;  %2141 = vst.msk [vmem:[#allocation2 + $0x588] sm:$0xff] %vm2020_vm4, %v1995_v51  ;;  %8224 = vpow2.f32 %v13798_v54  ;;  %v11345_v29 = vmul.f32 -1.442695, %v13801_v47  ;;  %v13807_v10 = vld [vmem:[#allocation86_spill] sm:$0xff]  ;;  %v11363_v51 = vpop.f32.mrb[62].mxu1 }
 0x30f   :  { %v8213_v19 = vpop.eup %8212  ;;  %2144 = vst.msk [vmem:[#allocation2 + $0x5b0] sm:$0xff] %vm2020_vm4, %v1998_v49  ;;  %v1996_v20 = vmul.f32 %v8211_v33, %v13799_v6  ;;  %8226 = vpow2.f32 %v13800_v61  ;;  %v11349_v18 = vadd.f32 %v13803_v43, %v13802_v2  ;;  %v13805_v44 = vmov 0.0   ;;  %v13811_v6 = vld [vmem:[#allocation87_spill] sm:$0xff] }
 0x310   :  { %7470 = vmatprep.subr.bf16.mxu1 %v13805_v44  ;;  %v8215_v32 = vpop.eup %8214  ;;  %v2738_v14 = vadd.f32 %v2674_v12, %v2538_v41  ;;  %v2739_v1 = vadd.f32 %v2675_v0, %v2539_v63  ;;  %v11353_v59 = vadd.f32 %v11155_v3, %v3938_v9  ;;  %8228 = vpow2.f32 %v13806_v11  ;;  %v13810_v9 = vld [vmem:[#allocation77_spill] sm:$0xff]  ;;  %v11389_v11 = vpop.f32.mrb[63].mxu1 }
 0x311   :  { %13804 = vst [vmem:[#allocation100_spill] sm:$0xff] %v11349_v18  ;;  %8230 = vpow2.f32 %v6889_v39  ;;  %v6890_v36 = vmul.f32 -1.442695, %v11326_v26  ;;  %2142 = vst.msk [vmem:[#allocation2 + $0x590] sm:$0xff] %vm2020_vm4, %v1996_v20  ;;  %v2001_v60 = vmul.f32 %v8215_v32, %v13807_v10  ;;  %v11361_v24 = vadd.f32 %v13803_v43, %v13808_v17  ;;  %v8217_v41 = vpop.eup %8216  ;;  %v13812_v32 = vld [vmem:[#allocation110_spill] sm:$0xff] }
 0x312   :  { %v2276_v63 = vmul.f32 %v10907_v21, %v11219_v46  ;;  %v2874_v12 = vmul.f32 %v10987_v28, %v11219_v46  ;;  %v2875_v39 = vmul.f32 %v10987_v28, %v11231_v53  ;;  %8232 = vpow2.f32 %v13810_v9 }
 0x313   :  { %13809 = vst [vmem:[#allocation117_spill] sm:$0xff] %v11361_v24  ;;  %v8219_v15 = vpop.eup %8218  ;;  %v4261_v37 = vadd.f32 1.0, %v8213_v19  ;;  %v2476_v49 = vmul.f32 %v10913_v5, %v11255_v40  ;;  %v2277_v33 = vmul.f32 %v10907_v21, %v11231_v53  ;;  %v2477_v7 = vmul.f32 %v10913_v5, %v11268_v42  ;;  %2147 = vst.msk [vmem:[#allocation2 + $0x5e8] sm:$0xff] %vm2020_vm4, %v2001_v60 }
 0x314   :  { %v2938_v0 = vadd.f32 %v2874_v12, %v2738_v14  ;;  %v2939_v46 = vadd.f32 %v2875_v39, %v2739_v1  ;;  %v6891_v54 = vmul.f32 -1.442695, %v11353_v59  ;;  %v1999_v20 = vmul.f32 %v8219_v15, %v13811_v6  ;;  %v13814_v12 = vld [vmem:[#allocation120_spill] sm:$0xff] }
 0x315   :  { %v8221_v61 = vpop.eup %8220  ;;  %v4254_v19 = vadd.f32 1.0, %v11241_v58  ;;  %8234 = vpow2.f32 %v6890_v36  ;;  %v11383_v2 = vmul.f32 -1.442695, %v11349_v18  ;;  %v11387_v53 = vadd.f32 %v13803_v43, %v13812_v32 }
 0x316   :  { %v4255_v10 = vadd.f32 1.0, %v8209_v27  ;;  %v4260_v14 = vadd.f32 1.0, %v8217_v41  ;;  %v3074_v1 = vmul.f32 %v10995_v52, %v11255_v40  ;;  %v3075_v60 = vmul.f32 %v10995_v52, %v11268_v42  ;;  %2145 = vst.msk [vmem:[#allocation2 + $0x5c8] sm:$0xff] %vm2020_vm4, %v1999_v20 }
 0x317   :  { %13813 = vst [vmem:[#allocation85_spill] sm:$0xff] %v11387_v53  ;;  %v8223_v58 = vpop.eup %8222  ;;  %8236 = vrcp.f32 %v4261_v37  ;;  %v2540_v36 = vadd.f32 %v2476_v49, %v2276_v63  ;;  %v2676_v17 = vmul.f32 %v10938_v4, %v11270_v30  ;;  %v11400_v39 = vadd.f32 %v13803_v43, %v13814_v12 }
 0x318   :  { %v8225_v27 = vpop.eup %8224  ;;  %v2541_v41 = vadd.f32 %v2477_v7, %v2277_v33  ;;  %8238 = vpow2.f32 %v6891_v54  ;;  %v3138_v9 = vadd.f32 %v3074_v1, %v2938_v0  ;;  %v3139_v40 = vadd.f32 %v3075_v60, %v2939_v46  ;;  %v2209_v0 = vld [vmem:[#allocation2 + $0x5a7] sm:$0xff] }
 0x319   :  { %13815 = vst [vmem:[#allocation68_spill] sm:$0xff] %v11400_v39  ;;  %v8227_v15 = vpop.eup %8226  ;;  %8240 = vrcp.f32 %v4254_v19  ;;  %v2677_v42 = vmul.f32 %v10938_v4, %v11287_v34  ;;  %v11405_v37 = vmul.f32 -1.442695, %v11361_v24  ;;  %v11408_v63 = vmul.f32 -1.442695, %v11387_v53  ;;  %v2408_v46 = vld [vmem:[#allocation2 + $0x5a8] sm:$0xff] }
 0x31a   :  { %v8229_v49 = vpop.eup %8228  ;;  %8242 = vrcp.f32 %v4260_v14  ;;  %v3274_v43 = vmul.f32 %v11060_v35, %v11270_v30  ;;  %v3275_v33 = vmul.f32 %v11060_v35, %v11287_v34  ;;  %v4262_v7 = vadd.f32 1.0, %v8223_v58  ;;  %v2207_v60 = vld [vmem:[#allocation2 + $0x587] sm:$0xff]  ;;  %v11421_v58 = vld [vmem:[#allocation2 + $0x58f] sm:$0xff] }
 0x31b   :  { %v8231_v54 = vpop.eup %8230  ;;  %8244 = vrcp.f32 %v4255_v10  ;;  %v2740_v6 = vadd.f32 %v2676_v17, %v2540_v36  ;;  %v1810_v20 = vadd.f32 1.0, %v8221_v61  ;;  %v11415_v19 = vmul.f32 -1.442695, %v11400_v39  ;;  %v11429_v17 = vld [vmem:[%s13452_s4] ss:$0 sm:$0xff] }
 0x31c   :  { %v8233_v32 = vpop.eup %8232  ;;  %v2741_v1 = vadd.f32 %v2677_v42, %v2541_v41  ;;  %v3338_v14 = vadd.f32 %v3274_v43, %v3138_v9  ;;  %v11417_v12 = vadd.f32 %v3275_v33, %v3139_v40  ;;  %v1808_v30 = vadd.f32 1.0, %v8225_v27  ;;  %v13817_v41 = vld [vmem:[#allocation121_spill] sm:$0xff] }
 0x31d   :  { %13816 = vst [vmem:[#allocation74_spill] sm:$0xff] %v11415_v19  ;;  %v2280_v48 = vmul.f32 %v10907_v21, %v2209_v0  ;;  %v2480_v34 = vmul.f32 %v10913_v5, %v2408_v46  ;;  %v1813_v31 = vadd.f32 1.0, %v8227_v15  ;;  %v1811_v10 = vadd.f32 1.0, %v8229_v49  ;;  %v2608_v19 = vld [vmem:[#allocation2 + $0x5a9] sm:$0xff] }
 0x31e   :  { %v4263_v36 = vadd.f32 1.0, %v8231_v54  ;;  %8246 = vrcp.f32 %v4262_v7  ;;  %v11424_v61 = vmul.f32 %v10987_v28, %v2209_v0  ;;  %v11433_v27 = vadd.f32 %v11429_v17, %v13817_v41  ;;  %v13821_v41 = vld [vmem:[#allocation109_spill] sm:$0xff] }
 0x31f   :  { %v8235_v9 = vpop.eup %8234  ;;  %v11436_v40 = vmul.f32 %v10995_v52, %v2408_v46  ;;  %v2876_v15 = vmul.f32 %v10987_v28, %v2207_v60  ;;  %8248 = vrcp.f32 %v1810_v20  ;;  %v11441_v42 = vadd.f32 %v11429_v17, %v11188_v8 }
 0x320   :  { %13818 = vst [vmem:[#allocation70_spill] sm:$0xff] %v11433_v27  ;;  %v2877_v49 = vmul.f32 %v10987_v28, %v11421_v58  ;;  %8250 = vrcp.f32 %v1808_v30  ;;  %v1814_v43 = vadd.f32 1.0, %v8233_v32  ;;  %v11447_v33 = vadd.f32 %v11429_v17, %v11272_v16  ;;  %v2406_v28 = vld [vmem:[#allocation2 + $0x588] sm:$0xff] }
 0x321   :  { %13819 = vst [vmem:[#allocation69_spill] sm:$0xff] %v11441_v42  ;;  %v8237_v7 = vpop.eup %8236  ;;  %v11449_v54 = vadd.f32 %v2480_v34, %v2280_v48  ;;  %v11452_v39 = vmul.f32 %v13821_v41, %v2209_v0  ;;  %v11455_v20 = vmul.f32 %v11048_v50, %v2408_v46  ;;  %8252 = vrcp.f32 %v1813_v31  ;;  %v11466_v0 = vld [vmem:[#allocation2 + $0x590] sm:$0xff] }
 0x322   :  { %13820 = vst [vmem:[#allocation75_spill] sm:$0xff] %v11447_v33  ;;  %v8239_v8 = vpop.eup %8238  ;;  %v4264_v53 = vadd.f32 1.0, %v8235_v9  ;;  %8254 = vrcp.f32 %v4263_v36  ;;  %v11458_v32 = vmul.f32 -1.442695, %v11433_v27  ;;  %v11462_v16 = vadd.f32 %v11429_v17, %v11320_v13  ;;  %v13827_v36 = vld [vmem:[#allocation127_spill] sm:$0xff] }
 0x323   :  { %v11464_v48 = vpop.eup %8240  ;;  %v2940_v30 = vadd.f32 %v2876_v15, %v2740_v6  ;;  %8256 = vrcp.f32 %v1811_v10  ;;  %v11469_v46 = vmul.f32 -1.442695, %v11441_v42  ;;  %v11473_v31 = vadd.f32 %v11429_v17, %v11329_v25 }
 0x324   :  { %13822 = vst [vmem:[#allocation86_spill] sm:$0xff] %v11458_v32  ;;  %13823 = vst [vmem:[#allocation107_spill] sm:$0xff] %v11462_v16  ;;  %v8243_v34 = vpop.eup %8242  ;;  %v11476_v9 = vmul.f32 %v8237_v7, %v13827_v36  ;;  %v2941_v27 = vadd.f32 %v2877_v49, %v2741_v1  ;;  %8258 = vrcp.f32 %v1814_v43  ;;  %v11479_v13 = vmul.f32 -1.442695, %v11447_v33  ;;  %v13838_v33 = vld [vmem:[#allocation71_spill] sm:$0xff] }
 0x325   :  { %13824 = vst [vmem:[#allocation77_spill] sm:$0xff] %v11464_v48  ;;  %13825 = vst [vmem:[#allocation87_spill] sm:$0xff] %v11469_v46  ;;  %v11481_v6 = vpop.eup %8244  ;;  %v4265_v15 = vadd.f32 1.0, %v8239_v8  ;;  %v2278_v10 = vmul.f32 %v10907_v21, %v2207_v60  ;;  %v2478_v48 = vmul.f32 %v10913_v5, %v2406_v28  ;;  %v3076_v42 = vmul.f32 %v10995_v52, %v2406_v28  ;;  %v2606_v46 = vld [vmem:[#allocation2 + $0x589] sm:$0xff]  ;;  %v11495_v8 = vld [vmem:[#allocation2 + $0x591] sm:$0xff] }
 0x326   :  { %13826 = vst [vmem:[#allocation110_spill] sm:$0xff] %v11473_v31  ;;  %13828 = vst [vmem:[#allocation120_spill] sm:$0xff] %v11476_v9  ;;  %8260 = vrcp.f32 %v4264_v53  ;;  %v3475_v25 = vmul.f32 %v13821_v41, %v2207_v60  ;;  %v3077_v1 = vmul.f32 %v10995_v52, %v11466_v0  ;;  %v11490_v49 = vmul.f32 -1.442695, %v11462_v16  ;;  %v13834_v5 = vld [vmem:[#allocation116_spill] sm:$0xff] }
 0x327   :  { %13829 = vst [vmem:[#allocation121_spill] sm:$0xff] %v11479_v13  ;;  %13830 = vst [vmem:[#allocation109_spill] sm:$0xff] %v11481_v6  ;;  %v11493_v43 = vmul.f32 %v8243_v34, %v11244_v23  ;;  %v3140_v7 = vadd.f32 %v3076_v42, %v2940_v30  ;;  %v11498_v21 = vmul.f32 -1.442695, %v11473_v31  ;;  %v11502_v53 = vadd.f32 %v13834_v5, %v11310_v22  ;;  %v11512_v22 = vld [vmem:[#allocation2 + $0x5af] sm:$0xff] }
 0x328   :  { %13831 = vst [vmem:[#allocation127_spill] sm:$0xff] %v11490_v49  ;;  %v8247_v60 = vpop.eup %8246  ;;  %v4554_v52 = vsel %vm2020_vm4, %v11476_v9, 0.0  ;;  %v3539_v36 = vadd.f32 %v3475_v25, %v3338_v14  ;;  %v3141_v6 = vadd.f32 %v3077_v1, %v2941_v27  ;;  %v11508_v23 = vadd.f32 %v11429_v17, %v11363_v51  ;;  %v11517_v5 = vld [vmem:[%s13453_s5] ss:$0 sm:$0xff]  ;;  %v11524_v51 = vld [vmem:[%s13453_s5 + $0x1] ss:$0 sm:$0xff] }
 0x329   :  { %13832 = vst [vmem:[#allocation129_spill] sm:$0xff] %v11493_v43  ;;  %13833 = vst [vmem:[#allocation130_spill] sm:$0xff] %v11498_v21  ;;  %v8249_v42 = vpop.eup %8248  ;;  %8262 = vrcp.f32 %v4265_v15  ;;  %v2542_v30 = vadd.f32 %v2478_v48, %v2278_v10  ;;  %v3675_v34 = vmul.f32 %v11048_v50, %v2406_v28  ;;  %v3276_v31 = vmul.f32 %v11060_v35, %v2606_v46  ;;  %v3395_v15 = vld [vmem:[#allocation2 + $0x307] sm:$0xff] }
 0x32a   :  { %13835 = vst [vmem:[#allocation116_spill] sm:$0xff] %v11508_v23  ;;  %v8251_v16 = vpop.eup %8250  ;;  %v2279_v14 = vmul.f32 %v11517_v5, %v11421_v58  ;;  %v2479_v27 = vmul.f32 %v11524_v51, %v11466_v0  ;;  %v2678_v28 = vmul.f32 %v10938_v4, %v2606_v46  ;;  %v3277_v48 = vmul.f32 %v11060_v35, %v11495_v8  ;;  %v13837_v9 = vld [vmem:[#allocation79_spill] sm:$0xff] }
 0x32b   :  { %v8253_v10 = vpop.eup %8252  ;;  %v11532_v25 = vmul.f32 %v8247_v60, %v11277_v57  ;;  %v3340_v1 = vadd.f32 %v3276_v31, %v3140_v7  ;;  %8264 = vpow2.f32 %v13837_v9  ;;  %v11537_v21 = vadd.f32 %v13838_v33, %v11332_v45  ;;  %v11548_v31 = vld [vmem:[%s13453_s5 + $0x2] ss:$0 sm:$0xff]  ;;  %v3396_v60 = vld [vmem:[#allocation2 + $0x30f] sm:$0xff] }
 0x32c   :  { %v8255_v49 = vpop.eup %8254  ;;  %v4553_v13 = vsel %vm2020_vm4, %v11493_v43, 0.0  ;;  %v3739_v4 = vadd.f32 %v3675_v34, %v3539_v36  ;;  %v3341_v24 = vadd.f32 %v3277_v48, %v3141_v6  ;;  %v3476_v18 = vmul.f32 %v13821_v41, %v11421_v58  ;;  %v2409_v34 = vld [vmem:[#allocation2 + $0x5b0] sm:$0xff] }
 0x32d   :  { %13836 = vst [vmem:[#allocation131_spill] sm:$0xff] %v11532_v25  ;;  %v8257_v44 = vpop.eup %8256  ;;  %v4555_v47 = vadd.f32 %v4554_v52, %v4553_v13  ;;  %v3478_v57 = vmul.f32 %v13821_v41, %v11512_v22  ;;  %v2679_v45 = vmul.f32 %v11548_v31, %v11495_v8  ;;  %v3467_v33 = vmul.f32 %v13821_v41, %v3395_v15 }
 0x32e   :  { %v8259_v9 = vpop.eup %8258  ;;  %v2543_v6 = vadd.f32 %v2479_v27, %v2279_v14  ;;  %v2742_v7 = vadd.f32 %v2678_v28, %v2542_v30  ;;  %v3540_v58 = vadd.f32 %v3476_v18, %v11417_v12  ;;  %v3875_v13 = vmul.f32 %v11083_v55, %v2606_v46  ;;  %v13840_v27 = vld [vmem:[#allocation89_spill] sm:$0xff]  ;;  %v13842_v28 = vld [vmem:[#allocation112_spill] sm:$0xff] }
 0x32f   :  { %v11556_v52 = vmul.f32 %v8255_v49, %v11292_v38  ;;  %v4556_v36 = vsel %vm2020_vm4, %v11532_v25, 0.0  ;;  %v3541_v48 = vadd.f32 %v11452_v39, %v3340_v1  ;;  %v3676_v15 = vmul.f32 %v11048_v50, %v11466_v0  ;;  %v13841_v12 = vld [vmem:[#allocation101_spill] sm:$0xff] }
 0x330   :  { %v8261_v43 = vpop.eup %8260  ;;  %v3542_v14 = vadd.f32 %v3478_v57, %v3341_v24  ;;  %v3939_v30 = vadd.f32 %v3875_v13, %v3739_v4  ;;  %v2002_v18 = vmul.f32 %v8249_v42, %v13840_v27  ;;  %v2000_v46 = vmul.f32 %v8251_v16, %v13841_v12  ;;  %v13843_v38 = vld [vmem:[#allocation113_spill] sm:$0xff]  ;;  %v13844_v24 = vld [vmem:[#allocation96_spill] sm:$0xff] }
 0x331   :  { %13839 = vst [vmem:[#allocation79_spill] sm:$0xff] %v11556_v52  ;;  %v2005_v32 = vmul.f32 %v8253_v10, %v13842_v28  ;;  %v2003_v49 = vmul.f32 %v8257_v44, %v13843_v38  ;;  %8266 = vpow2.f32 %v11345_v29  ;;  %v3468_v25 = vmul.f32 %v13821_v41, %v3396_v60  ;;  %v2609_v4 = vld [vmem:[#allocation2 + $0x5b1] sm:$0xff]  ;;  %v2211_v13 = vld [vmem:[#allocation2 + $0x5c7] sm:$0xff]  ;;  %v11624_v28 = vld [vmem:[%s13453_s5 + $0x4] ss:$0 sm:$0xff] }
 0x332   :  { %v3678_v39 = vmul.f32 %v11048_v50, %v2409_v34  ;;  %v2743_v1 = vadd.f32 %v2679_v45, %v2543_v6  ;;  %v3740_v0 = vadd.f32 %v3676_v15, %v3540_v58  ;;  %2148 = vst.msk [vmem:[#allocation2 + $0x5f0] sm:$0xff] %vm2020_vm4, %v2002_v18  ;;  %2146 = vst.msk [vmem:[#allocation2 + $0x5d0] sm:$0xff] %vm2020_vm4, %v2000_v46  ;;  %v4558_v50 = vsel %vm2020_vm4, %v11556_v52, 0.0 }
 0x333   :  { %v2006_v42 = vmul.f32 %v8259_v9, %v13844_v24  ;;  %v8263_v16 = vpop.eup %8262  ;;  %v11574_v10 = vmul.f32 %v8261_v43, %v11326_v26  ;;  %v4557_v44 = vadd.f32 %v4556_v36, %v4555_v47  ;;  %v2942_v29 = vadd.f32 %v11424_v61, %v2742_v7  ;;  %2151 = vst.msk [vmem:[#allocation2 + $0x628] sm:$0xff] %vm2020_vm4, %v2005_v32 }
 0x334   :  { %v3741_v41 = vadd.f32 %v11455_v20, %v3541_v48  ;;  %2149 = vst.msk [vmem:[#allocation2 + $0x608] sm:$0xff] %vm2020_vm4, %v2003_v49  ;;  %v3742_v57 = vadd.f32 %v3678_v39, %v3542_v14  ;;  %v3876_v45 = vmul.f32 %v11083_v55, %v11495_v8  ;;  %v11585_v26 = vadd.f32 %v11155_v3, %v3939_v30  ;;  %v11595_v20 = vld [vmem:[%s13453_s5 + $0x3] ss:$0 sm:$0xff]  ;;  %v2213_v39 = vld [vmem:[#allocation2 + $0x5e7] sm:$0xff] }
 0x335   :  { %13845 = vst [vmem:[#allocation71_spill] sm:$0xff] %v11574_v10  ;;  %2152 = vst.msk [vmem:[#allocation2 + $0x630] sm:$0xff] %vm2020_vm4, %v2006_v42  ;;  %v11588_v47 = vpop.eup %8264  ;;  %v2281_v61 = vmul.f32 %v11517_v5, %v11512_v22  ;;  %v2879_v32 = vmul.f32 %v11595_v20, %v11512_v22  ;;  %v3877_v43 = vmul.f32 %v11083_v55, %v2608_v19  ;;  %v11601_v8 = vmul.f32 -1.442695, %v11508_v23  ;;  %v11643_v42 = vld [vmem:[%s13453_s5 + $0x5] ss:$0 sm:$0xff] }
 0x336   :  { %v2481_v9 = vmul.f32 %v11524_v51, %v2409_v34  ;;  %v2680_v6 = vmul.f32 %v11548_v31, %v2608_v19  ;;  %v3878_v7 = vmul.f32 %v11083_v55, %v2609_v4  ;;  %v3940_v58 = vadd.f32 %v3876_v45, %v3740_v0 }
 0x337   :  { %v11607_v60 = vmul.f32 %v8263_v16, %v11353_v59  ;;  %v4559_v36 = vadd.f32 %v4558_v50, %v4557_v44  ;;  %v2943_v48 = vadd.f32 %v2879_v32, %v2743_v1  ;;  %v3941_v15 = vadd.f32 %v3877_v43, %v3741_v41  ;;  %v2412_v1 = vld [vmem:[#allocation2 + $0x5e8] sm:$0xff] }
 0x338   :  { %v4560_v22 = vsel %vm2020_vm4, %v11574_v10, 0.0  ;;  %v3942_v14 = vadd.f32 %v3878_v7, %v3742_v57  ;;  %v6892_v30 = vmul.f32 -1.442695, %v11585_v26  ;;  %v3142_v27 = vadd.f32 %v11436_v40, %v2942_v29 }
 0x339   :  { %13846 = vst [vmem:[#allocation89_spill] sm:$0xff] %v11607_v60  ;;  %v2681_v18 = vmul.f32 %v11548_v31, %v2609_v4  ;;  %v2880_v55 = vmul.f32 %v11595_v20, %v2211_v13  ;;  %v11616_v12 = vadd.f32 %v3467_v33, %v11502_v53  ;;  %v11619_v59 = vadd.f32 %v3468_v25, %v11537_v21  ;;  %v11648_v41 = vld [vmem:[#allocation2 + $0x5cf] sm:$0xff] }
 0x33a   :  { %v2545_v46 = vadd.f32 %v2481_v9, %v2281_v61  ;;  %v3079_v38 = vmul.f32 %v11624_v28, %v2409_v34  ;;  %v3278_v40 = vmul.f32 %v11060_v35, %v2608_v19  ;;  %v11629_v49 = vadd.f32 %v11155_v3, %v3940_v58  ;;  %v2410_v35 = vld [vmem:[#allocation2 + $0x5c8] sm:$0xff]  ;;  %v11657_v61 = vld [vmem:[%s13453_s5 + $0x6] ss:$0 sm:$0xff] }
 0x33b   :  { %v8267_v53 = vpop.eup %8266  ;;  %v4561_v33 = vadd.f32 %v4560_v22, %v4559_v36  ;;  %v2744_v21 = vadd.f32 %v2680_v6, %v11449_v54  ;;  %v11633_v25 = vadd.f32 %v11155_v3, %v3941_v15  ;;  %v4562_v0 = vsel %vm2020_vm4, %v11607_v60, 0.0  ;;  %v2610_v36 = vld [vmem:[#allocation2 + $0x5c9] sm:$0xff] }
 0x33c   :  { %v11638_v24 = vadd.f32 %v11155_v3, %v3942_v14  ;;  %8268 = vpow2.f32 %v6892_v30  ;;  %v3342_v19 = vadd.f32 %v3278_v40, %v3142_v27  ;;  %v3143_v34 = vadd.f32 %v3079_v38, %v2943_v48  ;;  %v2411_v38 = vld [vmem:[#allocation2 + $0x5d0] sm:$0xff] }
 0x33d   :  { %v3279_v54 = vmul.f32 %v11643_v42, %v2609_v4  ;;  %v2284_v16 = vmul.f32 %v11517_v5, %v2213_v39  ;;  %v2484_v44 = vmul.f32 %v11524_v51, %v2412_v1  ;;  %v2944_v29 = vadd.f32 %v2880_v55, %v2744_v21  ;;  %v11678_v55 = vld [vmem:[%s13453_s5 + $0x7] ss:$0 sm:$0xff]  ;;  %v3595_v21 = vld [vmem:[#allocation2 + $0x308] sm:$0xff] }
 0x33e   :  { %v2745_v50 = vadd.f32 %v2681_v18, %v2545_v46  ;;  %v6893_v57 = vmul.f32 -1.442695, %v11629_v49  ;;  %v11652_v45 = vmul.f32 %v11595_v20, %v2213_v39  ;;  %v3479_v4 = vmul.f32 %v11657_v61, %v2211_v13 }
 0x33f   :  { %v6894_v32 = vmul.f32 -1.442695, %v11633_v25  ;;  %v11661_v43 = vadd.f32 %v4562_v0, %v4561_v33  ;;  %v11664_v9 = vmul.f32 %v11624_v28, %v2412_v1  ;;  %v3080_v6 = vmul.f32 %v11624_v28, %v2410_v35 }
 0x340   :  { %v6895_v7 = vmul.f32 -1.442695, %v11638_v24  ;;  %v3543_v58 = vadd.f32 %v3479_v4, %v3342_v19  ;;  %v2881_v48 = vmul.f32 %v11595_v20, %v11648_v41  ;;  %v3343_v15 = vadd.f32 %v3279_v54, %v3143_v34  ;;  %v3596_v54 = vld [vmem:[#allocation2 + $0x310] sm:$0xff] }
 0x341   :  { %v11670_v22 = vadd.f32 %v2484_v44, %v2284_v16  ;;  %v3481_v14 = vmul.f32 %v11657_v61, %v2213_v39  ;;  %v2282_v30 = vmul.f32 %v11517_v5, %v2211_v13  ;;  %v3144_v27 = vadd.f32 %v3080_v6, %v2944_v29 }
 0x342   :  { %8270 = vpow2.f32 %v6893_v57  ;;  %v2482_v18 = vmul.f32 %v11524_v51, %v2410_v35  ;;  %v3679_v46 = vmul.f32 %v11678_v55, %v2410_v35  ;;  %v3480_v40 = vmul.f32 %v11657_v61, %v11648_v41  ;;  %v2611_v57 = vld [vmem:[#allocation2 + $0x5d1] sm:$0xff] }
 0x343   :  { %8272 = vpow2.f32 %v6894_v32  ;;  %v2945_v33 = vadd.f32 %v2881_v48, %v2745_v50  ;;  %v3280_v39 = vmul.f32 %v11643_v42, %v2610_v36  ;;  %v1812_v13 = vadd.f32 1.0, %v11588_v47  ;;  %v11692_v47 = vld [vmem:[%s13453_s5 + $0x8] ss:$0 sm:$0xff] }
 0x344   :  { %8274 = vpow2.f32 %v6895_v7  ;;  %v3681_v0 = vmul.f32 %v11678_v55, %v2412_v1  ;;  %v3743_v19 = vadd.f32 %v3679_v46, %v3543_v58  ;;  %v3544_v34 = vadd.f32 %v3480_v40, %v3343_v15  ;;  %v3795_v7 = vld [vmem:[#allocation2 + $0x309] sm:$0xff] }
 0x345   :  { %v3081_v16 = vmul.f32 %v11624_v28, %v2411_v38  ;;  %v3344_v35 = vadd.f32 %v3280_v39, %v3144_v27  ;;  %v1817_v44 = vadd.f32 1.0, %v8267_v53  ;;  %8276 = vpow2.f32 %v11383_v2  ;;  %v13848_v27 = vld [vmem:[#allocation93_spill] sm:$0xff] }
 0x346   :  { %v8269_v29 = vpop.eup %8268  ;;  %v3680_v50 = vmul.f32 %v11678_v55, %v2411_v38  ;;  %v3879_v1 = vmul.f32 %v11692_v47, %v2610_v36  ;;  %v11697_v4 = vadd.f32 %v11429_v17, %v11389_v11  ;;  %v3667_v32 = vmul.f32 %v11678_v55, %v3595_v21  ;;  %v2214_v17 = vld [vmem:[#allocation2 + $0x5ef] sm:$0xff] }
 0x347   :  { %v2546_v53 = vadd.f32 %v2482_v18, %v2282_v30  ;;  %v3145_v6 = vadd.f32 %v3081_v16, %v2945_v33  ;;  %8278 = vrcp.f32 %v1812_v13  ;;  %v3668_v2 = vmul.f32 %v11678_v55, %v3596_v54  ;;  %v3796_v13 = vld [vmem:[#allocation2 + $0x311] sm:$0xff] }
 0x348   :  { %13847 = vst [vmem:[#allocation101_spill] sm:$0xff] %v11697_v4  ;;  %v2682_v58 = vmul.f32 %v11548_v31, %v2610_v36  ;;  %v3744_v48 = vadd.f32 %v3680_v50, %v3544_v34  ;;  %v3943_v15 = vadd.f32 %v3879_v1, %v3743_v19  ;;  %v3730_v46 = vadd.f32 %v13848_v27, %v11335_v56  ;;  %v2612_v34 = vld [vmem:[#allocation2 + $0x5e9] sm:$0xff] }
 0x349   :  { %v4266_v40 = vadd.f32 1.0, %v8269_v29  ;;  %v3281_v39 = vmul.f32 %v11643_v42, %v2611_v57  ;;  %v3545_v11 = vadd.f32 %v3481_v14, %v3344_v35  ;;  %8280 = vrcp.f32 %v1817_v44  ;;  %v2413_v1 = vld [vmem:[#allocation2 + $0x5f0] sm:$0xff] }
 0x34a   :  { %v3880_v30 = vmul.f32 %v11692_v47, %v2611_v57  ;;  %v11707_v18 = vmul.f32 -1.442695, %v11697_v4  ;;  %v3731_v33 = vadd.f32 %v3667_v32, %v11616_v12  ;;  %v3867_v36 = vmul.f32 %v11692_v47, %v3795_v7 }
 0x34b   :  { %v2283_v21 = vmul.f32 %v11517_v5, %v11648_v41  ;;  %v2483_v56 = vmul.f32 %v11524_v51, %v2411_v38  ;;  %v3345_v19 = vadd.f32 %v3281_v39, %v3145_v6  ;;  %8282 = vpow2.f32 %v11405_v37  ;;  %v13849_v37 = vld [vmem:[#allocation118_spill] sm:$0xff] }
 0x34c   :  { %v8271_v14 = vpop.eup %8270  ;;  %v2746_v54 = vadd.f32 %v2682_v58, %v2546_v53  ;;  %v3944_v16 = vadd.f32 %v3880_v30, %v3744_v48  ;;  %v11716_v35 = vadd.f32 %v11155_v3, %v3943_v15  ;;  %v3732_v12 = vadd.f32 %v3668_v2, %v11619_v59  ;;  %v13850_v53 = vld [vmem:[#allocation119_spill] sm:$0xff] }
 0x34d   :  { %v8273_v44 = vpop.eup %8272  ;;  %8284 = vrcp.f32 %v4266_v40  ;;  %v3482_v29 = vmul.f32 %v11657_v61, %v2214_v17  ;;  %v3745_v50 = vadd.f32 %v3681_v0, %v3545_v11  ;;  %v3868_v41 = vmul.f32 %v11692_v47, %v3796_v13  ;;  %v11735_v58 = vld [vmem:[%s13454_s6] ss:$0 sm:$0xff] }
 0x34e   :  { %v8275_v38 = vpop.eup %8274  ;;  %8286 = vpow2.f32 %v11408_v63  ;;  %v3929_v32 = vadd.f32 %v13849_v37, %v11323_v62  ;;  %v11725_v6 = vadd.f32 %v13850_v53, %v3730_v46  ;;  %v11727_v3 = vadd.f32 %v3867_v36, %v3731_v33  ;;  %v13851_v63 = vld [vmem:[#allocation111_spill] sm:$0xff]  ;;  %v13853_v46 = vld [vmem:[#allocation74_spill] sm:$0xff] }
 0x34f   :  { %v11729_v59 = vpop.eup %8276  ;;  %v3881_v2 = vmul.f32 %v11692_v47, %v2612_v34  ;;  %v2547_v7 = vadd.f32 %v2483_v56, %v2283_v21  ;;  %v3546_v0 = vadd.f32 %v3482_v29, %v3345_v19  ;;  %v11739_v48 = vadd.f32 %v11735_v58, %v13851_v63  ;;  %v2613_v21 = vld [vmem:[#allocation2 + $0x5f1] sm:$0xff]  ;;  %v11757_v53 = vld [vmem:[#allocation2 + $0x607] sm:$0xff] }
 0x350   :  { %v2946_v62 = vadd.f32 %v11652_v45, %v2746_v54  ;;  %v11743_v15 = vadd.f32 %v11735_v58, %v3944_v16  ;;  %v6896_v27 = vmul.f32 -1.442695, %v11716_v35  ;;  %8288 = vpow2.f32 %v13853_v46  ;;  %v13854_v56 = vld [vmem:[#allocation86_spill] sm:$0xff] }
 0x351   :  { %13852 = vst [vmem:[#allocation112_spill] sm:$0xff] %v11739_v48  ;;  %v8279_v40 = vpop.eup %8278  ;;  %v3682_v39 = vmul.f32 %v11678_v55, %v2413_v1  ;;  %v2683_v11 = vmul.f32 %v11548_v31, %v2611_v57  ;;  %v3945_v30 = vadd.f32 %v3881_v2, %v3745_v50  ;;  %v11749_v33 = vadd.f32 %v3868_v41, %v3732_v12  ;;  %v13856_v2 = vld [vmem:[#allocation114_spill] sm:$0xff] }
 0x352   :  { %v4267_v13 = vadd.f32 1.0, %v8271_v14  ;;  %v4268_v36 = vadd.f32 1.0, %v8273_v44  ;;  %8290 = vpow2.f32 %v13854_v56  ;;  %v11753_v45 = vadd.f32 %v11735_v58, %v3929_v32 }
 0x353   :  { %v8281_v19 = vpop.eup %8280  ;;  %v2285_v54 = vmul.f32 %v11517_v5, %v2214_v17  ;;  %v2485_v16 = vmul.f32 %v11524_v51, %v2413_v1  ;;  %v2747_v29 = vadd.f32 %v2683_v11, %v2547_v7  ;;  %v3746_v37 = vadd.f32 %v3682_v39, %v3546_v0 }
 0x354   :  { %13855 = vst [vmem:[#allocation113_spill] sm:$0xff] %v11753_v45  ;;  %v2684_v57 = vmul.f32 %v11548_v31, %v2612_v34  ;;  %8292 = vpow2.f32 %v6896_v27  ;;  %v6897_v14 = vmul.f32 -1.442695, %v11743_v15  ;;  %v3146_v12 = vadd.f32 %v11664_v9, %v2946_v62  ;;  %v13857_v27 = vld [vmem:[#allocation94_spill] sm:$0xff] }
 0x355   :  { %v8283_v44 = vpop.eup %8282  ;;  %v2883_v50 = vmul.f32 %v11595_v20, %v2214_v17  ;;  %v3882_v41 = vmul.f32 %v11692_v47, %v2613_v21  ;;  %v11765_v32 = vadd.f32 %v11735_v58, %v3945_v30  ;;  %v2004_v7 = vmul.f32 %v8279_v40, %v13856_v2 }
 0x356   :  { %8294 = vrcp.f32 %v4267_v13  ;;  %v3282_v0 = vmul.f32 %v11643_v42, %v2612_v34  ;;  %v2884_v63 = vmul.f32 %v11595_v20, %v11757_v53  ;;  %v2009_v46 = vmul.f32 %v8281_v19, %v13857_v27  ;;  %v7664_v34 = vld [vmem:[%s13455_s7 + $0x8] sm:$0xff]  }
 0x357   :  { %v8285_v39 = vpop.eup %8284  ;;  %v4269_v9 = vadd.f32 1.0, %v8275_v38  ;;  %v2685_v62 = vmul.f32 %v11548_v31, %v2613_v21  ;;  %v2947_v17 = vadd.f32 %v2883_v50, %v2747_v29  ;;  %v3946_v11 = vadd.f32 %v3882_v41, %v3746_v37  ;;  %2150 = vst.msk [vmem:[#allocation2 + $0x610] sm:$0xff] %vm2020_vm4, %v2004_v7  ;;  %v2414_v29 = vld [vmem:[#allocation2 + $0x608] sm:$0xff]  ;;  %7471 = vmatpush3.bf16.msra.mxu1 %v7664_v34 }
 0x358   :  { %v8287_v30 = vpop.eup %8286  ;;  %v2748_v56 = vadd.f32 %v2684_v57, %v11670_v22  ;;  %8296 = vpow2.f32 %v6897_v14  ;;  %v3346_v40 = vadd.f32 %v3282_v0, %v3146_v12  ;;  %2155 = vst.msk [vmem:[#allocation2 + $0x668] sm:$0xff] %vm2020_vm4, %v2009_v46  ;;  %v2549_v13 = vadd.f32 %v2485_v16, %v2285_v54  ;;  %v11786_v14 = vld [vmem:[#allocation2 + $0x627] sm:$0xff]  ;;  %v7665_v54 = vld [vmem:[%s13455_s7 + $0x10] sm:$0xff]  }
 0x359   :  { %8298 = vrcp.f32 %v4268_v36  ;;  %v3083_v38 = vmul.f32 %v11624_v28, %v2413_v1  ;;  %v6898_v19 = vmul.f32 -1.442695, %v11765_v32  ;;  %v13858_v37 = vmov 0.0  }
 0x35a   :  { %7476 = vmatprep.mubr.msk.bf16.mxu1 %vm8751_vm7, %v13858_v37  ;;  %7482 = vmatprep.mubr.msk.bf16.mxu0 %vm8751_vm7, %v13858_v37  ;;  %v8289_v22 = vpop.eup %8288  ;;  %v11784_v57 = vmul.f32 %v8285_v39, %v11585_v26  ;;  %v2948_v12 = vadd.f32 %v2884_v63, %v2748_v56  ;;  %v3483_v36 = vmul.f32 %v11657_v61, %v11757_v53  ;;  %v1815_v1 = vadd.f32 1.0, %v11729_v59 }
 0x35b   :  { %v3283_v16 = vmul.f32 %v11643_v42, %v2613_v21  ;;  %v11796_v50 = vadd.f32 %v11735_v58, %v3946_v11  ;;  %v3147_v26 = vadd.f32 %v3083_v38, %v2947_v17  ;;  %v1818_v41 = vadd.f32 1.0, %v8283_v44  ;;  %7472 = vmatprep.subr.bf16.mxu1 %v13858_v37 }
 0x35c   :  { %13859 = vst [vmem:[#allocation96_spill] sm:$0xff] %v11784_v57  ;;  %v11799_v2 = vpop.eup %8290  ;;  %8300 = vrcp.f32 %v4269_v9  ;;  %v3084_v7 = vmul.f32 %v11624_v28, %v2414_v29  ;;  %v3547_v59 = vadd.f32 %v3483_v36, %v3346_v40  ;;  %v1816_v0 = vadd.f32 1.0, %v8287_v30  ;;  %7473 = vmatpush3.bf16.msra.mxu1 %v7665_v54 }
 0x35d   :  { %v2749_v63 = vadd.f32 %v2685_v62, %v2549_v13  ;;  %8302 = vpow2.f32 %v6898_v19  ;;  %v11804_v27 = vmul.f32 %v11517_v5, %v11786_v14  ;;  %v1821_v21 = vadd.f32 1.0, %v8289_v22  ;;  %v7666_v62 = vld [vmem:[%s13455_s7 + $0x18] sm:$0xff]   ;;  %7474 = vmatprep.subr.bf16.mxu1 %v13858_v37 }
 0x35e   :  { %v8293_v46 = vpop.eup %8292  ;;  %v4564_v44 = vsel %vm2020_vm4, %v11784_v57, 0.0  ;;  %v3148_v39 = vadd.f32 %v3084_v7, %v2948_v12  ;;  %v3683_v17 = vmul.f32 %v11678_v55, %v2414_v29  ;;  %v11809_v11 = vld [vmem:[#allocation2 + $0x60f] sm:$0xff]  ;;  %8304 = vrcp.f32 %v1815_v1 }
 0x35f   :  { %v2614_v9 = vld [vmem:[#allocation2 + $0x609] sm:$0xff]  ;;  %v6899_v30 = vmul.f32 -1.442695, %v11796_v50  ;;  %v3485_v56 = vmul.f32 %v11657_v61, %v11786_v14  ;;  %v3347_v34 = vadd.f32 %v3283_v16, %v3147_v26  ;;  %8306 = vrcp.f32 %v1818_v41  ;;  %v11825_v1 = vld [vmem:[#allocation2 + $0x611] sm:$0xff] }
 0x360   :  { %v11817_v40 = vld [vmem:[#allocation2 + $0x610] sm:$0xff]  ;;  %v8295_v13 = vpop.eup %8294  ;;  %v3747_v38 = vadd.f32 %v3683_v17, %v3547_v59  ;;  %v2885_v19 = vmul.f32 %v11595_v20, %v11809_v11  ;;  %v3284_v22 = vmul.f32 %v11643_v42, %v2614_v9  ;;  %8308 = vrcp.f32 %v1816_v0  ;;  %7475 = vmatpush3.bf16.msra.mxu1 %v7666_v62  ;;  %v11832_v0 = vld [vmem:[#allocation2 + $0x628] sm:$0xff] }
 0x361   :  { %v4270_v12 = vadd.f32 1.0, %v8293_v46  ;;  %v2286_v36 = vmul.f32 %v11517_v5, %v11757_v53  ;;  %v3484_v54 = vmul.f32 %v11657_v61, %v11809_v11  ;;  %8310 = vrcp.f32 %v1821_v21  ;;  %v11835_v46 = vld [vmem:[#allocation2 + $0x62f] sm:$0xff] }
 0x362   :  { %v8297_v16 = vpop.eup %8296  ;;  %v2949_v37 = vadd.f32 %v2885_v19, %v2749_v63  ;;  %v3085_v26 = vmul.f32 %v11624_v28, %v11817_v40  ;;  %v3348_v41 = vadd.f32 %v3284_v22, %v3148_v39  ;;  %v3883_v7 = vmul.f32 %v11692_v47, %v2614_v9 }
 0x363   :  { %v8299_v59 = vpop.eup %8298  ;;  %8312 = vpow2.f32 %v6899_v30  ;;  %v2486_v53 = vmul.f32 %v11524_v51, %v2414_v29  ;;  %v3548_v17 = vadd.f32 %v3484_v54, %v3347_v34  ;;  %v3684_v21 = vmul.f32 %v11678_v55, %v11817_v40  ;;  %v11848_v54 = vld [vmem:[#allocation2 + $0x630] sm:$0xff] }
 0x364   :  { %v3149_v63 = vadd.f32 %v3085_v26, %v2949_v37  ;;  %v3285_v19 = vmul.f32 %v11643_v42, %v11825_v1  ;;  %v3549_v39 = vadd.f32 %v3485_v56, %v3348_v41  ;;  %v3947_v22 = vadd.f32 %v3883_v7, %v3747_v38  ;;  %v11856_v26 = vld [vmem:[#allocation2 + $0x629] sm:$0xff] }
 0x365   :  { %v11842_v62 = vmul.f32 %v8295_v13, %v11629_v49  ;;  %v4271_v30 = vadd.f32 1.0, %v8297_v16  ;;  %v3748_v57 = vadd.f32 %v3684_v21, %v3548_v17  ;;  %v3884_v29 = vmul.f32 %v11692_v47, %v11825_v1 }
 0x366   :  { %v8301_v60 = vpop.eup %8300  ;;  %8314 = vrcp.f32 %v4270_v12  ;;  %v3685_v34 = vmul.f32 %v11678_v55, %v11832_v0  ;;  %v3486_v37 = vmul.f32 %v11657_v61, %v11835_v46  ;;  %v3349_v56 = vadd.f32 %v3285_v19, %v3149_v63 }
 0x367   :  { %13860 = vst [vmem:[#allocation93_spill] sm:$0xff] %v11842_v62  ;;  %v8303_v38 = vpop.eup %8302  ;;  %v11853_v49 = vmul.f32 %v8299_v59, %v11633_v25  ;;  %v4565_v13 = vadd.f32 %v4564_v44, %v11661_v43  ;;  %v2550_v16 = vadd.f32 %v2486_v53, %v2286_v36  ;;  %v3948_v41 = vadd.f32 %v3884_v29, %v3748_v57  ;;  %v11871_v36 = vld [vmem:[#allocation2 + $0x631] sm:$0xff] }
 0x368   :  { %v8305_v12 = vpop.eup %8304  ;;  %v2686_v7 = vmul.f32 %v11548_v31, %v2614_v9  ;;  %v3550_v17 = vadd.f32 %v3486_v37, %v3349_v56  ;;  %v3749_v21 = vadd.f32 %v3685_v34, %v3549_v39  ;;  %v11860_v10 = vadd.f32 %v11735_v58, %v3947_v22 }
 0x369   :  { %13861 = vst [vmem:[#allocation118_spill] sm:$0xff] %v11853_v49  ;;  %v8307_v52 = vpop.eup %8306  ;;  %v4566_v63 = vsel %vm2020_vm4, %v11842_v62, 0.0  ;;  %8316 = vrcp.f32 %v4271_v30  ;;  %v2488_v25 = vmul.f32 %v11524_v51, %v11832_v0  ;;  %v3686_v43 = vmul.f32 %v11678_v55, %v11848_v54 }
 0x36a   :  { %13862 = vst [vmem:[#allocation119_spill] sm:$0xff] %v11860_v10  ;;  %v8309_v57 = vpop.eup %8308  ;;  %v11869_v44 = vmul.f32 %v8301_v60, %v11638_v24  ;;  %v4272_v9 = vadd.f32 1.0, %v8303_v38  ;;  %v3885_v59 = vmul.f32 %v11692_v47, %v11856_v26  ;;  %v11876_v53 = vadd.f32 %v11735_v58, %v3948_v41 }
 0x36b   :  { %v8311_v19 = vpop.eup %8310  ;;  %v4568_v39 = vsel %vm2020_vm4, %v11853_v49, 0.0  ;;  %v2287_v22 = vmul.f32 %v11517_v5, %v11809_v11  ;;  %v2487_v60 = vmul.f32 %v11524_v51, %v11817_v40  ;;  %v3750_v24 = vadd.f32 %v3686_v43, %v3550_v17  ;;  %v13864_v11 = vld [vmem:[#allocation100_spill] sm:$0xff] }
 0x36c   :  { %13863 = vst [vmem:[#allocation111_spill] sm:$0xff] %v11869_v44  ;;  %v4567_v30 = vadd.f32 %v4566_v63, %v4565_v13  ;;  %v2750_v29 = vadd.f32 %v2686_v7, %v2550_v16  ;;  %v3949_v34 = vadd.f32 %v3885_v59, %v3749_v21  ;;  %v6900_v37 = vmul.f32 -1.442695, %v11860_v10  ;;  %v13865_v16 = vld [vmem:[#allocation117_spill] sm:$0xff]  ;;  %v13867_v43 = vld [vmem:[#allocation68_spill] sm:$0xff] }
 0x36d   :  { %v8313_v56 = vpop.eup %8312  ;;  %v2886_v38 = vmul.f32 %v11595_v20, %v11786_v14  ;;  %v2289_v41 = vmul.f32 %v11517_v5, %v11835_v46  ;;  %v3886_v49 = vmul.f32 %v11692_v47, %v11871_v36  ;;  %v2007_v62 = vmul.f32 %v8305_v12, %v13864_v11  ;;  %v13866_v14 = vld [vmem:[#allocation85_spill] sm:$0xff] }
 0x36e   :  { %8318 = vrcp.f32 %v4272_v9  ;;  %v2489_v40 = vmul.f32 %v11524_v51, %v11848_v54  ;;  %v6901_v13 = vmul.f32 -1.442695, %v11876_v53  ;;  %v2010_v7 = vmul.f32 %v8307_v52, %v13865_v16  ;;  %v3628_v11 = vld [vmem:[#allocation2 + $0x710] sm:$0xff] }
 0x36f   :  { %v2551_v17 = vadd.f32 %v2487_v60, %v2287_v22  ;;  %v3950_v21 = vadd.f32 %v3886_v49, %v3750_v24  ;;  %2153 = vst.msk [vmem:[#allocation2 + $0x648] sm:$0xff] %vm2020_vm4, %v2007_v62  ;;  %v2008_v63 = vmul.f32 %v8309_v57, %v13866_v14  ;;  %v2013_v59 = vmul.f32 %v8311_v19, %v13867_v43  ;;  %v3827_v43 = vld [vmem:[#allocation2 + $0x709] sm:$0xff] }
 0x370   :  { %v8315_v4 = vpop.eup %8314  ;;  %v4273_v23 = vadd.f32 1.0, %v8313_v56  ;;  %v2950_v10 = vadd.f32 %v2886_v38, %v2750_v29  ;;  %v11900_v12 = vadd.f32 %v11735_v58, %v3949_v34  ;;  %8320 = vpow2.f32 %v6900_v37  ;;  %2156 = vst.msk [vmem:[#allocation2 + $0x670] sm:$0xff] %vm2020_vm4, %v2010_v7  ;;  %v3427_v34 = vld [vmem:[#allocation2 + $0x707] sm:$0xff]  ;;  %v3428_v37 = vld [vmem:[#allocation2 + $0x70f] sm:$0xff] }
 0x371   :  { %v4569_v9 = vadd.f32 %v4568_v39, %v4567_v30  ;;  %v2552_v52 = vadd.f32 %v2488_v25, %v11804_v27  ;;  %v2687_v49 = vmul.f32 %v11548_v31, %v11825_v1  ;;  %2154 = vst.msk [vmem:[#allocation2 + $0x650] sm:$0xff] %vm2020_vm4, %v2008_v63  ;;  %2159 = vst.msk [vmem:[#allocation2 + $0x6a8] sm:$0xff] %vm2020_vm4, %v2013_v59  ;;  %v4570_v57 = vsel %vm2020_vm4, %v11869_v44, 0.0 }
 0x372   :  { %v11910_v62 = vadd.f32 %v11735_v58, %v11725_v6  ;;  %v3086_v19 = vmul.f32 %v11624_v28, %v11832_v0  ;;  %v2688_v27 = vmul.f32 %v11548_v31, %v11856_v26  ;;  %8322 = vpow2.f32 %v6901_v13 }
 0x373   :  { %v8317_v25 = vpop.eup %8316  ;;  %v11919_v1 = vmul.f32 %v8315_v4, %v11716_v35  ;;  %v2751_v39 = vadd.f32 %v2687_v49, %v2551_v17  ;;  %v11922_v22 = vadd.f32 %v11735_v58, %v3950_v21  ;;  %v11926_v6 = vadd.f32 %v11735_v58, %v11727_v3  ;;  %v3828_v49 = vld [vmem:[#allocation2 + $0x711] sm:$0xff] }
 0x374   :  { %13868 = vst [vmem:[#allocation74_spill] sm:$0xff] %v11910_v62  ;;  %8324 = vrcp.f32 %v4273_v23  ;;  %v2553_v60 = vadd.f32 %v2489_v40, %v2289_v41  ;;  %v6902_v0 = vmul.f32 -1.442695, %v11900_v12  ;;  %v3150_v24 = vadd.f32 %v3086_v19, %v2950_v10  ;;  %v3627_v41 = vld [vmem:[#allocation2 + $0x708] sm:$0xff] }
 0x375   :  { %13869 = vst [vmem:[#allocation86_spill] sm:$0xff] %v11919_v1  ;;  %13870 = vst [vmem:[#allocation114_spill] sm:$0xff] %v11926_v6  ;;  %v4571_v30 = vadd.f32 %v4570_v57, %v4569_v9  ;;  %v2689_v29 = vmul.f32 %v11548_v31, %v11871_v36  ;;  %v2887_v4 = vmul.f32 %v11595_v20, %v11835_v46  ;;  %v1819_v38 = vadd.f32 1.0, %v11799_v2 }
 0x376   :  { %v3087_v35 = vmul.f32 %v11624_v28, %v11848_v54  ;;  %v11936_v3 = vmul.f32 %v8317_v25, %v11743_v15  ;;  %v2752_v23 = vadd.f32 %v2688_v27, %v2552_v52  ;;  %v3286_v56 = vmul.f32 %v11643_v42, %v11856_v26  ;;  %v11940_v10 = vld [vmem:[#allocation2 + $0x647] sm:$0xff] }
 0x377   :  { %v4572_v46 = vsel %vm2020_vm4, %v11919_v1, 0.0  ;;  %v2951_v40 = vadd.f32 %v2887_v4, %v2751_v39  ;;  %v6903_v54 = vmul.f32 -1.442695, %v11922_v22  ;;  %v2888_v15 = vmul.f32 %v11595_v20, %v11940_v10  ;;  %v11950_v17 = vld [vmem:[#allocation2 + $0x648] sm:$0xff]  ;;  %v13874_v4 = vld [vmem:[#allocation121_spill] sm:$0xff] }
 0x378   :  { %13871 = vst [vmem:[#allocation94_spill] sm:$0xff] %v11936_v3  ;;  %v8319_v13 = vpop.eup %8318  ;;  %v2753_v16 = vadd.f32 %v2689_v29, %v2553_v60  ;;  %v3287_v26 = vmul.f32 %v11643_v42, %v11871_v36  ;;  %8326 = vpow2.f32 %v6902_v0  ;;  %v3350_v7 = vadd.f32 %v3286_v56, %v3150_v24  ;;  %v13873_v0 = vld [vmem:[#allocation87_spill] sm:$0xff]  ;;  %v11977_v29 = vld [vmem:[#allocation2 + $0x64f] sm:$0xff] }
 0x379   :  { %v11953_v2 = vmul.f32 %v11657_v61, %v3427_v34  ;;  %v11956_v21 = vmul.f32 %v11657_v61, %v3428_v37  ;;  %v11959_v14 = vmul.f32 %v11678_v55, %v3627_v41  ;;  %v11962_v63 = vmul.f32 %v11678_v55, %v3628_v11  ;;  %v11989_v56 = vld [vmem:[#allocation2 + $0x667] sm:$0xff] }
 0x37a   :  { %v8321_v59 = vpop.eup %8320  ;;  %v4573_v9 = vadd.f32 %v4572_v46, %v4571_v30  ;;  %v2952_v36 = vadd.f32 %v2888_v15, %v2752_v23  ;;  %v3487_v52 = vmul.f32 %v11657_v61, %v11940_v10  ;;  %8328 = vrcp.f32 %v1819_v38  ;;  %v13876_v11 = vld [vmem:[#allocation127_spill] sm:$0xff] }
 0x37b   :  { %v11967_v57 = vmul.f32 %v8319_v13, %v11765_v32  ;;  %v4574_v19 = vsel %vm2020_vm4, %v11936_v3, 0.0  ;;  %8330 = vpow2.f32 %v6903_v54  ;;  %v3151_v27 = vadd.f32 %v3087_v35, %v2951_v40  ;;  %v11979_v32 = vld [vmem:[#allocation2 + $0x649] sm:$0xff]  ;;  %v13877_v13 = vld [vmem:[#allocation130_spill] sm:$0xff] }
 0x37c   :  { %v8323_v25 = vpop.eup %8322  ;;  %v3088_v39 = vmul.f32 %v11624_v28, %v11950_v17  ;;  %v3551_v60 = vadd.f32 %v3487_v52, %v3350_v7  ;;  %8332 = vpow2.f32 %v13873_v0  ;;  %v11975_v24 = vmul.f32 %v11692_v47, %v3827_v43  ;;  %v11996_v54 = vld [vmem:[#allocation2 + $0x650] sm:$0xff] }
 0x37d   :  { %13872 = vst [vmem:[#allocation100_spill] sm:$0xff] %v11967_v57  ;;  %v4274_v30 = vadd.f32 1.0, %v8321_v59  ;;  %8334 = vpow2.f32 %v13874_v4  ;;  %v11983_v34 = vmul.f32 %v11692_v47, %v3828_v49  ;;  %v11987_v35 = vadd.f32 %v11735_v58, %v11749_v33  ;;  %v11999_v33 = vld [vmem:[#allocation2 + $0x668] sm:$0xff] }
 0x37e   :  { %v8325_v37 = vpop.eup %8324  ;;  %v4575_v23 = vadd.f32 %v4574_v19, %v4573_v9  ;;  %v3152_v38 = vadd.f32 %v3088_v39, %v2952_v36  ;;  %v3687_v41 = vmul.f32 %v11678_v55, %v11950_v17  ;;  %8336 = vpow2.f32 %v13876_v11  ;;  %v12011_v36 = vld [vmem:[#allocation2 + $0x651] sm:$0xff] }
 0x37f   :  { %13875 = vst [vmem:[#allocation117_spill] sm:$0xff] %v11987_v35  ;;  %v4576_v46 = vsel %vm2020_vm4, %v11967_v57, 0.0  ;;  %v4275_v40 = vadd.f32 1.0, %v8323_v25  ;;  %v3351_v15 = vadd.f32 %v3287_v26, %v3151_v27  ;;  %8338 = vpow2.f32 %v13877_v13  ;;  %v12021_v39 = vld [vmem:[#allocation2 + $0x66f] sm:$0xff] }
 0x380   :  { %v3751_v7 = vadd.f32 %v3687_v41, %v3551_v60  ;;  %v2889_v43 = vmul.f32 %v11595_v20, %v11977_v29  ;;  %v3288_v59 = vmul.f32 %v11643_v42, %v11979_v32  ;;  %8340 = vpow2.f32 %v11601_v8  ;;  %v12023_v60 = vld [vmem:[#allocation2 + $0x669] sm:$0xff] }
 0x381   :  { %v12007_v9 = vmul.f32 %v8325_v37, %v11796_v50  ;;  %8342 = vrcp.f32 %v4274_v30  ;;  %v3489_v26 = vmul.f32 %v11657_v61, %v11989_v56  ;;  %v3488_v52 = vmul.f32 %v11657_v61, %v11977_v29  ;;  %v12029_v13 = vld [vmem:[#allocation2 + $0x670] sm:$0xff] }
 0x382   :  { %v8327_v49 = vpop.eup %8326  ;;  %v2953_v19 = vadd.f32 %v2889_v43, %v2753_v16  ;;  %v3089_v27 = vmul.f32 %v11624_v28, %v11996_v54  ;;  %v3352_v25 = vadd.f32 %v3288_v59, %v3152_v38  ;;  %v3887_v8 = vmul.f32 %v11692_v47, %v11979_v32 }
 0x383   :  { %13878 = vst [vmem:[#allocation85_spill] sm:$0xff] %v12007_v9  ;;  %8344 = vrcp.f32 %v4275_v40  ;;  %v3689_v50 = vmul.f32 %v11678_v55, %v11999_v33  ;;  %v3552_v0 = vadd.f32 %v3488_v52, %v3351_v15  ;;  %v3688_v30 = vmul.f32 %v11678_v55, %v11996_v54 }
 0x384   :  { %v8329_v16 = vpop.eup %8328  ;;  %v3153_v4 = vadd.f32 %v3089_v27, %v2953_v19  ;;  %v3289_v37 = vmul.f32 %v11643_v42, %v12011_v36  ;;  %v3553_v38 = vadd.f32 %v3489_v26, %v3352_v25  ;;  %v3951_v41 = vadd.f32 %v3887_v8, %v3751_v7  ;;  %v12040_v8 = vld [vmem:[#allocation2 + $0x671] sm:$0xff] }
 0x385   :  { %v8331_v11 = vpop.eup %8330  ;;  %v4276_v40 = vadd.f32 1.0, %v8327_v49  ;;  %v3752_v43 = vadd.f32 %v3688_v30, %v3552_v0  ;;  %v3888_v59 = vmul.f32 %v11692_v47, %v12011_v36  ;;  %8346 = vpow2.f32 %v11707_v18 }
 0x386   :  { %v8333_v15 = vpop.eup %8332  ;;  %v3490_v52 = vmul.f32 %v11657_v61, %v12021_v39  ;;  %v3889_v19 = vmul.f32 %v11692_v47, %v12023_v60  ;;  %v3353_v27 = vadd.f32 %v3289_v37, %v3153_v4  ;;  %v3753_v26 = vadd.f32 %v3689_v50, %v3553_v38 }
 0x387   :  { %v8335_v7 = vpop.eup %8334  ;;  %v4577_v25 = vadd.f32 %v4576_v46, %v4575_v23  ;;  %v4578_v49 = vsel %vm2020_vm4, %v12007_v9, 0.0  ;;  %v3952_v0 = vadd.f32 %v3888_v59, %v3752_v43  ;;  %v12043_v30 = vadd.f32 %v11735_v58, %v3951_v41 }
 0x388   :  { %v8337_v18 = vpop.eup %8336  ;;  %v4277_v57 = vadd.f32 1.0, %v8331_v11  ;;  %v3690_v3 = vmul.f32 %v11678_v55, %v12029_v13  ;;  %v3554_v1 = vadd.f32 %v3490_v52, %v3353_v27  ;;  %v3953_v44 = vadd.f32 %v3889_v19, %v3753_v26  ;;  %v13879_v52 = vld [vmem:[#allocation70_spill] sm:$0xff] }
 0x389   :  { %v8339_v4 = vpop.eup %8338  ;;  %8348 = vrcp.f32 %v4276_v40  ;;  %v2290_v23 = vmul.f32 %v11517_v5, %v11940_v10  ;;  %v12050_v46 = vadd.f32 %v11735_v58, %v3952_v0  ;;  %v6904_v50 = vmul.f32 -1.442695, %v12043_v30 }
 0x38a   :  { %v8341_v37 = vpop.eup %8340  ;;  %v2490_v38 = vmul.f32 %v11524_v51, %v11950_v17  ;;  %v3890_v41 = vmul.f32 %v11692_v47, %v12040_v8  ;;  %v3754_v55 = vadd.f32 %v3690_v3, %v3554_v1  ;;  %v12058_v11 = vadd.f32 %v11735_v58, %v3953_v44  ;;  %v12074_v3 = vld [vmem:[%s13453_s5] ss:$0 sm:$0xff] }
 0x38b   :  { %v8343_v40 = vpop.eup %8342  ;;  %8350 = vpow2.f32 %v6904_v50  ;;  %v6905_v5 = vmul.f32 -1.442695, %v12050_v46  ;;  %v12062_v10 = vmul.f32 -1.442695, %v11739_v48  ;;  %v12065_v43 = vmul.f32 -1.442695, %v11753_v45 }
 0x38c   :  { %8352 = vrcp.f32 %v4277_v57  ;;  %v3954_v59 = vadd.f32 %v3890_v41, %v3754_v55  ;;  %v6906_v51 = vmul.f32 -1.442695, %v12058_v11  ;;  %v12069_v47 = vmul.f32 -1.442695, %v11910_v62  ;;  %v13880_v57 = vld [vmem:[#allocation119_spill] sm:$0xff] }
 0x38d   :  { %v8345_v1 = vpop.eup %8344  ;;  %v4579_v44 = vadd.f32 %v4578_v49, %v4577_v25  ;;  %v2292_v17 = vmul.f32 %v12074_v3, %v11989_v56  ;;  %8354 = vpow2.f32 %v6905_v5  ;;  %v2011_v19 = vmul.f32 %v8329_v16, %v13879_v52 }
 0x38e   :  { %v12080_v27 = vmul.f32 %v8343_v40, %v13880_v57  ;;  %v2554_v26 = vadd.f32 %v2490_v38, %v2290_v23  ;;  %v12083_v0 = vadd.f32 %v11735_v58, %v3954_v59  ;;  %v1822_v50 = vadd.f32 1.0, %v8333_v15  ;;  %v4723_v58 = vld [vmem:[%s13456_s9] sm:$0x3] }
 0x38f   :  { %v8347_v25 = vpop.eup %8346  ;;  %v2690_v49 = vmul.f32 %v11548_v31, %v11979_v32  ;;  %8356 = vpow2.f32 %v6906_v51  ;;  %2157 = vst.msk [vmem:[#allocation2 + $0x688] sm:$0xff] %vm2020_vm4, %v2011_v19  ;;  %v1820_v41 = vadd.f32 1.0, %v8335_v7  ;;  %v1825_v55 = vadd.f32 1.0, %v8337_v18  ;;  %v12100_v31 = vld [vmem:[%s13453_s5 + $0x1] ss:$0 sm:$0xff] }
 0x390   :  { %13881 = vst [vmem:[#allocation68_spill] sm:$0xff] %v12080_v27  ;;  %v2291_v16 = vmul.f32 %v12074_v3, %v11977_v29  ;;  %v6907_v40 = vmul.f32 -1.442695, %v12083_v0  ;;  %8358 = vrcp.f32 %v1822_v50  ;;  %v1823_v23 = vadd.f32 1.0, %v8339_v4 }
 0x391   :  { %v12095_v15 = vmul.f32 %v8345_v1, %v11876_v53  ;;  %v2491_v32 = vmul.f32 %v12100_v31, %v11996_v54  ;;  %8360 = vrcp.f32 %v1820_v41  ;;  %v1826_v29 = vadd.f32 1.0, %v8341_v37 }
 0x392   :  { %v4580_v7 = vsel %vm2020_vm4, %v12080_v27, 0.0  ;;  %8362 = vpow2.f32 %v6907_v40  ;;  %v1824_v18 = vadd.f32 1.0, %v8347_v25  ;;  %v2492_v53 = vmul.f32 %v12100_v31, %v11999_v33 }
 0x393   :  { %13882 = vst [vmem:[#allocation87_spill] sm:$0xff] %v12095_v15  ;;  %v8349_v4 = vpop.eup %8348  ;;  %v2754_v38 = vadd.f32 %v2690_v49, %v2554_v26  ;;  %8364 = vrcp.f32 %v1825_v55  ;;  %v4737_v5 = vsel %vm4735_vm8, %v4723_v58, 0  ;;  %v2890_v59 = vmul.f32 %v11595_v20, %v11989_v56 }
 0x394   :  { %v2293_v54 = vmul.f32 %v12074_v3, %v12021_v39  ;;  %8366 = vrcp.f32 %v1823_v23  ;;  %v12113_v37 = vmul.f32 -1.442695, %v11926_v6  ;;  %7481 = vmatpush3.bf16.msra.mxu0 %v4737_v5  ;;  %v4581_v1 = vadd.f32 %v4580_v7, %v4579_v44  ;;  %v12125_v44 = vld [vmem:[%s13453_s5 + $0x2] ss:$0 sm:$0xff]  ;;  %v2424_v7 = vld [vmem:[#allocation2 + $0x6a8] sm:$0xff] }
 0x395   :  { %v8351_v51 = vpop.eup %8350  ;;  %v2493_v52 = vmul.f32 %v12100_v31, %v12029_v13  ;;  %v2555_v19 = vadd.f32 %v2491_v32, %v2291_v16  ;;  %8368 = vrcp.f32 %v1826_v29  ;;  %v12118_v26 = vmul.f32 %v8349_v4, %v11900_v12  ;;  %v12141_v32 = vld [vmem:[%s13453_s5 + $0x3] ss:$0 sm:$0xff] }
 0x396   :  { %v8353_v57 = vpop.eup %8352  ;;  %v4582_v20 = vsel %vm2020_vm4, %v12095_v15, 0.0  ;;  %v4278_v56 = vadd.f32 1.0, %v8351_v51  ;;  %8370 = vrcp.f32 %v1824_v18  ;;  %v2556_v25 = vadd.f32 %v2492_v53, %v2292_v17  ;;  %v2223_v51 = vld [vmem:[#allocation2 + $0x687] sm:$0xff] }
 0x397   :  { %13883 = vst [vmem:[#allocation121_spill] sm:$0xff] %v12118_v26  ;;  %v8355_v50 = vpop.eup %8354  ;;  %v2692_v49 = vmul.f32 %v12125_v44, %v12023_v60  ;;  %v2691_v41 = vmul.f32 %v12125_v44, %v12011_v36  ;;  %v2954_v12 = vadd.f32 %v2890_v59, %v2754_v38  ;;  %v3090_v55 = vmul.f32 %v11624_v28, %v11999_v33  ;;  %v2225_v33 = vld [vmem:[#allocation2 + $0x6a7] sm:$0xff] }
 0x398   :  { %v4279_v16 = vadd.f32 1.0, %v8355_v50  ;;  %8372 = vrcp.f32 %v4278_v56  ;;  %v12134_v40 = vmul.f32 -1.442695, %v11987_v35  ;;  %v4583_v23 = vadd.f32 %v4582_v20, %v4581_v1  ;;  %v13885_v20 = vld [vmem:[#allocation69_spill] sm:$0xff]  ;;  %v13886_v50 = vld [vmem:[#allocation75_spill] sm:$0xff] }
 0x399   :  { %v8357_v17 = vpop.eup %8356  ;;  %v2693_v58 = vmul.f32 %v12125_v44, %v12040_v8  ;;  %v2891_v36 = vmul.f32 %v12141_v32, %v12021_v39  ;;  %v2755_v29 = vadd.f32 %v2691_v41, %v2555_v19  ;;  %v12146_v4 = vmul.f32 %v8353_v57, %v11922_v22 }
 0x39a   :  { %v8359_v18 = vpop.eup %8358  ;;  %v4584_v53 = vsel %vm2020_vm4, %v12118_v26, 0.0  ;;  %v2557_v38 = vadd.f32 %v2493_v52, %v2293_v54  ;;  %8374 = vrcp.f32 %v4279_v16  ;;  %v2756_v59 = vadd.f32 %v2692_v49, %v2556_v25  ;;  %v13887_v16 = vld [vmem:[#allocation107_spill] sm:$0xff] }
 0x39b   :  { %13884 = vst [vmem:[#allocation127_spill] sm:$0xff] %v12146_v4  ;;  %v8361_v5 = vpop.eup %8360  ;;  %v3154_v1 = vadd.f32 %v3090_v55, %v2954_v12  ;;  %v2014_v56 = vmul.f32 %v8359_v18, %v13885_v20  ;;  %8376 = vpow2.f32 %v12062_v10  ;;  %v3091_v19 = vmul.f32 %v11624_v28, %v12029_v13  ;;  %v12176_v20 = vld [vmem:[%s13453_s5 + $0x4] ss:$0 sm:$0xff] }
 0x39c   :  { %v8363_v39 = vpop.eup %8362  ;;  %v2296_v22 = vmul.f32 %v12074_v3, %v2225_v33  ;;  %v2496_v57 = vmul.f32 %v12100_v31, %v2424_v7  ;;  %v2012_v41 = vmul.f32 %v8361_v5, %v13886_v50  ;;  %v4585_v52 = vadd.f32 %v4584_v53, %v4583_v23 }
 0x39d   :  { %v8365_v54 = vpop.eup %8364  ;;  %v3290_v25 = vmul.f32 %v11643_v42, %v12023_v60  ;;  %v3291_v49 = vmul.f32 %v11643_v42, %v12040_v8  ;;  %v2955_v12 = vadd.f32 %v2891_v36, %v2755_v29  ;;  %2160 = vst.msk [vmem:[#allocation2 + $0x6b0] sm:$0xff] %vm2020_vm4, %v2014_v56  ;;  %v4280_v55 = vadd.f32 1.0, %v8357_v17  ;;  %v2422_v42 = vld [vmem:[#allocation2 + $0x688] sm:$0xff]  ;;  %v13888_v36 = vld [vmem:[#allocation110_spill] sm:$0xff] }
 0x39e   :  { %v8367_v10 = vpop.eup %8366  ;;  %v4586_v28 = vsel %vm2020_vm4, %v12146_v4, 0.0  ;;  %v2892_v13 = vmul.f32 %v12141_v32, %v2223_v51  ;;  %2158 = vst.msk [vmem:[#allocation2 + $0x690] sm:$0xff] %vm2020_vm4, %v2012_v41  ;;  %v2017_v23 = vmul.f32 %v8365_v54, %v13887_v16  ;;  %v12167_v53 = vadd.f32 %v2693_v58, %v2557_v38  ;;  %v13889_v38 = vld [vmem:[#allocation116_spill] sm:$0xff]  ;;  %v13890_v54 = vld [vmem:[#allocation101_spill] sm:$0xff] }
 0x39f   :  { %v8369_v18 = vpop.eup %8368  ;;  %v12170_v60 = vmul.f32 %v12141_v32, %v2225_v33  ;;  %v3354_v8 = vadd.f32 %v3290_v25, %v3154_v1  ;;  %v2015_v29 = vmul.f32 %v8367_v10, %v13888_v36  ;;  %v2560_v5 = vadd.f32 %v2496_v57, %v2296_v22  ;;  %v12189_v22 = vld [vmem:[%s13453_s5 + $0x6] ss:$0 sm:$0xff] }
 0x3a0   :  { %v8371_v17 = vpop.eup %8370  ;;  %v12179_v56 = vmul.f32 %v12176_v20, %v2424_v7  ;;  %v12182_v58 = vmul.f32 %v11657_v61, %v2225_v33  ;;  %2163 = vst.msk [vmem:[#allocation2 + $0x6e8] sm:$0xff] %vm2020_vm4, %v2017_v23  ;;  %v2018_v50 = vmul.f32 %v8369_v18, %v13889_v38  ;;  %v4587_v1 = vadd.f32 %v4586_v28, %v4585_v52 }
 0x3a1   :  { %v3491_v57 = vmul.f32 %v12189_v22, %v2223_v51  ;;  %v3155_v41 = vadd.f32 %v3091_v19, %v2955_v12  ;;  %2161 = vst.msk [vmem:[#allocation2 + $0x6c8] sm:$0xff] %vm2020_vm4, %v2015_v29  ;;  %v2016_v25 = vmul.f32 %v8371_v17, %v13890_v54  ;;  %8378 = vrcp.f32 %v4280_v55  ;;  %v12205_v12 = vld [vmem:[%s13453_s5 + $0x7] ss:$0 sm:$0xff] }
 0x3a2   :  { %v8373_v10 = vpop.eup %8372  ;;  %v2294_v61 = vmul.f32 %v12074_v3, %v2223_v51  ;;  %v2494_v33 = vmul.f32 %v12100_v31, %v2422_v42  ;;  %v2956_v16 = vadd.f32 %v2892_v13, %v2756_v59  ;;  %2164 = vst.msk [vmem:[#allocation2 + $0x6f0] sm:$0xff] %vm2020_vm4, %v2018_v50  ;;  %v4281_v52 = vadd.f32 1.0, %v8363_v39 }
 0x3a3   :  { %v12198_v28 = vmul.f32 %v8373_v10, %v12043_v30  ;;  %v3555_v23 = vadd.f32 %v3491_v57, %v3354_v8  ;;  %2162 = vst.msk [vmem:[#allocation2 + $0x6d0] sm:$0xff] %vm2020_vm4, %v2016_v25  ;;  %8380 = vpow2.f32 %v12065_v43  ;;  %v12208_v51 = vmul.f32 %v12205_v12, %v2424_v7 }
 0x3a4   :  { %v8375_v19 = vpop.eup %8374  ;;  %v3092_v59 = vmul.f32 %v12176_v20, %v2422_v42  ;;  %v3691_v39 = vmul.f32 %v12205_v12, %v2422_v42  ;;  %v2226_v30 = vld [vmem:[#allocation2 + $0x6af] sm:$0xff]  ;;  %8382 = vpow2.f32 %v12069_v47  ;;  %v2558_v17 = vadd.f32 %v2494_v33, %v2294_v61  ;;  %v12243_v33 = vld [vmem:[%s13453_s5 + $0x5] ss:$0 sm:$0xff] }
 0x3a5   :  { %13891 = vst [vmem:[#allocation130_spill] sm:$0xff] %v12198_v28  ;;  %v2425_v55 = vld [vmem:[#allocation2 + $0x6b0] sm:$0xff]  ;;  %v8377_v18 = vpop.eup %8376  ;;  %v12214_v43 = vmul.f32 %v8375_v19, %v12050_v46  ;;  %v4588_v8 = vsel %vm2020_vm4, %v12198_v28, 0.0  ;;  %v2297_v36 = vmul.f32 %v12074_v3, %v2226_v30  ;;  %v3355_v38 = vadd.f32 %v3291_v49, %v3155_v41 }
 0x3a6   :  { %v2624_v13 = vld [vmem:[#allocation2 + $0x6a9] sm:$0xff]  ;;  %v2497_v7 = vmul.f32 %v12100_v31, %v2425_v55  ;;  %v2625_v29 = vld [vmem:[#allocation2 + $0x6b1] sm:$0xff]  ;;  %8384 = vpow2.f32 %v12113_v37  ;;  %v3156_v47 = vadd.f32 %v3092_v59, %v2956_v16  ;;  %v3755_v50 = vadd.f32 %v3691_v39, %v3555_v23 }
 0x3a7   :  { %13892 = vst [vmem:[#allocation70_spill] sm:$0xff] %v12214_v43  ;;  %v2696_v42 = vmul.f32 %v12125_v44, %v2624_v13  ;;  %8386 = vrcp.f32 %v4281_v52  ;;  %v12222_v46 = vadd.f32 %v4588_v8, %v4587_v1  ;;  %v2697_v54 = vmul.f32 %v12125_v44, %v2625_v29  ;;  %v2224_v25 = vld [vmem:[#allocation2 + $0x68f] sm:$0xff]  ;;  %v2826_v35 = vld [vmem:[#allocation2 + $0x6e7] sm:$0xff] }
 0x3a8   :  { %v2561_v57 = vadd.f32 %v2497_v7, %v2297_v36  ;;  %v2423_v10 = vld [vmem:[#allocation2 + $0x690] sm:$0xff]  ;;  %8388 = vpow2.f32 %v12134_v40  ;;  %v12226_v28 = vadd.f32 1.0, %v8377_v18  ;;  %v12230_v49 = vsel %vm2020_vm4, %v12214_v43, 0.0  ;;  %v12261_v36 = vld [vmem:[%s13453_s5 + $0x8] ss:$0 sm:$0xff] }
 0x3a9   :  { %v2622_v19 = vld [vmem:[#allocation2 + $0x689] sm:$0xff]  ;;  %v12232_v37 = vadd.f32 %v2696_v42, %v2560_v5  ;;  %v2895_v41 = vmul.f32 %v12141_v32, %v2226_v30  ;;  %v12236_v1 = vmul.f32 %v12176_v20, %v2425_v55  ;;  %v12246_v40 = vmul.f32 %v12243_v33, %v2624_v13  ;;  %v2623_v52 = vld [vmem:[#allocation2 + $0x691] sm:$0xff] }
 0x3aa   :  { %v12238_v61 = vadd.f32 %v2697_v54, %v2561_v57  ;;  %v12249_v16 = vmul.f32 %v12243_v33, %v2625_v29  ;;  %v3494_v5 = vmul.f32 %v12189_v22, %v2226_v30  ;;  %v3694_v23 = vmul.f32 %v12205_v12, %v2425_v55  ;;  %v2227_v48 = vld [vmem:[#allocation2 + $0x6c7] sm:$0xff] }
 0x3ab   :  { %v2295_v59 = vmul.f32 %v12074_v3, %v2224_v25  ;;  %v2495_v39 = vmul.f32 %v12100_v31, %v2423_v10  ;;  %v2694_v18 = vmul.f32 %v12125_v44, %v2622_v19  ;;  %v12256_v8 = vpop.eup %8378  ;;  %v3893_v7 = vmul.f32 %v12261_v36, %v2624_v13 }
 0x3ac   :  { %v3894_v30 = vmul.f32 %v12261_v36, %v2625_v29  ;;  %v2893_v42 = vmul.f32 %v12141_v32, %v2224_v25  ;;  %v3292_v55 = vmul.f32 %v12243_v33, %v2622_v19  ;;  %v2695_v43 = vmul.f32 %v12125_v44, %v2623_v52 }
 0x3ad   :  { %v12267_v57 = vpop.eup %8380  ;;  %v2559_v54 = vadd.f32 %v2495_v39, %v2295_v59  ;;  %v2758_v4 = vadd.f32 %v2694_v18, %v2558_v17  ;;  %v3492_v26 = vmul.f32 %v12189_v22, %v2224_v25  ;;  %v3093_v13 = vmul.f32 %v12176_v20, %v2423_v10  ;;  %v3026_v39 = vld [vmem:[#allocation2 + $0x6e8] sm:$0xff] }
 0x3ae   :  { %v12271_v15 = vpop.eup %8382  ;;  %v2957_v27 = vadd.f32 %v2893_v42, %v12167_v53  ;;  %v3356_v9 = vadd.f32 %v3292_v55, %v3156_v47  ;;  %v3891_v29 = vmul.f32 %v12261_v36, %v2622_v19  ;;  %v3293_v62 = vmul.f32 %v12243_v33, %v2623_v52  ;;  %v2426_v47 = vld [vmem:[#allocation2 + $0x6c8] sm:$0xff] }
 0x3af   :  { %v2759_v6 = vadd.f32 %v2695_v43, %v2559_v54  ;;  %v3556_v45 = vadd.f32 %v3492_v26, %v3355_v38  ;;  %v3692_v59 = vmul.f32 %v12205_v12, %v2423_v10  ;;  %v3892_v53 = vmul.f32 %v12261_v36, %v2623_v52 }
 0x3b0   :  { %v12278_v17 = vpop.eup %8384  ;;  %v3157_v25 = vadd.f32 %v3093_v13, %v2957_v27  ;;  %v3557_v18 = vadd.f32 %v12182_v58, %v3356_v9  ;;  %v3955_v42 = vadd.f32 %v3891_v29, %v3755_v50  ;;  %v2958_v43 = vadd.f32 %v12170_v60, %v2758_v4  ;;  %v12294_v9 = vld [vmem:[%s13454_s6] ss:$0 sm:$0xff] }
 0x3b1   :  { %v12282_v55 = vpop.eup %8386  ;;  %v2959_v19 = vadd.f32 %v2895_v41, %v2759_v6  ;;  %v3756_v54 = vadd.f32 %v3692_v59, %v3556_v45  ;;  %v12286_v26 = vmul.f32 %v12141_v32, %v2826_v35  ;;  %v12300_v4 = vmul.f32 %v12176_v20, %v3026_v39 }
 0x3b2   :  { %v12288_v38 = vpop.eup %8388  ;;  %v3357_v10 = vadd.f32 %v3293_v62, %v3157_v25  ;;  %v3757_v27 = vadd.f32 %v12208_v51, %v3557_v18  ;;  %v12297_v58 = vadd.f32 %v12294_v9, %v3955_v42  ;;  %v12303_v6 = vmul.f32 %v12189_v22, %v2826_v35 }
 0x3b3   :  { %13893 = vst [vmem:[#allocation119_spill] sm:$0xff] %v12288_v38  ;;  %v3956_v45 = vadd.f32 %v3892_v53, %v3756_v54  ;;  %v2298_v60 = vmul.f32 %v12074_v3, %v2227_v48  ;;  %v2498_v62 = vmul.f32 %v12100_v31, %v2426_v47  ;;  %v2896_v52 = vmul.f32 %v12141_v32, %v2227_v48  ;;  %v3027_v53 = vld [vmem:[#allocation2 + $0x6f0] sm:$0xff] }
 0x3b4   :  { %13894 = vst [vmem:[#allocation69_spill] sm:$0xff] %v12297_v58  ;;  %v3558_v51 = vadd.f32 %v3494_v5, %v3357_v10  ;;  %v3957_v50 = vadd.f32 %v3893_v7, %v3757_v27  ;;  %v6908_v41 = vmul.f32 -1.442695, %v12297_v58  ;;  %v12313_v29 = vmul.f32 %v12205_v12, %v3026_v39  ;;  %v2827_v7 = vld [vmem:[#allocation2 + $0x6ef] sm:$0xff] }
 0x3b5   :  { %v12310_v13 = vadd.f32 %v12294_v9, %v3956_v45  ;;  %v3096_v59 = vmul.f32 %v12176_v20, %v2426_v47  ;;  %v3158_v35 = vadd.f32 %v12179_v56, %v2958_v43  ;;  %v2960_v5 = vadd.f32 %v2896_v52, %v12232_v37  ;;  %v3226_v27 = vld [vmem:[#allocation2 + $0x6e9] sm:$0xff]  ;;  %v3227_v45 = vld [vmem:[#allocation2 + $0x6f1] sm:$0xff] }
 0x3b6   :  { %v3758_v25 = vadd.f32 %v3694_v23, %v3558_v51  ;;  %v12318_v18 = vadd.f32 %v12294_v9, %v3957_v50  ;;  %8390 = vpow2.f32 %v6908_v41  ;;  %v2562_v54 = vadd.f32 %v2498_v62, %v2298_v60  ;;  %v2228_v51 = vld [vmem:[#allocation2 + $0x6cf] sm:$0xff] }
 0x3b7   :  { %13895 = vst [vmem:[#allocation75_spill] sm:$0xff] %v12310_v13  ;;  %v6909_v42 = vmul.f32 -1.442695, %v12310_v13  ;;  %v3358_v10 = vadd.f32 %v12246_v40, %v3158_v35  ;;  %v3495_v39 = vmul.f32 %v12189_v22, %v2227_v48  ;;  %v3160_v23 = vadd.f32 %v3096_v59, %v2960_v5  ;;  %v2427_v60 = vld [vmem:[#allocation2 + $0x6d0] sm:$0xff] }
 0x3b8   :  { %13896 = vst [vmem:[#allocation107_spill] sm:$0xff] %v12318_v18  ;;  %v3958_v58 = vadd.f32 %v3894_v30, %v3758_v25  ;;  %v6910_v56 = vmul.f32 -1.442695, %v12318_v18  ;;  %v3695_v43 = vmul.f32 %v12205_v12, %v2426_v47  ;;  %v2899_v50 = vmul.f32 %v12141_v32, %v2827_v7  ;;  %v2626_v62 = vld [vmem:[#allocation2 + $0x6c9] sm:$0xff]  ;;  %v2627_v40 = vld [vmem:[#allocation2 + $0x6d1] sm:$0xff] }
 0x3b9   :  { %8392 = vpow2.f32 %v6909_v42  ;;  %v3559_v37 = vadd.f32 %v3495_v39, %v3358_v10  ;;  %v3099_v41 = vmul.f32 %v12176_v20, %v3027_v53  ;;  %v3298_v48 = vmul.f32 %v12243_v33, %v3226_v27 }
 0x3ba   :  { %8394 = vpow2.f32 %v6910_v56  ;;  %v3299_v30 = vmul.f32 %v12243_v33, %v3227_v45  ;;  %v3498_v52 = vmul.f32 %v12189_v22, %v2827_v7  ;;  %v3698_v47 = vmul.f32 %v12205_v12, %v3027_v53 }
 0x3bb   :  { %v3759_v59 = vadd.f32 %v3695_v43, %v3559_v37  ;;  %v3897_v35 = vmul.f32 %v12261_v36, %v3226_v27  ;;  %v2299_v25 = vmul.f32 %v12074_v3, %v2228_v51  ;;  %v2499_v5 = vmul.f32 %v12100_v31, %v2427_v60 }
 0x3bc   :  { %v2698_v42 = vmul.f32 %v12125_v44, %v2626_v62  ;;  %v2699_v10 = vmul.f32 %v12125_v44, %v2627_v40  ;;  %v2897_v39 = vmul.f32 %v12141_v32, %v2228_v51  ;;  %v3097_v56 = vmul.f32 %v12176_v20, %v2427_v60 }
 0x3bd   :  { %v3159_v18 = vadd.f32 %v12236_v1, %v2959_v19  ;;  %v3296_v7 = vmul.f32 %v12243_v33, %v2626_v62  ;;  %v3297_v53 = vmul.f32 %v12243_v33, %v2627_v40  ;;  %v2563_v43 = vadd.f32 %v2499_v5, %v2299_v25 }
 0x3be   :  { %v2762_v27 = vadd.f32 %v2698_v42, %v2562_v54  ;;  %v2961_v3 = vadd.f32 %v2897_v39, %v12238_v61  ;;  %v3496_v31 = vmul.f32 %v12189_v22, %v2228_v51  ;;  %v3696_v44 = vmul.f32 %v12205_v12, %v2427_v60 }
 0x3bf   :  { %v3359_v37 = vadd.f32 %v12249_v16, %v3159_v18  ;;  %v3360_v13 = vadd.f32 %v3296_v7, %v3160_v23  ;;  %v3895_v32 = vmul.f32 %v12261_v36, %v2626_v62  ;;  %v2763_v38 = vadd.f32 %v2699_v10, %v2563_v43 }
 0x3c0   :  { %v8391_v20 = vpop.eup %8390  ;;  %v2962_v1 = vadd.f32 %v12286_v26, %v2762_v27  ;;  %v3161_v19 = vadd.f32 %v3097_v56, %v2961_v3  ;;  %v3896_v33 = vmul.f32 %v12261_v36, %v2627_v40  ;;  %v12352_v12 = vadd.f32 %v12294_v9, %v3958_v58 }
 0x3c1   :  { %v4282_v25 = vadd.f32 1.0, %v8391_v20  ;;  %v3560_v54 = vadd.f32 %v3496_v31, %v3359_v37  ;;  %v3561_v61 = vadd.f32 %v12303_v6, %v3360_v13  ;;  %v3959_v5 = vadd.f32 %v3895_v32, %v3759_v59  ;;  %v13901_v20 = vld [vmem:[#allocation104_spill] sm:$0xff] }
 0x3c2   :  { %v2963_v22 = vadd.f32 %v2899_v50, %v2763_v38  ;;  %v3162_v16 = vadd.f32 %v12300_v4, %v2962_v1  ;;  %v3361_v18 = vadd.f32 %v3297_v53, %v3161_v19  ;;  %v3898_v38 = vmul.f32 %v12261_v36, %v3227_v45  ;;  %v13902_v1 = vld [vmem:[#allocation124_spill] sm:$0xff] }
 0x3c3   :  { %v8393_v23 = vpop.eup %8392  ;;  %8396 = vrcp.f32 %v4282_v25  ;;  %v3760_v51 = vadd.f32 %v3696_v44, %v3560_v54  ;;  %v3761_v26 = vadd.f32 %v12313_v29, %v3561_v61  ;;  %v12356_v60 = vadd.f32 %v12294_v9, %v3959_v5  ;;  %v13904_v54 = vld [vmem:[#allocation69_spill] sm:$0xff] }
 0x3c4   :  { %v8395_v62 = vpop.eup %8394  ;;  %v4283_v40 = vadd.f32 1.0, %v8393_v23  ;;  %v3163_v42 = vadd.f32 %v3099_v41, %v2963_v22  ;;  %v3562_v6 = vadd.f32 %v3498_v52, %v3361_v18  ;;  %v3362_v13 = vadd.f32 %v3298_v48, %v3162_v16 }
 0x3c5   :  { %v3960_v4 = vadd.f32 %v3896_v33, %v3760_v51  ;;  %v6912_v50 = vmul.f32 -1.442695, %v12356_v60  ;;  %v3961_v58 = vadd.f32 %v3897_v35, %v3761_v26  ;;  %v4284_v59 = vadd.f32 1.0, %v8395_v62  ;;  %v13903_v33 = vld [vmem:[#allocation119_spill] sm:$0xff] }
 0x3c6   :  { %v3363_v10 = vadd.f32 %v3299_v30, %v3163_v42  ;;  %v3563_v39 = vadd.f32 %v11953_v2, %v3362_v13  ;;  %v3762_v56 = vadd.f32 %v3698_v47, %v3562_v6  ;;  %8398 = vrcp.f32 %v4283_v40  ;;  %v13905_v42 = vld [vmem:[#allocation75_spill] sm:$0xff] }
 0x3c7   :  { %v12362_v29 = vadd.f32 %v12294_v9, %v3960_v4  ;;  %v12365_v7 = vadd.f32 %v12294_v9, %v3961_v58  ;;  %v6911_v41 = vmul.f32 -1.442695, %v12352_v12  ;;  %8400 = vpow2.f32 %v6912_v50  ;;  %v13906_v50 = vld [vmem:[#allocation122_spill] sm:$0xff]  ;;  %v13907_v58 = vld [vmem:[#allocation77_spill] sm:$0xff] }
 0x3c8   :  { %v3564_v36 = vadd.f32 %v11956_v21, %v3363_v10  ;;  %v3763_v45 = vadd.f32 %v11959_v14, %v3563_v39  ;;  %v3962_v48 = vadd.f32 %v3898_v38, %v3762_v56  ;;  %v12372_v30 = vmul.f32 %v12256_v8, %v12058_v11  ;;  %v13897_v21 = vld [vmem:[#allocation103_spill] sm:$0xff] }
 0x3c9   :  { %v6913_v2 = vmul.f32 -1.442695, %v12362_v29  ;;  %8402 = vpow2.f32 %v6911_v41  ;;  %v6914_v52 = vmul.f32 -1.442695, %v12365_v7  ;;  %v13898_v14 = vld [vmem:[#allocation123_spill] sm:$0xff]  ;;  %v4591_v11 = vadd.f32 %v12230_v49, %v12222_v46 }
 0x3ca   :  { %8404 = vrcp.f32 %v4284_v59  ;;  %v3764_v47 = vadd.f32 %v11962_v63, %v3564_v36  ;;  %v3963_v35 = vadd.f32 %v11975_v24, %v3763_v45  ;;  %v12379_v53 = vadd.f32 %v12294_v9, %v3962_v48  ;;  %v13899_v49 = vld [vmem:[#allocation115_spill] sm:$0xff]  ;;  %v13908_v45 = vld [vmem:[#allocation112_spill] sm:$0xff] }
 0x3cb   :  { %v12383_v43 = vmul.f32 %v13898_v14, %v13897_v21  ;;  %8406 = vpow2.f32 %v6913_v2  ;;  %v4256_v8 = vadd.f32 1.0, %v12267_v57  ;;  %v12395_v31 = vmul.f32 %v12282_v55, %v12083_v0  ;;  %v13909_v2 = vld [vmem:[#allocation125_spill] sm:$0xff] }
 0x3cc   :  { %v3964_v27 = vadd.f32 %v11983_v34, %v3764_v47  ;;  %v12390_v3 = vadd.f32 %v12294_v9, %v3963_v35  ;;  %8408 = vpow2.f32 %v6914_v52  ;;  %v6915_v63 = vmul.f32 -1.442695, %v12379_v53  ;;  %v13900_v34 = vld [vmem:[#allocation128_spill] sm:$0xff]  ;;  %v13910_v52 = vld [vmem:[#allocation109_spill] sm:$0xff] }
 0x3cd   :  { %v8397_v24 = vpop.eup %8396  ;;  %v4592_v37 = vsel %vm2020_vm4, %v12372_v30, 0.0  ;;  %v4257_v46 = vadd.f32 1.0, %v12271_v15  ;;  %8410 = vrcp.f32 %v12226_v28  ;;  %v4528_v57 = vadd.f32 %v13900_v34, %v13899_v49 }
 0x3ce   :  { %v12404_v44 = vadd.f32 %v12294_v9, %v3964_v27  ;;  %8412 = vpow2.f32 %v6915_v63  ;;  %v6916_v32 = vmul.f32 -1.442695, %v12390_v3  ;;  %v4529_v0 = vsel %vm2020_vm4, %v12383_v43, 0.0  ;;  %v13912_v63 = vld [vmem:[#allocation113_spill] sm:$0xff] }
 0x3cf   :  { %v4258_v55 = vadd.f32 1.0, %v12278_v17  ;;  %8414 = vrcp.f32 %v4256_v8  ;;  %v12412_v15 = vmul.f32 %v13902_v1, %v13901_v20  ;;  %v4593_v28 = vadd.f32 %v4592_v37, %v4591_v11  ;;  %v13911_v11 = vld [vmem:[#allocation107_spill] sm:$0xff] }
 0x3d0   :  { %8416 = vpow2.f32 %v6916_v32  ;;  %v6917_v19 = vmul.f32 -1.442695, %v12404_v44  ;;  %v4259_v9 = vadd.f32 1.0, %v13903_v33  ;;  %v8399_v25 = vpop.eup %8398  ;;  %v12417_v61 = vmul.f32 %v8397_v24, %v13904_v54  ;;  %v13914_v54 = vld [vmem:[#allocation114_spill] sm:$0xff] }
 0x3d1   :  { %v4594_v5 = vsel %vm2020_vm4, %v12395_v31, 0.0  ;;  %8418 = vrcp.f32 %v4257_v46  ;;  %v8401_v17 = vpop.eup %8400  ;;  %v4530_v18 = vadd.f32 %v4529_v0, %v4528_v57  ;;  %v4531_v62 = vsel %vm2020_vm4, %v12412_v15, 0.0  ;;  %v13913_v0 = vld [vmem:[#allocation74_spill] sm:$0xff] }
 0x3d2   :  { %8420 = vpow2.f32 %v6917_v19  ;;  %v4286_v16 = vadd.f32 1.0, %v8401_v17  ;;  %v4595_v51 = vadd.f32 %v4594_v5, %v4593_v28  ;;  %v12424_v6 = vmul.f32 %v8399_v25, %v13905_v42 }
 0x3d3   :  { %v8403_v22 = vpop.eup %8402  ;;  %8422 = vrcp.f32 %v4258_v55  ;;  %v4596_v13 = vsel %vm2020_vm4, %v12417_v61, 0.0  ;;  %v12430_v59 = vmul.f32 %v13907_v58, %v13906_v50  ;;  %v4532_v56 = vadd.f32 %v4531_v62, %v4530_v18 }
 0x3d4   :  { %v8405_v23 = vpop.eup %8404  ;;  %v4285_v26 = vadd.f32 1.0, %v8403_v22  ;;  %8424 = vrcp.f32 %v4259_v9  ;;  %v4597_v36 = vadd.f32 %v4596_v13, %v4595_v51  ;;  %v12437_v47 = vmul.f32 %v13910_v52, %v13909_v2 }
 0x3d5   :  { %v8407_v40 = vpop.eup %8406  ;;  %8426 = vrcp.f32 %v4286_v16  ;;  %v4598_v21 = vsel %vm2020_vm4, %v12424_v6, 0.0  ;;  %v12442_v8 = vmul.f32 %v8405_v23, %v13911_v11  ;;  %v4535_v46 = vsel %vm2020_vm4, %v12430_v59, 0.0  ;;  %v13915_v23 = vld [vmem:[#allocation117_spill] sm:$0xff] }
 0x3d6   :  { %v8409_v38 = vpop.eup %8408  ;;  %v4287_v4 = vadd.f32 1.0, %v8407_v40  ;;  %8428 = vrcp.f32 %v4285_v26  ;;  %v4537_v20 = vsel %vm2020_vm4, %v12437_v47, 0.0  ;;  %v4599_v1 = vadd.f32 %v4598_v21, %v4597_v36 }
 0x3d7   :  { %v8411_v10 = vpop.eup %8410  ;;  %v4288_v39 = vadd.f32 1.0, %v8409_v38  ;;  %v4600_v9 = vsel %vm2020_vm4, %v12442_v8, 0.0 }
 0x3d8   :  { %v8413_v41 = vpop.eup %8412  ;;  %8430 = vrcp.f32 %v4287_v4  ;;  %v12433_v48 = vmul.f32 %v8411_v10, %v13908_v45  ;;  %v4601_v40 = vadd.f32 %v4600_v9, %v4599_v1 }
 0x3d9   :  { %v8415_v35 = vpop.eup %8414  ;;  %v4289_v14 = vadd.f32 1.0, %v8413_v41  ;;  %8432 = vrcp.f32 %v4288_v39 }
 0x3da   :  { %v8417_v27 = vpop.eup %8416  ;;  %v12445_v24 = vmul.f32 %v8415_v35, %v13912_v63  ;;  %v4533_v37 = vsel %vm2020_vm4, %v12433_v48, 0.0 }
 0x3db   :  { %v8419_v49 = vpop.eup %8418  ;;  %v4290_v34 = vadd.f32 1.0, %v8417_v27  ;;  %8434 = vrcp.f32 %v4289_v14  ;;  %v4534_v57 = vadd.f32 %v4533_v37, %v4532_v56 }
 0x3dc   :  { %v8421_v32 = vpop.eup %8420  ;;  %v12452_v55 = vmul.f32 %v8419_v49, %v13913_v0  ;;  %v4539_v17 = vsel %vm2020_vm4, %v12445_v24, 0.0 }
 0x3dd   :  { %v8423_v28 = vpop.eup %8422  ;;  %v4291_v19 = vadd.f32 1.0, %v8421_v32  ;;  %8436 = vrcp.f32 %v4290_v34  ;;  %v4536_v33 = vadd.f32 %v4535_v46, %v4534_v57 }
 0x3de   :  { %v8425_v25 = vpop.eup %8424  ;;  %v12459_v5 = vmul.f32 %v8423_v28, %v13914_v54  ;;  %v4541_v62 = vsel %vm2020_vm4, %v12452_v55, 0.0 }
 0x3df   :  { %v8427_v22 = vpop.eup %8426  ;;  %8438 = vrcp.f32 %v4291_v19  ;;  %v4538_v16 = vadd.f32 %v4537_v20, %v4536_v33  ;;  %v12464_v51 = vmul.f32 %v8425_v25, %v13915_v23 }
 0x3e0   :  { %v8429_v18 = vpop.eup %8428  ;;  %v12467_v26 = vmul.f32 %v8427_v22, %v12356_v60  ;;  %v4543_v4 = vsel %vm2020_vm4, %v12459_v5, 0.0 }
 0x3e1   :  { %v12472_v42 = vmul.f32 %v8429_v18, %v12352_v12  ;;  %v4540_v13 = vadd.f32 %v4539_v17, %v4538_v16  ;;  %v4545_v12 = vsel %vm2020_vm4, %v12464_v51, 0.0 }
 0x3e2   :  { %v8431_v38 = vpop.eup %8430  ;;  %v4604_v39 = vsel %vm2020_vm4, %v12467_v26, 0.0 }
 0x3e3   :  { %v8433_v50 = vpop.eup %8432  ;;  %v12477_v58 = vmul.f32 %v8431_v38, %v12362_v29  ;;  %v4542_v10 = vadd.f32 %v4541_v62, %v4540_v13  ;;  %v4602_v60 = vsel %vm2020_vm4, %v12472_v42, 0.0 }
 0x3e4   :  { %v12484_v56 = vmul.f32 %v8433_v50, %v12365_v7  ;;  %v4603_v41 = vadd.f32 %v4602_v60, %v4601_v40 }
 0x3e5   :  { %v8435_v36 = vpop.eup %8434  ;;  %v4544_v45 = vadd.f32 %v4543_v4, %v4542_v10  ;;  %v4606_v29 = vsel %vm2020_vm4, %v12477_v58, 0.0  ;;  %v6918_v4 = vld [vmem:[%s13457_s8] ss:$0 sm:$0xff] }
 0x3e6   :  { %v12491_v2 = vmul.f32 %v8435_v36, %v12379_v53  ;;  %v4605_v52 = vadd.f32 %v4604_v39, %v4603_v41  ;;  %v4608_v14 = vsel %vm2020_vm4, %v12484_v56, 0.0 }
 0x3e7   :  { %v8437_v35 = vpop.eup %8436  ;;  %v4546_v21 = vadd.f32 %v4545_v12, %v4544_v45 }
 0x3e8   :  { %v12496_v7 = vmul.f32 %v8437_v35, %v12390_v3  ;;  %v4607_v11 = vadd.f32 %v4606_v29, %v4605_v52  ;;  %v4610_v37 = vsel %vm2020_vm4, %v12491_v2, 0.0 }
 0x3e9   :  { %v8439_v27 = vpop.eup %8438  ;;  %v4547_v63 = vrot.slane %v4546_v21, 4 }
 0x3ea   :  { %v12501_v46 = vmul.f32 %v8439_v27, %v12404_v44  ;;  %v4609_v53 = vadd.f32 %v4608_v14, %v4607_v11  ;;  %v4612_v34 = vsel %vm2020_vm4, %v12496_v7, 0.0  ;;  %v7668_v14 = vld [vmem:[%s13458_s11 + $0x8] sm:$0xff]   ;;  %v7669_v11 = vld [vmem:[%s13458_s11 + $0x10] sm:$0xff]   ;;  %v7670_v27 = vld [vmem:[%s13458_s11 + $0x18] sm:$0xff]  }
 0x3eb   :  { %v4548_v49 = vadd.f32 %v4547_v63, %v4546_v21  ;;  %v7667_v21 = vld [vmem:[%s13458_s11] sm:$0xff]  }
 0x3ec   :  { %v4611_v57 = vadd.f32 %v4610_v37, %v4609_v53  ;;  %v4614_v3 = vsel %vm2020_vm4, %v12501_v46, 0.0  ;;  %7486 = vmatprep.subr.bf16.mxu1 %v7667_v21  ;;  %v6925_v63 = vld [vmem:[%s13459_s10] ss:$0 sm:$0xff] }
 0x3ed   :  { %v4549_v32 = vrot.slane %v4548_v49, 2 }
 0x3ee   :  { %v4613_v0 = vadd.f32 %v4612_v34, %v4611_v57 }
 0x3ef   :  { %v4550_v20 = vadd.f32 %v4549_v32, %v4548_v49 }
 0x3f0   :  { %v4615_v1 = vadd.f32 %v4614_v3, %v4613_v0 }
 0x3f1   :  { %v4551_v28 = vrot.slane %v4550_v20, 1 }
 0x3f2   :  { %v4616_v19 = vrot.slane %v4615_v1, 4 }
 0x3f3   :  { %v4552_v9 = vadd.f32 %v4551_v28, %v4550_v20  ;;  %v8752_v20 = vmov 1966171168   ;;  %v4789_v28 = vlaneseq }
 0x3f4   :  { %v4617_v33 = vadd.f32 %v4616_v19, %v4615_v1  ;;  %v4787_v1 = vunpack.c.l.s4 %v8752_v20 }
 0x3f5   :  { %v4622_v17 = vmul.f32 0.00390625, %v4552_v9 }
 0x3f6   :  { %v4618_v25 = vrot.slane %v4617_v33, 2  ;;  %v4788_v19 = vunpack.c.0.s8 %v4787_v1 }
 0x3f7   :  { %v4624_v18 = vpack.c.bf16 %v4622_v17, %v4622_v17 }
 0x3f8   :  { %v4619_v44 = vadd.f32 %v4618_v25, %v4617_v33  ;;  %v12526_v33 = vshrl.u32 %v4789_v28, 7 }
 0x3f9   :  { %v4643_v62 = vunpack.c.l.b16 %v4624_v18 }
 0x3fa   :  { %v4620_v54 = vrot.slane %v4619_v44, 1  ;;  %v4791_v9 = vsub.s32 %v4788_v19, %v12526_v33  ;;  %v13930_v19 = vld [vmem:[#allocation95_spill] sm:$0xff] }
 0x3fc   :  { %v4621_v22 = vadd.f32 %v4620_v54, %v4619_v44  ;;  %v4810_v54 = vsub.s32 0, %v12526_v33 }
 0x3fe   :  { %v4623_v16 = vmul.f32 0.00390625, %v4621_v22 }
 0x400   :  { %v4625_v23 = vpack.c.bf16 %v4623_v16, %v4623_v16  ;;  %v13916_v16 = vld [vmem:[#allocation73_spill] sm:$0xff] }
 0x402   :  { %v4644_v40 = vunpack.c.l.b16 %v4625_v23  ;;  %v13917_v23 = vld [vmem:[#allocation72_spill] sm:$0xff] }
 0x404   :  { %v4646_v13 = vsel %vm4645_vm9, %v4644_v40, %v4643_v62  ;;  %v13918_v40 = vld [vmem:[#allocation76_spill] sm:$0xff] }
 0x405   :  { %v4647_v38 = vpack.c.b16 %v4646_v13, %v4646_v13 }
 0x407   :  { %7477 = vmatmul.mubr.msk.bf16.vlgmr.msra.gmra.mrb[64].mxu1 %vm2020_vm4, %v4647_v38  ;;  %v13919_v38 = vld [vmem:[#allocation78_spill] sm:$0xff] }
 0x408   :  { %7487 = vmatpush3.bf16.msra.mxu1 %v7667_v21  ;;  %v13924_v21 = vld [vmem:[#allocation84_spill] sm:$0xff] }
 0x409   :  { %7488 = vmatprep.subr.bf16.mxu1 %v7668_v14 }
 0x40c   :  { %7489 = vmatpush3.bf16.msra.mxu1 %v7668_v14 }
 0x40d   :  { %7490 = vmatprep.subr.bf16.mxu1 %v7669_v11 }
 0x410   :  { %7491 = vmatpush3.bf16.msra.mxu1 %v7669_v11  ;;  %v13925_v11 = vld [vmem:[#allocation67_spill] sm:$0xff] }
 0x411   :  { %7492 = vmatprep.subr.bf16.mxu1 %v7670_v27 }
 0x414   :  { %7493 = vmatpush3.bf16.msra.mxu1 %v7670_v27 }
 0x4da   :  { %v4709_v50 = vpop.f32.mrb[64].mxu1 }
 0x4db   :  { %v4710_v10 = vadd.f32 %v6918_v4, %v4709_v50  ;;  %v7478_v60 = vpop.f32.mrb[65].mxu1  ;;  %v13920_v50 = vld [vmem:[#allocation80_spill] sm:$0xff] }
 0x4dc   :  { %v4712_v39 = vpop.f32.mrb[66].mxu1  ;;  %v13921_v60 = vld [vmem:[#allocation81_spill] sm:$0xff] }
 0x4dd   :  { %v6924_v12 = vmul.f32 -1.442695, %v4710_v10  ;;  %v7479_v41 = vpop.f32.mrb[67].mxu1 }
 0x4df   :  { %8440 = vpow2.f32 %v6924_v12 }
 0x4e9   :  { %v8441_v36 = vpop.eup %8440 }
 0x4ea   :  { %v4718_v45 = vadd.f32 1.0, %v8441_v36 }
 0x4ec   :  { %8442 = vrcp.f32 %v4718_v45  ;;  %v13922_v45 = vld [vmem:[#allocation82_spill] sm:$0xff] }
 0x4f6   :  { %v8443_v29 = vpop.eup %8442 }
 0x4f7   :  { %v4721_v52 = vmul.f32 %v8443_v29, %v4710_v10 }
 0x4f9   :  { %v4722_v35 = vpack.c.bf16 %v4721_v52, %v4721_v52  ;;  %v13923_v52 = vld [vmem:[#allocation83_spill] sm:$0xff] }
 0x4fb   :  { %7483 = vmatmul.mubr.msk.bf16.vlgmr.msra.gmra.mrb[64].mxu0 %vm4731_vm10, %v4722_v35 }
 0x5ce   :  { %v4773_v37 = vpop.f32.mrb[64].mxu0 }
 0x5cf   :  { %v4774_v53 = vadd.f32 %v6925_v63, %v4773_v37  ;;  %v7484_v49 = vpop.f32.mrb[65].mxu0 }
 0x5d0   :  { %v4776_v34 = vpop.f32.mrb[66].mxu0 }
 0x5d1   :  { %v6927_v57 = vmul.f32 -1.442695, %v4774_v53  ;;  %v7485_v32 = vpop.f32.mrb[67].mxu0  ;;  %v13926_v53 = vld [vmem:[#allocation88_spill] sm:$0xff]  ;;  %v13927_v34 = vld [vmem:[#allocation90_spill] sm:$0xff] }
 0x5d2   :  { %v13928_v32 = vld [vmem:[#allocation91_spill] sm:$0xff] }
 0x5d3   :  { %8444 = vpow2.f32 %v6927_v57 }
 0x5dd   :  { %v8445_v3 = vpop.eup %8444 }
 0x5de   :  { %v4782_v0 = vadd.f32 1.0, %v8445_v3 }
 0x5e0   :  { %8446 = vrcp.f32 %v4782_v0  ;;  %v13929_v0 = vld [vmem:[#allocation92_spill] sm:$0xff] }
 0x5ea   :  { %v8447_v25 = vpop.eup %8446 }
 0x5eb   :  { %v4792_v44 = vrot.slane %v8447_v25, %v4791_v9  ;;  %v13931_v25 = vld [vmem:[#allocation97_spill] sm:$0xff] }
 0x5ed   :  { %v4800_v17 = vrot.slane %v4792_v44, %v4791_v9 }
 0x5ef   :  { %v12530_v22 = vrot.slane %v4800_v17, %v4810_v54 }
 0x5f1   :  { %v4818_v18 = vmul.f32 %v12530_v22, %v13916_v16  ;;  %v4819_v62 = vmul.f32 %v12530_v22, %v13917_v23  ;;  %v4820_v13 = vmul.f32 %v12530_v22, %v13918_v40  ;;  %v4821_v4 = vmul.f32 %v12530_v22, %v13919_v38  ;;  %v13932_v16 = vld [vmem:[#allocation98_spill] sm:$0xff]  ;;  %v13933_v23 = vld [vmem:[#allocation99_spill] sm:$0xff] }
 0x5f2   :  { %v4822_v10 = vmul.f32 %v12530_v22, %v13920_v50  ;;  %v4823_v39 = vmul.f32 %v12530_v22, %v13921_v60  ;;  %v4824_v29 = vmul.f32 %v12530_v22, %v13922_v45  ;;  %v4825_v35 = vmul.f32 %v12530_v22, %v13923_v52  ;;  %v13934_v38 = vld [vmem:[#allocation102_spill] sm:$0xff]  ;;  %v13935_v50 = vld [vmem:[#allocation105_spill] sm:$0xff] }
 0x5f3   :  { %v4882_v12 = vpack.c.bf16 %v4819_v62, %v4818_v18  ;;  %v4883_v41 = vpack.c.bf16 %v4821_v4, %v4820_v13  ;;  %v4826_v14 = vmul.f32 %v12530_v22, %v13924_v21  ;;  %v4827_v27 = vmul.f32 %v12530_v22, %v13925_v11  ;;  %v13936_v60 = vld [vmem:[#allocation106_spill] sm:$0xff] }
 0x5f4   :  { %v4884_v36 = vpack.c.bf16 %v4823_v39, %v4822_v10  ;;  %v4885_v63 = vpack.c.bf16 %v4825_v35, %v4824_v29  ;;  %v4828_v49 = vmul.f32 %v12530_v22, %v13926_v53  ;;  %v4829_v57 = vmul.f32 %v12530_v22, %v13927_v34  ;;  %v13938_v29 = vld [vmem:[#allocation126_spill] sm:$0xff] }
 0x5f5   :  { %7494 = vmatprep.mubr.msk.bf16.mxu1 %vm2020_vm4, %v4882_v12  ;;  %v4886_v37 = vpack.c.bf16 %v4827_v27, %v4826_v14  ;;  %v4830_v3 = vmul.f32 %v12530_v22, %v13928_v32  ;;  %v4831_v20 = vmul.f32 %v12530_v22, %v13929_v0  ;;  %v4832_v33 = vmul.f32 %v12530_v22, %v13930_v19  ;;  %v13937_v12 = vld [vmem:[#allocation108_spill] sm:$0xff] }
 0x5f6   :  { %7495 = vmatmul.mubr.msk.bf16.vlgmr.msra.gmra.mrb[68].mxu1 %vm2020_vm4, %v4883_v41  ;;  %v4887_v1 = vpack.c.bf16 %v4829_v57, %v4828_v49  ;;  %v4833_v17 = vmul.f32 %v12530_v22, %v13931_v25  ;;  %v4834_v18 = vmul.f32 %v12530_v22, %v13932_v16  ;;  %v4835_v62 = vmul.f32 %v12530_v22, %v13933_v23  ;;  %v13940_v57 = vld [vmem:[#allocation120_spill] sm:$0xff]  ;;  %v13946_v16 = vld [vmem:[#allocation93_spill] sm:$0xff]  ;;  %v13947_v23 = vld [vmem:[#allocation118_spill] sm:$0xff] }
 0x5f7   :  { %7498 = vmatprep.mubr.msk.bf16.mxu1 %vm2020_vm4, %v4884_v36  ;;  %v4888_v28 = vpack.c.bf16 %v4831_v20, %v4830_v3  ;;  %v4836_v4 = vmul.f32 %v12530_v22, %v13934_v38  ;;  %v4837_v10 = vmul.f32 %v12530_v22, %v13935_v50  ;;  %v4838_v39 = vmul.f32 %v12530_v22, %v13936_v60  ;;  %v13941_v3 = vld [vmem:[#allocation131_spill] sm:$0xff]  ;;  %v13945_v25 = vld [vmem:[#allocation96_spill] sm:$0xff]  ;;  %v13949_v50 = vld [vmem:[#allocation86_spill] sm:$0xff] }
 0x5f8   :  { %v4889_v40 = vpack.c.bf16 %v4833_v17, %v4832_v33  ;;  %v4890_v13 = vpack.c.bf16 %v4835_v62, %v4834_v18  ;;  %v4839_v41 = vmul.f32 %v12530_v22, %v13937_v12  ;;  %v4840_v52 = vmul.f32 %v12530_v22, %v13938_v29  ;;  %v13942_v20 = vld [vmem:[#allocation79_spill] sm:$0xff]  ;;  %v13950_v60 = vld [vmem:[#allocation94_spill] sm:$0xff]  ;;  %v13951_v12 = vld [vmem:[#allocation100_spill] sm:$0xff] }
 0x5f9   :  { %v4891_v36 = vpack.c.bf16 %v4837_v10, %v4836_v4  ;;  %v4841_v35 = vmul.f32 %v12530_v22, %v12383_v43  ;;  %v4842_v21 = vmul.f32 %v12530_v22, %v12412_v15  ;;  %v4843_v14 = vmul.f32 %v12530_v22, %v12433_v48 }
 0x5fa   :  { %v4892_v45 = vpack.c.bf16 %v4839_v41, %v4838_v39  ;;  %v4793_v27 = vcombine.high %v4792_v44, %v4792_v44  ;;  %v4845_v53 = vmul.f32 %v12530_v22, %v12437_v47  ;;  %v4846_v15 = vmul.f32 %v12530_v22, %v12445_v24 }
 0x5fb   :  { %v4893_v11 = vpack.c.bf16 %v4841_v35, %v4840_v52  ;;  %v4847_v48 = vmul.f32 %v12530_v22, %v12452_v55  ;;  %v4849_v47 = vmul.f32 %v12530_v22, %v12464_v51  ;;  %v13953_v35 = vld [vmem:[#allocation68_spill] sm:$0xff] }
 0x5fc   :  { %v4807_v43 = vrot.slane %v4793_v27, %v4791_v9  ;;  %v13939_v9 = vld [vmem:[#allocation129_spill] sm:$0xff] }
 0x5fd   :  { %v4896_v34 = vpack.c.bf16 %v4847_v48, %v4846_v15  ;;  %v13955_v27 = vld [vmem:[#allocation121_spill] sm:$0xff]  ;;  %v13957_v48 = vld [vmem:[#allocation130_spill] sm:$0xff] }
 0x5fe   :  { %7499 = vmatmul.mubr.msk.bf16.gmra.mrb[72].mxu1 %vm2020_vm4, %v4885_v63  ;;  %v4894_v63 = vpack.c.bf16 %v4843_v14, %v4842_v21  ;;  %v12605_v44 = vrot.slane %v4807_v43, %v4810_v54  ;;  %v13954_v14 = vld [vmem:[#allocation87_spill] sm:$0xff] }
 0x5ff   :  { %7502 = vmatprep.mubr.msk.bf16.mxu1 %vm2020_vm4, %v4886_v37  ;;  %v4844_v37 = vmul.f32 %v12530_v22, %v12430_v59  ;;  %v4848_v59 = vmul.f32 %v12530_v22, %v12459_v5  ;;  %v13944_v22 = vld [vmem:[#allocation89_spill] sm:$0xff] }
 0x600   :  { %v4850_v24 = vmul.f32 %v12605_v44, %v13939_v9  ;;  %v4851_v55 = vmul.f32 %v12605_v44, %v13940_v57  ;;  %v4852_v0 = vmul.f32 %v12605_v44, %v13941_v3  ;;  %v4853_v5 = vmul.f32 %v12605_v44, %v13942_v20 }
 0x601   :  { %v4895_v49 = vpack.c.bf16 %v4845_v53, %v4844_v37  ;;  %v4897_v32 = vpack.c.bf16 %v4849_v47, %v4848_v59  ;;  %v4856_v17 = vmul.f32 %v12605_v44, %v13945_v25  ;;  %v4857_v18 = vmul.f32 %v12605_v44, %v13946_v16  ;;  %v13956_v37 = vld [vmem:[#allocation127_spill] sm:$0xff] }
 0x602   :  { %v4898_v54 = vpack.c.bf16 %v4851_v55, %v4850_v24  ;;  %v4899_v19 = vpack.c.bf16 %v4853_v5, %v4852_v0  ;;  %v4858_v62 = vmul.f32 %v12605_v44, %v13947_v23  ;;  %v4860_v10 = vmul.f32 %v12605_v44, %v13949_v50  ;;  %v7671_v24 = vld [vmem:[%s13460_s13] sm:$0xff]  }
 0x603   :  { %v4901_v38 = vpack.c.bf16 %v4857_v18, %v4856_v17  ;;  %v4861_v39 = vmul.f32 %v12605_v44, %v13950_v60  ;;  %v4862_v41 = vmul.f32 %v12605_v44, %v13951_v12  ;;  %v4864_v21 = vmul.f32 %v12605_v44, %v13953_v35  ;;  %7558 = vmatprep.subr.bf16.mxu0 %v7671_v24  ;;  %v13960_v17 = vld [vmem:[#allocation3_spill] sm:$0xff]  ;;  %v13961_v18 = vld [vmem:[#allocation5_spill] sm:$0xff] }
 0x604   :  { %v4867_v53 = vmul.f32 %v12605_v44, %v13956_v37  ;;  %v4870_v47 = vmul.f32 %v12605_v44, %v12372_v30  ;;  %v4871_v9 = vmul.f32 %v12605_v44, %v12395_v31  ;;  %7559 = vmatpush3.bf16.msra.mxu0 %v7671_v24  ;;  %v4873_v30 = vmul.f32 %v12605_v44, %v12424_v6 }
 0x605   :  { %v4903_v29 = vpack.c.bf16 %v4861_v39, %v4860_v10  ;;  %v4874_v31 = vmul.f32 %v12605_v44, %v12442_v8  ;;  %v4876_v20 = vmul.f32 %v12605_v44, %v12467_v26  ;;  %v4878_v6 = vmul.f32 %v12605_v44, %v12484_v56 }
 0x606   :  { %7503 = vmatmul.mubr.msk.bf16.gmra.mrb[76].mxu1 %vm2020_vm4, %v4887_v1  ;;  %v13943_v1 = vld [vmem:[#allocation71_spill] sm:$0xff]  ;;  %v4908_v55 = vpack.c.bf16 %v4871_v9, %v4870_v47  ;;  %v4879_v8 = vmul.f32 %v12605_v44, %v12491_v2  ;;  %v4881_v26 = vmul.f32 %v12605_v44, %v12501_v46 }
 0x607   :  { %7506 = vmatprep.mubr.msk.bf16.mxu1 %vm2020_vm4, %v4888_v28  ;;  %v4854_v51 = vmul.f32 %v12605_v44, %v13943_v1  ;;  %v4855_v28 = vmul.f32 %v12605_v44, %v13944_v22  ;;  %v4880_v1 = vmul.f32 %v12605_v44, %v12496_v7  ;;  %v13967_v9 = vld [vmem:[#allocation11_spill] sm:$0xff] }
 0x609   :  { %v4900_v33 = vpack.c.bf16 %v4855_v28, %v4854_v51  ;;  %v4913_v51 = vpack.c.bf16 %v4881_v26, %v4880_v1 }
 0x60e   :  { %7507 = vmatmul.mubr.msk.bf16.gmra.mrb[80].mxu1 %vm2020_vm4, %v4889_v40  ;;  %v13948_v40 = vld [vmem:[#allocation111_spill] sm:$0xff] }
 0x60f   :  { %7510 = vmatprep.mubr.msk.bf16.mxu1 %vm2020_vm4, %v4890_v13  ;;  %v4859_v13 = vmul.f32 %v12605_v44, %v13948_v40 }
 0x611   :  { %v4902_v4 = vpack.c.bf16 %v4859_v13, %v4858_v62  ;;  %v13962_v62 = vld [vmem:[#allocation6_spill] sm:$0xff] }
 0x616   :  { %7511 = vmatmul.mubr.msk.bf16.gmra.mrb[84].mxu1 %vm2020_vm4, %v4891_v36  ;;  %v13952_v36 = vld [vmem:[#allocation85_spill] sm:$0xff] }
 0x617   :  { %7514 = vmatprep.mubr.msk.bf16.mxu1 %vm2020_vm4, %v4892_v45  ;;  %v4863_v45 = vmul.f32 %v12605_v44, %v13952_v36 }
 0x619   :  { %v4904_v52 = vpack.c.bf16 %v4863_v45, %v4862_v41  ;;  %v13963_v45 = vld [vmem:[#allocation7_spill] sm:$0xff] }
 0x61e   :  { %7515 = vmatmul.mubr.msk.bf16.gmra.mrb[88].mxu1 %vm2020_vm4, %v4893_v11  ;;  %v4865_v11 = vmul.f32 %v12605_v44, %v13954_v14 }
 0x61f   :  { %7518 = vmatprep.mubr.msk.bf16.mxu1 %vm2020_vm4, %v4894_v63  ;;  %v4866_v63 = vmul.f32 %v12605_v44, %v13955_v27 }
 0x620   :  { %v4905_v43 = vpack.c.bf16 %v4865_v11, %v4864_v21  ;;  %v13965_v21 = vld [vmem:[#allocation9_spill] sm:$0xff]  ;;  %v13966_v11 = vld [vmem:[#allocation10_spill] sm:$0xff] }
 0x621   :  { %v4906_v15 = vpack.c.bf16 %v4867_v53, %v4866_v63 }
 0x626   :  { %7519 = vmatmul.mubr.msk.bf16.gmra.mrb[92].mxu1 %vm2020_vm4, %v4895_v49  ;;  %v4868_v49 = vmul.f32 %v12605_v44, %v13957_v48 }
 0x627   :  { %7522 = vmatprep.mubr.msk.bf16.mxu1 %vm2020_vm4, %v4896_v34  ;;  %v13958_v34 = vld [vmem:[#allocation70_spill] sm:$0xff] }
 0x628   :  { %v4869_v59 = vmul.f32 %v12605_v44, %v13958_v34 }
 0x62a   :  { %v4907_v57 = vpack.c.bf16 %v4869_v59, %v4868_v49 }
 0x62e   :  { %7523 = vmatmul.mubr.msk.bf16.gmra.mrb[96].mxu1 %vm2020_vm4, %v4897_v32  ;;  %v4872_v32 = vmul.f32 %v12605_v44, %v12417_v61  ;;  %v4877_v61 = vmul.f32 %v12605_v44, %v12477_v58  ;;  %v12700_v58 = vld [vmem:[%s13461_s12] ss:$0 sm:$0xff] }
 0x62f   :  { %7526 = vmatprep.mubr.msk.bf16.mxu1 %vm2020_vm4, %v4898_v54  ;;  %v4875_v54 = vmul.f32 %v12605_v44, %v12472_v42  ;;  %v4912_v42 = vpack.c.bf16 %v4879_v8, %v4878_v6  ;;  %v13959_v44 = vld [vmem:[#allocation4_spill] sm:$0xff] }
 0x630   :  { %v4909_v3 = vpack.c.bf16 %v4873_v30, %v4872_v32  ;;  %v4911_v5 = vpack.c.bf16 %v4877_v61, %v4876_v20  ;;  %v13969_v32 = vld [vmem:[#allocation13_spill] sm:$0xff] }
 0x631   :  { %v4910_v0 = vpack.c.bf16 %v4875_v54, %v4874_v31  ;;  %v13970_v31 = vld [vmem:[#allocation14_spill] sm:$0xff] }
 0x636   :  { %7527 = vmatmul.mubr.msk.bf16.gmra.mrb[100].mxu1 %vm2020_vm4, %v4899_v19 }
 0x637   :  { %7530 = vmatprep.mubr.msk.bf16.mxu1 %vm2020_vm4, %v4900_v33 }
 0x63e   :  { %7531 = vmatmul.mubr.msk.bf16.gmra.mrb[104].mxu1 %vm2020_vm4, %v4901_v38 }
 0x63f   :  { %7534 = vmatprep.mubr.msk.bf16.mxu1 %vm2020_vm4, %v4902_v4 }
 0x646   :  { %7535 = vmatmul.mubr.msk.bf16.gmra.mrb[108].mxu1 %vm2020_vm4, %v4903_v29 }
 0x647   :  { %7538 = vmatprep.mubr.msk.bf16.mxu1 %vm2020_vm4, %v4904_v52  ;;  %v13964_v52 = vld [vmem:[#allocation8_spill] sm:$0xff] }
 0x64e   :  { %7539 = vmatmul.mubr.msk.bf16.gmra.mrb[112].mxu1 %vm2020_vm4, %v4905_v43 }
 0x64f   :  { %7542 = vmatprep.mubr.msk.bf16.mxu1 %vm2020_vm4, %v4906_v15 }
 0x656   :  { %7543 = vmatmul.mubr.msk.bf16.gmra.mrb[116].mxu1 %vm2020_vm4, %v4907_v57  ;;  %v13968_v57 = vld [vmem:[#allocation12_spill] sm:$0xff] }
 0x657   :  { %7546 = vmatprep.mubr.msk.bf16.mxu1 %vm2020_vm4, %v4908_v55 }
 0x65e   :  { %7547 = vmatmul.mubr.msk.bf16.gmra.mrb[120].mxu1 %vm2020_vm4, %v4909_v3 }
 0x65f   :  { %7550 = vmatprep.mubr.msk.bf16.mxu1 %vm2020_vm4, %v4910_v0 }
 0x666   :  { %7551 = vmatmul.mubr.msk.bf16.gmra.mrb[124].mxu1 %vm2020_vm4, %v4911_v5 }
 0x667   :  { %7554 = vmatprep.mubr.msk.bf16.mxu1 %vm2020_vm4, %v4912_v42 }
 0x66e   :  { %7555 = vmatmul.mubr.msk.bf16.gmra.mrb[128].mxu1 %vm2020_vm4, %v4913_v51  ;;  %v13971_v51 = vld [vmem:[#allocation15_spill] sm:$0xff] }
 0x6c9   :  { %v7496_v56 = vpop.f32.mrb[68].mxu1 }
 0x6ca   :  { %v5092_v2 = vadd.f32 %v7496_v56, %v12700_v58  ;;  %v5083_v22 = vpop.f32.mrb[69].mxu1 }
 0x6cb   :  { %v5084_v28 = vadd.f32 %v12700_v58, %v5083_v22  ;;  %v7497_v19 = vpop.f32.mrb[70].mxu1 }
 0x6cc   :  { %v5095_v7 = vadd.f32 %v7497_v19, %v12700_v58  ;;  %v5086_v33 = vpop.f32.mrb[71].mxu1  ;;  %v5340_v25 = vadd.f32 %v5092_v2, %v13959_v44  ;;  %v13972_v2 = vld [vmem:[#allocation16_spill] sm:$0xff] }
 0x6cd   :  { %v5087_v46 = vadd.f32 %v12700_v58, %v5086_v33  ;;  %v5338_v23 = vadd.f32 %v5084_v28, %v13961_v18  ;;  %v13973_v28 = vld [vmem:[#allocation17_spill] sm:$0xff] }
 0x6ce   :  { %v5341_v16 = vadd.f32 %v5095_v7, %v13960_v17  ;;  %v13974_v7 = vld [vmem:[#allocation18_spill] sm:$0xff] }
 0x6cf   :  { %v5339_v40 = vadd.f32 %v5087_v46, %v13962_v62 }
 0x6d0   :  { %v5403_v13 = vpack.c.bf16 %v5341_v16, %v5340_v25 }
 0x6d1   :  { %v5402_v38 = vpack.c.bf16 %v5339_v40, %v5338_v23  ;;  %v7500_v4 = vpop.f32.mrb[72].mxu1 }
 0x6d2   :  { %v5108_v50 = vadd.f32 %v7500_v4, %v12700_v58  ;;  %v5099_v10 = vpop.f32.mrb[73].mxu1 }
 0x6d3   :  { %v5100_v60 = vadd.f32 %v12700_v58, %v5099_v10  ;;  %v7501_v39 = vpop.f32.mrb[74].mxu1  ;;  %7560 = vmatprep.mubr.msk.bf16.mxu0 %vm1185_vm3, %v5402_v38  ;;  %v13975_v38 = vld [vmem:[#allocation19_spill] sm:$0xff] }
 0x6d4   :  { %v5111_v12 = vadd.f32 %v7501_v39, %v12700_v58  ;;  %v5102_v41 = vpop.f32.mrb[75].mxu1  ;;  %7561 = vmatmul.mubr.msk.bf16.vlgmr.msra.gmra.mrb[68].mxu0 %vm1185_vm3, %v5403_v13  ;;  %v5344_v29 = vadd.f32 %v5108_v50, %v13963_v45  ;;  %v13976_v50 = vld [vmem:[#allocation20_spill] sm:$0xff] }
 0x6d5   :  { %v5103_v36 = vadd.f32 %v12700_v58, %v5102_v41  ;;  %v5342_v14 = vadd.f32 %v5100_v60, %v13965_v21  ;;  %v13977_v60 = vld [vmem:[#allocation21_spill] sm:$0xff] }
 0x6d6   :  { %v5345_v35 = vadd.f32 %v5111_v12, %v13964_v52  ;;  %v13978_v12 = vld [vmem:[#allocation22_spill] sm:$0xff] }
 0x6d7   :  { %v5343_v27 = vadd.f32 %v5103_v36, %v13966_v11 }
 0x6d8   :  { %v5405_v63 = vpack.c.bf16 %v5345_v35, %v5344_v29 }
 0x6d9   :  { %v5404_v37 = vpack.c.bf16 %v5343_v27, %v5342_v14  ;;  %v7504_v53 = vpop.f32.mrb[76].mxu1 }
 0x6da   :  { %v5124_v43 = vadd.f32 %v7504_v53, %v12700_v58  ;;  %v5115_v15 = vpop.f32.mrb[77].mxu1 }
 0x6db   :  { %v5116_v48 = vadd.f32 %v12700_v58, %v5115_v15  ;;  %v7505_v49 = vpop.f32.mrb[78].mxu1  ;;  %7564 = vmatprep.mubr.msk.bf16.mxu0 %vm1185_vm3, %v5404_v37  ;;  %v13979_v37 = vld [vmem:[#allocation23_spill] sm:$0xff] }
 0x6dc   :  { %v5127_v34 = vadd.f32 %v7505_v49, %v12700_v58  ;;  %v5118_v59 = vpop.f32.mrb[79].mxu1  ;;  %7565 = vmatmul.mubr.msk.bf16.gmra.mrb[72].mxu0 %vm1185_vm3, %v5405_v63  ;;  %v5348_v24 = vadd.f32 %v5124_v43, %v13967_v9  ;;  %v13980_v43 = vld [vmem:[#allocation24_spill] sm:$0xff] }
 0x6dd   :  { %v5119_v47 = vadd.f32 %v12700_v58, %v5118_v59  ;;  %v5346_v30 = vadd.f32 %v5116_v48, %v13969_v32  ;;  %v13981_v48 = vld [vmem:[#allocation25_spill] sm:$0xff] }
 0x6de   :  { %v5349_v55 = vadd.f32 %v5127_v34, %v13968_v57  ;;  %v13982_v34 = vld [vmem:[#allocation26_spill] sm:$0xff] }
 0x6df   :  { %v5347_v54 = vadd.f32 %v5119_v47, %v13970_v31 }
 0x6e0   :  { %v5407_v3 = vpack.c.bf16 %v5349_v55, %v5348_v24 }
 0x6e1   :  { %v5406_v0 = vpack.c.bf16 %v5347_v54, %v5346_v30  ;;  %v7508_v20 = vpop.f32.mrb[80].mxu1 }
 0x6e2   :  { %v5140_v61 = vadd.f32 %v7508_v20, %v12700_v58  ;;  %v5131_v6 = vpop.f32.mrb[81].mxu1 }
 0x6e3   :  { %v5132_v8 = vadd.f32 %v12700_v58, %v5131_v6  ;;  %v7509_v5 = vpop.f32.mrb[82].mxu1  ;;  %7568 = vmatprep.mubr.msk.bf16.mxu0 %vm1185_vm3, %v5406_v0  ;;  %v13983_v0 = vld [vmem:[#allocation27_spill] sm:$0xff] }
 0x6e4   :  { %v5143_v42 = vadd.f32 %v7509_v5, %v12700_v58  ;;  %v5134_v1 = vpop.f32.mrb[83].mxu1  ;;  %7569 = vmatmul.mubr.msk.bf16.gmra.mrb[76].mxu0 %vm1185_vm3, %v5407_v3  ;;  %v5352_v56 = vadd.f32 %v5140_v61, %v13971_v51  ;;  %v13984_v61 = vld [vmem:[#allocation29_spill] sm:$0xff] }
 0x6e5   :  { %v5135_v26 = vadd.f32 %v12700_v58, %v5134_v1  ;;  %v5350_v19 = vadd.f32 %v5132_v8, %v13973_v28  ;;  %v13985_v8 = vld [vmem:[#allocation28_spill] sm:$0xff] }
 0x6e6   :  { %v5353_v22 = vadd.f32 %v5143_v42, %v13972_v2  ;;  %v13986_v42 = vld [vmem:[#allocation30_spill] sm:$0xff] }
 0x6e7   :  { %v5351_v33 = vadd.f32 %v5135_v26, %v13974_v7 }
 0x6e8   :  { %v5409_v46 = vpack.c.bf16 %v5353_v22, %v5352_v56 }
 0x6e9   :  { %v5408_v44 = vpack.c.bf16 %v5351_v33, %v5350_v19  ;;  %v7512_v25 = vpop.f32.mrb[84].mxu1 }
 0x6ea   :  { %v5156_v17 = vadd.f32 %v7512_v25, %v12700_v58  ;;  %v5147_v16 = vpop.f32.mrb[85].mxu1 }
 0x6eb   :  { %v5148_v18 = vadd.f32 %v12700_v58, %v5147_v16  ;;  %v7513_v23 = vpop.f32.mrb[86].mxu1  ;;  %7572 = vmatprep.mubr.msk.bf16.mxu0 %vm1185_vm3, %v5408_v44  ;;  %v13987_v44 = vld [vmem:[#allocation34_spill] sm:$0xff] }
 0x6ec   :  { %v5159_v62 = vadd.f32 %v7513_v23, %v12700_v58  ;;  %v5150_v40 = vpop.f32.mrb[87].mxu1  ;;  %7573 = vmatmul.mubr.msk.bf16.gmra.mrb[80].mxu0 %vm1185_vm3, %v5409_v46  ;;  %v5356_v4 = vadd.f32 %v5156_v17, %v13975_v38  ;;  %v13988_v17 = vld [vmem:[#allocation32_spill] sm:$0xff] }
 0x6ed   :  { %v5151_v13 = vadd.f32 %v12700_v58, %v5150_v40  ;;  %v5354_v39 = vadd.f32 %v5148_v18, %v13977_v60  ;;  %v13989_v18 = vld [vmem:[#allocation31_spill] sm:$0xff] }
 0x6ee   :  { %v5357_v10 = vadd.f32 %v5159_v62, %v13976_v50  ;;  %v13990_v62 = vld [vmem:[#allocation33_spill] sm:$0xff] }
 0x6ef   :  { %v5355_v41 = vadd.f32 %v5151_v13, %v13978_v12 }
 0x6f0   :  { %v5411_v36 = vpack.c.bf16 %v5357_v10, %v5356_v4 }
 0x6f1   :  { %v5410_v45 = vpack.c.bf16 %v5355_v41, %v5354_v39  ;;  %v7516_v29 = vpop.f32.mrb[88].mxu1 }
 0x6f2   :  { %v5172_v52 = vadd.f32 %v7516_v29, %v12700_v58  ;;  %v5163_v35 = vpop.f32.mrb[89].mxu1 }
 0x6f3   :  { %v5164_v21 = vadd.f32 %v12700_v58, %v5163_v35  ;;  %v7517_v14 = vpop.f32.mrb[90].mxu1  ;;  %7576 = vmatprep.mubr.msk.bf16.mxu0 %vm1185_vm3, %v5410_v45  ;;  %v13991_v45 = vld [vmem:[#allocation38_spill] sm:$0xff] }
 0x6f4   :  { %v5175_v11 = vadd.f32 %v7517_v14, %v12700_v58  ;;  %v5166_v27 = vpop.f32.mrb[91].mxu1  ;;  %7577 = vmatmul.mubr.msk.bf16.gmra.mrb[84].mxu0 %vm1185_vm3, %v5411_v36  ;;  %v5360_v53 = vadd.f32 %v5172_v52, %v13979_v37  ;;  %v13992_v52 = vld [vmem:[#allocation35_spill] sm:$0xff] }
 0x6f5   :  { %v5167_v63 = vadd.f32 %v12700_v58, %v5166_v27  ;;  %v5358_v49 = vadd.f32 %v5164_v21, %v13981_v48  ;;  %v13993_v21 = vld [vmem:[#allocation36_spill] sm:$0xff] }
 0x6f6   :  { %v5361_v15 = vadd.f32 %v5175_v11, %v13980_v43  ;;  %v13994_v11 = vld [vmem:[#allocation37_spill] sm:$0xff] }
 0x6f7   :  { %v5359_v59 = vadd.f32 %v5167_v63, %v13982_v34 }
 0x6f8   :  { %v5413_v47 = vpack.c.bf16 %v5361_v15, %v5360_v53 }
 0x6f9   :  { %v5412_v9 = vpack.c.bf16 %v5359_v59, %v5358_v49  ;;  %v7520_v24 = vpop.f32.mrb[92].mxu1 }
 0x6fa   :  { %v5188_v57 = vadd.f32 %v7520_v24, %v12700_v58  ;;  %v5179_v55 = vpop.f32.mrb[93].mxu1 }
 0x6fb   :  { %v5180_v32 = vadd.f32 %v12700_v58, %v5179_v55  ;;  %v7521_v30 = vpop.f32.mrb[94].mxu1  ;;  %7580 = vmatprep.mubr.msk.bf16.mxu0 %vm1185_vm3, %v5412_v9  ;;  %v13995_v9 = vld [vmem:[#allocation42_spill] sm:$0xff] }
 0x6fc   :  { %v5191_v31 = vadd.f32 %v7521_v30, %v12700_v58  ;;  %v5182_v54 = vpop.f32.mrb[95].mxu1  ;;  %7581 = vmatmul.mubr.msk.bf16.gmra.mrb[88].mxu0 %vm1185_vm3, %v5413_v47  ;;  %v5364_v20 = vadd.f32 %v5188_v57, %v13983_v0  ;;  %v13996_v57 = vld [vmem:[#allocation40_spill] sm:$0xff] }
 0x6fd   :  { %v5183_v3 = vadd.f32 %v12700_v58, %v5182_v54  ;;  %v5362_v5 = vadd.f32 %v5180_v32, %v13985_v8  ;;  %v13997_v32 = vld [vmem:[#allocation39_spill] sm:$0xff] }
 0x6fe   :  { %v5365_v6 = vadd.f32 %v5191_v31, %v13984_v61  ;;  %v13998_v31 = vld [vmem:[#allocation41_spill] sm:$0xff] }
 0x6ff   :  { %v5363_v1 = vadd.f32 %v5183_v3, %v13986_v42 }
 0x700   :  { %v5415_v26 = vpack.c.bf16 %v5365_v6, %v5364_v20 }
 0x701   :  { %v5414_v51 = vpack.c.bf16 %v5363_v1, %v5362_v5  ;;  %v7524_v56 = vpop.f32.mrb[96].mxu1 }
 0x702   :  { %v5204_v2 = vadd.f32 %v7524_v56, %v12700_v58  ;;  %v5195_v22 = vpop.f32.mrb[97].mxu1 }
 0x703   :  { %v5196_v28 = vadd.f32 %v12700_v58, %v5195_v22  ;;  %v7525_v19 = vpop.f32.mrb[98].mxu1  ;;  %7584 = vmatprep.mubr.msk.bf16.mxu0 %vm1185_vm3, %v5414_v51  ;;  %v13999_v51 = vld [vmem:[#allocation46_spill] sm:$0xff] }
 0x704   :  { %v5207_v7 = vadd.f32 %v7525_v19, %v12700_v58  ;;  %v5198_v33 = vpop.f32.mrb[99].mxu1  ;;  %7585 = vmatmul.mubr.msk.bf16.gmra.mrb[92].mxu0 %vm1185_vm3, %v5415_v26  ;;  %v5368_v25 = vadd.f32 %v5204_v2, %v13987_v44  ;;  %v14000_v2 = vld [vmem:[#allocation43_spill] sm:$0xff] }
 0x705   :  { %v5199_v46 = vadd.f32 %v12700_v58, %v5198_v33  ;;  %v5366_v23 = vadd.f32 %v5196_v28, %v13989_v18  ;;  %v14001_v28 = vld [vmem:[#allocation44_spill] sm:$0xff] }
 0x706   :  { %v5369_v16 = vadd.f32 %v5207_v7, %v13988_v17  ;;  %v14002_v7 = vld [vmem:[#allocation45_spill] sm:$0xff] }
 0x707   :  { %v5367_v40 = vadd.f32 %v5199_v46, %v13990_v62 }
 0x708   :  { %v5417_v13 = vpack.c.bf16 %v5369_v16, %v5368_v25 }
 0x709   :  { %v5416_v38 = vpack.c.bf16 %v5367_v40, %v5366_v23  ;;  %v7528_v4 = vpop.f32.mrb[100].mxu1 }
 0x70a   :  { %v5220_v50 = vadd.f32 %v7528_v4, %v12700_v58  ;;  %v5211_v10 = vpop.f32.mrb[101].mxu1 }
 0x70b   :  { %v5212_v60 = vadd.f32 %v12700_v58, %v5211_v10  ;;  %v7529_v39 = vpop.f32.mrb[102].mxu1  ;;  %7588 = vmatprep.mubr.msk.bf16.mxu0 %vm1185_vm3, %v5416_v38  ;;  %v14003_v38 = vld [vmem:[#allocation50_spill] sm:$0xff] }
 0x70c   :  { %v5223_v12 = vadd.f32 %v7529_v39, %v12700_v58  ;;  %v5214_v41 = vpop.f32.mrb[103].mxu1  ;;  %7589 = vmatmul.mubr.msk.bf16.gmra.mrb[96].mxu0 %vm1185_vm3, %v5417_v13  ;;  %v5372_v29 = vadd.f32 %v5220_v50, %v13991_v45  ;;  %v14004_v50 = vld [vmem:[#allocation47_spill] sm:$0xff] }
 0x70d   :  { %v5215_v36 = vadd.f32 %v12700_v58, %v5214_v41  ;;  %v5370_v14 = vadd.f32 %v5212_v60, %v13993_v21  ;;  %v14005_v60 = vld [vmem:[#allocation48_spill] sm:$0xff] }
 0x70e   :  { %v5373_v35 = vadd.f32 %v5223_v12, %v13992_v52  ;;  %v14006_v12 = vld [vmem:[#allocation49_spill] sm:$0xff] }
 0x70f   :  { %v5371_v27 = vadd.f32 %v5215_v36, %v13994_v11 }
 0x710   :  { %v5419_v63 = vpack.c.bf16 %v5373_v35, %v5372_v29 }
 0x711   :  { %v5418_v37 = vpack.c.bf16 %v5371_v27, %v5370_v14  ;;  %v7532_v53 = vpop.f32.mrb[104].mxu1 }
 0x712   :  { %v5236_v43 = vadd.f32 %v7532_v53, %v12700_v58  ;;  %v5227_v15 = vpop.f32.mrb[105].mxu1 }
 0x713   :  { %v5228_v48 = vadd.f32 %v12700_v58, %v5227_v15  ;;  %v7533_v49 = vpop.f32.mrb[106].mxu1  ;;  %7592 = vmatprep.mubr.msk.bf16.mxu0 %vm1185_vm3, %v5418_v37  ;;  %v14007_v37 = vld [vmem:[#allocation54_spill] sm:$0xff] }
 0x714   :  { %v5239_v34 = vadd.f32 %v7533_v49, %v12700_v58  ;;  %v5230_v59 = vpop.f32.mrb[107].mxu1  ;;  %7593 = vmatmul.mubr.msk.bf16.gmra.mrb[100].mxu0 %vm1185_vm3, %v5419_v63  ;;  %v5376_v24 = vadd.f32 %v5236_v43, %v13995_v9  ;;  %v14008_v43 = vld [vmem:[#allocation51_spill] sm:$0xff] }
 0x715   :  { %v5231_v47 = vadd.f32 %v12700_v58, %v5230_v59  ;;  %v5374_v30 = vadd.f32 %v5228_v48, %v13997_v32  ;;  %v14009_v48 = vld [vmem:[#allocation52_spill] sm:$0xff] }
 0x716   :  { %v5377_v55 = vadd.f32 %v5239_v34, %v13996_v57  ;;  %v14010_v34 = vld [vmem:[#allocation53_spill] sm:$0xff] }
 0x717   :  { %v5375_v54 = vadd.f32 %v5231_v47, %v13998_v31 }
 0x718   :  { %v5421_v3 = vpack.c.bf16 %v5377_v55, %v5376_v24 }
 0x719   :  { %v5420_v0 = vpack.c.bf16 %v5375_v54, %v5374_v30  ;;  %v7536_v20 = vpop.f32.mrb[108].mxu1 }
 0x71a   :  { %v5252_v61 = vadd.f32 %v7536_v20, %v12700_v58  ;;  %v5243_v6 = vpop.f32.mrb[109].mxu1 }
 0x71b   :  { %v5244_v8 = vadd.f32 %v12700_v58, %v5243_v6  ;;  %v7537_v5 = vpop.f32.mrb[110].mxu1  ;;  %7596 = vmatprep.mubr.msk.bf16.mxu0 %vm1185_vm3, %v5420_v0  ;;  %v14011_v0 = vld [vmem:[#allocation58_spill] sm:$0xff] }
 0x71c   :  { %v5255_v42 = vadd.f32 %v7537_v5, %v12700_v58  ;;  %v5246_v1 = vpop.f32.mrb[111].mxu1  ;;  %7597 = vmatmul.mubr.msk.bf16.gmra.mrb[104].mxu0 %vm1185_vm3, %v5421_v3  ;;  %v5380_v56 = vadd.f32 %v5252_v61, %v13999_v51  ;;  %v14012_v61 = vld [vmem:[#allocation55_spill] sm:$0xff] }
 0x71d   :  { %v5247_v26 = vadd.f32 %v12700_v58, %v5246_v1  ;;  %v5378_v19 = vadd.f32 %v5244_v8, %v14001_v28  ;;  %v14013_v8 = vld [vmem:[#allocation56_spill] sm:$0xff] }
 0x71e   :  { %v5381_v22 = vadd.f32 %v5255_v42, %v14000_v2  ;;  %v14014_v42 = vld [vmem:[#allocation57_spill] sm:$0xff] }
 0x71f   :  { %v5379_v33 = vadd.f32 %v5247_v26, %v14002_v7 }
 0x720   :  { %v5423_v46 = vpack.c.bf16 %v5381_v22, %v5380_v56 }
 0x721   :  { %v5422_v44 = vpack.c.bf16 %v5379_v33, %v5378_v19  ;;  %v7540_v25 = vpop.f32.mrb[112].mxu1 }
 0x722   :  { %v5268_v17 = vadd.f32 %v7540_v25, %v12700_v58  ;;  %v5259_v16 = vpop.f32.mrb[113].mxu1 }
 0x723   :  { %v5260_v18 = vadd.f32 %v12700_v58, %v5259_v16  ;;  %v7541_v23 = vpop.f32.mrb[114].mxu1  ;;  %7600 = vmatprep.mubr.msk.bf16.mxu0 %vm1185_vm3, %v5422_v44  ;;  %v14015_v44 = vld [vmem:[#allocation62_spill] sm:$0xff] }
 0x724   :  { %v5271_v62 = vadd.f32 %v7541_v23, %v12700_v58  ;;  %v5262_v40 = vpop.f32.mrb[115].mxu1  ;;  %7601 = vmatmul.mubr.msk.bf16.gmra.mrb[108].mxu0 %vm1185_vm3, %v5423_v46  ;;  %v5384_v4 = vadd.f32 %v5268_v17, %v14003_v38  ;;  %v14016_v17 = vld [vmem:[#allocation59_spill] sm:$0xff] }
 0x725   :  { %v5263_v13 = vadd.f32 %v12700_v58, %v5262_v40  ;;  %v5382_v39 = vadd.f32 %v5260_v18, %v14005_v60  ;;  %v14017_v18 = vld [vmem:[#allocation60_spill] sm:$0xff] }
 0x726   :  { %v5385_v10 = vadd.f32 %v5271_v62, %v14004_v50  ;;  %v14018_v62 = vld [vmem:[#allocation61_spill] sm:$0xff] }
 0x727   :  { %v5383_v41 = vadd.f32 %v5263_v13, %v14006_v12 }
 0x728   :  { %v5425_v36 = vpack.c.bf16 %v5385_v10, %v5384_v4 }
 0x729   :  { %v5424_v45 = vpack.c.bf16 %v5383_v41, %v5382_v39  ;;  %v7544_v29 = vpop.f32.mrb[116].mxu1 }
 0x72a   :  { %v5284_v52 = vadd.f32 %v7544_v29, %v12700_v58  ;;  %v5275_v35 = vpop.f32.mrb[117].mxu1 }
 0x72b   :  { %v5276_v21 = vadd.f32 %v12700_v58, %v5275_v35  ;;  %v7545_v14 = vpop.f32.mrb[118].mxu1  ;;  %7604 = vmatprep.mubr.msk.bf16.mxu0 %vm1185_vm3, %v5424_v45  ;;  %v14019_v45 = vld [vmem:[#allocation66_spill] sm:$0xff] }
 0x72c   :  { %v5287_v11 = vadd.f32 %v7545_v14, %v12700_v58  ;;  %v5278_v27 = vpop.f32.mrb[119].mxu1  ;;  %7605 = vmatmul.mubr.msk.bf16.gmra.mrb[112].mxu0 %vm1185_vm3, %v5425_v36  ;;  %v5388_v53 = vadd.f32 %v5284_v52, %v14007_v37  ;;  %v14020_v52 = vld [vmem:[#allocation63_spill] sm:$0xff] }
 0x72d   :  { %v5279_v63 = vadd.f32 %v12700_v58, %v5278_v27  ;;  %v5386_v49 = vadd.f32 %v5276_v21, %v14009_v48  ;;  %v14021_v21 = vld [vmem:[#allocation64_spill] sm:$0xff] }
 0x72e   :  { %v5389_v15 = vadd.f32 %v5287_v11, %v14008_v43  ;;  %v14022_v11 = vld [vmem:[#allocation65_spill] sm:$0xff] }
 0x72f   :  { %v5387_v59 = vadd.f32 %v5279_v63, %v14010_v34 }
 0x730   :  { %v5427_v47 = vpack.c.bf16 %v5389_v15, %v5388_v53  ;;  %v12865_v53 = vld [vmem:[%s13462_s14] ss:$0 sm:$0xff] }
 0x731   :  { %v5426_v9 = vpack.c.bf16 %v5387_v59, %v5386_v49  ;;  %v7548_v24 = vpop.f32.mrb[120].mxu1 }
 0x732   :  { %v5300_v57 = vadd.f32 %v7548_v24, %v12700_v58  ;;  %v5291_v55 = vpop.f32.mrb[121].mxu1 }
 0x733   :  { %v5292_v32 = vadd.f32 %v12700_v58, %v5291_v55  ;;  %v7549_v30 = vpop.f32.mrb[122].mxu1  ;;  %7608 = vmatprep.mubr.msk.bf16.mxu0 %vm1185_vm3, %v5426_v9 }
 0x734   :  { %v5303_v31 = vadd.f32 %v7549_v30, %v12700_v58  ;;  %v5294_v54 = vpop.f32.mrb[123].mxu1  ;;  %7609 = vmatmul.mubr.msk.bf16.gmra.mrb[116].mxu0 %vm1185_vm3, %v5427_v47  ;;  %v5392_v20 = vadd.f32 %v5300_v57, %v14011_v0 }
 0x735   :  { %v5295_v3 = vadd.f32 %v12700_v58, %v5294_v54  ;;  %v5390_v5 = vadd.f32 %v5292_v32, %v14013_v8 }
 0x736   :  { %v5393_v6 = vadd.f32 %v5303_v31, %v14012_v61 }
 0x737   :  { %v5391_v1 = vadd.f32 %v5295_v3, %v14014_v42 }
 0x738   :  { %v5429_v26 = vpack.c.bf16 %v5393_v6, %v5392_v20 }
 0x739   :  { %v5428_v51 = vpack.c.bf16 %v5391_v1, %v5390_v5  ;;  %v7552_v56 = vpop.f32.mrb[124].mxu1 }
 0x73a   :  { %v5316_v2 = vadd.f32 %v7552_v56, %v12700_v58  ;;  %v5307_v22 = vpop.f32.mrb[125].mxu1 }
 0x73b   :  { %v5308_v28 = vadd.f32 %v12700_v58, %v5307_v22  ;;  %v7553_v19 = vpop.f32.mrb[126].mxu1  ;;  %7612 = vmatprep.mubr.msk.bf16.mxu0 %vm1185_vm3, %v5428_v51 }
 0x73c   :  { %v5319_v7 = vadd.f32 %v7553_v19, %v12700_v58  ;;  %v5310_v33 = vpop.f32.mrb[127].mxu1  ;;  %7613 = vmatmul.mubr.msk.bf16.gmra.mrb[120].mxu0 %vm1185_vm3, %v5429_v26  ;;  %v5396_v25 = vadd.f32 %v5316_v2, %v14015_v44 }
 0x73d   :  { %v5311_v46 = vadd.f32 %v12700_v58, %v5310_v33  ;;  %v5394_v23 = vadd.f32 %v5308_v28, %v14017_v18 }
 0x73e   :  { %v5397_v16 = vadd.f32 %v5319_v7, %v14016_v17 }
 0x73f   :  { %v5395_v40 = vadd.f32 %v5311_v46, %v14018_v62 }
 0x740   :  { %v5431_v13 = vpack.c.bf16 %v5397_v16, %v5396_v25 }
 0x741   :  { %v5430_v38 = vpack.c.bf16 %v5395_v40, %v5394_v23  ;;  %v7556_v4 = vpop.f32.mrb[128].mxu1 }
 0x742   :  { %v5332_v50 = vadd.f32 %v7556_v4, %v12700_v58  ;;  %v5323_v10 = vpop.f32.mrb[129].mxu1 }
 0x743   :  { %v5324_v60 = vadd.f32 %v12700_v58, %v5323_v10  ;;  %v7557_v39 = vpop.f32.mrb[130].mxu1  ;;  %7616 = vmatprep.mubr.msk.bf16.mxu0 %vm1185_vm3, %v5430_v38 }
 0x744   :  { %v5335_v12 = vadd.f32 %v7557_v39, %v12700_v58  ;;  %v5326_v41 = vpop.f32.mrb[131].mxu1  ;;  %7617 = vmatmul.mubr.msk.bf16.gmra.mrb[124].mxu0 %vm1185_vm3, %v5431_v13  ;;  %v5400_v29 = vadd.f32 %v5332_v50, %v14019_v45 }
 0x745   :  { %v5327_v36 = vadd.f32 %v12700_v58, %v5326_v41  ;;  %v5398_v14 = vadd.f32 %v5324_v60, %v14021_v21 }
 0x746   :  { %v5401_v35 = vadd.f32 %v5335_v12, %v14020_v52 }
 0x747   :  { %v5399_v27 = vadd.f32 %v5327_v36, %v14022_v11 }
 0x748   :  { %v5433_v63 = vpack.c.bf16 %v5401_v35, %v5400_v29 }
 0x749   :  { %v5432_v37 = vpack.c.bf16 %v5399_v27, %v5398_v14 }
 0x74b   :  { %7620 = vmatprep.mubr.msk.bf16.mxu0 %vm1185_vm3, %v5432_v37 }
 0x74c   :  { %7621 = vmatmul.mubr.msk.bf16.gmra.mrb[128].mxu0 %vm1185_vm3, %v5433_v63 }
 0x7a7   :  { %v7562_v58 = vpop.f32.mrb[68].mxu0 }
 0x7a8   :  { %v12868_v43 = vadd.f32 %v7562_v58, %v12865_v53  ;;  %v5579_v15 = vpop.f32.mrb[69].mxu0 }
 0x7a9   :  { %v12871_v48 = vadd.f32 %v12865_v53, %v5579_v15  ;;  %v7563_v49 = vpop.f32.mrb[70].mxu0 }
 0x7aa   :  { %v7001_v34 = vmul.f32 -1.442695, %v12868_v43  ;;  %v12875_v59 = vadd.f32 %v7563_v49, %v12865_v53  ;;  %v5582_v47 = vpop.f32.mrb[71].mxu0 }
 0x7ab   :  { %v6999_v9 = vmul.f32 -1.442695, %v12871_v48  ;;  %v12879_v24 = vadd.f32 %v12865_v53, %v5582_v47 }
 0x7ac   :  { %8448 = vpow2.f32 %v7001_v34  ;;  %v7002_v57 = vmul.f32 -1.442695, %v12875_v59 }
 0x7ad   :  { %8450 = vpow2.f32 %v6999_v9  ;;  %v7000_v55 = vmul.f32 -1.442695, %v12879_v24 }
 0x7ae   :  { %8452 = vpow2.f32 %v7002_v57 }
 0x7af   :  { %8454 = vpow2.f32 %v7000_v55  ;;  %v7566_v32 = vpop.f32.mrb[72].mxu0 }
 0x7b0   :  { %v12884_v30 = vadd.f32 %v7566_v32, %v12865_v53  ;;  %v5595_v31 = vpop.f32.mrb[73].mxu0 }
 0x7b1   :  { %v12887_v54 = vadd.f32 %v12865_v53, %v5595_v31  ;;  %v7567_v3 = vpop.f32.mrb[74].mxu0 }
 0x7b2   :  { %v7005_v0 = vmul.f32 -1.442695, %v12884_v30  ;;  %v12891_v20 = vadd.f32 %v7567_v3, %v12865_v53  ;;  %v5598_v61 = vpop.f32.mrb[75].mxu0 }
 0x7b3   :  { %v7003_v6 = vmul.f32 -1.442695, %v12887_v54  ;;  %v12895_v8 = vadd.f32 %v12865_v53, %v5598_v61 }
 0x7b4   :  { %8456 = vpow2.f32 %v7005_v0  ;;  %v7006_v5 = vmul.f32 -1.442695, %v12891_v20 }
 0x7b5   :  { %8458 = vpow2.f32 %v7003_v6  ;;  %v7004_v42 = vmul.f32 -1.442695, %v12895_v8 }
 0x7b6   :  { %v8449_v1 = vpop.eup %8448  ;;  %8460 = vpow2.f32 %v7006_v5 }
 0x7b7   :  { %v8451_v26 = vpop.eup %8450  ;;  %v6028_v51 = vadd.f32 1.0, %v8449_v1  ;;  %8462 = vpow2.f32 %v7004_v42  ;;  %v7570_v56 = vpop.f32.mrb[76].mxu0 }
 0x7b8   :  { %v8453_v2 = vpop.eup %8452  ;;  %v6026_v22 = vadd.f32 1.0, %v8451_v26  ;;  %v12900_v28 = vadd.f32 %v7570_v56, %v12865_v53  ;;  %v5611_v19 = vpop.f32.mrb[77].mxu0 }
 0x7b9   :  { %v8455_v7 = vpop.eup %8454  ;;  %8464 = vrcp.f32 %v6028_v51  ;;  %v6029_v33 = vadd.f32 1.0, %v8453_v2  ;;  %v12903_v46 = vadd.f32 %v12865_v53, %v5611_v19  ;;  %v7571_v44 = vpop.f32.mrb[78].mxu0 }
 0x7ba   :  { %8466 = vrcp.f32 %v6026_v22  ;;  %v6027_v25 = vadd.f32 1.0, %v8455_v7  ;;  %v7009_v17 = vmul.f32 -1.442695, %v12900_v28  ;;  %v12907_v16 = vadd.f32 %v7571_v44, %v12865_v53  ;;  %v5614_v18 = vpop.f32.mrb[79].mxu0 }
 0x7bb   :  { %8468 = vrcp.f32 %v6029_v33  ;;  %v7007_v23 = vmul.f32 -1.442695, %v12903_v46  ;;  %v12911_v62 = vadd.f32 %v12865_v53, %v5614_v18 }
 0x7bc   :  { %8470 = vrcp.f32 %v6027_v25  ;;  %v7010_v40 = vmul.f32 -1.442695, %v12907_v16 }
 0x7bd   :  { %8472 = vpow2.f32 %v7009_v17  ;;  %v7008_v13 = vmul.f32 -1.442695, %v12911_v62 }
 0x7be   :  { %v8457_v38 = vpop.eup %8456  ;;  %8474 = vpow2.f32 %v7007_v23 }
 0x7bf   :  { %v8459_v4 = vpop.eup %8458  ;;  %v6032_v50 = vadd.f32 1.0, %v8457_v38  ;;  %8476 = vpow2.f32 %v7010_v40  ;;  %v7574_v10 = vpop.f32.mrb[80].mxu0 }
 0x7c0   :  { %v8461_v60 = vpop.eup %8460  ;;  %v6030_v39 = vadd.f32 1.0, %v8459_v4  ;;  %8478 = vpow2.f32 %v7008_v13  ;;  %v12916_v12 = vadd.f32 %v7574_v10, %v12865_v53  ;;  %v5627_v41 = vpop.f32.mrb[81].mxu0 }
 0x7c1   :  { %v8463_v36 = vpop.eup %8462  ;;  %8480 = vrcp.f32 %v6032_v50  ;;  %v6033_v45 = vadd.f32 1.0, %v8461_v60  ;;  %v12919_v29 = vadd.f32 %v12865_v53, %v5627_v41  ;;  %v7575_v52 = vpop.f32.mrb[82].mxu0 }
 0x7c2   :  { %8482 = vrcp.f32 %v6030_v39  ;;  %v6031_v35 = vadd.f32 1.0, %v8463_v36  ;;  %v7013_v21 = vmul.f32 -1.442695, %v12916_v12  ;;  %v12923_v14 = vadd.f32 %v7575_v52, %v12865_v53  ;;  %v5630_v11 = vpop.f32.mrb[83].mxu0 }
 0x7c3   :  { %v8465_v27 = vpop.eup %8464  ;;  %8484 = vrcp.f32 %v6033_v45  ;;  %v7011_v63 = vmul.f32 -1.442695, %v12919_v29  ;;  %v12927_v37 = vadd.f32 %v12865_v53, %v5630_v11 }
 0x7c4   :  { %v8467_v58 = vpop.eup %8466  ;;  %v6220_v15 = vmul.f32 %v8465_v27, %v12868_v43  ;;  %8486 = vrcp.f32 %v6031_v35  ;;  %v7014_v49 = vmul.f32 -1.442695, %v12923_v14 }
 0x7c5   :  { %v8469_v34 = vpop.eup %8468  ;;  %v6218_v47 = vmul.f32 %v8467_v58, %v12871_v48  ;;  %8488 = vpow2.f32 %v7013_v21  ;;  %v7012_v9 = vmul.f32 -1.442695, %v12927_v37 }
 0x7c6   :  { %v8471_v57 = vpop.eup %8470  ;;  %v7129_v55 = vpack.c.bf16 %v6220_v15, %v6220_v15  ;;  %v6221_v32 = vmul.f32 %v8469_v34, %v12875_v59  ;;  %8490 = vpow2.f32 %v7011_v63 }
 0x7c7   :  { %v8473_v31 = vpop.eup %8472  ;;  %v7127_v3 = vpack.c.bf16 %v6218_v47, %v6218_v47  ;;  %v6219_v0 = vmul.f32 %v8471_v57, %v12879_v24  ;;  %8492 = vpow2.f32 %v7014_v49  ;;  %v7578_v43 = vpop.f32.mrb[84].mxu0 }
 0x7c8   :  { %v8475_v61 = vpop.eup %8474  ;;  %6541 = vst.msk [vmem:[%s13463_s15 + $0x8] sm:$0xf] %vm6538_vm11, %v7129_v55  ;;  %v7130_v48 = vpack.c.bf16 %v6221_v32, %v6221_v32  ;;  %v6036_v6 = vadd.f32 1.0, %v8473_v31  ;;  %8494 = vpow2.f32 %v7012_v9  ;;  %v12940_v5 = vadd.f32 %v7578_v43, %v12865_v53  ;;  %v5643_v59 = vpop.f32.mrb[85].mxu0 }
 0x7c9   :  { %v8477_v42 = vpop.eup %8476  ;;  %6539 = vst.msk [vmem:[%s13463_s15] sm:$0xf] %vm6538_vm11, %v7127_v3  ;;  %v7128_v24 = vpack.c.bf16 %v6219_v0, %v6219_v0  ;;  %v6034_v1 = vadd.f32 1.0, %v8475_v61  ;;  %v12947_v26 = vadd.f32 %v12865_v53, %v5643_v59  ;;  %v7579_v51 = vpop.f32.mrb[86].mxu0 }
 0x7ca   :  { %v8479_v56 = vpop.eup %8478  ;;  %6542 = vst.msk [vmem:[%s13463_s15 + $0xc] sm:$0xf] %vm6538_vm11, %v7130_v48  ;;  %8496 = vrcp.f32 %v6036_v6  ;;  %v6037_v2 = vadd.f32 1.0, %v8477_v42  ;;  %v7017_v22 = vmul.f32 -1.442695, %v12940_v5  ;;  %v12955_v19 = vadd.f32 %v7579_v51, %v12865_v53  ;;  %v5646_v7 = vpop.f32.mrb[87].mxu0 }
 0x7cb   :  { %v8481_v33 = vpop.eup %8480  ;;  %6540 = vst.msk [vmem:[%s13463_s15 + $0x4] sm:$0xf] %vm6538_vm11, %v7128_v24  ;;  %8498 = vrcp.f32 %v6034_v1  ;;  %v6035_v44 = vadd.f32 1.0, %v8479_v56  ;;  %v7015_v25 = vmul.f32 -1.442695, %v12947_v26  ;;  %v12963_v17 = vadd.f32 %v12865_v53, %v5646_v7 }
 0x7cc   :  { %v8483_v18 = vpop.eup %8482  ;;  %v6224_v23 = vmul.f32 %v8481_v33, %v12884_v30  ;;  %8500 = vrcp.f32 %v6037_v2  ;;  %v7018_v40 = vmul.f32 -1.442695, %v12955_v19 }
 0x7cd   :  { %v8485_v13 = vpop.eup %8484  ;;  %v6222_v38 = vmul.f32 %v8483_v18, %v12887_v54  ;;  %8502 = vrcp.f32 %v6035_v44  ;;  %v7016_v4 = vmul.f32 -1.442695, %v12963_v17 }
 0x7ce   :  { %v8487_v50 = vpop.eup %8486  ;;  %v7133_v10 = vpack.c.bf16 %v6224_v23, %v6224_v23  ;;  %v6225_v60 = vmul.f32 %v8485_v13, %v12891_v20  ;;  %8504 = vpow2.f32 %v7017_v22 }
 0x7cf   :  { %v8489_v39 = vpop.eup %8488  ;;  %v7131_v41 = vpack.c.bf16 %v6222_v38, %v6222_v38  ;;  %v6223_v36 = vmul.f32 %v8487_v50, %v12895_v8  ;;  %8506 = vpow2.f32 %v7015_v25  ;;  %v7582_v30 = vpop.f32.mrb[88].mxu0 }
 0x7d0   :  { %v8491_v45 = vpop.eup %8490  ;;  %6545 = vst.msk [vmem:[%s13463_s15 + $0x18] sm:$0xf] %vm6538_vm11, %v7133_v10  ;;  %v7134_v54 = vpack.c.bf16 %v6225_v60, %v6225_v60  ;;  %v6040_v52 = vadd.f32 1.0, %v8489_v39  ;;  %8508 = vpow2.f32 %v7018_v40  ;;  %v12976_v35 = vadd.f32 %v7582_v30, %v12865_v53  ;;  %v5659_v20 = vpop.f32.mrb[89].mxu0 }
 0x7d1   :  { %v8493_v21 = vpop.eup %8492  ;;  %6543 = vst.msk [vmem:[%s13463_s15 + $0x10] sm:$0xf] %vm6538_vm11, %v7131_v41  ;;  %v7132_v8 = vpack.c.bf16 %v6223_v36, %v6223_v36  ;;  %v6038_v11 = vadd.f32 1.0, %v8491_v45  ;;  %8510 = vpow2.f32 %v7016_v4  ;;  %v12983_v27 = vadd.f32 %v12865_v53, %v5659_v20  ;;  %v7583_v63 = vpop.f32.mrb[90].mxu0 }
 0x7d2   :  { %v8495_v58 = vpop.eup %8494  ;;  %6546 = vst.msk [vmem:[%s13463_s15 + $0x1c] sm:$0xf] %vm6538_vm11, %v7134_v54  ;;  %8512 = vrcp.f32 %v6040_v52  ;;  %v6041_v15 = vadd.f32 1.0, %v8493_v21  ;;  %v7021_v49 = vmul.f32 -1.442695, %v12976_v35  ;;  %v12991_v34 = vadd.f32 %v7583_v63, %v12865_v53  ;;  %v5662_v47 = vpop.f32.mrb[91].mxu0 }
 0x7d3   :  { %6544 = vst.msk [vmem:[%s13463_s15 + $0x14] sm:$0xf] %vm6538_vm11, %v7132_v8  ;;  %8514 = vrcp.f32 %v6038_v11  ;;  %v6039_v9 = vadd.f32 1.0, %v8495_v58  ;;  %v7019_v57 = vmul.f32 -1.442695, %v12983_v27  ;;  %v12999_v55 = vadd.f32 %v12865_v53, %v5662_v47 }
 0x7d4   :  { %v8497_v32 = vpop.eup %8496  ;;  %8516 = vrcp.f32 %v6041_v15  ;;  %v7022_v31 = vmul.f32 -1.442695, %v12991_v34 }
 0x7d5   :  { %v8499_v3 = vpop.eup %8498  ;;  %v6228_v0 = vmul.f32 %v8497_v32, %v12900_v28  ;;  %8518 = vrcp.f32 %v6039_v9  ;;  %v7020_v43 = vmul.f32 -1.442695, %v12999_v55 }
 0x7d6   :  { %v8501_v61 = vpop.eup %8500  ;;  %v6226_v48 = vmul.f32 %v8499_v3, %v12903_v46  ;;  %8520 = vpow2.f32 %v7021_v49 }
 0x7d7   :  { %v8503_v6 = vpop.eup %8502  ;;  %v7137_v59 = vpack.c.bf16 %v6228_v0, %v6228_v0  ;;  %v6229_v42 = vmul.f32 %v8501_v61, %v12907_v16  ;;  %8522 = vpow2.f32 %v7019_v57  ;;  %v7586_v24 = vpop.f32.mrb[92].mxu0 }
 0x7d8   :  { %v8505_v1 = vpop.eup %8504  ;;  %v7135_v51 = vpack.c.bf16 %v6226_v48, %v6226_v48  ;;  %v6227_v56 = vmul.f32 %v8503_v6, %v12911_v62  ;;  %8524 = vpow2.f32 %v7022_v31  ;;  %v13008_v28 = vadd.f32 %v7586_v24, %v12865_v53  ;;  %v5675_v2 = vpop.f32.mrb[93].mxu0 }
 0x7d9   :  { %v8507_v22 = vpop.eup %8506  ;;  %6549 = vst.msk [vmem:[%s13463_s15 + $0x28] sm:$0xf] %vm6538_vm11, %v7137_v59  ;;  %v7138_v46 = vpack.c.bf16 %v6229_v42, %v6229_v42  ;;  %v6044_v7 = vadd.f32 1.0, %v8505_v1  ;;  %8526 = vpow2.f32 %v7020_v43  ;;  %v13015_v16 = vadd.f32 %v12865_v53, %v5675_v2  ;;  %v7587_v33 = vpop.f32.mrb[94].mxu0 }
 0x7da   :  { %v8509_v44 = vpop.eup %8508  ;;  %6547 = vst.msk [vmem:[%s13463_s15 + $0x20] sm:$0xf] %vm6538_vm11, %v7135_v51  ;;  %v7136_v62 = vpack.c.bf16 %v6227_v56, %v6227_v56  ;;  %v6042_v25 = vadd.f32 1.0, %v8507_v22  ;;  %v13022_v18 = vadd.f32 %v7587_v33, %v12865_v53  ;;  %v5678_v23 = vpop.f32.mrb[95].mxu0  ;;  %v7025_v38 = vmul.f32 -1.442695, %v13008_v28 }
 0x7db   :  { %v8511_v40 = vpop.eup %8510  ;;  %6550 = vst.msk [vmem:[%s13463_s15 + $0x2c] sm:$0xf] %vm6538_vm11, %v7138_v46  ;;  %8528 = vrcp.f32 %v6044_v7  ;;  %v6045_v13 = vadd.f32 1.0, %v8509_v44  ;;  %v13030_v4 = vadd.f32 %v12865_v53, %v5678_v23  ;;  %v7023_v60 = vmul.f32 -1.442695, %v13015_v16 }
 0x7dc   :  { %v8513_v50 = vpop.eup %8512  ;;  %6548 = vst.msk [vmem:[%s13463_s15 + $0x24] sm:$0xf] %vm6538_vm11, %v7136_v62  ;;  %8530 = vrcp.f32 %v6042_v25  ;;  %v6043_v10 = vadd.f32 1.0, %v8511_v40  ;;  %v7026_v36 = vmul.f32 -1.442695, %v13022_v18 }
 0x7dd   :  { %v8515_v39 = vpop.eup %8514  ;;  %v6232_v41 = vmul.f32 %v8513_v50, %v12916_v12  ;;  %8532 = vrcp.f32 %v6045_v13  ;;  %v7024_v54 = vmul.f32 -1.442695, %v13030_v4 }
 0x7de   :  { %v8517_v30 = vpop.eup %8516  ;;  %v6230_v45 = vmul.f32 %v8515_v39, %v12919_v29  ;;  %8534 = vrcp.f32 %v6043_v10 }
 0x7df   :  { %v8519_v52 = vpop.eup %8518  ;;  %v7141_v20 = vpack.c.bf16 %v6232_v41, %v6232_v41  ;;  %v6233_v21 = vmul.f32 %v8517_v30, %v12923_v14  ;;  %8536 = vpow2.f32 %v7025_v38  ;;  %v7590_v8 = vpop.f32.mrb[96].mxu0 }
 0x7e0   :  { %v8521_v11 = vpop.eup %8520  ;;  %v7139_v63 = vpack.c.bf16 %v6230_v45, %v6230_v45  ;;  %v6231_v58 = vmul.f32 %v8519_v52, %v12927_v37  ;;  %8538 = vpow2.f32 %v7023_v60  ;;  %v13044_v12 = vadd.f32 %v7590_v8, %v12865_v53  ;;  %v5691_v15 = vpop.f32.mrb[97].mxu0 }
 0x7e1   :  { %v8523_v49 = vpop.eup %8522  ;;  %6553 = vst.msk [vmem:[%s13463_s15 + $0x38] sm:$0xf] %vm6538_vm11, %v7141_v20  ;;  %v7142_v29 = vpack.c.bf16 %v6233_v21, %v6233_v21  ;;  %v6048_v47 = vadd.f32 1.0, %v8521_v11  ;;  %8540 = vpow2.f32 %v7026_v36  ;;  %v13051_v14 = vadd.f32 %v12865_v53, %v5691_v15  ;;  %v7591_v9 = vpop.f32.mrb[98].mxu0 }
 0x7e2   :  { %v8525_v57 = vpop.eup %8524  ;;  %6551 = vst.msk [vmem:[%s13463_s15 + $0x30] sm:$0xf] %vm6538_vm11, %v7139_v63  ;;  %v7140_v37 = vpack.c.bf16 %v6231_v58, %v6231_v58  ;;  %v6046_v32 = vadd.f32 1.0, %v8523_v49  ;;  %8542 = vpow2.f32 %v7024_v54  ;;  %v5694_v31 = vpop.f32.mrb[99].mxu0  ;;  %v7029_v43 = vmul.f32 -1.442695, %v13044_v12 }
 0x7e3   :  { %v8527_v3 = vpop.eup %8526  ;;  %6554 = vst.msk [vmem:[%s13463_s15 + $0x3c] sm:$0xf] %vm6538_vm11, %v7142_v29  ;;  %8544 = vrcp.f32 %v6048_v47  ;;  %v6049_v0 = vadd.f32 1.0, %v8525_v57  ;;  %v13063_v61 = vadd.f32 %v7591_v9, %v12865_v53  ;;  %v7027_v6 = vmul.f32 -1.442695, %v13051_v14 }
 0x7e4   :  { %6552 = vst.msk [vmem:[%s13463_s15 + $0x34] sm:$0xf] %vm6538_vm11, %v7140_v37  ;;  %8546 = vrcp.f32 %v6046_v32  ;;  %v6047_v48 = vadd.f32 1.0, %v8527_v3  ;;  %v13071_v59 = vadd.f32 %v12865_v53, %v5694_v31 }
 0x7e5   :  { %v8529_v42 = vpop.eup %8528  ;;  %8548 = vrcp.f32 %v6049_v0  ;;  %v7030_v24 = vmul.f32 -1.442695, %v13063_v61 }
 0x7e6   :  { %v8531_v1 = vpop.eup %8530  ;;  %v6236_v51 = vmul.f32 %v8529_v42, %v12940_v5  ;;  %8550 = vrcp.f32 %v6047_v48  ;;  %v7028_v56 = vmul.f32 -1.442695, %v13071_v59 }
 0x7e7   :  { %v8533_v2 = vpop.eup %8532  ;;  %v6234_v22 = vmul.f32 %v8531_v1, %v12947_v26  ;;  %8552 = vpow2.f32 %v7029_v43  ;;  %v7594_v46 = vpop.f32.mrb[100].mxu0 }
 0x7e8   :  { %v8535_v7 = vpop.eup %8534  ;;  %v7145_v33 = vpack.c.bf16 %v6236_v51, %v6236_v51  ;;  %v6237_v44 = vmul.f32 %v8533_v2, %v12955_v19  ;;  %8554 = vpow2.f32 %v7027_v6  ;;  %v13079_v62 = vadd.f32 %v7594_v46, %v12865_v53  ;;  %v5707_v25 = vpop.f32.mrb[101].mxu0 }
 0x7e9   :  { %v8537_v23 = vpop.eup %8536  ;;  %v7143_v40 = vpack.c.bf16 %v6234_v22, %v6234_v22  ;;  %v6235_v5 = vmul.f32 %v8535_v7, %v12963_v17  ;;  %8556 = vpow2.f32 %v7030_v24  ;;  %v13083_v13 = vadd.f32 %v12865_v53, %v5707_v25  ;;  %v7595_v26 = vpop.f32.mrb[102].mxu0 }
 0x7ea   :  { %v8539_v38 = vpop.eup %8538  ;;  %6557 = vst.msk [vmem:[%s13463_s15 + $0x48] sm:$0xf] %vm6538_vm11, %v7145_v33  ;;  %v7146_v19 = vpack.c.bf16 %v6237_v44, %v6237_v44  ;;  %v6052_v50 = vadd.f32 1.0, %v8537_v23  ;;  %8558 = vpow2.f32 %v7028_v56  ;;  %v5710_v10 = vpop.f32.mrb[103].mxu0  ;;  %v13094_v41 = vadd.f32 %v7595_v26, %v12865_v53 }
 0x7eb   :  { %v8541_v60 = vpop.eup %8540  ;;  %6555 = vst.msk [vmem:[%s13463_s15 + $0x40] sm:$0xf] %vm6538_vm11, %v7143_v40  ;;  %v7144_v17 = vpack.c.bf16 %v6235_v5, %v6235_v5  ;;  %v6050_v39 = vadd.f32 1.0, %v8539_v38  ;;  %v7033_v45 = vmul.f32 -1.442695, %v13079_v62  ;;  %v13102_v54 = vadd.f32 %v12865_v53, %v5710_v10 }
 0x7ec   :  { %v8543_v36 = vpop.eup %8542  ;;  %6558 = vst.msk [vmem:[%s13463_s15 + $0x4c] sm:$0xf] %vm6538_vm11, %v7146_v19  ;;  %8560 = vrcp.f32 %v6052_v50  ;;  %v6053_v30 = vadd.f32 1.0, %v8541_v60  ;;  %v7031_v21 = vmul.f32 -1.442695, %v13083_v13 }
 0x7ed   :  { %v8545_v52 = vpop.eup %8544  ;;  %6556 = vst.msk [vmem:[%s13463_s15 + $0x44] sm:$0xf] %vm6538_vm11, %v7144_v17  ;;  %8562 = vrcp.f32 %v6050_v39  ;;  %v6051_v20 = vadd.f32 1.0, %v8543_v36  ;;  %v7034_v63 = vmul.f32 -1.442695, %v13094_v41 }
 0x7ee   :  { %v8547_v8 = vpop.eup %8546  ;;  %v6240_v11 = vmul.f32 %v8545_v52, %v12976_v35  ;;  %8564 = vrcp.f32 %v6053_v30  ;;  %v7032_v49 = vmul.f32 -1.442695, %v13102_v54 }
 0x7ef   :  { %v8549_v58 = vpop.eup %8548  ;;  %v6238_v15 = vmul.f32 %v8547_v8, %v12983_v27  ;;  %8566 = vrcp.f32 %v6051_v20  ;;  %v7598_v29 = vpop.f32.mrb[104].mxu0 }
 0x7f0   :  { %v8551_v47 = vpop.eup %8550  ;;  %v7149_v9 = vpack.c.bf16 %v6240_v11, %v6240_v11  ;;  %v6241_v57 = vmul.f32 %v8549_v58, %v12991_v34  ;;  %8568 = vpow2.f32 %v7033_v45  ;;  %v13115_v37 = vadd.f32 %v7598_v29, %v12865_v53  ;;  %v5723_v32 = vpop.f32.mrb[105].mxu0 }
 0x7f1   :  { %v8553_v35 = vpop.eup %8552  ;;  %v7147_v31 = vpack.c.bf16 %v6238_v15, %v6238_v15  ;;  %v6239_v3 = vmul.f32 %v8551_v47, %v12999_v55  ;;  %8570 = vpow2.f32 %v7031_v21  ;;  %v13119_v27 = vadd.f32 %v12865_v53, %v5723_v32  ;;  %v7599_v0 = vpop.f32.mrb[106].mxu0 }
 0x7f2   :  { %v8555_v43 = vpop.eup %8554  ;;  %6561 = vst.msk [vmem:[%s13463_s15 + $0x58] sm:$0xf] %vm6538_vm11, %v7149_v9  ;;  %v7150_v34 = vpack.c.bf16 %v6241_v57, %v6241_v57  ;;  %v6056_v48 = vadd.f32 1.0, %v8553_v35  ;;  %8572 = vpow2.f32 %v7034_v63  ;;  %v5726_v6 = vpop.f32.mrb[107].mxu0  ;;  %v7037_v1 = vmul.f32 -1.442695, %v13115_v37 }
 0x7f3   :  { %v8557_v42 = vpop.eup %8556  ;;  %6559 = vst.msk [vmem:[%s13463_s15 + $0x50] sm:$0xf] %vm6538_vm11, %v7147_v31  ;;  %v7148_v55 = vpack.c.bf16 %v6239_v3, %v6239_v3  ;;  %v6054_v24 = vadd.f32 1.0, %v8555_v43  ;;  %8574 = vpow2.f32 %v7032_v49  ;;  %v13135_v2 = vadd.f32 %v7599_v0, %v12865_v53 }
 0x7f4   :  { %v8559_v51 = vpop.eup %8558  ;;  %6562 = vst.msk [vmem:[%s13463_s15 + $0x5c] sm:$0xf] %vm6538_vm11, %v7150_v34  ;;  %8576 = vrcp.f32 %v6056_v48  ;;  %v6057_v56 = vadd.f32 1.0, %v8557_v42  ;;  %v13138_v22 = vadd.f32 %v12865_v53, %v5726_v6  ;;  %v7035_v7 = vmul.f32 -1.442695, %v13119_v27 }
 0x7f5   :  { %6560 = vst.msk [vmem:[%s13463_s15 + $0x54] sm:$0xf] %vm6538_vm11, %v7148_v55  ;;  %8578 = vrcp.f32 %v6054_v24  ;;  %v6055_v46 = vadd.f32 1.0, %v8559_v51  ;;  %v7038_v44 = vmul.f32 -1.442695, %v13135_v2 }
 0x7f6   :  { %v8561_v33 = vpop.eup %8560  ;;  %8580 = vrcp.f32 %v6057_v56  ;;  %v7036_v40 = vmul.f32 -1.442695, %v13138_v22 }
 0x7f7   :  { %v8563_v25 = vpop.eup %8562  ;;  %v6244_v23 = vmul.f32 %v8561_v33, %v13008_v28  ;;  %8582 = vrcp.f32 %v6055_v46  ;;  %v7602_v5 = vpop.f32.mrb[108].mxu0 }
 0x7f8   :  { %v8565_v26 = vpop.eup %8564  ;;  %v6242_v38 = vmul.f32 %v8563_v25, %v13015_v16  ;;  %8584 = vpow2.f32 %v7037_v1  ;;  %v13150_v19 = vadd.f32 %v7602_v5, %v12865_v53  ;;  %v5739_v50 = vpop.f32.mrb[109].mxu0 }
 0x7f9   :  { %v8567_v10 = vpop.eup %8566  ;;  %v7153_v60 = vpack.c.bf16 %v6244_v23, %v6244_v23  ;;  %v6245_v17 = vmul.f32 %v8565_v26, %v13022_v18  ;;  %8586 = vpow2.f32 %v7035_v7  ;;  %v13154_v39 = vadd.f32 %v12865_v53, %v5739_v50  ;;  %v7603_v28 = vpop.f32.mrb[110].mxu0 }
 0x7fa   :  { %v8569_v36 = vpop.eup %8568  ;;  %v7151_v30 = vpack.c.bf16 %v6242_v38, %v6242_v38  ;;  %v6243_v45 = vmul.f32 %v8567_v10, %v13030_v4  ;;  %8588 = vpow2.f32 %v7038_v44  ;;  %v7041_v16 = vmul.f32 -1.442695, %v13150_v19  ;;  %v5742_v52 = vpop.f32.mrb[111].mxu0 }
 0x7fb   :  { %v8571_v20 = vpop.eup %8570  ;;  %6565 = vst.msk [vmem:[%s13463_s15 + $0x68] sm:$0xf] %vm6538_vm11, %v7153_v60  ;;  %v7154_v18 = vpack.c.bf16 %v6245_v17, %v6245_v17  ;;  %v6060_v21 = vadd.f32 1.0, %v8569_v36  ;;  %8590 = vpow2.f32 %v7036_v40  ;;  %v13167_v63 = vadd.f32 %v7603_v28, %v12865_v53 }
 0x7fc   :  { %v8573_v8 = vpop.eup %8572  ;;  %6563 = vst.msk [vmem:[%s13463_s15 + $0x60] sm:$0xf] %vm6538_vm11, %v7151_v30  ;;  %v7152_v4 = vpack.c.bf16 %v6243_v45, %v6243_v45  ;;  %v6058_v11 = vadd.f32 1.0, %v8571_v20  ;;  %8592 = vpow2.f32 %v7041_v16  ;;  %v7039_v49 = vmul.f32 -1.442695, %v13154_v39 }
 0x7fd   :  { %v8575_v58 = vpop.eup %8574  ;;  %6566 = vst.msk [vmem:[%s13463_s15 + $0x6c] sm:$0xf] %vm6538_vm11, %v7154_v18  ;;  %8594 = vrcp.f32 %v6060_v21  ;;  %v6061_v15 = vadd.f32 1.0, %v8573_v8  ;;  %v13175_v29 = vadd.f32 %v12865_v53, %v5742_v52  ;;  %v7042_v57 = vmul.f32 -1.442695, %v13167_v63 }
 0x7fe   :  { %v8577_v47 = vpop.eup %8576  ;;  %6564 = vst.msk [vmem:[%s13463_s15 + $0x64] sm:$0xf] %vm6538_vm11, %v7152_v4  ;;  %8596 = vrcp.f32 %v6058_v11  ;;  %v6059_v9 = vadd.f32 1.0, %v8575_v58 }
 0x7ff   :  { %v8579_v32 = vpop.eup %8578  ;;  %v6248_v35 = vmul.f32 %v8577_v47, %v13044_v12  ;;  %8598 = vrcp.f32 %v6061_v15  ;;  %v7040_v31 = vmul.f32 -1.442695, %v13175_v29  ;;  %v7606_v3 = vpop.f32.mrb[112].mxu0 }
 0x800   :  { %v8581_v0 = vpop.eup %8580  ;;  %v6246_v43 = vmul.f32 %v8579_v32, %v13051_v14  ;;  %8600 = vrcp.f32 %v6059_v9  ;;  %v13186_v34 = vadd.f32 %v7606_v3, %v12865_v53  ;;  %v5755_v48 = vpop.f32.mrb[113].mxu0 }
 0x801   :  { %v8583_v6 = vpop.eup %8582  ;;  %v7157_v42 = vpack.c.bf16 %v6248_v35, %v6248_v35  ;;  %v6249_v55 = vmul.f32 %v8581_v0, %v13063_v61  ;;  %8602 = vpow2.f32 %v7039_v49  ;;  %v13190_v24 = vadd.f32 %v12865_v53, %v5755_v48  ;;  %v7607_v12 = vpop.f32.mrb[114].mxu0 }
 0x802   :  { %v8585_v1 = vpop.eup %8584  ;;  %v7155_v51 = vpack.c.bf16 %v6246_v43, %v6246_v43  ;;  %v6247_v56 = vmul.f32 %v8583_v6, %v13071_v59  ;;  %8604 = vpow2.f32 %v7042_v57  ;;  %v7045_v14 = vmul.f32 -1.442695, %v13186_v34  ;;  %v5758_v46 = vpop.f32.mrb[115].mxu0 }
 0x803   :  { %v8587_v7 = vpop.eup %8586  ;;  %6569 = vst.msk [vmem:[%s13463_s15 + $0x78] sm:$0xf] %vm6538_vm11, %v7157_v42  ;;  %v7158_v61 = vpack.c.bf16 %v6249_v55, %v6249_v55  ;;  %v6064_v33 = vadd.f32 1.0, %v8585_v1  ;;  %8606 = vpow2.f32 %v7040_v31  ;;  %v13203_v23 = vadd.f32 %v7607_v12, %v12865_v53 }
 0x804   :  { %v8589_v44 = vpop.eup %8588  ;;  %6567 = vst.msk [vmem:[%s13463_s15 + $0x70] sm:$0xf] %vm6538_vm11, %v7155_v51  ;;  %v7156_v59 = vpack.c.bf16 %v6247_v56, %v6247_v56  ;;  %v6062_v25 = vadd.f32 1.0, %v8587_v7  ;;  %8608 = vpow2.f32 %v7045_v14  ;;  %v13210_v26 = vadd.f32 %v12865_v53, %v5758_v46 }
 0x805   :  { %v8591_v40 = vpop.eup %8590  ;;  %6570 = vst.msk [vmem:[%s13463_s15 + $0x7c] sm:$0xf] %vm6538_vm11, %v7158_v61  ;;  %8610 = vrcp.f32 %v6064_v33  ;;  %v6065_v5 = vadd.f32 1.0, %v8589_v44  ;;  %v7043_v10 = vmul.f32 -1.442695, %v13190_v24 }
 0x806   :  { %v8593_v38 = vpop.eup %8592  ;;  %6568 = vst.msk [vmem:[%s13463_s15 + $0x74] sm:$0xf] %vm6538_vm11, %v7156_v59  ;;  %8612 = vrcp.f32 %v6062_v25  ;;  %v6063_v50 = vadd.f32 1.0, %v8591_v40  ;;  %v7046_v28 = vmul.f32 -1.442695, %v13203_v23 }
 0x807   :  { %v8595_v60 = vpop.eup %8594  ;;  %8614 = vrcp.f32 %v6065_v5  ;;  %v6068_v17 = vadd.f32 1.0, %v8593_v38  ;;  %v7610_v36 = vpop.f32.mrb[116].mxu0  ;;  %v7044_v16 = vmul.f32 -1.442695, %v13210_v26 }
 0x808   :  { %v8597_v30 = vpop.eup %8596  ;;  %v6252_v45 = vmul.f32 %v8595_v60, %v13079_v62  ;;  %8616 = vrcp.f32 %v6063_v50  ;;  %v13221_v52 = vadd.f32 %v7610_v36, %v12865_v53  ;;  %v5771_v20 = vpop.f32.mrb[117].mxu0 }
 0x809   :  { %v8599_v18 = vpop.eup %8598  ;;  %v6250_v21 = vmul.f32 %v8597_v30, %v13083_v13  ;;  %8618 = vrcp.f32 %v6068_v17  ;;  %v13225_v8 = vadd.f32 %v12865_v53, %v5771_v20  ;;  %v7611_v4 = vpop.f32.mrb[118].mxu0 }
 0x80a   :  { %v8601_v11 = vpop.eup %8600  ;;  %v7161_v58 = vpack.c.bf16 %v6252_v45, %v6252_v45  ;;  %v6253_v15 = vmul.f32 %v8599_v18, %v13094_v41  ;;  %8620 = vpow2.f32 %v7043_v10  ;;  %v7049_v62 = vmul.f32 -1.442695, %v13221_v52  ;;  %v5774_v49 = vpop.f32.mrb[119].mxu0 }
 0x80b   :  { %v8603_v47 = vpop.eup %8602  ;;  %v7159_v9 = vpack.c.bf16 %v6250_v21, %v6250_v21  ;;  %v6251_v57 = vmul.f32 %v8601_v11, %v13102_v54  ;;  %8622 = vpow2.f32 %v7046_v28  ;;  %v13235_v41 = vadd.f32 %v7611_v4, %v12865_v53  ;;  %v13275_v28 = vld [vmem:[%s13462_s14] ss:$0 sm:$0xff] }
 0x80c   :  { %v8605_v32 = vpop.eup %8604  ;;  %6573 = vst.msk [vmem:[%s13463_s15 + $0x88] sm:$0xf] %vm6538_vm11, %v7161_v58  ;;  %v7162_v13 = vpack.c.bf16 %v6253_v15, %v6253_v15  ;;  %v6066_v35 = vadd.f32 1.0, %v8603_v47  ;;  %8624 = vpow2.f32 %v7044_v16  ;;  %v13242_v0 = vadd.f32 %v12865_v53, %v5774_v49 }
 0x80d   :  { %v8607_v31 = vpop.eup %8606  ;;  %6571 = vst.msk [vmem:[%s13463_s15 + $0x80] sm:$0xf] %vm6538_vm11, %v7159_v9  ;;  %v7160_v54 = vpack.c.bf16 %v6251_v57, %v6251_v57  ;;  %v6069_v3 = vadd.f32 1.0, %v8605_v32  ;;  %8626 = vpow2.f32 %v7049_v62  ;;  %v7047_v6 = vmul.f32 -1.442695, %v13225_v8 }
 0x80e   :  { %v8609_v43 = vpop.eup %8608  ;;  %6574 = vst.msk [vmem:[%s13463_s15 + $0x8c] sm:$0xf] %vm6538_vm11, %v7162_v13  ;;  %8628 = vrcp.f32 %v6066_v35  ;;  %v6067_v48 = vadd.f32 1.0, %v8607_v31  ;;  %v7050_v12 = vmul.f32 -1.442695, %v13235_v41 }
 0x80f   :  { %v8611_v42 = vpop.eup %8610  ;;  %6572 = vst.msk [vmem:[%s13463_s15 + $0x84] sm:$0xf] %vm6538_vm11, %v7160_v54  ;;  %8630 = vrcp.f32 %v6069_v3  ;;  %v6072_v55 = vadd.f32 1.0, %v8609_v43  ;;  %v7614_v1 = vpop.f32.mrb[120].mxu0  ;;  %v7048_v14 = vmul.f32 -1.442695, %v13242_v0 }
 0x810   :  { %v8613_v51 = vpop.eup %8612  ;;  %v6256_v56 = vmul.f32 %v8611_v42, %v13115_v37  ;;  %8632 = vrcp.f32 %v6067_v48  ;;  %v13257_v46 = vadd.f32 %v7614_v1, %v12865_v53  ;;  %v5787_v7 = vpop.f32.mrb[121].mxu0 }
 0x811   :  { %v8615_v61 = vpop.eup %8614  ;;  %v6254_v33 = vmul.f32 %v8613_v51, %v13119_v27  ;;  %8634 = vrcp.f32 %v6072_v55  ;;  %v13261_v44 = vadd.f32 %v12865_v53, %v5787_v7  ;;  %v7615_v59 = vpop.f32.mrb[122].mxu0 }
 0x812   :  { %v8617_v25 = vpop.eup %8616  ;;  %v7165_v40 = vpack.c.bf16 %v6256_v56, %v6256_v56  ;;  %v6257_v5 = vmul.f32 %v8615_v61, %v13135_v2  ;;  %8636 = vpow2.f32 %v7047_v6  ;;  %v7053_v37 = vmul.f32 -1.442695, %v13257_v46  ;;  %v5790_v38 = vpop.f32.mrb[123].mxu0 }
 0x813   :  { %v8619_v50 = vpop.eup %8618  ;;  %v7163_v10 = vpack.c.bf16 %v6254_v33, %v6254_v33  ;;  %v6255_v60 = vmul.f32 %v8617_v25, %v13138_v22  ;;  %8638 = vpow2.f32 %v7050_v12  ;;  %v7051_v27 = vmul.f32 -1.442695, %v13261_v44 }
 0x814   :  { %v8621_v17 = vpop.eup %8620  ;;  %6577 = vst.msk [vmem:[%s13463_s15 + $0x98] sm:$0xf] %vm6538_vm11, %v7165_v40  ;;  %v7166_v53 = vpack.c.bf16 %v6257_v5, %v6257_v5  ;;  %v6260_v2 = vmul.f32 %v8619_v50, %v13150_v19  ;;  %8640 = vpow2.f32 %v7048_v14  ;;  %v13278_v22 = vadd.f32 %v13275_v28, %v7615_v59 }
 0x815   :  { %v8623_v36 = vpop.eup %8622  ;;  %6575 = vst.msk [vmem:[%s13463_s15 + $0x90] sm:$0xf] %vm6538_vm11, %v7163_v10  ;;  %v7164_v30 = vpack.c.bf16 %v6255_v60, %v6255_v60  ;;  %v6070_v45 = vadd.f32 1.0, %v8621_v17  ;;  %8642 = vpow2.f32 %v7053_v37  ;;  %v13285_v19 = vadd.f32 %v13275_v28, %v5790_v38 }
 0x816   :  { %v8625_v16 = vpop.eup %8624  ;;  %6578 = vst.msk [vmem:[%s13463_s15 + $0x9c] sm:$0xf] %vm6538_vm11, %v7166_v53  ;;  %v7169_v20 = vpack.c.bf16 %v6260_v2, %v6260_v2  ;;  %v6073_v18 = vadd.f32 1.0, %v8623_v36  ;;  %8644 = vpow2.f32 %v7051_v27  ;;  %v7054_v11 = vmul.f32 -1.442695, %v13278_v22 }
 0x817   :  { %v8627_v21 = vpop.eup %8626  ;;  %6576 = vst.msk [vmem:[%s13463_s15 + $0x94] sm:$0xf] %vm6538_vm11, %v7164_v30  ;;  %8646 = vrcp.f32 %v6070_v45  ;;  %v6071_v4 = vadd.f32 1.0, %v8625_v16  ;;  %v7618_v58 = vpop.f32.mrb[124].mxu0  ;;  %v7052_v49 = vmul.f32 -1.442695, %v13285_v19 }
 0x818   :  { %v8629_v15 = vpop.eup %8628  ;;  %6581 = vst.msk [vmem:[%s13463_s15 + $0xa8] sm:$0xf] %vm6538_vm11, %v7169_v20  ;;  %8648 = vrcp.f32 %v6073_v18  ;;  %v6076_v62 = vadd.f32 1.0, %v8627_v21  ;;  %v13302_v47 = vadd.f32 %v13275_v28, %v7618_v58  ;;  %v5803_v9 = vpop.f32.mrb[125].mxu0 }
 0x819   :  { %v8631_v57 = vpop.eup %8630  ;;  %v6258_v32 = vmul.f32 %v8629_v15, %v13154_v39  ;;  %8650 = vrcp.f32 %v6071_v4  ;;  %v13306_v13 = vadd.f32 %v13275_v28, %v5803_v9  ;;  %v7619_v35 = vpop.f32.mrb[126].mxu0 }
 0x81a   :  { %v8633_v31 = vpop.eup %8632  ;;  %v6261_v54 = vmul.f32 %v8631_v57, %v13167_v63  ;;  %8652 = vrcp.f32 %v6076_v62  ;;  %v7057_v3 = vmul.f32 -1.442695, %v13302_v47  ;;  %v5806_v43 = vpop.f32.mrb[127].mxu0  ;;  %v13314_v51 = vadd.f32 %v13275_v28, %v7619_v35 }
 0x81b   :  { %v8635_v48 = vpop.eup %8634  ;;  %v7167_v6 = vpack.c.bf16 %v6258_v32, %v6258_v32  ;;  %v6259_v42 = vmul.f32 %v8633_v31, %v13175_v29  ;;  %8654 = vpow2.f32 %v7054_v11  ;;  %v7055_v55 = vmul.f32 -1.442695, %v13306_v13 }
 0x81c   :  { %v8637_v39 = vpop.eup %8636  ;;  %v7170_v12 = vpack.c.bf16 %v6261_v54, %v6261_v54  ;;  %v6264_v1 = vmul.f32 %v8635_v48, %v13186_v34  ;;  %8656 = vpow2.f32 %v7052_v49  ;;  %v13321_v29 = vadd.f32 %v13275_v28, %v5806_v43 }
 0x81d   :  { %v8639_v63 = vpop.eup %8638  ;;  %6579 = vst.msk [vmem:[%s13463_s15 + $0xa0] sm:$0xf] %vm6538_vm11, %v7167_v6  ;;  %v7168_v56 = vpack.c.bf16 %v6259_v42, %v6259_v42  ;;  %v6074_v14 = vadd.f32 1.0, %v8637_v39  ;;  %8658 = vpow2.f32 %v7057_v3  ;;  %v7058_v37 = vmul.f32 -1.442695, %v13314_v51 }
 0x81e   :  { %v8641_v7 = vpop.eup %8640  ;;  %6582 = vst.msk [vmem:[%s13463_s15 + $0xac] sm:$0xf] %vm6538_vm11, %v7170_v12  ;;  %v7173_v34 = vpack.c.bf16 %v6264_v1, %v6264_v1  ;;  %v6077_v61 = vadd.f32 1.0, %v8639_v63  ;;  %8660 = vpow2.f32 %v7055_v55  ;;  %v7056_v27 = vmul.f32 -1.442695, %v13321_v29 }
 0x81f   :  { %v8643_v33 = vpop.eup %8642  ;;  %6580 = vst.msk [vmem:[%s13463_s15 + $0xa4] sm:$0xf] %vm6538_vm11, %v7168_v56  ;;  %8662 = vrcp.f32 %v6074_v14  ;;  %v6075_v59 = vadd.f32 1.0, %v8641_v7  ;;  %v7622_v25 = vpop.f32.mrb[128].mxu0 }
 0x820   :  { %v8645_v40 = vpop.eup %8644  ;;  %6585 = vst.msk [vmem:[%s13463_s15 + $0xb8] sm:$0xf] %vm6538_vm11, %v7173_v34  ;;  %8664 = vrcp.f32 %v6077_v61  ;;  %v6080_v5 = vadd.f32 1.0, %v8643_v33  ;;  %v13337_v38 = vadd.f32 %v13275_v28, %v7622_v25  ;;  %v5819_v50 = vpop.f32.mrb[129].mxu0 }
 0x821   :  { %v8647_v10 = vpop.eup %8646  ;;  %8666 = vrcp.f32 %v6075_v59  ;;  %v6078_v60 = vadd.f32 1.0, %v8645_v40  ;;  %v13341_v17 = vadd.f32 %v13275_v28, %v5819_v50  ;;  %v7623_v53 = vpop.f32.mrb[130].mxu0 }
 0x822   :  { %v8649_v2 = vpop.eup %8648  ;;  %v6262_v36 = vmul.f32 %v8647_v10, %v13190_v24  ;;  %8668 = vrcp.f32 %v6080_v5  ;;  %v7061_v30 = vmul.f32 -1.442695, %v13337_v38  ;;  %v5822_v45 = vpop.f32.mrb[131].mxu0  ;;  %v13349_v58 = vadd.f32 %v13275_v28, %v7623_v53 }
 0x823   :  { %v8651_v16 = vpop.eup %8650  ;;  %v6265_v20 = vmul.f32 %v8649_v2, %v13203_v23  ;;  %8670 = vrcp.f32 %v6078_v60  ;;  %v7059_v18 = vmul.f32 -1.442695, %v13341_v17  ;;  %v13353_v49 = vadd.f32 %v13275_v28, %v5822_v45 }
 0x824   :  { %v8653_v21 = vpop.eup %8652  ;;  %v7171_v4 = vpack.c.bf16 %v6262_v36, %v6262_v36  ;;  %v6263_v11 = vmul.f32 %v8651_v16, %v13210_v26  ;;  %8672 = vpow2.f32 %v7058_v37  ;;  %v7062_v31 = vmul.f32 -1.442695, %v13349_v58 }
 0x825   :  { %v8655_v15 = vpop.eup %8654  ;;  %v7174_v24 = vpack.c.bf16 %v6265_v20, %v6265_v20  ;;  %v6268_v62 = vmul.f32 %v8653_v21, %v13221_v52  ;;  %8674 = vpow2.f32 %v7056_v27  ;;  %v7060_v43 = vmul.f32 -1.442695, %v13353_v49 }
 0x826   :  { %v8657_v23 = vpop.eup %8656  ;;  %6583 = vst.msk [vmem:[%s13463_s15 + $0xb0] sm:$0xf] %vm6538_vm11, %v7171_v4  ;;  %v7172_v9 = vpack.c.bf16 %v6263_v11, %v6263_v11  ;;  %v6081_v26 = vadd.f32 1.0, %v8655_v15  ;;  %8676 = vpow2.f32 %v7061_v30 }
 0x827   :  { %v8659_v57 = vpop.eup %8658  ;;  %6586 = vst.msk [vmem:[%s13463_s15 + $0xbc] sm:$0xf] %vm6538_vm11, %v7174_v24  ;;  %v7177_v52 = vpack.c.bf16 %v6268_v62, %v6268_v62  ;;  %v6079_v32 = vadd.f32 1.0, %v8657_v23  ;;  %8678 = vpow2.f32 %v7059_v18 }
 0x828   :  { %v8661_v28 = vpop.eup %8660  ;;  %6584 = vst.msk [vmem:[%s13463_s15 + $0xb4] sm:$0xf] %vm6538_vm11, %v7172_v9  ;;  %8680 = vrcp.f32 %v6081_v26  ;;  %v6084_v35 = vadd.f32 1.0, %v8659_v57 }
 0x829   :  { %v8663_v54 = vpop.eup %8662  ;;  %6589 = vst.msk [vmem:[%s13463_s15 + $0xc8] sm:$0xf] %vm6538_vm11, %v7177_v52  ;;  %8682 = vrcp.f32 %v6079_v32  ;;  %v6082_v3 = vadd.f32 1.0, %v8661_v28 }
 0x82a   :  { %v8665_v48 = vpop.eup %8664  ;;  %v6266_v6 = vmul.f32 %v8663_v54, %v13225_v8  ;;  %8684 = vrcp.f32 %v6084_v35 }
 0x82b   :  { %v8667_v42 = vpop.eup %8666  ;;  %v6269_v55 = vmul.f32 %v8665_v48, %v13235_v41  ;;  %8686 = vrcp.f32 %v6082_v3 }
 0x82c   :  { %v8669_v39 = vpop.eup %8668  ;;  %v7175_v12 = vpack.c.bf16 %v6266_v6, %v6266_v6  ;;  %v6267_v1 = vmul.f32 %v8667_v42, %v13242_v0  ;;  %8688 = vpow2.f32 %v7062_v31 }
 0x82d   :  { %v8671_v63 = vpop.eup %8670  ;;  %v7178_v56 = vpack.c.bf16 %v6269_v55, %v6269_v55  ;;  %v6272_v14 = vmul.f32 %v8669_v39, %v13257_v46  ;;  %8690 = vpow2.f32 %v7060_v43 }
 0x82e   :  { %v8673_v7 = vpop.eup %8672  ;;  %6587 = vst.msk [vmem:[%s13463_s15 + $0xc0] sm:$0xf] %vm6538_vm11, %v7175_v12  ;;  %v7176_v8 = vpack.c.bf16 %v6267_v1, %v6267_v1  ;;  %v6270_v41 = vmul.f32 %v8671_v63, %v13261_v44 }
 0x82f   :  { %v8675_v34 = vpop.eup %8674  ;;  %6590 = vst.msk [vmem:[%s13463_s15 + $0xcc] sm:$0xf] %vm6538_vm11, %v7178_v56  ;;  %v7181_v0 = vpack.c.bf16 %v6272_v14, %v6272_v14  ;;  %v6085_v61 = vadd.f32 1.0, %v8673_v7 }
 0x830   :  { %v8677_v33 = vpop.eup %8676  ;;  %6588 = vst.msk [vmem:[%s13463_s15 + $0xc4] sm:$0xf] %vm6538_vm11, %v7176_v8  ;;  %v7179_v46 = vpack.c.bf16 %v6270_v41, %v6270_v41  ;;  %v6083_v59 = vadd.f32 1.0, %v8675_v34 }
 0x831   :  { %v8679_v25 = vpop.eup %8678  ;;  %6593 = vst.msk [vmem:[%s13463_s15 + $0xd8] sm:$0xf] %vm6538_vm11, %v7181_v0  ;;  %8692 = vrcp.f32 %v6085_v61  ;;  %v6088_v44 = vadd.f32 1.0, %v8677_v33 }
 0x832   :  { %v8681_v40 = vpop.eup %8680  ;;  %6591 = vst.msk [vmem:[%s13463_s15 + $0xd0] sm:$0xf] %vm6538_vm11, %v7179_v46  ;;  %8694 = vrcp.f32 %v6083_v59  ;;  %v6086_v5 = vadd.f32 1.0, %v8679_v25 }
 0x833   :  { %v8683_v37 = vpop.eup %8682  ;;  %v6273_v50 = vmul.f32 %v8681_v40, %v13278_v22  ;;  %8696 = vrcp.f32 %v6088_v44 }
 0x834   :  { %v8685_v10 = vpop.eup %8684  ;;  %v6271_v60 = vmul.f32 %v8683_v37, %v13285_v19  ;;  %8698 = vrcp.f32 %v6086_v5 }
 0x835   :  { %v8687_v27 = vpop.eup %8686  ;;  %v7182_v53 = vpack.c.bf16 %v6273_v50, %v6273_v50  ;;  %v6276_v2 = vmul.f32 %v8685_v10, %v13302_v47 }
 0x836   :  { %v8689_v36 = vpop.eup %8688  ;;  %v7180_v30 = vpack.c.bf16 %v6271_v60, %v6271_v60  ;;  %v6274_v45 = vmul.f32 %v8687_v27, %v13306_v13 }
 0x837   :  { %v8691_v16 = vpop.eup %8690  ;;  %6594 = vst.msk [vmem:[%s13463_s15 + $0xdc] sm:$0xf] %vm6538_vm11, %v7182_v53  ;;  %v7185_v22 = vpack.c.bf16 %v6276_v2, %v6276_v2  ;;  %v6089_v20 = vadd.f32 1.0, %v8689_v36 }
 0x838   :  { %6592 = vst.msk [vmem:[%s13463_s15 + $0xd4] sm:$0xf] %vm6538_vm11, %v7180_v30  ;;  %v7183_v19 = vpack.c.bf16 %v6274_v45, %v6274_v45  ;;  %v6087_v18 = vadd.f32 1.0, %v8691_v16 }
 0x839   :  { %6597 = vst.msk [vmem:[%s13463_s15 + $0xe8] sm:$0xf] %vm6538_vm11, %v7185_v22  ;;  %8700 = vrcp.f32 %v6089_v20 }
 0x83a   :  { %6595 = vst.msk [vmem:[%s13463_s15 + $0xe0] sm:$0xf] %vm6538_vm11, %v7183_v19  ;;  %8702 = vrcp.f32 %v6087_v18 }
 0x83b   :  { %v8693_v47 = vpop.eup %8692 }
 0x83c   :  { %v8695_v13 = vpop.eup %8694  ;;  %v6277_v21 = vmul.f32 %v8693_v47, %v13314_v51 }
 0x83d   :  { %v8697_v4 = vpop.eup %8696  ;;  %v6275_v11 = vmul.f32 %v8695_v13, %v13321_v29 }
 0x83e   :  { %v8699_v15 = vpop.eup %8698  ;;  %v7186_v24 = vpack.c.bf16 %v6277_v21, %v6277_v21  ;;  %v6280_v62 = vmul.f32 %v8697_v4, %v13337_v38 }
 0x83f   :  { %v7184_v23 = vpack.c.bf16 %v6275_v11, %v6275_v11  ;;  %v6278_v9 = vmul.f32 %v8699_v15, %v13341_v17 }
 0x840   :  { %6598 = vst.msk [vmem:[%s13463_s15 + $0xec] sm:$0xf] %vm6538_vm11, %v7186_v24  ;;  %v7189_v26 = vpack.c.bf16 %v6280_v62, %v6280_v62 }
 0x841   :  { %6596 = vst.msk [vmem:[%s13463_s15 + $0xe4] sm:$0xf] %vm6538_vm11, %v7184_v23  ;;  %v7187_v51 = vpack.c.bf16 %v6278_v9, %v6278_v9 }
 0x842   :  { %6601 = vst.msk [vmem:[%s13463_s15 + $0xf8] sm:$0xf] %vm6538_vm11, %v7189_v26 }
 0x843   :  { %v8701_v29 = vpop.eup %8700  ;;  %6599 = vst.msk [vmem:[%s13463_s15 + $0xf0] sm:$0xf] %vm6538_vm11, %v7187_v51 }
 0x844   :  { %v8703_v38 = vpop.eup %8702  ;;  %v6281_v17 = vmul.f32 %v8701_v29, %v13349_v58 }
 0x845   :  { %v6279_v57 = vmul.f32 %v8703_v38, %v13353_v49 }
 0x846   :  { %v7190_v52 = vpack.c.bf16 %v6281_v17, %v6281_v17 }
 0x847   :  { %v7188_v32 = vpack.c.bf16 %v6279_v57, %v6279_v57 }
 0x848   :  { %6602 = vst.msk [vmem:[%s13463_s15 + $0xfc] sm:$0xf] %vm6538_vm11, %v7190_v52 }
 0x849   :  { %6600 = vst.msk [vmem:[%s13463_s15 + $0xf4] sm:$0xf] %vm6538_vm11, %v7188_v32 }

</bundles_post_ra>
